<compile_context>
chip_gen: v6e
topology: v6e:2x2x1
jax: 0.10.0
libtpu: 0.0.40
codegen_flags: <defaults>
</compile_context>

<pallas_src>
import functools

import jax
import jax.numpy as jnp
from jax.experimental import pallas as pl
from jax.experimental.pallas import tpu as pltpu


# ----------------------------------------------------------------------------
# Generation-aware VMEM budget.
# ----------------------------------------------------------------------------
@functools.lru_cache(maxsize=None)
def _vmem_limit_bytes():
    cap = 128 * 1024 * 1024                       # v5e/v6e physical
    try:
        cap = int(pltpu.get_tpu_info().vmem_capacity_bytes)   # 64 MiB on v7x
    except Exception:
        pass
    # 3/4 of physical, capped at 100 MB, leaves headroom for internal scratch.
    return min(cap * 3 // 4, 100 * 1024 * 1024)


# ----------------------------------------------------------------------------
# Kernels
# ----------------------------------------------------------------------------
def _conv3x3_kernel(x_ref, w_ref, b_ref, *rest, H, W, Cin, Cout,
                    relu, has_residual, pool):
    """Per-image 3x3 'same' conv as 3 accumulated matmuls with K = 3*Cin.

    x_ref : (1, H, W, Cin)    unpadded NHWC activation block (bf16)
    w_ref : (3, 3*Cin, Cout)  weight, kh major, (kw*Cin + ci) contraction (bf16)
    b_ref : (1, Cout)         bias (f32)
    rest  : [r_ref (1,H,W,Cout)] optional residual, then o_ref, then xp_ref
            (VMEM halo scratch).  Optionally fuses residual add and a
            2x2/stride-2 max pool before the store.
    """
    if has_residual:
        r_ref, o_ref, xp_ref = rest
    else:
        o_ref, xp_ref = rest

    # Build the zero halo in VMEM (no padded HBM copy).
    xp_ref[...] = jnp.zeros_like(xp_ref)
    xp_ref[1:H + 1, 1:W + 1, :] = x_ref[0]
    xp = xp_ref[...]                                   # (H+2, W+2, Cin)

    acc = jnp.zeros((H * W, Cout), jnp.float32)
    for kh in range(3):                                # static unroll
        slab = xp[kh:kh + H]                           # (H, W+2, Cin)
        patch = jnp.concatenate(                       # (H, W, 3*Cin)
            [slab[:, 0:W], slab[:, 1:W + 1], slab[:, 2:W + 2]], axis=-1)
        acc = acc + jnp.dot(patch.reshape(H * W, 3 * Cin), w_ref[kh],
                            preferred_element_type=jnp.float32)

    acc = acc + b_ref[...]                             # (1, Cout) broadcast
    if relu:
        acc = jnp.maximum(acc, 0.0)
    if has_residual:
        # Spec: Arithmetic('add', in_name=[input, 'conv2/relu']) -> the ReLU
        # is applied to conv2 *before* the add, and there is no ReLU after.
        acc = acc + r_ref[0].reshape(H * W, Cout).astype(jnp.float32)

    if pool:
        # Fused 2x2 stride-2 max pool (no full-res HBM round trip).
        y = acc.reshape(H // 2, 2, W, Cout)
        m = jnp.maximum(y[:, 0], y[:, 1])              # (H/2, W, Cout)
        m = m.reshape(H // 2, W // 2, 2, Cout)
        p = jnp.maximum(m[:, :, 0], m[:, :, 1])        # (H/2, W/2, Cout)
        o_ref[0] = p.astype(o_ref.dtype)
    else:
        o_ref[0] = acc.reshape(H, W, Cout).astype(o_ref.dtype)


def _lin1_partial_kernel(x_ref, w_ref, o_ref, acc_ref):
    """Partial x @ w over one K half, K-tiled; f32 VMEM accumulator."""
    k = pl.program_id(1)

    @pl.when(k == 0)
    def _():
        acc_ref[...] = jnp.zeros_like(acc_ref)

    acc_ref[...] += jnp.dot(x_ref[...], w_ref[...],
                            preferred_element_type=jnp.float32)

    @pl.when(k == pl.num_programs(1) - 1)
    def _():
        o_ref[0] = acc_ref[...]


def _head_kernel(hp_ref, b1_ref, w2_ref, b2_ref, logits_ref, probs_ref, *,
                 n_split):
    """Combine lin1 partials + bias + relu, then fused lin2 + softmax."""
    h = hp_ref[0]
    for s in range(1, n_split):
        h = h + hp_ref[s]
    h = jnp.maximum(h + b1_ref[...], 0.0)              # lin1 epilogue (f32)

    logits = jnp.dot(h, w2_ref[...],
                     preferred_element_type=jnp.float32) + b2_ref[...]
    logits_ref[...] = logits.astype(logits_ref.dtype)

    m = jnp.max(logits, axis=-1, keepdims=True)
    e = jnp.exp(logits - m)
    s = jnp.sum(e, axis=-1, keepdims=True)
    probs_ref[...] = (e / s).astype(probs_ref.dtype)


# ----------------------------------------------------------------------------
# Wrappers
# ----------------------------------------------------------------------------
def conv3x3_same(x_nhwc, w_hwio, b, *, relu=True, residual=None, pool=False,
                 out_dtype=jnp.bfloat16):
    """3x3 'same' conv (+bias, +relu, +optional residual, +optional 2x2 pool).

    Gridded over batch (auto double-buffered HBM<->VMEM); halo built in-kernel.
    """
    N, H, W, Cin = x_nhwc.shape
    Cout = w_hwio.shape[-1]
    assert H % 2 == 0 and W % 2 == 0
    Ho, Wo = (H // 2, W // 2) if pool else (H, W)

    # (3,3,Cin,Cout) -> (3, 3*Cin, Cout): kh major, contraction = (kw, ci).
    w3 = w_hwio.reshape(3, 3 * Cin, Cout)
    b2 = b.reshape(1, Cout).astype(jnp.float32)

    in_specs = [
        pl.BlockSpec((1, H, W, Cin), lambda n: (n, 0, 0, 0)),
        pl.BlockSpec((3, 3 * Cin, Cout), lambda n: (0, 0, 0)),
        pl.BlockSpec((1, Cout), lambda n: (0, 0)),
    ]
    args = [x_nhwc, w3, b2]
    if residual is not None:
        in_specs.append(pl.BlockSpec((1, H, W, Cout), lambda n: (n, 0, 0, 0)))
        args.append(residual)

    kern = functools.partial(
        _conv3x3_kernel, H=H, W=W, Cin=Cin, Cout=Cout,
        relu=relu, has_residual=residual is not None, pool=pool)

    return pl.pallas_call(
        kern,
        out_shape=jax.ShapeDtypeStruct((N, Ho, Wo, Cout), out_dtype),
        grid=(N,),
        in_specs=in_specs,
        out_specs=pl.BlockSpec((1, Ho, Wo, Cout), lambda n: (n, 0, 0, 0)),
        scratch_shapes=[pltpu.VMEM((H + 2, W + 2, Cin), x_nhwc.dtype)],
        compiler_params=pltpu.CompilerParams(
            dimension_semantics=("parallel",),
            vmem_limit_bytes=_vmem_limit_bytes()),
    )(*args)


def linear1_partials(x, w, *, tk_max=16384):
    """x @ w as n_split partial sums, each streamed in (tk, Nf) weight blocks.

    Output: (n_split, M, Nf) f32 partials (bias/relu deferred to the head
    kernel).  The leading 'parallel' axis lets v7x's two TensorCores each
    stream half of the weight; on single-TC chips it is a sequential split.
    """
    M, K = x.shape
    K2, Nf = w.shape
    assert K == K2
    n_split = 2 if (K % 256 == 0 and K >= 256) else 1
    k_half = K // n_split

    if k_half % 128 == 0:
        tk = min(tk_max, k_half)
        tk -= tk % 128
        while k_half % tk:
            tk -= 128
    else:
        # TODO(synk): non-128-multiple K loads a whole half per block; fine at
        #             tiny sizes, would need K padding at scale.
        tk = k_half
    nk = k_half // tk

    return pl.pallas_call(
        _lin1_partial_kernel,
        out_shape=jax.ShapeDtypeStruct((n_split, M, Nf), jnp.float32),
        grid=(n_split, nk),
        in_specs=[
            pl.BlockSpec((M, tk), lambda c, k: (0, c * nk + k)),
            pl.BlockSpec((tk, Nf), lambda c, k: (c * nk + k, 0)),
        ],
        out_specs=pl.BlockSpec((1, M, Nf), lambda c, k: (c, 0, 0)),
        scratch_shapes=[pltpu.VMEM((M, Nf), jnp.float32)],
        compiler_params=pltpu.CompilerParams(
            dimension_semantics=("parallel", "arbitrary"),
            vmem_limit_bytes=_vmem_limit_bytes()),
    )(x, w)


def classifier_head(h_partials, b1, w2, b2):
    """Fused lin1-epilogue (combine + bias + relu) + lin2 + softmax."""
    n_split, M, Nf = h_partials.shape
    Nc = w2.shape[-1]
    vmem = pl.BlockSpec(memory_space=pltpu.MemorySpace.VMEM)
    return pl.pallas_call(
        functools.partial(_head_kernel, n_split=n_split),
        out_shape=(jax.ShapeDtypeStruct((M, Nc), jnp.float32),
                   jax.ShapeDtypeStruct((M, Nc), jnp.float32)),
        in_specs=[vmem, vmem, vmem, vmem],
        out_specs=(vmem, vmem),
        compiler_params=pltpu.CompilerParams(
            vmem_limit_bytes=_vmem_limit_bytes()),
    )(h_partials, b1.reshape(1, Nf).astype(jnp.float32),
      w2.astype(jnp.float32), b2.reshape(1, Nc).astype(jnp.float32))


# ----------------------------------------------------------------------------
# Parameters (deterministic, synthetic) and forward pass
# ----------------------------------------------------------------------------
def init_params(key, in_ch, img_hw, num_class=10):
    H, W = img_hw
    # Only pool2 halves the spatial dims on the consumed path.
    flat_features = 64 * (H // 2) * (W // 2)
    hidden, hidden_pad = 100, 128           # lin1 out_features padded to 128

    def conv_w(k, cin, cout):
        scale = 1.0 / jnp.sqrt(9.0 * cin)
        return (jax.random.normal(k, (3, 3, cin, cout), jnp.float32)
                * scale).astype(jnp.bfloat16)

    ks = jax.random.split(key, 12)

    # lin1_w rows are stored in NHWC-flatten order of the conv2 feature map
    # (once-at-init row permutation of the PyTorch NCHW-flatten weight, free
    # and numerically identical); columns 100..127 are zero padding, with the
    # matching lin2_w rows zeroed, so results equal the unpadded model.
    lin1_w = (jax.random.normal(ks[8], (flat_features, hidden), jnp.float32)
              / jnp.sqrt(float(flat_features))).astype(jnp.bfloat16)
    lin1_w = jnp.pad(lin1_w, ((0, 0), (0, hidden_pad - hidden)))
    lin1_b = jnp.pad(jax.random.normal(ks[9], (hidden,), jnp.float32) * 0.01,
                     (0, hidden_pad - hidden))
    lin2_w = (jax.random.normal(ks[10], (hidden, num_class), jnp.float32)
              / jnp.sqrt(float(hidden)))
    lin2_w = jnp.pad(lin2_w, ((0, hidden_pad - hidden), (0, 0)))

    return {
        "bkbn_conv1_w": conv_w(ks[0], in_ch, 32),
        "bkbn_conv1_b": jax.random.normal(ks[1], (32,), jnp.float32) * 0.01,
        "rb2_conv1_w": conv_w(ks[2], 32, 16),
        "rb2_conv1_b": jax.random.normal(ks[3], (16,), jnp.float32) * 0.01,
        "rb2_conv2_w": conv_w(ks[4], 16, 32),
        "rb2_conv2_b": jax.random.normal(ks[5], (32,), jnp.float32) * 0.01,
        "bkbn_conv2_w": conv_w(ks[6], 32, 64),
        "bkbn_conv2_b": jax.random.normal(ks[7], (64,), jnp.float32) * 0.01,
        "lin1_w": lin1_w,
        "lin1_b": lin1_b,
        "lin2_w": lin2_w,
        "lin2_b": jax.random.normal(ks[11], (num_class,), jnp.float32) * 0.01,
    }


def model_forward(params, x_nchw):
    # NCHW -> NHWC (TPU lane-friendly), bf16 storage downstream, f32 MXU acc.
    x = jnp.transpose(x_nchw, (0, 2, 3, 1)).astype(jnp.bfloat16)

    # bkbn/conv1 + relu (in_ch -> 32)
    c1 = conv3x3_same(x, params["bkbn_conv1_w"], params["bkbn_conv1_b"])

    # bkbn/pool1 and bkbn/resblock1 feed no declared output (resblock2 reads
    # conv1/relu directly per the spec; pool2 reads resblock2/add) -> dead
    # subgraph, skipped without changing the declared outputs.

    # bkbn/resblock2: conv1 (32->16)+relu, then [conv2 (16->32)+relu +
    # residual add + bkbn/pool2 (2x2 max pool)] fused in one kernel.
    r1 = conv3x3_same(c1, params["rb2_conv1_w"], params["rb2_conv1_b"])
    p2 = conv3x3_same(r1, params["rb2_conv2_w"], params["rb2_conv2_b"],
                      residual=c1, pool=True)

    # bkbn/conv2 + relu (32 -> 64)
    c2 = conv3x3_same(p2, params["bkbn_conv2_w"], params["bkbn_conv2_b"])

    # clsf: Flatten (NHWC order, weight rows permuted at init to match)
    #       -> Linear(100)+relu (K-split + K-tiled) -> fused Linear(10)+softmax.
    feat = c2.reshape(c2.shape[0], -1)
    hp = linear1_partials(feat, params["lin1_w"])
    logits, probs = classifier_head(hp, params["lin1_b"],
                                    params["lin2_w"], params["lin2_b"])

    # output_names of ModelTemplate: clsf/linear2 and clsf/linear2/softmax.
    return {"clsf/linear2": logits, "clsf/linear2/softmax": probs}


# ----------------------------------------------------------------------------
# Driver
# ----------------------------------------------------------------------------
if __name__ == "__main__":
    key = jax.random.PRNGKey(0)
    k_param, k_input = jax.random.split(key)

    batch, in_ch, H, W = 2, 3, 16, 16          # small stand-in for (3, 320, 320)
    x = jax.random.normal(k_input, (batch, in_ch, H, W), jnp.float32)  # NCHW

    params = init_params(k_param, in_ch, (H, W), num_class=10)

    fwd = jax.jit(model_forward)
    out = fwd(params, x)
    out = jax.tree_util.tree_map(jax.block_until_ready, out)

    logits = out["clsf/linear2"]
    probs = out["clsf/linear2/softmax"]
    assert logits.shape == (batch, 10) and probs.shape == (batch, 10)
    assert bool(jnp.all(jnp.isfinite(logits))) and bool(jnp.all(jnp.isfinite(probs)))
    assert bool(jnp.allclose(jnp.sum(probs, axis=-1), 1.0, atol=1e-5))

    print("KERNEL_OK")
</pallas_src>

<mosaic_0001>
module attributes {stable_mosaic.version = 11 : i64} {
  func.func @_conv3x3_kernel(%arg0: i32, %arg1: memref<1x16x16x3xbf16, #tpu.memory_space<vmem>>, %arg2: memref<3x9x32xbf16, #tpu.memory_space<vmem>>, %arg3: memref<1x32xf32, #tpu.memory_space<vmem>>, %arg4: memref<1x16x16x32xbf16, #tpu.memory_space<vmem>>, %arg5: memref<18x18x3xbf16, #tpu.memory_space<vmem>>) attributes {dimension_semantics = [#tpu.dimension_semantics<parallel>], iteration_bounds = array<i64: 2>, scalar_prefetch = 0 : i64, scratch_operands = 1 : i64, tpu.core_type = #tpu.core_type<tc>, window_params = [{transform_indices = @transform_0, window_bounds = array<i64: 1, 16, 16, 3>}, {pipeline_mode = #tpu.pipeline_mode<synchronous>, transform_indices = @transform_1, window_bounds = array<i64: 3, 9, 32>}, {pipeline_mode = #tpu.pipeline_mode<synchronous>, transform_indices = @transform_2, window_bounds = array<i64: 1, 32>}, {transform_indices = @transform_3, window_bounds = array<i64: 1, 16, 16, 32>}]} {
    %cst = arith.constant 0.000000e+00 : bf16
    %0 = vector.broadcast %cst : bf16 to vector<18x18x3xbf16>
    %c0 = arith.constant 0 : index
    %c0_0 = arith.constant 0 : index
    %c0_1 = arith.constant 0 : index
    %1 = vector.load %arg5[%c0, %c0_0, %c0_1] : memref<18x18x3xbf16, #tpu.memory_space<vmem>>, vector<18x18x3xbf16>
    tpu.vector_store %arg5[%c0, %c0_0, %c0_1], %0 {strides = array<i32>} : memref<18x18x3xbf16, #tpu.memory_space<vmem>>, vector<18x18x3xbf16>,
    %c0_2 = arith.constant 0 : index
    %c0_3 = arith.constant 0 : index
    %c0_4 = arith.constant 0 : index
    %c0_5 = arith.constant 0 : index
    %2 = vector.load %arg1[%c0_2, %c0_3, %c0_4, %c0_5] : memref<1x16x16x3xbf16, #tpu.memory_space<vmem>>, vector<1x16x16x3xbf16>
    %3 = vector.shape_cast %2 : vector<1x16x16x3xbf16> to vector<16x16x3xbf16>
    %c1 = arith.constant 1 : index
    %c1_6 = arith.constant 1 : index
    %c0_7 = arith.constant 0 : index
    %4 = vector.load %arg5[%c1, %c1_6, %c0_7] : memref<18x18x3xbf16, #tpu.memory_space<vmem>>, vector<16x16x3xbf16>
    tpu.vector_store %arg5[%c1, %c1_6, %c0_7], %3 {strides = array<i32>} : memref<18x18x3xbf16, #tpu.memory_space<vmem>>, vector<16x16x3xbf16>,
    %c0_8 = arith.constant 0 : index
    %c0_9 = arith.constant 0 : index
    %c0_10 = arith.constant 0 : index
    %5 = vector.load %arg5[%c0_8, %c0_9, %c0_10] : memref<18x18x3xbf16, #tpu.memory_space<vmem>>, vector<18x18x3xbf16>
    %cst_11 = arith.constant 0.000000e+00 : f32
    %6 = vector.broadcast %cst_11 : f32 to vector<256x32xf32>
    %7 = vector.extract_strided_slice %5 {offsets = [0, 0, 0], sizes = [16, 18, 3], strides = [1, 1, 1]} : vector<18x18x3xbf16> to vector<16x18x3xbf16>
    %8 = vector.extract_strided_slice %7 {offsets = [0, 0, 0], sizes = [16, 16, 3], strides = [1, 1, 1]} : vector<16x18x3xbf16> to vector<16x16x3xbf16>
    %9 = vector.extract_strided_slice %7 {offsets = [0, 1, 0], sizes = [16, 16, 3], strides = [1, 1, 1]} : vector<16x18x3xbf16> to vector<16x16x3xbf16>
    %10 = vector.extract_strided_slice %7 {offsets = [0, 2, 0], sizes = [16, 16, 3], strides = [1, 1, 1]} : vector<16x18x3xbf16> to vector<16x16x3xbf16>
    %11 = tpu.concatenate %8, %9, %10 in 2 : vector<16x16x3xbf16>, vector<16x16x3xbf16>, vector<16x16x3xbf16> -> vector<16x16x9xbf16>
    %12 = vector.shape_cast %11 : vector<16x16x9xbf16> to vector<256x9xbf16>
    %c0_12 = arith.constant 0 : index
    %c0_13 = arith.constant 0 : index
    %c0_14 = arith.constant 0 : index
    %13 = vector.load %arg2[%c0_12, %c0_13, %c0_14] : memref<3x9x32xbf16, #tpu.memory_space<vmem>>, vector<1x9x32xbf16>
    %14 = vector.shape_cast %13 : vector<1x9x32xbf16> to vector<9x32xbf16>
    %cst_15 = arith.constant dense<0.000000e+00> : vector<256x32xf32>
    %15 = tpu.matmul %12, %14, %cst_15 {dimension_numbers = #tpu.dot_dimension_numbers<[1], [0], [0], [1], [0, 0, 1, 1], [], []>} : vector<256x9xbf16>, vector<9x32xbf16>, vector<256x32xf32> -> vector<256x32xf32>
    %16 = arith.addf %6, %15 : vector<256x32xf32>
    %17 = vector.extract_strided_slice %5 {offsets = [1, 0, 0], sizes = [16, 18, 3], strides = [1, 1, 1]} : vector<18x18x3xbf16> to vector<16x18x3xbf16>
    %18 = vector.extract_strided_slice %17 {offsets = [0, 0, 0], sizes = [16, 16, 3], strides = [1, 1, 1]} : vector<16x18x3xbf16> to vector<16x16x3xbf16>
    %19 = vector.extract_strided_slice %17 {offsets = [0, 1, 0], sizes = [16, 16, 3], strides = [1, 1, 1]} : vector<16x18x3xbf16> to vector<16x16x3xbf16>
    %20 = vector.extract_strided_slice %17 {offsets = [0, 2, 0], sizes = [16, 16, 3], strides = [1, 1, 1]} : vector<16x18x3xbf16> to vector<16x16x3xbf16>
    %21 = tpu.concatenate %18, %19, %20 in 2 : vector<16x16x3xbf16>, vector<16x16x3xbf16>, vector<16x16x3xbf16> -> vector<16x16x9xbf16>
    %22 = vector.shape_cast %21 : vector<16x16x9xbf16> to vector<256x9xbf16>
    %c1_16 = arith.constant 1 : index
    %c0_17 = arith.constant 0 : index
    %c0_18 = arith.constant 0 : index
    %23 = vector.load %arg2[%c1_16, %c0_17, %c0_18] : memref<3x9x32xbf16, #tpu.memory_space<vmem>>, vector<1x9x32xbf16>
    %24 = vector.shape_cast %23 : vector<1x9x32xbf16> to vector<9x32xbf16>
    %cst_19 = arith.constant dense<0.000000e+00> : vector<256x32xf32>
    %25 = tpu.matmul %22, %24, %cst_19 {dimension_numbers = #tpu.dot_dimension_numbers<[1], [0], [0], [1], [0, 0, 1, 1], [], []>} : vector<256x9xbf16>, vector<9x32xbf16>, vector<256x32xf32> -> vector<256x32xf32>
    %26 = arith.addf %16, %25 : vector<256x32xf32>
    %27 = vector.extract_strided_slice %5 {offsets = [2, 0, 0], sizes = [16, 18, 3], strides = [1, 1, 1]} : vector<18x18x3xbf16> to vector<16x18x3xbf16>
    %28 = vector.extract_strided_slice %27 {offsets = [0, 0, 0], sizes = [16, 16, 3], strides = [1, 1, 1]} : vector<16x18x3xbf16> to vector<16x16x3xbf16>
    %29 = vector.extract_strided_slice %27 {offsets = [0, 1, 0], sizes = [16, 16, 3], strides = [1, 1, 1]} : vector<16x18x3xbf16> to vector<16x16x3xbf16>
    %30 = vector.extract_strided_slice %27 {offsets = [0, 2, 0], sizes = [16, 16, 3], strides = [1, 1, 1]} : vector<16x18x3xbf16> to vector<16x16x3xbf16>
    %31 = tpu.concatenate %28, %29, %30 in 2 : vector<16x16x3xbf16>, vector<16x16x3xbf16>, vector<16x16x3xbf16> -> vector<16x16x9xbf16>
    %32 = vector.shape_cast %31 : vector<16x16x9xbf16> to vector<256x9xbf16>
    %c2 = arith.constant 2 : index
    %c0_20 = arith.constant 0 : index
    %c0_21 = arith.constant 0 : index
    %33 = vector.load %arg2[%c2, %c0_20, %c0_21] : memref<3x9x32xbf16, #tpu.memory_space<vmem>>, vector<1x9x32xbf16>
    %34 = vector.shape_cast %33 : vector<1x9x32xbf16> to vector<9x32xbf16>
    %cst_22 = arith.constant dense<0.000000e+00> : vector<256x32xf32>
    %35 = tpu.matmul %32, %34, %cst_22 {dimension_numbers = #tpu.dot_dimension_numbers<[1], [0], [0], [1], [0, 0, 1, 1], [], []>} : vector<256x9xbf16>, vector<9x32xbf16>, vector<256x32xf32> -> vector<256x32xf32>
    %36 = arith.addf %26, %35 : vector<256x32xf32>
    %c0_23 = arith.constant 0 : index
    %c0_24 = arith.constant 0 : index
    %37 = vector.load %arg3[%c0_23, %c0_24] : memref<1x32xf32, #tpu.memory_space<vmem>>, vector<1x32xf32>
    %38 = vector.broadcast %37 : vector<1x32xf32> to vector<256x32xf32>
    %39 = arith.addf %36, %38 : vector<256x32xf32>
    %cst_25 = arith.constant 0.000000e+00 : f32
    %40 = vector.broadcast %cst_25 : f32 to vector<256x32xf32>
    %41 = arith.maximumf %39, %40 : vector<256x32xf32>
    %42 = vector.shape_cast %41 : vector<256x32xf32> to vector<16x16x32xf32>
    %43 = arith.truncf %42 : vector<16x16x32xf32> to vector<16x16x32xbf16>
    %c0_26 = arith.constant 0 : index
    %c0_27 = arith.constant 0 : index
    %c0_28 = arith.constant 0 : index
    %c0_29 = arith.constant 0 : index
    %44 = vector.load %arg4[%c0_26, %c0_27, %c0_28, %c0_29] : memref<1x16x16x32xbf16, #tpu.memory_space<vmem>>, vector<1x16x16x32xbf16>
    %45 = vector.shape_cast %44 : vector<1x16x16x32xbf16> to vector<16x16x32xbf16>
    %46 = vector.shape_cast %43 : vector<16x16x32xbf16> to vector<1x16x16x32xbf16>
    tpu.vector_store %arg4[%c0_26, %c0_27, %c0_28, %c0_29], %46 {strides = array<i32>} : memref<1x16x16x32xbf16, #tpu.memory_space<vmem>>, vector<1x16x16x32xbf16>,
    return
  }
  func.func @transform_0(%arg0: i32) -> (i32, i32, i32, i32) {
    %c0_i32 = arith.constant 0 : i32
    %c0_i32_0 = arith.constant 0 : i32
    %c0_i32_1 = arith.constant 0 : i32
    %c0_i32_2 = arith.constant 0 : i32
    return %arg0, %c0_i32, %c0_i32_0, %c0_i32_1 : i32, i32, i32, i32
  }
  func.func @transform_1(%arg0: i32) -> (i32, i32, i32) {
    %c0_i32 = arith.constant 0 : i32
    %c0_i32_0 = arith.constant 0 : i32
    %c0_i32_1 = arith.constant 0 : i32
    %c0_i32_2 = arith.constant 0 : i32
    return %c0_i32, %c0_i32_0, %c0_i32_1 : i32, i32, i32
  }
  func.func @transform_2(%arg0: i32) -> (i32, i32) {
    %c0_i32 = arith.constant 0 : i32
    %c0_i32_0 = arith.constant 0 : i32
    %c0_i32_1 = arith.constant 0 : i32
    return %c0_i32, %c0_i32_0 : i32, i32
  }
  func.func @transform_3(%arg0: i32) -> (i32, i32, i32, i32) {
    %c0_i32 = arith.constant 0 : i32
    %c0_i32_0 = arith.constant 0 : i32
    %c0_i32_1 = arith.constant 0 : i32
    %c0_i32_2 = arith.constant 0 : i32
    return %arg0, %c0_i32, %c0_i32_0, %c0_i32_1 : i32, i32, i32, i32
  }
}

module attributes {stable_mosaic.version = 11 : i64} {
  func.func @_conv3x3_kernel(%arg0: i32, %arg1: memref<1x16x16x32xbf16, #tpu.memory_space<vmem>>, %arg2: memref<3x96x16xbf16, #tpu.memory_space<vmem>>, %arg3: memref<1x16xf32, #tpu.memory_space<vmem>>, %arg4: memref<1x16x16x16xbf16, #tpu.memory_space<vmem>>, %arg5: memref<18x18x32xbf16, #tpu.memory_space<vmem>>) attributes {dimension_semantics = [#tpu.dimension_semantics<parallel>], iteration_bounds = array<i64: 2>, scalar_prefetch = 0 : i64, scratch_operands = 1 : i64, tpu.core_type = #tpu.core_type<tc>, window_params = [{transform_indices = @transform_0, window_bounds = array<i64: 1, 16, 16, 32>}, {pipeline_mode = #tpu.pipeline_mode<synchronous>, transform_indices = @transform_1, window_bounds = array<i64: 3, 96, 16>}, {pipeline_mode = #tpu.pipeline_mode<synchronous>, transform_indices = @transform_2, window_bounds = array<i64: 1, 16>}, {transform_indices = @transform_3, window_bounds = array<i64: 1, 16, 16, 16>}]} {
    %cst = arith.constant 0.000000e+00 : bf16
    %0 = vector.broadcast %cst : bf16 to vector<18x18x32xbf16>
    %c0 = arith.constant 0 : index
    %c0_0 = arith.constant 0 : index
    %c0_1 = arith.constant 0 : index
    %1 = vector.load %arg5[%c0, %c0_0, %c0_1] : memref<18x18x32xbf16, #tpu.memory_space<vmem>>, vector<18x18x32xbf16>
    tpu.vector_store %arg5[%c0, %c0_0, %c0_1], %0 {strides = array<i32>} : memref<18x18x32xbf16, #tpu.memory_space<vmem>>, vector<18x18x32xbf16>,
    %c0_2 = arith.constant 0 : index
    %c0_3 = arith.constant 0 : index
    %c0_4 = arith.constant 0 : index
    %c0_5 = arith.constant 0 : index
    %2 = vector.load %arg1[%c0_2, %c0_3, %c0_4, %c0_5] : memref<1x16x16x32xbf16, #tpu.memory_space<vmem>>, vector<1x16x16x32xbf16>
    %3 = vector.shape_cast %2 : vector<1x16x16x32xbf16> to vector<16x16x32xbf16>
    %c1 = arith.constant 1 : index
    %c1_6 = arith.constant 1 : index
    %c0_7 = arith.constant 0 : index
    %4 = vector.load %arg5[%c1, %c1_6, %c0_7] : memref<18x18x32xbf16, #tpu.memory_space<vmem>>, vector<16x16x32xbf16>
    tpu.vector_store %arg5[%c1, %c1_6, %c0_7], %3 {strides = array<i32>} : memref<18x18x32xbf16, #tpu.memory_space<vmem>>, vector<16x16x32xbf16>,
    %c0_8 = arith.constant 0 : index
    %c0_9 = arith.constant 0 : index
    %c0_10 = arith.constant 0 : index
    %5 = vector.load %arg5[%c0_8, %c0_9, %c0_10] : memref<18x18x32xbf16, #tpu.memory_space<vmem>>, vector<18x18x32xbf16>
    %cst_11 = arith.constant 0.000000e+00 : f32
    %6 = vector.broadcast %cst_11 : f32 to vector<256x16xf32>
    %7 = vector.extract_strided_slice %5 {offsets = [0, 0, 0], sizes = [16, 18, 32], strides = [1, 1, 1]} : vector<18x18x32xbf16> to vector<16x18x32xbf16>
    %8 = vector.extract_strided_slice %7 {offsets = [0, 0, 0], sizes = [16, 16, 32], strides = [1, 1, 1]} : vector<16x18x32xbf16> to vector<16x16x32xbf16>
    %9 = vector.extract_strided_slice %7 {offsets = [0, 1, 0], sizes = [16, 16, 32], strides = [1, 1, 1]} : vector<16x18x32xbf16> to vector<16x16x32xbf16>
    %10 = vector.extract_strided_slice %7 {offsets = [0, 2, 0], sizes = [16, 16, 32], strides = [1, 1, 1]} : vector<16x18x32xbf16> to vector<16x16x32xbf16>
    %11 = tpu.concatenate %8, %9, %10 in 2 : vector<16x16x32xbf16>, vector<16x16x32xbf16>, vector<16x16x32xbf16> -> vector<16x16x96xbf16>
    %12 = vector.shape_cast %11 : vector<16x16x96xbf16> to vector<256x96xbf16>
    %c0_12 = arith.constant 0 : index
    %c0_13 = arith.constant 0 : index
    %c0_14 = arith.constant 0 : index
    %13 = vector.load %arg2[%c0_12, %c0_13, %c0_14] : memref<3x96x16xbf16, #tpu.memory_space<vmem>>, vector<1x96x16xbf16>
    %14 = vector.shape_cast %13 : vector<1x96x16xbf16> to vector<96x16xbf16>
    %cst_15 = arith.constant dense<0.000000e+00> : vector<256x16xf32>
    %15 = tpu.matmul %12, %14, %cst_15 {dimension_numbers = #tpu.dot_dimension_numbers<[1], [0], [0], [1], [0, 0, 1, 1], [], []>} : vector<256x96xbf16>, vector<96x16xbf16>, vector<256x16xf32> -> vector<256x16xf32>
    %16 = arith.addf %6, %15 : vector<256x16xf32>
    %17 = vector.extract_strided_slice %5 {offsets = [1, 0, 0], sizes = [16, 18, 32], strides = [1, 1, 1]} : vector<18x18x32xbf16> to vector<16x18x32xbf16>
    %18 = vector.extract_strided_slice %17 {offsets = [0, 0, 0], sizes = [16, 16, 32], strides = [1, 1, 1]} : vector<16x18x32xbf16> to vector<16x16x32xbf16>
    %19 = vector.extract_strided_slice %17 {offsets = [0, 1, 0], sizes = [16, 16, 32], strides = [1, 1, 1]} : vector<16x18x32xbf16> to vector<16x16x32xbf16>
    %20 = vector.extract_strided_slice %17 {offsets = [0, 2, 0], sizes = [16, 16, 32], strides = [1, 1, 1]} : vector<16x18x32xbf16> to vector<16x16x32xbf16>
    %21 = tpu.concatenate %18, %19, %20 in 2 : vector<16x16x32xbf16>, vector<16x16x32xbf16>, vector<16x16x32xbf16> -> vector<16x16x96xbf16>
    %22 = vector.shape_cast %21 : vector<16x16x96xbf16> to vector<256x96xbf16>
    %c1_16 = arith.constant 1 : index
    %c0_17 = arith.constant 0 : index
    %c0_18 = arith.constant 0 : index
    %23 = vector.load %arg2[%c1_16, %c0_17, %c0_18] : memref<3x96x16xbf16, #tpu.memory_space<vmem>>, vector<1x96x16xbf16>
    %24 = vector.shape_cast %23 : vector<1x96x16xbf16> to vector<96x16xbf16>
    %cst_19 = arith.constant dense<0.000000e+00> : vector<256x16xf32>
    %25 = tpu.matmul %22, %24, %cst_19 {dimension_numbers = #tpu.dot_dimension_numbers<[1], [0], [0], [1], [0, 0, 1, 1], [], []>} : vector<256x96xbf16>, vector<96x16xbf16>, vector<256x16xf32> -> vector<256x16xf32>
    %26 = arith.addf %16, %25 : vector<256x16xf32>
    %27 = vector.extract_strided_slice %5 {offsets = [2, 0, 0], sizes = [16, 18, 32], strides = [1, 1, 1]} : vector<18x18x32xbf16> to vector<16x18x32xbf16>
    %28 = vector.extract_strided_slice %27 {offsets = [0, 0, 0], sizes = [16, 16, 32], strides = [1, 1, 1]} : vector<16x18x32xbf16> to vector<16x16x32xbf16>
    %29 = vector.extract_strided_slice %27 {offsets = [0, 1, 0], sizes = [16, 16, 32], strides = [1, 1, 1]} : vector<16x18x32xbf16> to vector<16x16x32xbf16>
    %30 = vector.extract_strided_slice %27 {offsets = [0, 2, 0], sizes = [16, 16, 32], strides = [1, 1, 1]} : vector<16x18x32xbf16> to vector<16x16x32xbf16>
    %31 = tpu.concatenate %28, %29, %30 in 2 : vector<16x16x32xbf16>, vector<16x16x32xbf16>, vector<16x16x32xbf16> -> vector<16x16x96xbf16>
    %32 = vector.shape_cast %31 : vector<16x16x96xbf16> to vector<256x96xbf16>
    %c2 = arith.constant 2 : index
    %c0_20 = arith.constant 0 : index
    %c0_21 = arith.constant 0 : index
    %33 = vector.load %arg2[%c2, %c0_20, %c0_21] : memref<3x96x16xbf16, #tpu.memory_space<vmem>>, vector<1x96x16xbf16>
    %34 = vector.shape_cast %33 : vector<1x96x16xbf16> to vector<96x16xbf16>
    %cst_22 = arith.constant dense<0.000000e+00> : vector<256x16xf32>
    %35 = tpu.matmul %32, %34, %cst_22 {dimension_numbers = #tpu.dot_dimension_numbers<[1], [0], [0], [1], [0, 0, 1, 1], [], []>} : vector<256x96xbf16>, vector<96x16xbf16>, vector<256x16xf32> -> vector<256x16xf32>
    %36 = arith.addf %26, %35 : vector<256x16xf32>
    %c0_23 = arith.constant 0 : index
    %c0_24 = arith.constant 0 : index
    %37 = vector.load %arg3[%c0_23, %c0_24] : memref<1x16xf32, #tpu.memory_space<vmem>>, vector<1x16xf32>
    %38 = vector.broadcast %37 : vector<1x16xf32> to vector<256x16xf32>
    %39 = arith.addf %36, %38 : vector<256x16xf32>
    %cst_25 = arith.constant 0.000000e+00 : f32
    %40 = vector.broadcast %cst_25 : f32 to vector<256x16xf32>
    %41 = arith.maximumf %39, %40 : vector<256x16xf32>
    %42 = vector.shape_cast %41 : vector<256x16xf32> to vector<16x16x16xf32>
    %43 = arith.truncf %42 : vector<16x16x16xf32> to vector<16x16x16xbf16>
    %c0_26 = arith.constant 0 : index
    %c0_27 = arith.constant 0 : index
    %c0_28 = arith.constant 0 : index
    %c0_29 = arith.constant 0 : index
    %44 = vector.load %arg4[%c0_26, %c0_27, %c0_28, %c0_29] : memref<1x16x16x16xbf16, #tpu.memory_space<vmem>>, vector<1x16x16x16xbf16>
    %45 = vector.shape_cast %44 : vector<1x16x16x16xbf16> to vector<16x16x16xbf16>
    %46 = vector.shape_cast %43 : vector<16x16x16xbf16> to vector<1x16x16x16xbf16>
    tpu.vector_store %arg4[%c0_26, %c0_27, %c0_28, %c0_29], %46 {strides = array<i32>} : memref<1x16x16x16xbf16, #tpu.memory_space<vmem>>, vector<1x16x16x16xbf16>,
    return
  }
  func.func @transform_0(%arg0: i32) -> (i32, i32, i32, i32) {
    %c0_i32 = arith.constant 0 : i32
    %c0_i32_0 = arith.constant 0 : i32
    %c0_i32_1 = arith.constant 0 : i32
    %c0_i32_2 = arith.constant 0 : i32
    return %arg0, %c0_i32, %c0_i32_0, %c0_i32_1 : i32, i32, i32, i32
  }
  func.func @transform_1(%arg0: i32) -> (i32, i32, i32) {
    %c0_i32 = arith.constant 0 : i32
    %c0_i32_0 = arith.constant 0 : i32
    %c0_i32_1 = arith.constant 0 : i32
    %c0_i32_2 = arith.constant 0 : i32
    return %c0_i32, %c0_i32_0, %c0_i32_1 : i32, i32, i32
  }
  func.func @transform_2(%arg0: i32) -> (i32, i32) {
    %c0_i32 = arith.constant 0 : i32
    %c0_i32_0 = arith.constant 0 : i32
    %c0_i32_1 = arith.constant 0 : i32
    return %c0_i32, %c0_i32_0 : i32, i32
  }
  func.func @transform_3(%arg0: i32) -> (i32, i32, i32, i32) {
    %c0_i32 = arith.constant 0 : i32
    %c0_i32_0 = arith.constant 0 : i32
    %c0_i32_1 = arith.constant 0 : i32
    %c0_i32_2 = arith.constant 0 : i32
    return %arg0, %c0_i32, %c0_i32_0, %c0_i32_1 : i32, i32, i32, i32
  }
}

module attributes {stable_mosaic.version = 11 : i64} {
  func.func @_conv3x3_kernel(%arg0: i32, %arg1: memref<1x16x16x16xbf16, #tpu.memory_space<vmem>>, %arg2: memref<3x48x32xbf16, #tpu.memory_space<vmem>>, %arg3: memref<1x32xf32, #tpu.memory_space<vmem>>, %arg4: memref<1x16x16x32xbf16, #tpu.memory_space<vmem>>, %arg5: memref<1x8x8x32xbf16, #tpu.memory_space<vmem>>, %arg6: memref<18x18x16xbf16, #tpu.memory_space<vmem>>) attributes {dimension_semantics = [#tpu.dimension_semantics<parallel>], iteration_bounds = array<i64: 2>, scalar_prefetch = 0 : i64, scratch_operands = 1 : i64, tpu.core_type = #tpu.core_type<tc>, window_params = [{transform_indices = @transform_0, window_bounds = array<i64: 1, 16, 16, 16>}, {pipeline_mode = #tpu.pipeline_mode<synchronous>, transform_indices = @transform_1, window_bounds = array<i64: 3, 48, 32>}, {pipeline_mode = #tpu.pipeline_mode<synchronous>, transform_indices = @transform_2, window_bounds = array<i64: 1, 32>}, {transform_indices = @transform_3, window_bounds = array<i64: 1, 16, 16, 32>}, {transform_indices = @transform_4, window_bounds = array<i64: 1, 8, 8, 32>}]} {
    %cst = arith.constant 0.000000e+00 : bf16
    %0 = vector.broadcast %cst : bf16 to vector<18x18x16xbf16>
    %c0 = arith.constant 0 : index
    %c0_0 = arith.constant 0 : index
    %c0_1 = arith.constant 0 : index
    %1 = vector.load %arg6[%c0, %c0_0, %c0_1] : memref<18x18x16xbf16, #tpu.memory_space<vmem>>, vector<18x18x16xbf16>
    tpu.vector_store %arg6[%c0, %c0_0, %c0_1], %0 {strides = array<i32>} : memref<18x18x16xbf16, #tpu.memory_space<vmem>>, vector<18x18x16xbf16>,
    %c0_2 = arith.constant 0 : index
    %c0_3 = arith.constant 0 : index
    %c0_4 = arith.constant 0 : index
    %c0_5 = arith.constant 0 : index
    %2 = vector.load %arg1[%c0_2, %c0_3, %c0_4, %c0_5] : memref<1x16x16x16xbf16, #tpu.memory_space<vmem>>, vector<1x16x16x16xbf16>
    %3 = vector.shape_cast %2 : vector<1x16x16x16xbf16> to vector<16x16x16xbf16>
    %c1 = arith.constant 1 : index
    %c1_6 = arith.constant 1 : index
    %c0_7 = arith.constant 0 : index
    %4 = vector.load %arg6[%c1, %c1_6, %c0_7] : memref<18x18x16xbf16, #tpu.memory_space<vmem>>, vector<16x16x16xbf16>
    tpu.vector_store %arg6[%c1, %c1_6, %c0_7], %3 {strides = array<i32>} : memref<18x18x16xbf16, #tpu.memory_space<vmem>>, vector<16x16x16xbf16>,
    %c0_8 = arith.constant 0 : index
    %c0_9 = arith.constant 0 : index
    %c0_10 = arith.constant 0 : index
    %5 = vector.load %arg6[%c0_8, %c0_9, %c0_10] : memref<18x18x16xbf16, #tpu.memory_space<vmem>>, vector<18x18x16xbf16>
    %cst_11 = arith.constant 0.000000e+00 : f32
    %6 = vector.broadcast %cst_11 : f32 to vector<256x32xf32>
    %7 = vector.extract_strided_slice %5 {offsets = [0, 0, 0], sizes = [16, 18, 16], strides = [1, 1, 1]} : vector<18x18x16xbf16> to vector<16x18x16xbf16>
    %8 = vector.extract_strided_slice %7 {offsets = [0, 0, 0], sizes = [16, 16, 16], strides = [1, 1, 1]} : vector<16x18x16xbf16> to vector<16x16x16xbf16>
    %9 = vector.extract_strided_slice %7 {offsets = [0, 1, 0], sizes = [16, 16, 16], strides = [1, 1, 1]} : vector<16x18x16xbf16> to vector<16x16x16xbf16>
    %10 = vector.extract_strided_slice %7 {offsets = [0, 2, 0], sizes = [16, 16, 16], strides = [1, 1, 1]} : vector<16x18x16xbf16> to vector<16x16x16xbf16>
    %11 = tpu.concatenate %8, %9, %10 in 2 : vector<16x16x16xbf16>, vector<16x16x16xbf16>, vector<16x16x16xbf16> -> vector<16x16x48xbf16>
    %12 = vector.shape_cast %11 : vector<16x16x48xbf16> to vector<256x48xbf16>
    %c0_12 = arith.constant 0 : index
    %c0_13 = arith.constant 0 : index
    %c0_14 = arith.constant 0 : index
    %13 = vector.load %arg2[%c0_12, %c0_13, %c0_14] : memref<3x48x32xbf16, #tpu.memory_space<vmem>>, vector<1x48x32xbf16>
    %14 = vector.shape_cast %13 : vector<1x48x32xbf16> to vector<48x32xbf16>
    %cst_15 = arith.constant dense<0.000000e+00> : vector<256x32xf32>
    %15 = tpu.matmul %12, %14, %cst_15 {dimension_numbers = #tpu.dot_dimension_numbers<[1], [0], [0], [1], [0, 0, 1, 1], [], []>} : vector<256x48xbf16>, vector<48x32xbf16>, vector<256x32xf32> -> vector<256x32xf32>
    %16 = arith.addf %6, %15 : vector<256x32xf32>
    %17 = vector.extract_strided_slice %5 {offsets = [1, 0, 0], sizes = [16, 18, 16], strides = [1, 1, 1]} : vector<18x18x16xbf16> to vector<16x18x16xbf16>
    %18 = vector.extract_strided_slice %17 {offsets = [0, 0, 0], sizes = [16, 16, 16], strides = [1, 1, 1]} : vector<16x18x16xbf16> to vector<16x16x16xbf16>
    %19 = vector.extract_strided_slice %17 {offsets = [0, 1, 0], sizes = [16, 16, 16], strides = [1, 1, 1]} : vector<16x18x16xbf16> to vector<16x16x16xbf16>
    %20 = vector.extract_strided_slice %17 {offsets = [0, 2, 0], sizes = [16, 16, 16], strides = [1, 1, 1]} : vector<16x18x16xbf16> to vector<16x16x16xbf16>
    %21 = tpu.concatenate %18, %19, %20 in 2 : vector<16x16x16xbf16>, vector<16x16x16xbf16>, vector<16x16x16xbf16> -> vector<16x16x48xbf16>
    %22 = vector.shape_cast %21 : vector<16x16x48xbf16> to vector<256x48xbf16>
    %c1_16 = arith.constant 1 : index
    %c0_17 = arith.constant 0 : index
    %c0_18 = arith.constant 0 : index
    %23 = vector.load %arg2[%c1_16, %c0_17, %c0_18] : memref<3x48x32xbf16, #tpu.memory_space<vmem>>, vector<1x48x32xbf16>
    %24 = vector.shape_cast %23 : vector<1x48x32xbf16> to vector<48x32xbf16>
    %cst_19 = arith.constant dense<0.000000e+00> : vector<256x32xf32>
    %25 = tpu.matmul %22, %24, %cst_19 {dimension_numbers = #tpu.dot_dimension_numbers<[1], [0], [0], [1], [0, 0, 1, 1], [], []>} : vector<256x48xbf16>, vector<48x32xbf16>, vector<256x32xf32> -> vector<256x32xf32>
    %26 = arith.addf %16, %25 : vector<256x32xf32>
    %27 = vector.extract_strided_slice %5 {offsets = [2, 0, 0], sizes = [16, 18, 16], strides = [1, 1, 1]} : vector<18x18x16xbf16> to vector<16x18x16xbf16>
    %28 = vector.extract_strided_slice %27 {offsets = [0, 0, 0], sizes = [16, 16, 16], strides = [1, 1, 1]} : vector<16x18x16xbf16> to vector<16x16x16xbf16>
    %29 = vector.extract_strided_slice %27 {offsets = [0, 1, 0], sizes = [16, 16, 16], strides = [1, 1, 1]} : vector<16x18x16xbf16> to vector<16x16x16xbf16>
    %30 = vector.extract_strided_slice %27 {offsets = [0, 2, 0], sizes = [16, 16, 16], strides = [1, 1, 1]} : vector<16x18x16xbf16> to vector<16x16x16xbf16>
    %31 = tpu.concatenate %28, %29, %30 in 2 : vector<16x16x16xbf16>, vector<16x16x16xbf16>, vector<16x16x16xbf16> -> vector<16x16x48xbf16>
    %32 = vector.shape_cast %31 : vector<16x16x48xbf16> to vector<256x48xbf16>
    %c2 = arith.constant 2 : index
    %c0_20 = arith.constant 0 : index
    %c0_21 = arith.constant 0 : index
    %33 = vector.load %arg2[%c2, %c0_20, %c0_21] : memref<3x48x32xbf16, #tpu.memory_space<vmem>>, vector<1x48x32xbf16>
    %34 = vector.shape_cast %33 : vector<1x48x32xbf16> to vector<48x32xbf16>
    %cst_22 = arith.constant dense<0.000000e+00> : vector<256x32xf32>
    %35 = tpu.matmul %32, %34, %cst_22 {dimension_numbers = #tpu.dot_dimension_numbers<[1], [0], [0], [1], [0, 0, 1, 1], [], []>} : vector<256x48xbf16>, vector<48x32xbf16>, vector<256x32xf32> -> vector<256x32xf32>
    %36 = arith.addf %26, %35 : vector<256x32xf32>
    %c0_23 = arith.constant 0 : index
    %c0_24 = arith.constant 0 : index
    %37 = vector.load %arg3[%c0_23, %c0_24] : memref<1x32xf32, #tpu.memory_space<vmem>>, vector<1x32xf32>
    %38 = vector.broadcast %37 : vector<1x32xf32> to vector<256x32xf32>
    %39 = arith.addf %36, %38 : vector<256x32xf32>
    %cst_25 = arith.constant 0.000000e+00 : f32
    %40 = vector.broadcast %cst_25 : f32 to vector<256x32xf32>
    %41 = arith.maximumf %39, %40 : vector<256x32xf32>
    %c0_26 = arith.constant 0 : index
    %c0_27 = arith.constant 0 : index
    %c0_28 = arith.constant 0 : index
    %c0_29 = arith.constant 0 : index
    %42 = vector.load %arg4[%c0_26, %c0_27, %c0_28, %c0_29] : memref<1x16x16x32xbf16, #tpu.memory_space<vmem>>, vector<1x16x16x32xbf16>
    %43 = vector.shape_cast %42 : vector<1x16x16x32xbf16> to vector<16x16x32xbf16>
    %44 = vector.shape_cast %43 : vector<16x16x32xbf16> to vector<256x32xbf16>
    %45 = arith.extf %44 : vector<256x32xbf16> to vector<256x32xf32>
    %46 = arith.addf %41, %45 : vector<256x32xf32>
    %47 = vector.shape_cast %46 : vector<256x32xf32> to vector<8x2x16x32xf32>
    %48 = vector.extract_strided_slice %47 {offsets = [0, 0, 0, 0], sizes = [8, 1, 16, 32], strides = [1, 1, 1, 1]} : vector<8x2x16x32xf32> to vector<8x1x16x32xf32>
    %49 = vector.shape_cast %48 : vector<8x1x16x32xf32> to vector<8x16x32xf32>
    %50 = vector.extract_strided_slice %47 {offsets = [0, 1, 0, 0], sizes = [8, 1, 16, 32], strides = [1, 1, 1, 1]} : vector<8x2x16x32xf32> to vector<8x1x16x32xf32>
    %51 = vector.shape_cast %50 : vector<8x1x16x32xf32> to vector<8x16x32xf32>
    %52 = arith.maximumf %49, %51 : vector<8x16x32xf32>
    %53 = vector.shape_cast %52 : vector<8x16x32xf32> to vector<8x8x2x32xf32>
    %54 = vector.extract_strided_slice %53 {offsets = [0, 0, 0, 0], sizes = [8, 8, 1, 32], strides = [1, 1, 1, 1]} : vector<8x8x2x32xf32> to vector<8x8x1x32xf32>
    %55 = vector.shape_cast %54 : vector<8x8x1x32xf32> to vector<8x8x32xf32>
    %56 = vector.extract_strided_slice %53 {offsets = [0, 0, 1, 0], sizes = [8, 8, 1, 32], strides = [1, 1, 1, 1]} : vector<8x8x2x32xf32> to vector<8x8x1x32xf32>
    %57 = vector.shape_cast %56 : vector<8x8x1x32xf32> to vector<8x8x32xf32>
    %58 = arith.maximumf %55, %57 : vector<8x8x32xf32>
    %59 = arith.truncf %58 : vector<8x8x32xf32> to vector<8x8x32xbf16>
    %c0_30 = arith.constant 0 : index
    %c0_31 = arith.constant 0 : index
    %c0_32 = arith.constant 0 : index
    %c0_33 = arith.constant 0 : index
    %60 = vector.load %arg5[%c0_30, %c0_31, %c0_32, %c0_33] : memref<1x8x8x32xbf16, #tpu.memory_space<vmem>>, vector<1x8x8x32xbf16>
    %61 = vector.shape_cast %60 : vector<1x8x8x32xbf16> to vector<8x8x32xbf16>
    %62 = vector.shape_cast %59 : vector<8x8x32xbf16> to vector<1x8x8x32xbf16>
    tpu.vector_store %arg5[%c0_30, %c0_31, %c0_32, %c0_33], %62 {strides = array<i32>} : memref<1x8x8x32xbf16, #tpu.memory_space<vmem>>, vector<1x8x8x32xbf16>,
    return
  }
  func.func @transform_0(%arg0: i32) -> (i32, i32, i32, i32) {
    %c0_i32 = arith.constant 0 : i32
    %c0_i32_0 = arith.constant 0 : i32
    %c0_i32_1 = arith.constant 0 : i32
    %c0_i32_2 = arith.constant 0 : i32
    return %arg0, %c0_i32, %c0_i32_0, %c0_i32_1 : i32, i32, i32, i32
  }
  func.func @transform_1(%arg0: i32) -> (i32, i32, i32) {
    %c0_i32 = arith.constant 0 : i32
    %c0_i32_0 = arith.constant 0 : i32
    %c0_i32_1 = arith.constant 0 : i32
    %c0_i32_2 = arith.constant 0 : i32
    return %c0_i32, %c0_i32_0, %c0_i32_1 : i32, i32, i32
  }
  func.func @transform_2(%arg0: i32) -> (i32, i32) {
    %c0_i32 = arith.constant 0 : i32
    %c0_i32_0 = arith.constant 0 : i32
    %c0_i32_1 = arith.constant 0 : i32
    return %c0_i32, %c0_i32_0 : i32, i32
  }
  func.func @transform_3(%arg0: i32) -> (i32, i32, i32, i32) {
    %c0_i32 = arith.constant 0 : i32
    %c0_i32_0 = arith.constant 0 : i32
    %c0_i32_1 = arith.constant 0 : i32
    %c0_i32_2 = arith.constant 0 : i32
    return %arg0, %c0_i32, %c0_i32_0, %c0_i32_1 : i32, i32, i32, i32
  }
  func.func @transform_4(%arg0: i32) -> (i32, i32, i32, i32) {
    %c0_i32 = arith.constant 0 : i32
    %c0_i32_0 = arith.constant 0 : i32
    %c0_i32_1 = arith.constant 0 : i32
    %c0_i32_2 = arith.constant 0 : i32
    return %arg0, %c0_i32, %c0_i32_0, %c0_i32_1 : i32, i32, i32, i32
  }
}

module attributes {stable_mosaic.version = 11 : i64} {
  func.func @_conv3x3_kernel(%arg0: i32, %arg1: memref<1x8x8x32xbf16, #tpu.memory_space<vmem>>, %arg2: memref<3x96x64xbf16, #tpu.memory_space<vmem>>, %arg3: memref<1x64xf32, #tpu.memory_space<vmem>>, %arg4: memref<1x8x8x64xbf16, #tpu.memory_space<vmem>>, %arg5: memref<10x10x32xbf16, #tpu.memory_space<vmem>>) attributes {dimension_semantics = [#tpu.dimension_semantics<parallel>], iteration_bounds = array<i64: 2>, scalar_prefetch = 0 : i64, scratch_operands = 1 : i64, tpu.core_type = #tpu.core_type<tc>, window_params = [{transform_indices = @transform_0, window_bounds = array<i64: 1, 8, 8, 32>}, {pipeline_mode = #tpu.pipeline_mode<synchronous>, transform_indices = @transform_1, window_bounds = array<i64: 3, 96, 64>}, {pipeline_mode = #tpu.pipeline_mode<synchronous>, transform_indices = @transform_2, window_bounds = array<i64: 1, 64>}, {transform_indices = @transform_3, window_bounds = array<i64: 1, 8, 8, 64>}]} {
    %cst = arith.constant 0.000000e+00 : bf16
    %0 = vector.broadcast %cst : bf16 to vector<10x10x32xbf16>
    %c0 = arith.constant 0 : index
    %c0_0 = arith.constant 0 : index
    %c0_1 = arith.constant 0 : index
    %1 = vector.load %arg5[%c0, %c0_0, %c0_1] : memref<10x10x32xbf16, #tpu.memory_space<vmem>>, vector<10x10x32xbf16>
    tpu.vector_store %arg5[%c0, %c0_0, %c0_1], %0 {strides = array<i32>} : memref<10x10x32xbf16, #tpu.memory_space<vmem>>, vector<10x10x32xbf16>,
    %c0_2 = arith.constant 0 : index
    %c0_3 = arith.constant 0 : index
    %c0_4 = arith.constant 0 : index
    %c0_5 = arith.constant 0 : index
    %2 = vector.load %arg1[%c0_2, %c0_3, %c0_4, %c0_5] : memref<1x8x8x32xbf16, #tpu.memory_space<vmem>>, vector<1x8x8x32xbf16>
    %3 = vector.shape_cast %2 : vector<1x8x8x32xbf16> to vector<8x8x32xbf16>
    %c1 = arith.constant 1 : index
    %c1_6 = arith.constant 1 : index
    %c0_7 = arith.constant 0 : index
    %4 = vector.load %arg5[%c1, %c1_6, %c0_7] : memref<10x10x32xbf16, #tpu.memory_space<vmem>>, vector<8x8x32xbf16>
    tpu.vector_store %arg5[%c1, %c1_6, %c0_7], %3 {strides = array<i32>} : memref<10x10x32xbf16, #tpu.memory_space<vmem>>, vector<8x8x32xbf16>,
    %c0_8 = arith.constant 0 : index
    %c0_9 = arith.constant 0 : index
    %c0_10 = arith.constant 0 : index
    %5 = vector.load %arg5[%c0_8, %c0_9, %c0_10] : memref<10x10x32xbf16, #tpu.memory_space<vmem>>, vector<10x10x32xbf16>
    %cst_11 = arith.constant 0.000000e+00 : f32
    %6 = vector.broadcast %cst_11 : f32 to vector<64x64xf32>
    %7 = vector.extract_strided_slice %5 {offsets = [0, 0, 0], sizes = [8, 10, 32], strides = [1, 1, 1]} : vector<10x10x32xbf16> to vector<8x10x32xbf16>
    %8 = vector.extract_strided_slice %7 {offsets = [0, 0, 0], sizes = [8, 8, 32], strides = [1, 1, 1]} : vector<8x10x32xbf16> to vector<8x8x32xbf16>
    %9 = vector.extract_strided_slice %7 {offsets = [0, 1, 0], sizes = [8, 8, 32], strides = [1, 1, 1]} : vector<8x10x32xbf16> to vector<8x8x32xbf16>
    %10 = vector.extract_strided_slice %7 {offsets = [0, 2, 0], sizes = [8, 8, 32], strides = [1, 1, 1]} : vector<8x10x32xbf16> to vector<8x8x32xbf16>
    %11 = tpu.concatenate %8, %9, %10 in 2 : vector<8x8x32xbf16>, vector<8x8x32xbf16>, vector<8x8x32xbf16> -> vector<8x8x96xbf16>
    %12 = vector.shape_cast %11 : vector<8x8x96xbf16> to vector<64x96xbf16>
    %c0_12 = arith.constant 0 : index
    %c0_13 = arith.constant 0 : index
    %c0_14 = arith.constant 0 : index
    %13 = vector.load %arg2[%c0_12, %c0_13, %c0_14] : memref<3x96x64xbf16, #tpu.memory_space<vmem>>, vector<1x96x64xbf16>
    %14 = vector.shape_cast %13 : vector<1x96x64xbf16> to vector<96x64xbf16>
    %cst_15 = arith.constant dense<0.000000e+00> : vector<64x64xf32>
    %15 = tpu.matmul %12, %14, %cst_15 {dimension_numbers = #tpu.dot_dimension_numbers<[1], [0], [0], [1], [0, 0, 1, 1], [], []>} : vector<64x96xbf16>, vector<96x64xbf16>, vector<64x64xf32> -> vector<64x64xf32>
    %16 = arith.addf %6, %15 : vector<64x64xf32>
    %17 = vector.extract_strided_slice %5 {offsets = [1, 0, 0], sizes = [8, 10, 32], strides = [1, 1, 1]} : vector<10x10x32xbf16> to vector<8x10x32xbf16>
    %18 = vector.extract_strided_slice %17 {offsets = [0, 0, 0], sizes = [8, 8, 32], strides = [1, 1, 1]} : vector<8x10x32xbf16> to vector<8x8x32xbf16>
    %19 = vector.extract_strided_slice %17 {offsets = [0, 1, 0], sizes = [8, 8, 32], strides = [1, 1, 1]} : vector<8x10x32xbf16> to vector<8x8x32xbf16>
    %20 = vector.extract_strided_slice %17 {offsets = [0, 2, 0], sizes = [8, 8, 32], strides = [1, 1, 1]} : vector<8x10x32xbf16> to vector<8x8x32xbf16>
    %21 = tpu.concatenate %18, %19, %20 in 2 : vector<8x8x32xbf16>, vector<8x8x32xbf16>, vector<8x8x32xbf16> -> vector<8x8x96xbf16>
    %22 = vector.shape_cast %21 : vector<8x8x96xbf16> to vector<64x96xbf16>
    %c1_16 = arith.constant 1 : index
    %c0_17 = arith.constant 0 : index
    %c0_18 = arith.constant 0 : index
    %23 = vector.load %arg2[%c1_16, %c0_17, %c0_18] : memref<3x96x64xbf16, #tpu.memory_space<vmem>>, vector<1x96x64xbf16>
    %24 = vector.shape_cast %23 : vector<1x96x64xbf16> to vector<96x64xbf16>
    %cst_19 = arith.constant dense<0.000000e+00> : vector<64x64xf32>
    %25 = tpu.matmul %22, %24, %cst_19 {dimension_numbers = #tpu.dot_dimension_numbers<[1], [0], [0], [1], [0, 0, 1, 1], [], []>} : vector<64x96xbf16>, vector<96x64xbf16>, vector<64x64xf32> -> vector<64x64xf32>
    %26 = arith.addf %16, %25 : vector<64x64xf32>
    %27 = vector.extract_strided_slice %5 {offsets = [2, 0, 0], sizes = [8, 10, 32], strides = [1, 1, 1]} : vector<10x10x32xbf16> to vector<8x10x32xbf16>
    %28 = vector.extract_strided_slice %27 {offsets = [0, 0, 0], sizes = [8, 8, 32], strides = [1, 1, 1]} : vector<8x10x32xbf16> to vector<8x8x32xbf16>
    %29 = vector.extract_strided_slice %27 {offsets = [0, 1, 0], sizes = [8, 8, 32], strides = [1, 1, 1]} : vector<8x10x32xbf16> to vector<8x8x32xbf16>
    %30 = vector.extract_strided_slice %27 {offsets = [0, 2, 0], sizes = [8, 8, 32], strides = [1, 1, 1]} : vector<8x10x32xbf16> to vector<8x8x32xbf16>
    %31 = tpu.concatenate %28, %29, %30 in 2 : vector<8x8x32xbf16>, vector<8x8x32xbf16>, vector<8x8x32xbf16> -> vector<8x8x96xbf16>
    %32 = vector.shape_cast %31 : vector<8x8x96xbf16> to vector<64x96xbf16>
    %c2 = arith.constant 2 : index
    %c0_20 = arith.constant 0 : index
    %c0_21 = arith.constant 0 : index
    %33 = vector.load %arg2[%c2, %c0_20, %c0_21] : memref<3x96x64xbf16, #tpu.memory_space<vmem>>, vector<1x96x64xbf16>
    %34 = vector.shape_cast %33 : vector<1x96x64xbf16> to vector<96x64xbf16>
    %cst_22 = arith.constant dense<0.000000e+00> : vector<64x64xf32>
    %35 = tpu.matmul %32, %34, %cst_22 {dimension_numbers = #tpu.dot_dimension_numbers<[1], [0], [0], [1], [0, 0, 1, 1], [], []>} : vector<64x96xbf16>, vector<96x64xbf16>, vector<64x64xf32> -> vector<64x64xf32>
    %36 = arith.addf %26, %35 : vector<64x64xf32>
    %c0_23 = arith.constant 0 : index
    %c0_24 = arith.constant 0 : index
    %37 = vector.load %arg3[%c0_23, %c0_24] : memref<1x64xf32, #tpu.memory_space<vmem>>, vector<1x64xf32>
    %38 = vector.broadcast %37 : vector<1x64xf32> to vector<64x64xf32>
    %39 = arith.addf %36, %38 : vector<64x64xf32>
    %cst_25 = arith.constant 0.000000e+00 : f32
    %40 = vector.broadcast %cst_25 : f32 to vector<64x64xf32>
    %41 = arith.maximumf %39, %40 : vector<64x64xf32>
    %42 = vector.shape_cast %41 : vector<64x64xf32> to vector<8x8x64xf32>
    %43 = arith.truncf %42 : vector<8x8x64xf32> to vector<8x8x64xbf16>
    %c0_26 = arith.constant 0 : index
    %c0_27 = arith.constant 0 : index
    %c0_28 = arith.constant 0 : index
    %c0_29 = arith.constant 0 : index
    %44 = vector.load %arg4[%c0_26, %c0_27, %c0_28, %c0_29] : memref<1x8x8x64xbf16, #tpu.memory_space<vmem>>, vector<1x8x8x64xbf16>
    %45 = vector.shape_cast %44 : vector<1x8x8x64xbf16> to vector<8x8x64xbf16>
    %46 = vector.shape_cast %43 : vector<8x8x64xbf16> to vector<1x8x8x64xbf16>
    tpu.vector_store %arg4[%c0_26, %c0_27, %c0_28, %c0_29], %46 {strides = array<i32>} : memref<1x8x8x64xbf16, #tpu.memory_space<vmem>>, vector<1x8x8x64xbf16>,
    return
  }
  func.func @transform_0(%arg0: i32) -> (i32, i32, i32, i32) {
    %c0_i32 = arith.constant 0 : i32
    %c0_i32_0 = arith.constant 0 : i32
    %c0_i32_1 = arith.constant 0 : i32
    %c0_i32_2 = arith.constant 0 : i32
    return %arg0, %c0_i32, %c0_i32_0, %c0_i32_1 : i32, i32, i32, i32
  }
  func.func @transform_1(%arg0: i32) -> (i32, i32, i32) {
    %c0_i32 = arith.constant 0 : i32
    %c0_i32_0 = arith.constant 0 : i32
    %c0_i32_1 = arith.constant 0 : i32
    %c0_i32_2 = arith.constant 0 : i32
    return %c0_i32, %c0_i32_0, %c0_i32_1 : i32, i32, i32
  }
  func.func @transform_2(%arg0: i32) -> (i32, i32) {
    %c0_i32 = arith.constant 0 : i32
    %c0_i32_0 = arith.constant 0 : i32
    %c0_i32_1 = arith.constant 0 : i32
    return %c0_i32, %c0_i32_0 : i32, i32
  }
  func.func @transform_3(%arg0: i32) -> (i32, i32, i32, i32) {
    %c0_i32 = arith.constant 0 : i32
    %c0_i32_0 = arith.constant 0 : i32
    %c0_i32_1 = arith.constant 0 : i32
    %c0_i32_2 = arith.constant 0 : i32
    return %arg0, %c0_i32, %c0_i32_0, %c0_i32_1 : i32, i32, i32, i32
  }
}

module attributes {stable_mosaic.version = 11 : i64} {
  func.func @_lin1_partial_kernel(%arg0: i32, %arg1: i32, %arg2: memref<2x2048xbf16, #tpu.memory_space<vmem>>, %arg3: memref<2048x128xbf16, #tpu.memory_space<vmem>>, %arg4: memref<1x2x128xf32, #tpu.memory_space<vmem>>, %arg5: memref<2x128xf32, #tpu.memory_space<vmem>>) attributes {dimension_semantics = [#tpu.dimension_semantics<parallel>, #tpu.dimension_semantics<arbitrary>], iteration_bounds = array<i64: 2, 1>, scalar_prefetch = 0 : i64, scratch_operands = 1 : i64, tpu.core_type = #tpu.core_type<tc>, window_params = [{transform_indices = @transform_0, window_bounds = array<i64: 2, 2048>}, {transform_indices = @transform_1, window_bounds = array<i64: 2048, 128>}, {transform_indices = @transform_2, window_bounds = array<i64: 1, 2, 128>}]} {
    %c0_i32 = arith.constant 0 : i32
    %0 = arith.cmpi eq, %arg1, %c0_i32 : i32
    %1 = arith.extui %0 : i1 to i32
    %c0_i32_0 = arith.constant 0 : i32
    %2 = arith.cmpi ne, %1, %c0_i32_0 : i32
    scf.if %2 {
      %cst_10 = arith.constant 0.000000e+00 : f32
      %12 = vector.broadcast %cst_10 : f32 to vector<2x128xf32>
      %c0_11 = arith.constant 0 : index
      %c0_12 = arith.constant 0 : index
      %13 = vector.load %arg5[%c0_11, %c0_12] : memref<2x128xf32, #tpu.memory_space<vmem>>, vector<2x128xf32>
      tpu.vector_store %arg5[%c0_11, %c0_12], %12 {strides = array<i32>} : memref<2x128xf32, #tpu.memory_space<vmem>>, vector<2x128xf32>,
    } else {
    }
    %c0 = arith.constant 0 : index
    %c0_1 = arith.constant 0 : index
    %3 = vector.load %arg5[%c0, %c0_1] : memref<2x128xf32, #tpu.memory_space<vmem>>, vector<2x128xf32>
    %c0_2 = arith.constant 0 : index
    %c0_3 = arith.constant 0 : index
    %4 = vector.load %arg2[%c0_2, %c0_3] : memref<2x2048xbf16, #tpu.memory_space<vmem>>, vector<2x2048xbf16>
    %c0_4 = arith.constant 0 : index
    %c0_5 = arith.constant 0 : index
    %5 = vector.load %arg3[%c0_4, %c0_5] : memref<2048x128xbf16, #tpu.memory_space<vmem>>, vector<2048x128xbf16>
    %cst = arith.constant dense<0.000000e+00> : vector<2x128xf32>
    %6 = tpu.matmul %4, %5, %cst {dimension_numbers = #tpu.dot_dimension_numbers<[1], [0], [0], [1], [0, 0, 1, 1], [], []>} : vector<2x2048xbf16>, vector<2048x128xbf16>, vector<2x128xf32> -> vector<2x128xf32>
    %7 = arith.addf %3, %6 : vector<2x128xf32>
    %c0_6 = arith.constant 0 : index
    %c0_7 = arith.constant 0 : index
    %8 = vector.load %arg5[%c0_6, %c0_7] : memref<2x128xf32, #tpu.memory_space<vmem>>, vector<2x128xf32>
    tpu.vector_store %arg5[%c0_6, %c0_7], %7 {strides = array<i32>} : memref<2x128xf32, #tpu.memory_space<vmem>>, vector<2x128xf32>,
    %c0_i32_8 = arith.constant 0 : i32
    %9 = arith.cmpi eq, %arg1, %c0_i32_8 : i32
    %10 = arith.extui %9 : i1 to i32
    %c0_i32_9 = arith.constant 0 : i32
    %11 = arith.cmpi ne, %10, %c0_i32_9 : i32
    scf.if %11 {
      %c0_10 = arith.constant 0 : index
      %c0_11 = arith.constant 0 : index
      %12 = vector.load %arg5[%c0_10, %c0_11] : memref<2x128xf32, #tpu.memory_space<vmem>>, vector<2x128xf32>
      %c0_12 = arith.constant 0 : index
      %c0_13 = arith.constant 0 : index
      %c0_14 = arith.constant 0 : index
      %13 = vector.load %arg4[%c0_12, %c0_13, %c0_14] : memref<1x2x128xf32, #tpu.memory_space<vmem>>, vector<1x2x128xf32>
      %14 = vector.shape_cast %13 : vector<1x2x128xf32> to vector<2x128xf32>
      %15 = vector.shape_cast %12 : vector<2x128xf32> to vector<1x2x128xf32>
      tpu.vector_store %arg4[%c0_12, %c0_13, %c0_14], %15 {strides = array<i32>} : memref<1x2x128xf32, #tpu.memory_space<vmem>>, vector<1x2x128xf32>,
    } else {
    }
    return
  }
  func.func @transform_0(%arg0: i32, %arg1: i32) -> (i32, i32) {
    %c1_i32 = arith.constant 1 : i32
    %0 = arith.muli %arg0, %c1_i32 : i32
    %1 = arith.addi %0, %arg1 : i32
    %c0_i32 = arith.constant 0 : i32
    %c0_i32_0 = arith.constant 0 : i32
    return %c0_i32, %1 : i32, i32
  }
  func.func @transform_1(%arg0: i32, %arg1: i32) -> (i32, i32) {
    %c1_i32 = arith.constant 1 : i32
    %0 = arith.muli %arg0, %c1_i32 : i32
    %1 = arith.addi %0, %arg1 : i32
    %c0_i32 = arith.constant 0 : i32
    %c0_i32_0 = arith.constant 0 : i32
    return %1, %c0_i32 : i32, i32
  }
  func.func @transform_2(%arg0: i32, %arg1: i32) -> (i32, i32, i32) {
    %c0_i32 = arith.constant 0 : i32
    %c0_i32_0 = arith.constant 0 : i32
    %c0_i32_1 = arith.constant 0 : i32
    return %arg0, %c0_i32, %c0_i32_0 : i32, i32, i32
  }
}

module attributes {stable_mosaic.version = 11 : i64} {
  func.func @_head_kernel(%arg0: memref<2x2x128xf32, #tpu.memory_space<vmem>>, %arg1: memref<1x128xf32, #tpu.memory_space<vmem>>, %arg2: memref<128x10xf32, #tpu.memory_space<vmem>>, %arg3: memref<1x10xf32, #tpu.memory_space<vmem>>, %arg4: memref<2x10xf32, #tpu.memory_space<vmem>>, %arg5: memref<2x10xf32, #tpu.memory_space<vmem>>) attributes {dimension_semantics = [], scalar_prefetch = 0 : i64, scratch_operands = 0 : i64, tpu.core_type = #tpu.core_type<tc>} {
    %c0 = arith.constant 0 : index
    %c0_0 = arith.constant 0 : index
    %c0_1 = arith.constant 0 : index
    %0 = vector.load %arg0[%c0, %c0_0, %c0_1] : memref<2x2x128xf32, #tpu.memory_space<vmem>>, vector<1x2x128xf32>
    %1 = vector.shape_cast %0 : vector<1x2x128xf32> to vector<2x128xf32>
    %c1 = arith.constant 1 : index
    %c0_2 = arith.constant 0 : index
    %c0_3 = arith.constant 0 : index
    %2 = vector.load %arg0[%c1, %c0_2, %c0_3] : memref<2x2x128xf32, #tpu.memory_space<vmem>>, vector<1x2x128xf32>
    %3 = vector.shape_cast %2 : vector<1x2x128xf32> to vector<2x128xf32>
    %4 = arith.addf %1, %3 : vector<2x128xf32>
    %c0_4 = arith.constant 0 : index
    %c0_5 = arith.constant 0 : index
    %5 = vector.load %arg1[%c0_4, %c0_5] : memref<1x128xf32, #tpu.memory_space<vmem>>, vector<1x128xf32>
    %6 = vector.broadcast %5 : vector<1x128xf32> to vector<2x128xf32>
    %7 = arith.addf %4, %6 : vector<2x128xf32>
    %cst = arith.constant 0.000000e+00 : f32
    %8 = vector.broadcast %cst : f32 to vector<2x128xf32>
    %9 = arith.maximumf %7, %8 : vector<2x128xf32>
    %c0_6 = arith.constant 0 : index
    %c0_7 = arith.constant 0 : index
    %10 = vector.load %arg2[%c0_6, %c0_7] : memref<128x10xf32, #tpu.memory_space<vmem>>, vector<128x10xf32>
    %cst_8 = arith.constant dense<0.000000e+00> : vector<2x10xf32>
    %11 = tpu.matmul %9, %10, %cst_8 {dimension_numbers = #tpu.dot_dimension_numbers<[1], [0], [0], [1], [0, 0, 1, 1], [], []>} : vector<2x128xf32>, vector<128x10xf32>, vector<2x10xf32> -> vector<2x10xf32>
    %c0_9 = arith.constant 0 : index
    %c0_10 = arith.constant 0 : index
    %12 = vector.load %arg3[%c0_9, %c0_10] : memref<1x10xf32, #tpu.memory_space<vmem>>, vector<1x10xf32>
    %13 = vector.broadcast %12 : vector<1x10xf32> to vector<2x10xf32>
    %14 = arith.addf %11, %13 : vector<2x10xf32>
    %c0_11 = arith.constant 0 : index
    %c0_12 = arith.constant 0 : index
    %15 = vector.load %arg4[%c0_11, %c0_12] : memref<2x10xf32, #tpu.memory_space<vmem>>, vector<2x10xf32>
    tpu.vector_store %arg4[%c0_11, %c0_12], %14 {strides = array<i32>} : memref<2x10xf32, #tpu.memory_space<vmem>>, vector<2x10xf32>,
    %cst_13 = arith.constant dense<0xFF800000> : vector<2xf32>
    %16 = vector.multi_reduction <maximumf>, %14, %cst_13 [1] : vector<2x10xf32> to vector<2xf32>
    %17 = vector.shape_cast %16 : vector<2xf32> to vector<2x1xf32>
    %18 = vector.broadcast %17 : vector<2x1xf32> to vector<2x10xf32>
    %19 = arith.subf %14, %18 : vector<2x10xf32>
    %20 = math.exp %19 : vector<2x10xf32>
    %cst_14 = arith.constant dense<0.000000e+00> : vector<2xf32>
    %21 = vector.multi_reduction <add>, %20, %cst_14 [1] : vector<2x10xf32> to vector<2xf32>
    %22 = vector.shape_cast %21 : vector<2xf32> to vector<2x1xf32>
    %23 = vector.broadcast %22 : vector<2x1xf32> to vector<2x10xf32>
    %24 = arith.divf %20, %23 : vector<2x10xf32>
    %c0_15 = arith.constant 0 : index
    %c0_16 = arith.constant 0 : index
    %25 = vector.load %arg5[%c0_15, %c0_16] : memref<2x10xf32, #tpu.memory_space<vmem>>, vector<2x10xf32>
    tpu.vector_store %arg5[%c0_15, %c0_16], %24 {strides = array<i32>} : memref<2x10xf32, #tpu.memory_space<vmem>>, vector<2x10xf32>,
    return
  }
}

</mosaic_0001>

<bundles_post_ra>
// kernel: model_forward.9
= control target key start
LH: loop header
LB: loop body
LE: loop exit
PB: predicated region body
PF: predicated region fallthrough
CT: control target
= control target key end

     0   :  { %s1339_s12 = smov 0   ;;  %s1619_s0 = inlined_call_operand.vmem [shape: bf16[2,8,8,32], index: 0, kind: input, shape index: {}]   ;;  %s1620_s1 = inlined_call_operand.vmem [shape: bf16[3,96,64], index: 1, kind: input, shape index: {}]   ;;  %s1621_s2 = inlined_call_operand.vmem [shape: f32[1,64], index: 2, kind: input, shape index: {}]   ;;  %s1622_s3 = inlined_call_operand.vmem [shape: bf16[2,8,8,64], index: 3, kind: output, shape index: {}]  }
   0x1 LB: > { %s1080_s13 = sadd.s32 4294967295, %s1314_s12   ;;  %p1084_p0 = scmp.ge.s32.totalorder %s1314_s12, 1  ;;  %s1314_s12 = sphi %s1339_s12, %s13_s12  }
   0x2   : > { %p137_p1 = scmp.lt.s32.totalorder %s1314_s12, 3 }
   0x4   : > { %p138_p2 = pnand %p1084_p0, %p137_p1 }
   0x5   : > { %p161_p3 = scmp.lt.s32.totalorder (!%p138_p2), %s1080_s13, 1  ;;  %s1317_s30 = smov (!%p138_p2), 64  }
   0x6   : > { %141 = sbr.rel (%p138_p2) target bundleno = 409 (0x199), region = 32  ;;  %s1318_s8 = smov (!%p138_p2), 32  }
   0xb   : > { %vm172_vm0 = vcmask 257024   ;;  %vm174_vm1 = vcmask 253952   ;;  %v1290_v0 = vld [vmem:[%s1620_s1 + $0x58] sm:$0xff]   ;;  %v1316_v1 = vmov 0   ;;  %vm284_vm2 = vsmask.f32 7938 }
   0xc   : > { %173 = vst.msk [vmem:[#allocation2] sm:$0xf] %vm172_vm0, %v1316_v1  ;;  %176 = vst.msk [vmem:[#allocation2 + $0x8] sm:$0xf] %vm172_vm0, %v1316_v1  ;;  %v1291_v2 = vld [vmem:[%s1620_s1 + $0x28] sm:$0xff]   ;;  %1197 = vmatprep.subr.bf16.mxu0 %v1290_v0  ;;  %s1628_s13 = smov (!%p161_p3, %s1080_s13), 1 }
   0xd   : > { %175 = vst.msk [vmem:[#allocation2 + $0x4] sm:$0x1] %vm174_vm1, %v1316_v1  ;;  %177 = vst.msk [vmem:[#allocation2 + $0xc] sm:$0x1] %vm174_vm1, %v1316_v1  ;;  %vm290_vm3 = vsmask.f32 256  ;;  %1217 = vmatprep.subr.bf16.mxu1 %v1291_v2  ;;  %1198 = vmatpush3.bf16.msra.mxu0 %v1290_v0 }
   0xe   : > { %178 = vst.msk [vmem:[#allocation2 + $0x10] sm:$0xf] %vm172_vm0, %v1316_v1  ;;  %180 = vst.msk [vmem:[#allocation2 + $0x18] sm:$0xf] %vm172_vm0, %v1316_v1  ;;  %1218 = vmatpush3.bf16.msra.mxu1 %v1291_v2  ;;  %v1292_v3 = vld [vmem:[%s1620_s1 + $0x50] sm:$0xff]   ;;  %s1165_s20 = sshll.u32 %s1628_s13, 5 }
   0xf   : > { %179 = vst.msk [vmem:[#allocation2 + $0x14] sm:$0x1] %vm174_vm1, %v1316_v1  ;;  %181 = vst.msk [vmem:[#allocation2 + $0x1c] sm:$0x1] %vm174_vm1, %v1316_v1  ;;  %v1293_v4 = vld [vmem:[%s1620_s1 + $0x20] sm:$0xff]   ;;  %s1391_s25 = scalar_lea.vmem %s1619_s0, %s1165_s20  ;;  %1199 = vmatprep.subr.bf16.mxu0 %v1292_v3  ;;  %v1294_v5 = vld [vmem:[%s1620_s1 + $0x48] sm:$0xff]   ;;  %s1598_s9 = scalar_lea.vmem %s1622_s3, %s1165_s20 }
  0x10   : > { %182 = vst.msk [vmem:[#allocation2 + $0x20] sm:$0xf] %vm172_vm0, %v1316_v1  ;;  %184 = vst.msk [vmem:[#allocation2 + $0x28] sm:$0xf] %vm172_vm0, %v1316_v1  ;;  %v195_v6 = vld [vmem:[%s1391_s25 + $0x4] sm:$0xf]  ;;  %1219 = vmatprep.subr.bf16.mxu1 %v1293_v4 }
  0x11   : > { %183 = vst.msk [vmem:[#allocation2 + $0x24] sm:$0x1] %vm174_vm1, %v1316_v1  ;;  %185 = vst.msk [vmem:[#allocation2 + $0x2c] sm:$0x1] %vm174_vm1, %v1316_v1  ;;  %v194_v7 = vld [vmem:[%s1391_s25] sm:$0xf]  ;;  %1200 = vmatpush3.bf16.msra.mxu0 %v1292_v3 }
  0x12   : > { %186 = vst.msk [vmem:[#allocation2 + $0x30] sm:$0xf] %vm172_vm0, %v1316_v1  ;;  %188 = vst.msk [vmem:[#allocation2 + $0x38] sm:$0xf] %vm172_vm0, %v1316_v1  ;;  %v197_v8 = vld [vmem:[%s1391_s25 + $0xc] sm:$0xf]  ;;  %1220 = vmatpush3.bf16.msra.mxu1 %v1293_v4  ;;  %1201 = vmatprep.subr.bf16.mxu0 %v1294_v5 }
  0x13   : > { %187 = vst.msk [vmem:[#allocation2 + $0x34] sm:$0x1] %vm174_vm1, %v1316_v1  ;;  %189 = vst.msk [vmem:[#allocation2 + $0x3c] sm:$0x1] %vm174_vm1, %v1316_v1  ;;  %v1399_v9 = vld [vmem:[#allocation2] sm:$0xf] }
  0x14   : > { %190 = vst.msk [vmem:[#allocation2 + $0x40] sm:$0xf] %vm172_vm0, %v1316_v1  ;;  %192 = vst.msk [vmem:[#allocation2 + $0x48] sm:$0xf] %vm172_vm0, %v1316_v1  ;;  %v338_v10 = vld [vmem:[#allocation2 + $0x4] sm:$0x1] }
  0x15   : > { %191 = vst.msk [vmem:[#allocation2 + $0x44] sm:$0x1] %vm174_vm1, %v1316_v1  ;;  %193 = vst.msk [vmem:[#allocation2 + $0x4c] sm:$0x1] %vm174_vm1, %v1316_v1  ;;  %v211_v11 = vshrl.u32 %v195_v6, 16  ;;  %v214_v12 = vshll.u32 %v195_v6, 16  ;;  %v1089_v13 = vcombine.low %v1399_v9, %v338_v10  ;;  %1202 = vmatpush3.bf16.msra.mxu0 %v1294_v5 }
  0x16   : > { %v295_v14 = vld [vmem:[#allocation2 + $0x10] sm:$0xf]  ;;  %v203_v15 = vshrl.u32 %v194_v7, 16  ;;  %v206_v16 = vshll.u32 %v194_v7, 16  ;;  %vm1404_vm4 = vmand %vm172_vm0, %vm284_vm2  ;;  %v298_v19 = vld [vmem:[#allocation2 + $0x14] sm:$0x1] }
  0x17   : > { %v213_v17 = vrot.slane %v211_v11, 7  ;;  %v286_v20 = vld [vmem:[#allocation2 + $0x8] sm:$0xf]  ;;  %v227_v21 = vshrl.u32 %v197_v8, 16  ;;  %v398_v22 = vshrl.u32 %v1089_v13, 16  ;;  %v400_v23 = vshll.u32 %v1089_v13, 16  ;;  %vm1410_vm5 = vmand %vm174_vm1, %vm290_vm3 }
  0x18   : > { %v469_v24 = vrot.slane %v1089_v13, 1  ;;  %v205_v26 = vrot.slane %v203_v15, 7  ;;  %v292_v27 = vld [vmem:[#allocation2 + $0xc] sm:$0x1]  ;;  %v230_v31 = vshll.u32 %v197_v8, 16  ;;  %v1295_v33 = vld [vmem:[%s1620_s1 + $0x18] sm:$0xff]  }
  0x19   : > { %v216_v28 = vor.u32 %v214_v12, %v213_v17  ;;  %v217_v29 = vrot.slane %v213_v17, 4  ;;  %v229_v30 = vrot.slane %v227_v21, 7  ;;  %v307_v32 = vld [vmem:[#allocation2 + $0x20] sm:$0xf]  ;;  %v402_v34 = vrot.slane %v400_v23, 1  ;;  %1221 = vmatprep.subr.bf16.mxu1 %v1295_v33  ;;  %v1297_v49 = vld [vmem:[%s1620_s1 + $0x10] sm:$0xff]  }
  0x1a   : > { %477 = vrot.lane.b32.xlu1 %v469_v24, %s1317_s30  ;;  %v208_v35 = vor.u32 %v206_v16, %v205_v26  ;;  %v209_v36 = vrot.slane %v205_v26, 4  ;;  %v310_v37 = vld [vmem:[#allocation2 + $0x24] sm:$0x1]  ;;  %v196_v38 = vld [vmem:[%s1391_s25 + $0x8] sm:$0xf]  ;;  %1222 = vmatpush3.bf16.msra.mxu1 %v1295_v33  ;;  %v1298_v17 = vld [vmem:[%s1620_s1 + $0x38] sm:$0xff]  }
  0x1b   : > { %v296_v39 = vsel %vm1404_vm4, %v216_v28, %v295_v14  ;;  %v299_v40 = vsel %vm1410_vm5, %v217_v29, %v298_v19  ;;  %v232_v41 = vor.u32 %v230_v31, %v229_v30  ;;  %v233_v42 = vrot.slane %v229_v30, 4  ;;  %v198_v43 = vld [vmem:[%s1391_s25 + $0x10] sm:$0xf]  ;;  %v1296_v44 = vld [vmem:[%s1620_s1 + $0x40] sm:$0xff]   ;;  %v301_v53 = vld [vmem:[#allocation2 + $0x18] sm:$0xf]  ;;  %1223 = vmatprep.subr.bf16.mxu1 %v1297_v49 }
  0x1c   : > { %v403_v45 = vor.u32 %v402_v34, %v398_v22  ;;  %297 = vst [vmem:[#allocation2 + $0x10] sm:$0xf] %v296_v39  ;;  %300 = vst [vmem:[#allocation2 + $0x14] sm:$0x1] %v299_v40  ;;  %v287_v46 = vsel %vm1404_vm4, %v208_v35, %v286_v20  ;;  %v293_v47 = vsel %vm1410_vm5, %v209_v36, %v292_v27  ;;  %v219_v48 = vshrl.u32 %v196_v38, 16  ;;  %v1299_v33 = vld [vmem:[%s1620_s1 + $0x8] sm:$0xff]  }
  0x1d   : > { %288 = vst [vmem:[#allocation2 + $0x8] sm:$0xf] %v287_v46  ;;  %294 = vst [vmem:[#allocation2 + $0xc] sm:$0x1] %v293_v47  ;;  %v308_v50 = vsel %vm1404_vm4, %v232_v41, %v307_v32  ;;  %v311_v51 = vsel %vm1410_vm5, %v233_v42, %v310_v37  ;;  %v222_v52 = vshll.u32 %v196_v38, 16  ;;  %v235_v55 = vshrl.u32 %v198_v43, 16  ;;  %1203 = vmatprep.subr.bf16.mxu0 %v1296_v44 }
  0x1e   : > { %v304_v54 = vld [vmem:[#allocation2 + $0x1c] sm:$0x1]  ;;  %v199_v56 = vld [vmem:[%s1391_s25 + $0x14] sm:$0xf]  ;;  %453 = vrot.lane.b32.xlu0 %v403_v45, %s1318_s8  ;;  %309 = vst [vmem:[#allocation2 + $0x20] sm:$0xf] %v308_v50  ;;  %1204 = vmatpush3.bf16.msra.mxu0 %v1296_v44 }
  0x1f   : > { %312 = vst [vmem:[#allocation2 + $0x24] sm:$0x1] %v311_v51  ;;  %v221_v57 = vrot.slane %v219_v48, 7  ;;  %v238_v58 = vshll.u32 %v198_v43, 16  ;;  %v313_v59 = vld [vmem:[#allocation2 + $0x28] sm:$0xf]  ;;  %1224 = vmatpush3.bf16.msra.mxu1 %v1297_v49  ;;  %1205 = vmatprep.subr.bf16.mxu0 %v1298_v17 }
  0x20   : > { %v243_v60 = vshrl.u32 %v199_v56, 16  ;;  %v246_v61 = vshll.u32 %v199_v56, 16  ;;  %v237_v62 = vrot.slane %v235_v55, 7  ;;  %v316_v63 = vld [vmem:[#allocation2 + $0x2c] sm:$0x1]  ;;  %1225 = vmatprep.subr.bf16.mxu1 %v1299_v33  ;;  %v1300_v45 = vld [vmem:[%s1620_s1 + $0x30] sm:$0xff]  }
  0x21   : > { %v201_v0 = vld [vmem:[%s1391_s25 + $0x1c] sm:$0xf]  ;;  %v224_v1 = vor.u32 %v222_v52, %v221_v57  ;;  %v225_v2 = vrot.slane %v221_v57, 4  ;;  %v319_v4 = vld [vmem:[#allocation2 + $0x30] sm:$0xf]  ;;  %v1301_v49 = vld [vmem:[%s1620_s1] sm:$0xff]  }
  0x22   : > { %v245_v3 = vrot.slane %v243_v60, 7  ;;  %v259_v5 = vshrl.u32 %v201_v0, 16  ;;  %v240_v6 = vor.u32 %v238_v58, %v237_v62  ;;  %v241_v7 = vrot.slane %v237_v62, 4  ;;  %v322_v8 = vld [vmem:[#allocation2 + $0x34] sm:$0x1]  ;;  %1206 = vmatpush3.bf16.msra.mxu0 %v1298_v17  ;;  %v1502_v25 = vld [vmem:[%s1620_s1 + $0x88] sm:$0xff]  }
  0x23   : > { %v262_v10 = vshll.u32 %v201_v0, 16  ;;  %v200_v11 = vld [vmem:[%s1391_s25 + $0x18] sm:$0xf]  ;;  %v302_v12 = vsel %vm1404_vm4, %v224_v1, %v301_v53  ;;  %v305_v13 = vsel %vm1410_vm5, %v225_v2, %v304_v54  ;;  %v331_v16 = vld [vmem:[#allocation2 + $0x40] sm:$0xf]  ;;  %1226 = vmatpush3.bf16.msra.mxu1 %v1299_v33  ;;  %1207 = vmatprep.subr.bf16.mxu0 %v1300_v45  ;;  %vm493_vm6 = vcmask 261120  }
  0x24   : > { %v248_v14 = vor.u32 %v246_v61, %v245_v3  ;;  %v249_v15 = vrot.slane %v245_v3, 4  ;;  %v1449_v19 = vld [vmem:[#allocation2 + $0x10] sm:$0xf]  ;;  %v342_v20 = vld [vmem:[#allocation2 + $0x14] sm:$0x1]  ;;  %v314_v21 = vsel %vm1404_vm4, %v240_v6, %v313_v59  ;;  %v317_v22 = vsel %vm1410_vm5, %v241_v7, %v316_v63  ;;  %1227 = vmatprep.subr.bf16.mxu1 %v1301_v49 }
  0x25   : > { %303 = vst [vmem:[#allocation2 + $0x18] sm:$0xf] %v302_v12  ;;  %306 = vst [vmem:[#allocation2 + $0x1c] sm:$0x1] %v305_v13  ;;  %v261_v23 = vrot.slane %v259_v5, 7  ;;  %v251_v24 = vshrl.u32 %v200_v11, 16  ;;  %v1091_v26 = vcombine.low %v1449_v19, %v342_v20 }
  0x26   : > { %v1456_v27 = vld [vmem:[#allocation2 + $0x8] sm:$0xf]  ;;  %v340_v28 = vld [vmem:[#allocation2 + $0xc] sm:$0x1]  ;;  %315 = vst [vmem:[#allocation2 + $0x28] sm:$0xf] %v314_v21  ;;  %v320_v29 = vsel %vm1404_vm4, %v248_v14, %v319_v4  ;;  %v323_v30 = vsel %vm1410_vm5, %v249_v15, %v322_v8  ;;  %1208 = vmatpush3.bf16.msra.mxu0 %v1300_v45 }
  0x27   : > { %318 = vst [vmem:[#allocation2 + $0x2c] sm:$0x1] %v317_v22  ;;  %v334_v31 = vld [vmem:[#allocation2 + $0x44] sm:$0x1]  ;;  %v254_v32 = vshll.u32 %v200_v11, 16  ;;  %v1090_v34 = vcombine.low %v1456_v27, %v340_v28  ;;  %v264_v37 = vor.u32 %v262_v10, %v261_v23  ;;  %v265_v38 = vrot.slane %v261_v23, 4  ;;  %1228 = vmatpush3.bf16.msra.mxu1 %v1301_v49  ;;  %1237 = vmatprep.subr.bf16.mxu0 %v1502_v25 }
  0x28   : > { %v1466_v35 = vld [vmem:[#allocation2 + $0x20] sm:$0xf]  ;;  %v346_v36 = vld [vmem:[#allocation2 + $0x24] sm:$0x1]  ;;  %321 = vst [vmem:[#allocation2 + $0x30] sm:$0xf] %v320_v29  ;;  %1257 = vmatprep.subr.bf16.mxu1 %v1502_v25 }
  0x29   : > { %324 = vst [vmem:[#allocation2 + $0x34] sm:$0x1] %v323_v30  ;;  %v253_v39 = vrot.slane %v251_v24, 7  ;;  %v471_v40 = vrot.slane %v1091_v26, 1  ;;  %v1469_v41 = vcombine.low %v1466_v35, %v346_v36  ;;  %v414_v42 = vshll.u32 %v1091_v26, 16 }
  0x2a   : > { %v325_v43 = vld [vmem:[#allocation2 + $0x38] sm:$0xf]  ;;  %v328_v44 = vld [vmem:[#allocation2 + $0x3c] sm:$0x1]  ;;  %v470_v46 = vrot.slane %v1090_v34, 1  ;;  %v407_v47 = vshll.u32 %v1090_v34, 16  ;;  %v332_v48 = vsel %vm1404_vm4, %v264_v37, %v331_v16  ;;  %v335_v54 = vsel %vm1410_vm5, %v265_v38, %v334_v31 }
  0x2b   : > { %481 = vrot.lane.b32.xlu1 %v471_v40, %s1317_s30  ;;  %v473_v50 = vrot.slane %v1469_v41, 1  ;;  %v412_v51 = vshrl.u32 %v1091_v26, 16  ;;  %v416_v52 = vrot.slane %v414_v42, 1  ;;  %333 = vst [vmem:[#allocation2 + $0x40] sm:$0xf] %v332_v48  ;;  %v405_v53 = vshrl.u32 %v1090_v34, 16 }
  0x2c   : > { %479 = vrot.lane.b32.xlu0 %v470_v46, %s1317_s30  ;;  %v256_v55 = vor.u32 %v254_v32, %v253_v39  ;;  %v257_v56 = vrot.slane %v253_v39, 4  ;;  %v1484_v57 = vld [vmem:[#allocation2 + $0x18] sm:$0xf]  ;;  %v344_v58 = vld [vmem:[#allocation2 + $0x1c] sm:$0x1]  ;;  %v409_v59 = vrot.slane %v407_v47, 1 }
  0x2d   : > { %v428_v60 = vshll.u32 %v1469_v41, 16  ;;  %336 = vst [vmem:[#allocation2 + $0x44] sm:$0x1] %v335_v54  ;;  %v1092_v61 = vcombine.low %v1484_v57, %v344_v58  ;;  %v1488_v62 = vld [vmem:[#allocation2 + $0x28] sm:$0xf]  ;;  %v417_v2 = vor.u32 %v416_v52, %v412_v51  ;;  %v426_v12 = vshrl.u32 %v1469_v41, 16 }
  0x2e   : > { %v348_v63 = vld [vmem:[#allocation2 + $0x2c] sm:$0x1]  ;;  %v326_v0 = vsel %vm1404_vm4, %v256_v55, %v325_v43  ;;  %v329_v1 = vsel %vm1410_vm5, %v257_v56, %v328_v44  ;;  %v410_v10 = vor.u32 %v409_v59, %v405_v53  ;;  %v1517_v37 = vld [vmem:[#allocation2 + $0x48] sm:$0xf]  ;;  %vm518_vm7 = vcmask 523264  }
  0x2f   : > { %485 = vrot.lane.b32.xlu1 %v473_v50, %s1317_s30  ;;  %v1094_v3 = vcombine.low %v1488_v62, %v348_v63  ;;  %v1496_v4 = vld [vmem:[#allocation2 + $0x30] sm:$0xf]  ;;  %327 = vst [vmem:[#allocation2 + $0x38] sm:$0xf] %v326_v0  ;;  %330 = vst [vmem:[#allocation2 + $0x3c] sm:$0x1] %v329_v1 }
  0x30   : > { %v350_v5 = vld [vmem:[#allocation2 + $0x34] sm:$0x1]  ;;  %v472_v6 = vrot.slane %v1092_v61, 1  ;;  %v419_v7 = vshrl.u32 %v1092_v61, 16  ;;  %v421_v8 = vshll.u32 %v1092_v61, 16  ;;  %v430_v13 = vrot.slane %v428_v60, 1 }
  0x31   : > { %v1095_v18 = vcombine.low %v1496_v4, %v350_v5  ;;  %v474_v17 = vrot.slane %v1094_v3, 1  ;;  %v435_v20 = vshll.u32 %v1094_v3, 16  ;;  %v433_v33 = vshrl.u32 %v1094_v3, 16  ;;  %v356_v38 = vld [vmem:[#allocation2 + $0x4c] sm:$0x1] }
  0x32   : > { %483 = vrot.lane.b32.xlu0 %v472_v6, %s1317_s30  ;;  %v423_v11 = vrot.slane %v421_v8, 1  ;;  %v1506_v14 = vld [vmem:[#allocation2 + $0x40] sm:$0xf]  ;;  %v431_v23 = vor.u32 %v430_v13, %v426_v12  ;;  %v1138_v45 = vcombine.low %v1517_v37, %v356_v38  ;;  %vm638_vm8 = vcmask 785408  }
  0x33   : > { %457 = vrot.lane.b32.xlu1 %v417_v2, %s1318_s8  ;;  %v442_v15 = vshll.u32 %v1095_v18, 16  ;;  %v440_v28 = vshrl.u32 %v1095_v18, 16  ;;  %v475_v32 = vrot.slane %v1095_v18, 1  ;;  %v437_v34 = vrot.slane %v435_v20, 1  ;;  %v1303_v13 = vld [vmem:[%s1620_s1 + $0x80] sm:$0xff]   ;;  %v1304_v20 = vld [vmem:[%s1620_s1 + $0x78] sm:$0xff]  }
  0x34   : > { %v424_v16 = vor.u32 %v423_v11, %v419_v7  ;;  %v354_v21 = vld [vmem:[#allocation2 + $0x44] sm:$0x1]  ;;  %v843_v48 = vshll.u32 %v1138_v45, 16  ;;  %v841_v51 = vshrl.u32 %v1138_v45, 16  ;;  %v849_v53 = vrot.slane %v1138_v45, 1 }
  0x35   : > { %v1097_v22 = vcombine.low %v1506_v14, %v354_v21  ;;  %v444_v29 = vrot.slane %v442_v15, 1  ;;  %v438_v42 = vor.u32 %v437_v34, %v433_v33  ;;  %vm1016_vm9 = vcmask 519168  }
  0x36   : > { %455 = vrot.lane.b32.xlu0 %v410_v10, %s1318_s8  ;;  %v1513_v24 = vld [vmem:[#allocation2 + $0x38] sm:$0xf]  ;;  %v352_v26 = vld [vmem:[#allocation2 + $0x3c] sm:$0x1]  ;;  %v845_v52 = vrot.slane %v843_v48, 1 }
  0x37   : > { %459 = vrot.lane.b32.xlu1 %v424_v16, %s1318_s8  ;;  %v555_v30 = vshll.u32 %v1097_v22, 16  ;;  %v1096_v31 = vcombine.low %v1513_v24, %v352_v26  ;;  %v445_v39 = vor.u32 %v444_v29, %v440_v28  ;;  %v553_v40 = vshrl.u32 %v1097_v22, 16  ;;  %v1305_v26 = vld [vmem:[%s1620_s1 + $0x70] sm:$0xff]  }
  0x38   : > { %v561_v49 = vrot.slane %v1097_v22, 1  ;;  %v846_v54 = vor.u32 %v845_v52, %v841_v51 }
  0x39   : > { %v449_v36 = vshll.u32 %v1096_v31, 16  ;;  %v557_v41 = vrot.slane %v555_v30, 1  ;;  %v447_v43 = vshrl.u32 %v1096_v31, 16  ;;  %v476_v50 = vrot.slane %v1096_v31, 1 }
  0x3a   : > { %461 = vrot.lane.b32.xlu0 %v431_v23, %s1318_s8 }
  0x3b   : > { %487 = vrot.lane.b32.xlu1 %v474_v17, %s1317_s30  ;;  %v451_v44 = vrot.slane %v449_v36, 1  ;;  %v558_v46 = vor.u32 %v557_v41, %v553_v40 }
  0x3d   : > { %v452_v47 = vor.u32 %v451_v44, %v447_v43 }
  0x3e   : > { %489 = vrot.lane.b32.xlu0 %v475_v32, %s1317_s30  ;;  %v1306_v32 = vld [vmem:[%s1620_s1 + $0x68] sm:$0xff]  }
  0x3f   : > { %465 = vrot.lane.b32.xlu1 %v445_v39, %s1318_s8 }
  0x42   : > { %463 = vrot.lane.b32.xlu0 %v438_v42, %s1318_s8  ;;  %v1307_v42 = vld [vmem:[%s1620_s1 + $0x60] sm:$0xff]  }
  0x43   : > { %559 = vrot.lane.b32.xlu1 %v558_v46, %s1318_s8 }
  0x46   : > { %467 = vrot.lane.b32.xlu0 %v452_v47, %s1318_s8 }
  0x47   : > { %562 = vrot.lane.b32.xlu1 %v561_v49, %s1317_s30 }
  0x4a   : > { %491 = vrot.lane.b32.xlu0 %v476_v50, %s1317_s30 }
  0x4b   : > { %850 = vrot.lane.b32.xlu1 %v849_v53, %s1317_s30 }
  0x4e   : > { %847 = vrot.lane.b32.xlu0 %v846_v54, %s1318_s8 }
  0x8c   : > { %v478_v55 = vpop.permute.xlu1 %477 }
  0x90   : > { %v454_v56 = vpop.permute.xlu0 %453 }
  0x91   : > { %v496_v1 = vsel %vm493_vm6, %v1399_v9, %v454_v56 }
  0x92   : > { %v520_v7 = vsel %vm518_vm7, %v496_v1, %v478_v55  ;;  %v1162_v1 = vld [vmem:[%s1621_s2] ss:$0 sm:$0xff] }
  0x9d   : > { %v482_v58 = vpop.permute.xlu1 %481 }
  0x9e   : > { %v480_v59 = vpop.permute.xlu0 %479 }
  0xa1   : > { %v486_v60 = vpop.permute.xlu1 %485 }
  0xa4   : > { %v484_v61 = vpop.permute.xlu0 %483 }
  0xa5   : > { %v458_v63 = vpop.permute.xlu1 %457 }
  0xa6   : > { %v502_v0 = vsel %vm493_vm6, %v1449_v19, %v458_v63 }
  0xa7   : > { %v524_v3 = vsel %vm518_vm7, %v502_v0, %v482_v58 }
  0xa8   : > { %v456_v2 = vpop.permute.xlu0 %455 }
  0xa9   : > { %v499_v5 = vsel %vm493_vm6, %v1456_v27, %v456_v2  ;;  %v460_v6 = vpop.permute.xlu1 %459 }
  0xaa   : > { %v505_v8 = vsel %vm493_vm6, %v1484_v57, %v460_v6  ;;  %v522_v18 = vsel %vm518_vm7, %v499_v5, %v480_v59 }
  0xab   : > { %v526_v19 = vsel %vm518_vm7, %v505_v8, %v484_v61  ;;  %v1110_v10 = vcombine.low %v522_v18, %v524_v3  ;;  %v1124_v9 = vcombine.low %v520_v7, %v522_v18 }
  0xac   : > { %v462_v11 = vpop.permute.xlu0 %461  ;;  %v1125_v12 = vcombine.low %v524_v3, %v526_v19 }
  0xad   : > { %v508_v27 = vsel %vm493_vm6, %v1466_v35, %v462_v11  ;;  %1209 = vmatprep.mubr.msk.bf16.mxu0 %vm638_vm8, %v1110_v10  ;;  %1229 = vmatprep.mubr.msk.bf16.mxu1 %vm638_vm8, %v1124_v9  ;;  %v488_v57 = vpop.permute.xlu1 %487 }
  0xae   : > { %v528_v15 = vsel %vm518_vm7, %v508_v27, %v486_v60  ;;  %1230 = vmatmul.mubr.msk.bf16.vlgmr.msra.gmra.mxu1 %vm638_vm8, %v1125_v12 }
  0xaf   : > { %v1111_v16 = vcombine.low %v526_v19, %v528_v15  ;;  %1263 = vmatpush3.bf16.msra.mxu1 %v1502_v25 }
  0xb0   : > { %v490_v17 = vpop.permute.xlu0 %489  ;;  %1258 = vmatprep.subr.bf16.mxu1 %v1303_v13 }
  0xb1   : > { %1210 = vmatmul.mubr.msk.bf16.vlgmr.msra.gmra.mxu0 %vm638_vm8, %v1111_v16  ;;  %v466_v35 = vpop.permute.xlu1 %465 }
  0xb2   : > { %1238 = vmatpush3.bf16.msra.mxu0 %v1502_v25  ;;  %v514_v21 = vsel %vm493_vm6, %v1496_v4, %v466_v35 }
  0xb3   : > { %1239 = vmatprep.subr.bf16.mxu0 %v1303_v13  ;;  %1264 = vmatpush3.bf16.msra.mxu1 %v1303_v13  ;;  %v532_v22 = vsel %vm518_vm7, %v514_v21, %v490_v17 }
  0xb4   : > { %v464_v23 = vpop.permute.xlu0 %463  ;;  %1259 = vmatprep.subr.bf16.mxu1 %v1304_v20 }
  0xb5   : > { %v511_v28 = vsel %vm493_vm6, %v1488_v62, %v464_v23  ;;  %v560_v29 = vpop.permute.xlu1 %559 }
  0xb6   : > { %v530_v30 = vsel %vm518_vm7, %v511_v28, %v488_v57  ;;  %1240 = vmatpush3.bf16.msra.mxu0 %v1303_v13  ;;  %v566_v62 = vsel %vm493_vm6, %v1506_v14, %v560_v29 }
  0xb7   : > { %v1112_v25 = vcombine.low %v530_v30, %v532_v22  ;;  %v1126_v31 = vcombine.low %v528_v15, %v530_v30  ;;  %1241 = vmatprep.subr.bf16.mxu0 %v1304_v20  ;;  %1265 = vmatpush3.bf16.msra.mxu1 %v1304_v20 }
  0xb8   : > { %v468_v4 = vpop.permute.xlu0 %467  ;;  %1260 = vmatprep.subr.bf16.mxu1 %v1305_v26 }
  0xb9   : > { %1213 = vmatprep.mubr.msk.bf16.mxu0 %vm638_vm8, %v1112_v25  ;;  %1233 = vmatprep.mubr.msk.bf16.mxu1 %vm638_vm8, %v1126_v31  ;;  %v563_v33 = vpop.permute.xlu1 %562  ;;  %v517_v36 = vsel %vm493_vm6, %v1513_v24, %v468_v4 }
  0xba   : > { %1242 = vmatpush3.bf16.msra.mxu0 %v1304_v20  ;;  %v568_v34 = vsel %vm518_vm7, %v566_v62, %v563_v33 }
  0xbb   : > { %1243 = vmatprep.subr.bf16.mxu0 %v1305_v26  ;;  %1266 = vmatpush3.bf16.msra.mxu1 %v1305_v26 }
  0xbc   : > { %v492_v38 = vpop.permute.xlu0 %491  ;;  %1261 = vmatprep.subr.bf16.mxu1 %v1306_v32 }
  0xbd   : > { %v534_v39 = vsel %vm518_vm7, %v517_v36, %v492_v38  ;;  %v851_v43 = vpop.permute.xlu1 %850 }
  0xbe   : > { %v1113_v40 = vcombine.low %v534_v39, %v568_v34  ;;  %v1127_v41 = vcombine.low %v532_v22, %v534_v39  ;;  %1244 = vmatpush3.bf16.msra.mxu0 %v1305_v26 }
  0xbf   : > { %1245 = vmatprep.subr.bf16.mxu0 %v1306_v32  ;;  %1267 = vmatpush3.bf16.msra.mxu1 %v1306_v32 }
  0xc0   : > { %1214 = vmatmul.mubr.msk.bf16.gmra.mxu0 %vm638_vm8, %v1113_v40  ;;  %1234 = vmatmul.mubr.msk.bf16.gmra.mxu1 %vm638_vm8, %v1127_v41  ;;  %v848_v14 = vpop.permute.xlu0 %847 }
  0xc1   : > { %v854_v24 = vsel %vm493_vm6, %v1517_v37, %v848_v14  ;;  %1249 = vmatprep.mubr.msk.bf16.mxu0 %vm638_vm8, %v1125_v12  ;;  %1253 = vmatprep.mubr.msk.bf16.mxu1 %vm638_vm8, %v1127_v41 }
  0xc2   : > { %1246 = vmatpush3.bf16.msra.mxu0 %v1306_v32  ;;  %1262 = vmatprep.subr.bf16.mxu1 %v1307_v42  ;;  %v856_v44 = vsel %vm518_vm7, %v854_v24, %v851_v43 }
  0xc3   : > { %1247 = vmatprep.subr.bf16.mxu0 %v1307_v42  ;;  %1268 = vmatpush3.bf16.msra.mxu1 %v1307_v42  ;;  %v1151_v45 = vcombine.low %v568_v34, %v856_v44 }
  0xc6   : > { %1248 = vmatpush3.bf16.msra.mxu0 %v1307_v42 }
  0xc8   : > { %1254 = vmatmul.mubr.msk.bf16.vlgmr.msra.gmra.mxu1 %vm638_vm8, %v1151_v45 }
  0xc9   : > { %1250 = vmatmul.mubr.msk.bf16.vlgmr.msra.gmra.mxu0 %vm638_vm8, %v1126_v31 }
 0x16e   : > { %v1231_v47 = vpop.f32.mrf.mxu1 }
 0x170   : > { %v804_v37 = vpop.f32.mrf.mxu1 }
 0x171   : > { %v1211_v46 = vpop.f32.mrf.mxu0 }
 0x172   : > { %v1232_v50 = vpop.f32.mrf.mxu1  ;;  %v813_v0 = vadd.f32 %v1231_v47, %v1211_v46 }
 0x173   : > { %v685_v48 = vpop.f32.mrf.mxu0 }
 0x174   : > { %v807_v52 = vpop.f32.mrf.mxu1  ;;  %v805_v7 = vadd.f32 %v804_v37, %v685_v48 }
 0x175   : > { %v1212_v49 = vpop.f32.mrf.mxu0 }
 0x176   : > { %v816_v12 = vadd.f32 %v1232_v50, %v1212_v49 }
 0x177   : > { %v688_v51 = vpop.f32.mrf.mxu0 }
 0x178   : > { %v808_v21 = vadd.f32 %v807_v52, %v688_v51 }
 0x180   : > { %v1215_v53 = vpop.f32.mrf.mxu0  ;;  %v1235_v54 = vpop.f32.mrf.mxu1 }
 0x181   : > { %v829_v63 = vadd.f32 %v1235_v54, %v1215_v53 }
 0x182   : > { %v701_v55 = vpop.f32.mrf.mxu0  ;;  %v820_v56 = vpop.f32.mrf.mxu1 }
 0x183   : > { %v821_v3 = vadd.f32 %v820_v56, %v701_v55 }
 0x184   : > { %v1216_v58 = vpop.f32.mrf.mxu0  ;;  %v1236_v59 = vpop.f32.mrf.mxu1 }
 0x185   : > { %v832_v19 = vadd.f32 %v1236_v59, %v1216_v58 }
 0x186   : > { %v704_v60 = vpop.f32.mrf.mxu0  ;;  %v823_v61 = vpop.f32.mrf.mxu1 }
 0x187   : > { %v824_v15 = vadd.f32 %v823_v61, %v704_v60 }
 0x188   : > { %v1255_v2 = vpop.f32.mrf.mxu1 }
 0x189   : > { %v1251_v5 = vpop.f32.mrf.mxu0  ;;  %v983_v6 = vadd.f32 %v1255_v2, %v829_v63 }
 0x18a   : > { %v979_v8 = vadd.f32 %v1251_v5, %v813_v0  ;;  %v962_v18 = vpop.f32.mrf.mxu1 }
 0x18b   : > { %v998_v10 = vadd.f32 %v1162_v1, %v983_v6  ;;  %v946_v9 = vpop.f32.mrf.mxu0  ;;  %v981_v11 = vadd.f32 %v962_v18, %v821_v3 }
 0x18c   : > { %v994_v13 = vadd.f32 %v1162_v1, %v979_v8  ;;  %v977_v27 = vadd.f32 %v946_v9, %v805_v7  ;;  %v1256_v57 = vpop.f32.mrf.mxu1 }
 0x18d   : > { %v1006_v16 = vmax.f32 %v998_v10, 0.0  ;;  %v996_v17 = vadd.f32 %v1162_v1, %v981_v11  ;;  %v1252_v20 = vpop.f32.mrf.mxu0  ;;  %v984_v35 = vadd.f32 %v1256_v57, %v832_v19 }
 0x18e   : > { %v1002_v22 = vmax.f32 %v994_v13, 0.0  ;;  %v992_v23 = vadd.f32 %v1162_v1, %v977_v27  ;;  %v980_v26 = vadd.f32 %v1252_v20, %v816_v12  ;;  %v965_v28 = vpop.f32.mrf.mxu1 }
 0x18f   : > { %v1014_v29 = vpack.c.bf16 %v1006_v16, %v1006_v16  ;;  %v1004_v30 = vmax.f32 %v996_v17, 0.0  ;;  %v999_v25 = vadd.f32 %v1162_v1, %v984_v35  ;;  %v949_v31 = vpop.f32.mrf.mxu0  ;;  %v982_v4 = vadd.f32 %v965_v28, %v824_v15 }
 0x190   : > { %v1010_v32 = vpack.c.bf16 %v1002_v22, %v1002_v22  ;;  %v1000_v33 = vmax.f32 %v992_v23, 0.0  ;;  %v995_v62 = vadd.f32 %v1162_v1, %v980_v26  ;;  %v978_v34 = vadd.f32 %v949_v31, %v808_v21 }
 0x191   : > { %1023 = vst.msk [vmem:[%s1598_s9 + $0x18] sm:$0xf] %vm1016_vm9, %v1014_v29  ;;  %v1012_v36 = vpack.c.bf16 %v1004_v30, %v1004_v30  ;;  %v1007_v38 = vmax.f32 %v999_v25, 0.0  ;;  %v997_v39 = vadd.f32 %v1162_v1, %v982_v4 }
 0x192   : > { %1019 = vst.msk [vmem:[%s1598_s9 + $0x8] sm:$0xf] %vm1016_vm9, %v1010_v32  ;;  %v1008_v40 = vpack.c.bf16 %v1000_v33, %v1000_v33  ;;  %v1003_v41 = vmax.f32 %v995_v62, 0.0  ;;  %v993_v42 = vadd.f32 %v1162_v1, %v978_v34 }
 0x193   : > { %1021 = vst.msk [vmem:[%s1598_s9 + $0x10] sm:$0xf] %vm1016_vm9, %v1012_v36  ;;  %v1015_v14 = vpack.c.bf16 %v1007_v38, %v1007_v38  ;;  %v1005_v43 = vmax.f32 %v997_v39, 0.0 }
 0x194   : > { %1017 = vst.msk [vmem:[%s1598_s9] sm:$0xf] %vm1016_vm9, %v1008_v40  ;;  %v1011_v24 = vpack.c.bf16 %v1003_v41, %v1003_v41  ;;  %v1001_v44 = vmax.f32 %v993_v42, 0.0 }
 0x195   : > { %1024 = vst.msk [vmem:[%s1598_s9 + $0x1c] sm:$0xf] %vm1016_vm9, %v1015_v14  ;;  %v1013_v45 = vpack.c.bf16 %v1005_v43, %v1005_v43 }
 0x196   : > { %1020 = vst.msk [vmem:[%s1598_s9 + $0xc] sm:$0xf] %vm1016_vm9, %v1011_v24  ;;  %v1009_v46 = vpack.c.bf16 %v1001_v44, %v1001_v44 }
 0x197   : > { %1022 = vst.msk [vmem:[%s1598_s9 + $0x14] sm:$0xf] %vm1016_vm9, %v1013_v45 }
 0x198   : > { %1018 = vst.msk [vmem:[%s1598_s9 + $0x4] sm:$0xf] %vm1016_vm9, %v1009_v46 }
 0x199 PF: > { %s13_s12 = sadd.s32 1, %s1314_s12  }
 0x19a   : > { %p10_p4 = scmp.ge.s32.totalorder %s13_s12, 4  }
 0x19c   :  { %12 = sbr.rel (!%p10_p4) target bundleno = 1 (0x1), region = 65 }

// kernel: model_forward.6
= control target key start
LH: loop header
LB: loop body
LE: loop exit
PB: predicated region body
PF: predicated region fallthrough
CT: control target
= control target key end

     0   :  { %s2603_s12 = smov 0   ;;  %s3380_s0 = inlined_call_operand.vmem [shape: bf16[2,16,16,3], index: 0, kind: input, shape index: {}]   ;;  %s3381_s1 = inlined_call_operand.vmem [shape: bf16[3,9,32], index: 1, kind: input, shape index: {}]   ;;  %s3382_s2 = inlined_call_operand.vmem [shape: f32[1,32], index: 2, kind: input, shape index: {}]   ;;  %s3383_s3 = inlined_call_operand.vmem [shape: bf16[2,16,16,32], index: 3, kind: output, shape index: {}]  }
   0x1 LB: > { %s2192_s13 = sadd.s32 4294967295, %s2577_s12   ;;  %p2196_p0 = scmp.ge.s32.totalorder %s2577_s12, 1  ;;  %s2577_s12 = sphi %s2603_s12, %s13_s12  }
   0x2   : > { %p137_p1 = scmp.lt.s32.totalorder %s2577_s12, 3 }
   0x4   : > { %p138_p2 = pnand %p2196_p0, %p137_p1 }
   0x5   : > { %p2613_p3 = scmp.lt.s32.totalorder (!%p138_p2), %s2192_s13, 1  ;;  %s2580_s19 = smov (!%p138_p2), 6  }
   0x6   : > { %141 = sbr.rel (%p138_p2) target bundleno = 533 (0x215), region = 32  ;;  %s2581_s20 = smov (!%p138_p2), 3  }
   0xb   : > { %vm172_vm0 = vcmask 19456   ;;  %vm175_vm1 = vcmask 16384   ;;  %v2579_v0 = vmov 0   ;;  %s3392_s13 = smov (!%p2613_p3, %s2192_s13), 1  ;;  %vm260_vm2 = vsmask.f32 256 }
   0xc   : > { %204 = vst.msk [vmem:[#allocation2 + $0x78] sm:$0xf] %vm172_vm0, %v2579_v0  ;;  %205 = vst.msk [vmem:[#allocation2 + $0x7c] sm:$0xf] %vm172_vm0, %v2579_v0  ;;  %s2327_s15 = sshll.u32 %s3392_s13, 7  ;;  %vm1108_vm8 = vcmask 1046528  }
   0xd   : > { %206 = vst.msk [vmem:[#allocation2 + $0x80] sm:$0x1] %vm175_vm1, %v2579_v0  ;;  %176 = vst.msk [vmem:[#allocation2 + $0x8] sm:$0x1] %vm175_vm1, %v2579_v0  ;;  %s2683_s18 = scalar_lea.vmem %s3380_s0, %s2327_s15  ;;  %vm261_vm3 = vsmask.f32 4368  ;;  %s3257_s4 = scalar_lea.vmem %s3383_s3, %s2327_s15 }
   0xe   : > { %173 = vst.msk [vmem:[#allocation2] sm:$0xf] %vm172_vm0, %v2579_v0  ;;  %174 = vst.msk [vmem:[#allocation2 + $0x4] sm:$0xf] %vm172_vm0, %v2579_v0  ;;  %vm585_vm4 = vsmask.f32 7938 }
   0xf   : > { %177 = vst.msk [vmem:[#allocation2 + $0xc] sm:$0xf] %vm172_vm0, %v2579_v0  ;;  %178 = vst.msk [vmem:[#allocation2 + $0x10] sm:$0xf] %vm172_vm0, %v2579_v0  ;;  %v246_v1 = vld [vmem:[%s2683_s18 + $0x48] sm:$0xf] }
  0x10   : > { %179 = vst.msk [vmem:[#allocation2 + $0x14] sm:$0x1] %vm175_vm1, %v2579_v0  ;;  %182 = vst.msk [vmem:[#allocation2 + $0x20] sm:$0x1] %vm175_vm1, %v2579_v0  ;;  %v247_v2 = vld [vmem:[%s2683_s18 + $0x4c] sm:$0xf] }
  0x11   : > { %180 = vst.msk [vmem:[#allocation2 + $0x18] sm:$0xf] %vm172_vm0, %v2579_v0  ;;  %181 = vst.msk [vmem:[#allocation2 + $0x1c] sm:$0xf] %vm172_vm0, %v2579_v0  ;;  %v244_v3 = vld [vmem:[%s2683_s18 + $0x40] sm:$0xf] }
  0x12   : > { %183 = vst.msk [vmem:[#allocation2 + $0x24] sm:$0xf] %vm172_vm0, %v2579_v0  ;;  %184 = vst.msk [vmem:[#allocation2 + $0x28] sm:$0xf] %vm172_vm0, %v2579_v0  ;;  %v417_v4 = vshrl.u32 %v246_v1, 16  ;;  %v420_v5 = vshll.u32 %v246_v1, 16 }
  0x13   : > { %185 = vst.msk [vmem:[#allocation2 + $0x2c] sm:$0x1] %vm175_vm1, %v2579_v0  ;;  %188 = vst.msk [vmem:[#allocation2 + $0x38] sm:$0x1] %vm175_vm1, %v2579_v0  ;;  %v425_v6 = vshrl.u32 %v247_v2, 16  ;;  %v428_v7 = vshll.u32 %v247_v2, 16 }
  0x14   : > { %186 = vst.msk [vmem:[#allocation2 + $0x30] sm:$0xf] %vm172_vm0, %v2579_v0  ;;  %187 = vst.msk [vmem:[#allocation2 + $0x34] sm:$0xf] %vm172_vm0, %v2579_v0  ;;  %v245_v8 = vld [vmem:[%s2683_s18 + $0x44] sm:$0xf] }
  0x15   : > { %189 = vst.msk [vmem:[#allocation2 + $0x3c] sm:$0xf] %vm172_vm0, %v2579_v0  ;;  %190 = vst.msk [vmem:[#allocation2 + $0x40] sm:$0xf] %vm172_vm0, %v2579_v0  ;;  %v400_v10 = vshrl.u32 %v244_v3, 16  ;;  %v403_v11 = vshll.u32 %v244_v3, 16 }
  0x16   : > { %191 = vst.msk [vmem:[#allocation2 + $0x44] sm:$0x1] %vm175_vm1, %v2579_v0  ;;  %194 = vst.msk [vmem:[#allocation2 + $0x50] sm:$0x1] %vm175_vm1, %v2579_v0  ;;  %v419_v13 = vrot.slane %v417_v4, 7  ;;  %v427_v14 = vrot.slane %v425_v6, 7 }
  0x17   : > { %192 = vst.msk [vmem:[#allocation2 + $0x48] sm:$0xf] %vm172_vm0, %v2579_v0  ;;  %193 = vst.msk [vmem:[#allocation2 + $0x4c] sm:$0xf] %vm172_vm0, %v2579_v0  ;;  %v652_v15 = vld [vmem:[#allocation2 + $0x78] sm:$0xf] }
  0x18   : > { %195 = vst.msk [vmem:[#allocation2 + $0x54] sm:$0xf] %vm172_vm0, %v2579_v0  ;;  %196 = vst.msk [vmem:[#allocation2 + $0x58] sm:$0xf] %vm172_vm0, %v2579_v0  ;;  %v408_v16 = vshrl.u32 %v245_v8, 16  ;;  %v402_v19 = vrot.slane %v400_v10, 7  ;;  %v422_v22 = vor.u32 %v420_v5, %v419_v13  ;;  %v430_v24 = vor.u32 %v428_v7, %v427_v14 }
  0x19   : > { %197 = vst.msk [vmem:[#allocation2 + $0x5c] sm:$0x1] %vm175_vm1, %v2579_v0  ;;  %200 = vst.msk [vmem:[#allocation2 + $0x68] sm:$0x1] %vm175_vm1, %v2579_v0  ;;  %v656_v18 = vld [vmem:[#allocation2 + $0x80] sm:$0x1] }
  0x1a   : > { %198 = vst.msk [vmem:[#allocation2 + $0x60] sm:$0xf] %vm172_vm0, %v2579_v0  ;;  %199 = vst.msk [vmem:[#allocation2 + $0x64] sm:$0xf] %vm172_vm0, %v2579_v0  ;;  %v411_v20 = vshll.u32 %v245_v8, 16  ;;  %v423_v23 = vrot.slane %v419_v13, 4  ;;  %v405_v27 = vor.u32 %v403_v11, %v402_v19 }
  0x1b   : > { %201 = vst.msk [vmem:[#allocation2 + $0x6c] sm:$0xf] %vm172_vm0, %v2579_v0  ;;  %202 = vst.msk [vmem:[#allocation2 + $0x70] sm:$0xf] %vm172_vm0, %v2579_v0  ;;  %v230_v21 = vld [vmem:[%s2683_s18 + $0x8] sm:$0xf] }
  0x1c   : > { %203 = vst.msk [vmem:[#allocation2 + $0x74] sm:$0x1] %vm175_vm1, %v2579_v0  ;;  %209 = vst.msk [vmem:[#allocation2 + $0x8c] sm:$0x1] %vm175_vm1, %v2579_v0  ;;  %v432_v25 = vrot.slane %v427_v14, 4  ;;  %v406_v28 = vrot.slane %v402_v19, 4 }
  0x1d   : > { %207 = vst.msk [vmem:[#allocation2 + $0x84] sm:$0xf] %vm172_vm0, %v2579_v0  ;;  %208 = vst.msk [vmem:[#allocation2 + $0x88] sm:$0xf] %vm172_vm0, %v2579_v0  ;;  %v410_v29 = vrot.slane %v408_v16, 7  ;;  %v281_v31 = vshrl.u32 %v230_v21, 16 }
  0x1e   : > { %210 = vst.msk [vmem:[#allocation2 + $0x90] sm:$0xf] %vm172_vm0, %v2579_v0  ;;  %211 = vst.msk [vmem:[#allocation2 + $0x94] sm:$0xf] %vm172_vm0, %v2579_v0  ;;  %v231_v30 = vld [vmem:[%s2683_s18 + $0xc] sm:$0xf] }
  0x1f   : > { %212 = vst.msk [vmem:[#allocation2 + $0x98] sm:$0x1] %vm175_vm1, %v2579_v0  ;;  %215 = vst.msk [vmem:[#allocation2 + $0xa4] sm:$0x1] %vm175_vm1, %v2579_v0  ;;  %v284_v36 = vshll.u32 %v230_v21, 16  ;;  %v413_v38 = vor.u32 %v411_v20, %v410_v29  ;;  %v415_v39 = vrot.slane %v410_v29, 4 }
  0x20   : > { %213 = vst.msk [vmem:[#allocation2 + $0x9c] sm:$0xf] %vm172_vm0, %v2579_v0  ;;  %214 = vst.msk [vmem:[#allocation2 + $0xa0] sm:$0xf] %vm172_vm0, %v2579_v0  ;;  %v228_v37 = vld [vmem:[%s2683_s18] sm:$0xf] }
  0x21   : > { %216 = vst.msk [vmem:[#allocation2 + $0xa8] sm:$0xf] %vm172_vm0, %v2579_v0  ;;  %217 = vst.msk [vmem:[#allocation2 + $0xac] sm:$0xf] %vm172_vm0, %v2579_v0  ;;  %v283_v41 = vrot.slane %v281_v31, 7  ;;  %v289_v44 = vshrl.u32 %v231_v30, 16 }
  0x22   : > { %218 = vst.msk [vmem:[#allocation2 + $0xb0] sm:$0x1] %vm175_vm1, %v2579_v0  ;;  %221 = vst.msk [vmem:[#allocation2 + $0xbc] sm:$0x1] %vm175_vm1, %v2579_v0  ;;  %v645_v26 = vld [vmem:[#allocation2 + $0x6c] sm:$0xf] }
  0x23   : > { %219 = vst.msk [vmem:[#allocation2 + $0xb4] sm:$0xf] %vm172_vm0, %v2579_v0  ;;  %220 = vst.msk [vmem:[#allocation2 + $0xb8] sm:$0xf] %vm172_vm0, %v2579_v0  ;;  %v649_v35 = vld [vmem:[#allocation2 + $0x74] sm:$0x1]  ;;  %v286_v51 = vor.u32 %v284_v36, %v283_v41 }
  0x24   : > { %222 = vst.msk [vmem:[#allocation2 + $0xc0] sm:$0xf] %vm172_vm0, %v2579_v0  ;;  %223 = vst.msk [vmem:[#allocation2 + $0xc4] sm:$0xf] %vm172_vm0, %v2579_v0  ;;  %v596_v42 = vld [vmem:[#allocation2 + $0x18] sm:$0xf] }
  0x25   : > { %224 = vst.msk [vmem:[#allocation2 + $0xc8] sm:$0x1] %vm175_vm1, %v2579_v0  ;;  %227 = vst.msk [vmem:[#allocation2 + $0xd4] sm:$0x1] %vm175_vm1, %v2579_v0  ;;  %v229_v43 = vld [vmem:[%s2683_s18 + $0x4] sm:$0xf] }
  0x26   : > { %225 = vst.msk [vmem:[#allocation2 + $0xcc] sm:$0xf] %vm172_vm0, %v2579_v0  ;;  %226 = vst.msk [vmem:[#allocation2 + $0xd0] sm:$0xf] %vm172_vm0, %v2579_v0  ;;  %v292_v45 = vshll.u32 %v231_v30, 16  ;;  %v264_v46 = vshrl.u32 %v228_v37, 16 }
  0x27   : > { %vm2691_vm5 = vmand %vm175_vm1, %vm260_vm2  ;;  %v267_v47 = vshll.u32 %v228_v37, 16  ;;  %v234_v48 = vld [vmem:[%s2683_s18 + $0x18] sm:$0xf]  ;;  %v287_v52 = vrot.slane %v283_v41, 4  ;;  %v235_v53 = vld [vmem:[%s2683_s18 + $0x1c] sm:$0xf] }
  0x28   : > { %vm2696_vm6 = vmor %vm260_vm2, %vm261_vm3  ;;  %v657_v34 = vsel %vm2691_vm5, %v432_v25, %v656_v18  ;;  %v650_v50 = vsel %vm2691_vm5, %v415_v39, %v649_v35  ;;  %v291_v54 = vrot.slane %v289_v44, 7  ;;  %v600_v55 = vld [vmem:[#allocation2 + $0x20] sm:$0x1]  ;;  %v266_v56 = vrot.slane %v264_v46, 7  ;;  %v587_v60 = vld [vmem:[#allocation2 + $0xc] sm:$0xf] }
  0x29   : > { %vm2702_vm7 = vmand %vm172_vm0, %vm585_vm4  ;;  %v431_v32 = vsel %vm2696_vm6, %v423_v23, %v430_v24  ;;  %658 = vst [vmem:[#allocation2 + $0x80] sm:$0x1] %v657_v34  ;;  %v414_v49 = vsel %vm2696_vm6, %v406_v28, %v413_v38  ;;  %v272_v57 = vshrl.u32 %v229_v43, 16  ;;  %v275_v58 = vshll.u32 %v229_v43, 16  ;;  %v610_v4 = vld [vmem:[#allocation2 + $0x30] sm:$0xf] }
  0x2a   : > { %v653_v33 = vsel %vm2702_vm7, %v422_v22, %v652_v15  ;;  %655 = vst.msk [vmem:[#allocation2 + $0x7c] sm:$0xf] %vm172_vm0, %v431_v32  ;;  %v646_v40 = vsel %vm2702_vm7, %v405_v27, %v645_v26  ;;  %648 = vst.msk [vmem:[#allocation2 + $0x70] sm:$0xf] %vm172_vm0, %v414_v49  ;;  %v597_v59 = vsel %vm2702_vm7, %v286_v51, %v596_v42  ;;  %v315_v61 = vshrl.u32 %v234_v48, 16 }
  0x2b   : > { %654 = vst [vmem:[#allocation2 + $0x78] sm:$0xf] %v653_v33  ;;  %647 = vst [vmem:[#allocation2 + $0x6c] sm:$0xf] %v646_v40  ;;  %v318_v62 = vshll.u32 %v234_v48, 16  ;;  %v323_v63 = vshrl.u32 %v235_v53, 16  ;;  %v294_v0 = vor.u32 %v292_v45, %v291_v54  ;;  %v269_v2 = vor.u32 %v267_v47, %v266_v56 }
  0x2c   : > { %651 = vst [vmem:[#allocation2 + $0x74] sm:$0x1] %v650_v50  ;;  %v296_v1 = vrot.slane %v291_v54, 4  ;;  %598 = vst [vmem:[#allocation2 + $0x18] sm:$0xf] %v597_v59  ;;  %v270_v3 = vrot.slane %v266_v56, 4 }
  0x2d   : > { %v274_v5 = vrot.slane %v272_v57, 7  ;;  %v593_v6 = vld [vmem:[#allocation2 + $0x14] sm:$0x1]  ;;  %v317_v7 = vrot.slane %v315_v61, 7  ;;  %v325_v8 = vrot.slane %v323_v63, 7  ;;  %v326_v10 = vshll.u32 %v235_v53, 16 }
  0x2e   : > { %v614_v11 = vld [vmem:[#allocation2 + $0x38] sm:$0x1]  ;;  %v248_v13 = vld [vmem:[%s2683_s18 + $0x50] sm:$0xf]  ;;  %v295_v14 = vsel %vm2696_vm6, %v287_v52, %v294_v0  ;;  %v601_v15 = vsel %vm2691_vm5, %v296_v1, %v600_v55  ;;  %v588_v16 = vsel %vm2702_vm7, %v269_v2, %v587_v60  ;;  %v249_v18 = vld [vmem:[%s2683_s18 + $0x54] sm:$0xf] }
  0x2f   : > { %599 = vst.msk [vmem:[#allocation2 + $0x1c] sm:$0xf] %vm172_vm0, %v295_v14  ;;  %602 = vst [vmem:[#allocation2 + $0x20] sm:$0x1] %v601_v15  ;;  %v277_v21 = vor.u32 %v275_v58, %v274_v5  ;;  %v320_v22 = vor.u32 %v318_v62, %v317_v7  ;;  %v328_v23 = vor.u32 %v326_v10, %v325_v8  ;;  %v279_v24 = vrot.slane %v274_v5, 4 }
  0x30   : > { %v2738_v20 = vld [vmem:[#allocation2 + $0x80] ss:$0 sps:$4 sm:$0x11]   ;;  %589 = vst [vmem:[#allocation2 + $0xc] sm:$0xf] %v588_v16  ;;  %v321_v25 = vrot.slane %v317_v7, 4 }
  0x31   : > { %v330_v26 = vrot.slane %v325_v8, 4  ;;  %v434_v27 = vshrl.u32 %v248_v13, 16  ;;  %v250_v28 = vld [vmem:[%s2683_s18 + $0x58] sm:$0xf]  ;;  %v1140_v30 = vrot.slane %v2738_v20, 1  ;;  %v278_v31 = vsel %vm2696_vm6, %v270_v3, %v277_v21 }
  0x32   : > { %v2736_v19 = vld [vmem:[#allocation2 + $0x78] sm:$0xff]   ;;  %v611_v32 = vsel %vm2702_vm7, %v320_v22, %v610_v4  ;;  %v2748_v33 = vld [vmem:[#allocation2 + $0x6c] sm:$0xff]   ;;  %590 = vst.msk [vmem:[#allocation2 + $0x10] sm:$0xf] %vm172_vm0, %v278_v31  ;;  %v594_v35 = vsel %vm2691_vm5, %v279_v24, %v593_v6  ;;  %v329_v36 = vsel %vm2696_vm6, %v321_v25, %v328_v23  ;;  %v659_v39 = vld [vmem:[#allocation2 + $0x84] sm:$0xf] }
  0x33   : > { %v1139_v29 = vrot.slane %v2736_v19, 1  ;;  %v2750_v34 = vld [vmem:[#allocation2 + $0x74] ss:$0 sps:$4 sm:$0x11]   ;;  %612 = vst [vmem:[#allocation2 + $0x30] sm:$0xf] %v611_v32  ;;  %v615_v37 = vsel %vm2691_vm5, %v330_v26, %v614_v11 }
  0x34   : > { %v436_v38 = vrot.slane %v434_v27, 7  ;;  %595 = vst [vmem:[#allocation2 + $0x14] sm:$0x1] %v594_v35  ;;  %613 = vst.msk [vmem:[#allocation2 + $0x34] sm:$0xf] %vm172_vm0, %v329_v36  ;;  %v437_v41 = vshll.u32 %v248_v13, 16 }
  0x35   : > { %v1141_v40 = vsel %vm1108_vm8, %v1139_v29, %v1140_v30  ;;  %616 = vst [vmem:[#allocation2 + $0x38] sm:$0x1] %v615_v37  ;;  %v442_v42 = vshrl.u32 %v249_v18, 16  ;;  %v445_v43 = vshll.u32 %v249_v18, 16  ;;  %v1136_v44 = vrot.slane %v2748_v33, 1 }
  0x36   : > { %1177 = vrot.lane.b32.xlu0 %v1141_v40, %s2580_s19  ;;  %v1137_v45 = vrot.slane %v2750_v34, 1  ;;  %v440_v46 = vrot.slane %v436_v38, 4  ;;  %v663_v47 = vld [vmem:[#allocation2 + $0x8c] sm:$0x1]  ;;  %v251_v48 = vld [vmem:[%s2683_s18 + $0x5c] sm:$0xf]  ;;  %v439_v50 = vor.u32 %v437_v41, %v436_v38 }
  0x37   : > { %v451_v49 = vshrl.u32 %v250_v28, 16  ;;  %v444_v51 = vrot.slane %v442_v42, 7  ;;  %v454_v52 = vshll.u32 %v250_v28, 16  ;;  %v459_v53 = vshrl.u32 %v251_v48, 16  ;;  %v666_v54 = vld [vmem:[#allocation2 + $0x90] sm:$0xf] }
  0x38   : > { %v1138_v55 = vsel %vm1108_vm8, %v1136_v44, %v1137_v45  ;;  %v2766_v56 = vld [vmem:[#allocation2 + $0x18] sm:$0xff]   ;;  %v2769_v58 = vld [vmem:[#allocation2 + $0x20] ss:$0 sps:$4 sm:$0x11]   ;;  %v660_v61 = vsel %vm2702_vm7, %v439_v50, %v659_v39  ;;  %vm883_vm9 = vsmask.f32 7424 }
  0x39   : > { %v453_v57 = vrot.slane %v451_v49, 7  ;;  %1175 = vrot.lane.b32.xlu1 %v1138_v55, %s2580_s19  ;;  %v447_v59 = vor.u32 %v445_v43, %v444_v51  ;;  %v449_v60 = vrot.slane %v444_v51, 4  ;;  %v1115_v62 = vrot.slane %v2766_v56, 1  ;;  %661 = vst [vmem:[#allocation2 + $0x84] sm:$0xf] %v660_v61  ;;  %v2775_v3 = vld [vmem:[#allocation2 + $0xc] sm:$0xff]  }
  0x3a   : > { %v461_v1 = vrot.slane %v459_v53, 7  ;;  %v1116_v2 = vrot.slane %v2769_v58, 1  ;;  %v670_v6 = vld [vmem:[#allocation2 + $0x98] sm:$0x1]  ;;  %v1112_v13 = vrot.slane %v2775_v3, 1  ;;  %v462_v14 = vshll.u32 %v251_v48, 16 }
  0x3b   : > { %v456_v63 = vor.u32 %v454_v52, %v453_v57  ;;  %v457_v0 = vrot.slane %v453_v57, 4  ;;  %v448_v4 = vsel %vm2696_vm6, %v440_v46, %v447_v59  ;;  %v664_v5 = vsel %vm2691_vm5, %v449_v60, %v663_v47  ;;  %v2535_v7 = vld [vmem:[#allocation2 + $0x14] ss:$0 sps:$4 sm:$0x11]   ;;  %v232_v26 = vld [vmem:[%s2683_s18 + $0x10] sm:$0xf] }
  0x3c   : > { %v2781_v8 = vld [vmem:[#allocation2 + $0x30] sm:$0xff]   ;;  %662 = vst.msk [vmem:[#allocation2 + $0x88] sm:$0xf] %vm172_vm0, %v448_v4  ;;  %665 = vst [vmem:[#allocation2 + $0x8c] sm:$0x1] %v664_v5  ;;  %v1117_v11 = vsel %vm1108_vm8, %v1115_v62, %v1116_v2  ;;  %v1113_v15 = vrot.slane %v2535_v7, 1  ;;  %v464_v22 = vor.u32 %v462_v14, %v461_v1 }
  0x3d   : > { %v667_v10 = vsel %vm2702_vm7, %v456_v63, %v666_v54  ;;  %1161 = vrot.lane.b32.xlu1 %v1117_v11, %s2580_s19  ;;  %v2789_v16 = vld [vmem:[#allocation2 + $0x38] ss:$0 sps:$4 sm:$0x11]   ;;  %v1121_v18 = vrot.slane %v2781_v8, 1  ;;  %v466_v21 = vrot.slane %v461_v1, 4  ;;  %v897_v23 = vshrl.u32 %v2775_v3, 16 }
  0x3e   : > { %668 = vst [vmem:[#allocation2 + $0x90] sm:$0xf] %v667_v10  ;;  %v899_v24 = vshll.u32 %v2775_v3, 16  ;;  %v904_v25 = vshll.u32 %v2535_v7, 16  ;;  %v1114_v27 = vsel %vm1108_vm8, %v1112_v13, %v1113_v15  ;;  %v1122_v28 = vrot.slane %v2789_v16, 1 }
  0x3f   : > { %v671_v29 = vsel %vm2691_vm5, %v466_v21, %v670_v6  ;;  %v233_v30 = vld [vmem:[%s2683_s18 + $0x14] sm:$0xf]  ;;  %v298_v31 = vshrl.u32 %v232_v26, 16  ;;  %1159 = vrot.lane.b32.xlu0 %v1114_v27, %s2580_s19  ;;  %v465_v32 = vsel %vm2696_vm6, %v457_v0, %v464_v22  ;;  %v301_v37 = vshll.u32 %v232_v26, 16  ;;  %v603_v42 = vld [vmem:[#allocation2 + $0x24] sm:$0xf] }
  0x40   : > { %672 = vst [vmem:[#allocation2 + $0x98] sm:$0x1] %v671_v29  ;;  %v901_v35 = vrot.slane %v899_v24, 1  ;;  %v906_v36 = vrot.slane %v904_v25, 1  ;;  %v1123_v38 = vsel %vm1108_vm8, %v1121_v18, %v1122_v28  ;;  %669 = vst.msk [vmem:[#allocation2 + $0x94] sm:$0xf] %vm172_vm0, %v465_v32 }
  0x41   : > { %v300_v39 = vrot.slane %v298_v31, 7  ;;  %v306_v40 = vshrl.u32 %v233_v30, 16  ;;  %v309_v41 = vshll.u32 %v233_v30, 16  ;;  %1165 = vrot.lane.b32.xlu1 %v1123_v38, %s2580_s19  ;;  %v909_v45 = vshrl.u32 %v2766_v56, 16  ;;  %v607_v55 = vld [vmem:[#allocation2 + $0x2c] sm:$0x1] }
  0x42   : > { %v902_v44 = vor.u32 %v901_v35, %v897_v23  ;;  %v911_v52 = vshll.u32 %v2766_v56, 16  ;;  %v916_v57 = vshll.u32 %v2769_v58, 16  ;;  %v993_v59 = vshrl.u32 %v2748_v33, 16 }
  0x43   : > { %v2806_v43 = vld [vmem:[#allocation2 + $0x84] sm:$0xff]   ;;  %v2539_v46 = vld [vmem:[#allocation2 + $0x8c] ss:$0 sps:$4 sm:$0x11]   ;;  %v303_v47 = vor.u32 %v301_v37, %v300_v39  ;;  %v304_v48 = vrot.slane %v300_v39, 4  ;;  %v308_v51 = vrot.slane %v306_v40, 7 }
  0x44   : > { %v1142_v49 = vrot.slane %v2806_v43, 1  ;;  %v907_v50 = vsel %vm883_vm9, %v902_v44, %v906_v36  ;;  %v1143_v53 = vrot.slane %v2539_v46, 1  ;;  %v913_v62 = vrot.slane %v911_v52, 1  ;;  %v252_v36 = vld [vmem:[%s2683_s18 + $0x60] sm:$0xf] }
  0x45   : > { %v604_v54 = vsel %vm2702_vm7, %v303_v47, %v603_v42  ;;  %1078 = vrot.lane.b32.xlu1 %v907_v50, %s2581_s20  ;;  %v311_v60 = vor.u32 %v309_v41, %v308_v51  ;;  %v313_v61 = vrot.slane %v308_v51, 4  ;;  %v995_v63 = vshll.u32 %v2748_v33, 16  ;;  %v253_v40 = vld [vmem:[%s2683_s18 + $0x64] sm:$0xf] }
  0x46   : > { %605 = vst [vmem:[#allocation2 + $0x24] sm:$0xf] %v604_v54  ;;  %v1144_v56 = vsel %vm1108_vm8, %v1142_v49, %v1143_v53  ;;  %v918_v1 = vrot.slane %v916_v57, 1  ;;  %v914_v5 = vor.u32 %v913_v62, %v909_v45  ;;  %v1000_v33 = vshll.u32 %v2750_v34, 16  ;;  %v254_v53 = vld [vmem:[%s2683_s18 + $0x68] sm:$0xf] }
  0x47   : > { %v2541_v0 = vld [vmem:[#allocation2 + $0x98] ss:$0 sps:$4 sm:$0x11]   ;;  %1179 = vrot.lane.b32.xlu0 %v1144_v56, %s2580_s19  ;;  %v2820_v2 = vld [vmem:[#allocation2 + $0x90] sm:$0xff]   ;;  %v312_v58 = vsel %vm2696_vm6, %v304_v48, %v311_v60  ;;  %v608_v4 = vsel %vm2691_vm5, %v313_v61, %v607_v55  ;;  %v997_v6 = vrot.slane %v995_v63, 1  ;;  %v1005_v15 = vshrl.u32 %v2736_v19, 16 }
  0x48   : > { %v1146_v7 = vrot.slane %v2541_v0, 1  ;;  %606 = vst.msk [vmem:[#allocation2 + $0x28] sm:$0xf] %vm172_vm0, %v312_v58  ;;  %609 = vst [vmem:[#allocation2 + $0x2c] sm:$0x1] %v608_v4  ;;  %v1036_v10 = vshll.u32 %v2541_v0, 16  ;;  %v919_v13 = vsel %vm883_vm9, %v914_v5, %v918_v1 }
  0x49   : > { %v1145_v11 = vrot.slane %v2820_v2, 1  ;;  %v998_v14 = vor.u32 %v997_v6, %v993_v59  ;;  %1080 = vrot.lane.b32.xlu1 %v919_v13, %s2581_s20  ;;  %v1002_v18 = vrot.slane %v1000_v33, 1  ;;  %v1029_v21 = vshrl.u32 %v2820_v2, 16  ;;  %v255_v60 = vld [vmem:[%s2683_s18 + $0x6c] sm:$0xf] }
  0x4a   : > { %v1031_v22 = vshll.u32 %v2820_v2, 16  ;;  %v1007_v23 = vshll.u32 %v2736_v19, 16  ;;  %v1012_v24 = vshll.u32 %v2738_v20, 16  ;;  %v1017_v25 = vshrl.u32 %v2806_v43, 16  ;;  %v236_v0 = vld [vmem:[%s2683_s18 + $0x20] sm:$0xf] }
  0x4b   : > { %v1147_v34 = vsel %vm1108_vm8, %v1145_v11, %v1146_v7  ;;  %v1019_v26 = vshll.u32 %v2806_v43, 16  ;;  %v1038_v28 = vrot.slane %v1036_v10, 1  ;;  %v1024_v30 = vshll.u32 %v2539_v46, 16  ;;  %v673_v6 = vld [vmem:[#allocation2 + $0x9c] sm:$0xf] }
  0x4c   : > { %1181 = vrot.lane.b32.xlu0 %v1147_v34, %s2580_s19  ;;  %v1033_v27 = vrot.slane %v1031_v22, 1  ;;  %v1009_v29 = vrot.slane %v1007_v23, 1  ;;  %v1014_v31 = vrot.slane %v1012_v24, 1  ;;  %v933_v35 = vshrl.u32 %v2781_v8, 16  ;;  %v677_v11 = vld [vmem:[#allocation2 + $0xa4] sm:$0x1] }
  0x4d   : > { %v1021_v32 = vrot.slane %v1019_v26, 1  ;;  %v935_v19 = vshll.u32 %v2781_v8, 16  ;;  %v1026_v38 = vrot.slane %v1024_v30, 1  ;;  %v940_v39 = vshll.u32 %v2789_v16, 16  ;;  %v238_v30 = vld [vmem:[%s2683_s18 + $0x28] sm:$0xf] }
  0x4e   : > { %v1034_v37 = vor.u32 %v1033_v27, %v1029_v21  ;;  %v1010_v20 = vor.u32 %v1009_v29, %v1005_v15  ;;  %v1003_v42 = vsel %vm883_vm9, %v998_v14, %v1002_v18  ;;  %v468_v49 = vshrl.u32 %v252_v36, 16  ;;  %v237_v21 = vld [vmem:[%s2683_s18 + $0x24] sm:$0xf] }
  0x4f   : > { %v2845_v41 = vld [vmem:[#allocation2 + $0x24] sm:$0xff]   ;;  %v1022_v44 = vor.u32 %v1021_v32, %v1017_v25  ;;  %v937_v45 = vrot.slane %v935_v19, 1  ;;  %v2543_v46 = vld [vmem:[#allocation2 + $0x2c] ss:$0 sps:$4 sm:$0x11]   ;;  %v942_v48 = vrot.slane %v940_v39, 1 }
  0x50   : > { %v1039_v47 = vsel %vm883_vm9, %v1034_v37, %v1038_v28  ;;  %v2850_v8 = vsel %vm883_vm9, %v1010_v20, %v1014_v31  ;;  %v1118_v16 = vrot.slane %v2845_v41, 1  ;;  %v921_v50 = vshrl.u32 %v2845_v41, 16  ;;  %v684_v19 = vld [vmem:[#allocation2 + $0xb0] sm:$0x1] }
  0x51   : > { %1100 = vrot.lane.b32.xlu1 %v1039_v47, %s2581_s20  ;;  %v923_v51 = vshll.u32 %v2845_v41, 16  ;;  %v2857_v52 = vsel %vm883_vm9, %v1022_v44, %v1026_v38  ;;  %v1119_v54 = vrot.slane %v2543_v46, 1  ;;  %v928_v55 = vshll.u32 %v2543_v46, 16  ;;  %v617_v44 = vld [vmem:[#allocation2 + $0x3c] sm:$0xf] }
  0x52   : > { %v938_v57 = vor.u32 %v937_v45, %v933_v35  ;;  %v470_v59 = vrot.slane %v468_v49, 7  ;;  %v471_v62 = vshll.u32 %v252_v36, 16  ;;  %v476_v63 = vshrl.u32 %v253_v40, 16  ;;  %v680_v35 = vld [vmem:[#allocation2 + $0xa8] sm:$0xf] }
  0x53   : > { %v925_v61 = vrot.slane %v923_v51, 1  ;;  %v479_v56 = vshll.u32 %v253_v40, 16  ;;  %v1120_v1 = vsel %vm1108_vm8, %v1118_v16, %v1119_v54  ;;  %v930_v58 = vrot.slane %v928_v55, 1  ;;  %v256_v49 = vld [vmem:[%s2683_s18 + $0x70] sm:$0xf] }
  0x54   : > { %v943_v4 = vsel %vm883_vm9, %v938_v57, %v942_v48  ;;  %v474_v5 = vrot.slane %v470_v59, 4  ;;  %1163 = vrot.lane.b32.xlu0 %v1120_v1, %s2580_s19  ;;  %v473_v33 = vor.u32 %v471_v62, %v470_v59  ;;  %v478_v10 = vrot.slane %v476_v63, 7  ;;  %v624_v55 = vld [vmem:[#allocation2 + $0x48] sm:$0xf]  ;;  %v257_v62 = vld [vmem:[%s2683_s18 + $0x74] sm:$0xf] }
  0x55   : > { %v926_v7 = vor.u32 %v925_v61, %v921_v50  ;;  %v485_v13 = vshrl.u32 %v254_v53, 16  ;;  %v488_v14 = vshll.u32 %v254_v53, 16  ;;  %v493_v15 = vshrl.u32 %v255_v60, 16  ;;  %v621_v53 = vld [vmem:[#allocation2 + $0x44] sm:$0x1] }
  0x56   : > { %v496_v18 = vshll.u32 %v255_v60, 16  ;;  %v332_v22 = vshrl.u32 %v236_v0, 16  ;;  %v481_v34 = vor.u32 %v479_v56, %v478_v10  ;;  %v483_v24 = vrot.slane %v478_v10, 4  ;;  %v2893_v63 = vld [vmem:[%s2683_s18 + $0x78] sm:$0xf] }
  0x57   : > { %v931_v23 = vsel %vm883_vm9, %v926_v7, %v930_v58  ;;  %v674_v25 = vsel %vm2702_vm7, %v473_v33, %v673_v6  ;;  %v487_v26 = vrot.slane %v485_v13, 7  ;;  %v495_v27 = vrot.slane %v493_v15, 7  ;;  %v628_v7 = vld [vmem:[#allocation2 + $0x50] sm:$0x1]  ;;  %v687_v33 = vld [vmem:[#allocation2 + $0xb4] sm:$0xf] }
  0x58   : > { %1082 = vrot.lane.b32.xlu1 %v931_v23, %s2581_s20  ;;  %675 = vst [vmem:[#allocation2 + $0x9c] sm:$0xf] %v674_v25  ;;  %v334_v28 = vrot.slane %v332_v22, 7  ;;  %v335_v29 = vshll.u32 %v236_v0, 16  ;;  %1094 = vrot.lane.b32.xlu0 %v1003_v42, %s2581_s20  ;;  %v482_v31 = vsel %vm2696_vm6, %v474_v5, %v481_v34  ;;  %v678_v32 = vsel %vm2691_vm5, %v483_v24, %v677_v11  ;;  %v239_v42 = vld [vmem:[%s2683_s18 + $0x2c] sm:$0xf] }
  0x59   : > { %v340_v36 = vshrl.u32 %v237_v21, 16  ;;  %v343_v37 = vshll.u32 %v237_v21, 16  ;;  %676 = vst.msk [vmem:[#allocation2 + $0xa0] sm:$0xf] %vm172_vm0, %v482_v31  ;;  %679 = vst [vmem:[#allocation2 + $0xa4] sm:$0x1] %v678_v32  ;;  %v490_v20 = vor.u32 %v488_v14, %v487_v26  ;;  %v498_v39 = vor.u32 %v496_v18, %v495_v27 }
  0x5a   : > { %v491_v38 = vrot.slane %v487_v26, 4  ;;  %v500_v40 = vrot.slane %v495_v27, 4  ;;  %v337_v45 = vor.u32 %v335_v29, %v334_v28  ;;  %v338_v46 = vrot.slane %v334_v28, 4 }
  0x5b   : > { %v342_v47 = vrot.slane %v340_v36, 7  ;;  %v349_v48 = vshrl.u32 %v238_v30, 16  ;;  %v681_v50 = vsel %vm2702_vm7, %v490_v20, %v680_v35  ;;  %v352_v54 = vshll.u32 %v238_v30, 16 }
  0x5c   : > { %1084 = vrot.lane.b32.xlu1 %v943_v4, %s2581_s20  ;;  %v499_v16 = vsel %vm2696_vm6, %v491_v38, %v498_v39  ;;  %v685_v51 = vsel %vm2691_vm5, %v500_v40, %v684_v19  ;;  %1096 = vrot.lane.b32.xlu0 %v2850_v8, %s2581_s20  ;;  %682 = vst [vmem:[#allocation2 + $0xa8] sm:$0xf] %v681_v50  ;;  %v357_v56 = vshrl.u32 %v239_v42, 16  ;;  %v360_v0 = vshll.u32 %v239_v42, 16 }
  0x5d   : > { %683 = vst.msk [vmem:[#allocation2 + $0xac] sm:$0xf] %vm172_vm0, %v499_v16  ;;  %686 = vst [vmem:[#allocation2 + $0xb0] sm:$0x1] %v685_v51  ;;  %v345_v57 = vor.u32 %v343_v37, %v342_v47  ;;  %v347_v59 = vrot.slane %v342_v47, 4  ;;  %v618_v60 = vsel %vm2702_vm7, %v337_v45, %v617_v44  ;;  %v351_v61 = vrot.slane %v349_v48, 7 }
  0x5e   : > { %619 = vst [vmem:[#allocation2 + $0x3c] sm:$0xf] %v618_v60  ;;  %v502_v1 = vshrl.u32 %v256_v49, 16  ;;  %v505_v58 = vshll.u32 %v256_v49, 16  ;;  %v359_v10 = vrot.slane %v357_v56, 7  ;;  %v510_v13 = vshrl.u32 %v257_v62, 16 }
  0x5f   : > { %v346_v8 = vsel %vm2696_vm6, %v338_v46, %v345_v57  ;;  %v622_v4 = vsel %vm2691_vm5, %v347_v59, %v621_v53  ;;  %v354_v5 = vor.u32 %v352_v54, %v351_v61  ;;  %v355_v6 = vrot.slane %v351_v61, 4  ;;  %v691_v61 = vld [vmem:[#allocation2 + $0xbc] sm:$0x1] }
  0x60   : > { %620 = vst.msk [vmem:[#allocation2 + $0x40] sm:$0xf] %vm172_vm0, %v346_v8  ;;  %623 = vst [vmem:[#allocation2 + $0x44] sm:$0x1] %v622_v4  ;;  %v504_v11 = vrot.slane %v502_v1, 7  ;;  %v513_v14 = vshll.u32 %v257_v62, 16  ;;  %1098 = vrot.lane.b32.xlu0 %v2857_v52, %s2581_s20  ;;  %v362_v23 = vor.u32 %v360_v0, %v359_v10 }
  0x61   : > { %v2902_v15 = vld [vmem:[#allocation2 + $0x9c] sm:$0xff]   ;;  %v625_v18 = vsel %vm2702_vm7, %v354_v5, %v624_v55  ;;  %v519_v21 = vshrl.u32 %v2893_v63, 16  ;;  %v2545_v22 = vld [vmem:[#allocation2 + $0xa4] ss:$0 sps:$4 sm:$0x11]   ;;  %v364_v34 = vrot.slane %v359_v10, 4 }
  0x62   : > { %626 = vst [vmem:[#allocation2 + $0x48] sm:$0xf] %v625_v18  ;;  %v507_v24 = vor.u32 %v505_v58, %v504_v11  ;;  %v508_v25 = vrot.slane %v504_v11, 4  ;;  %v1041_v26 = vshrl.u32 %v2902_v15, 16  ;;  %v1043_v27 = vshll.u32 %v2902_v15, 16 }
  0x63   : > { %v1148_v28 = vrot.slane %v2902_v15, 1  ;;  %v512_v52 = vrot.slane %v510_v13, 7  ;;  %v1048_v29 = vshll.u32 %v2545_v22, 16  ;;  %v363_v31 = vsel %vm2696_vm6, %v355_v6, %v362_v23  ;;  %v259_v1 = vld [vmem:[%s2683_s18 + $0x7c] sm:$0xf] }
  0x64   : > { %v2910_v30 = vld [vmem:[#allocation2 + $0xa8] sm:$0xff]   ;;  %v629_v32 = vsel %vm2691_vm5, %v364_v34, %v628_v7  ;;  %v688_v35 = vsel %vm2702_vm7, %v507_v24, %v687_v33  ;;  %v1045_v19 = vrot.slane %v1043_v27, 1  ;;  %v2547_v36 = vld [vmem:[#allocation2 + $0xb0] ss:$0 sps:$4 sm:$0x11]   ;;  %v1149_v40 = vrot.slane %v2545_v22, 1 }
  0x65   : > { %627 = vst.msk [vmem:[#allocation2 + $0x4c] sm:$0xf] %vm172_vm0, %v363_v31  ;;  %630 = vst [vmem:[#allocation2 + $0x50] sm:$0x1] %v629_v32  ;;  %v515_v37 = vor.u32 %v513_v14, %v512_v52  ;;  %v1050_v20 = vrot.slane %v1048_v29, 1  ;;  %v1053_v38 = vshrl.u32 %v2910_v30, 16 }
  0x66   : > { %689 = vst [vmem:[#allocation2 + $0xb4] sm:$0xf] %v688_v35  ;;  %v1055_v39 = vshll.u32 %v2910_v30, 16  ;;  %v1046_v44 = vor.u32 %v1045_v19, %v1041_v26  ;;  %v1060_v42 = vshll.u32 %v2547_v36, 16  ;;  %v1151_v49 = vrot.slane %v2910_v30, 1 }
  0x67   : > { %v2921_v45 = vld [vmem:[#allocation2 + $0x3c] sm:$0xff]   ;;  %v516_v46 = vsel %vm2696_vm6, %v508_v25, %v515_v37  ;;  %v2549_v48 = vld [vmem:[#allocation2 + $0x44] ss:$0 sps:$4 sm:$0x11]   ;;  %v1152_v16 = vrot.slane %v2547_v36, 1  ;;  %v1150_v57 = vsel %vm1108_vm8, %v1148_v28, %v1149_v40  ;;  %v517_v0 = vrot.slane %v512_v52, 4 }
  0x68   : > { %v1057_v47 = vrot.slane %v1055_v39, 1  ;;  %690 = vst.msk [vmem:[#allocation2 + $0xb8] sm:$0xf] %vm172_vm0, %v516_v46  ;;  %v1051_v50 = vsel %vm883_vm9, %v1046_v44, %v1050_v20  ;;  %v1062_v51 = vrot.slane %v1060_v42, 1  ;;  %v945_v53 = vshrl.u32 %v2921_v45, 16 }
  0x69   : > { %v947_v54 = vshll.u32 %v2921_v45, 16  ;;  %1102 = vrot.lane.b32.xlu0 %v1051_v50, %s2581_s20  ;;  %v952_v59 = vshll.u32 %v2549_v48, 16  ;;  %v1124_v60 = vrot.slane %v2921_v45, 1  ;;  %v1125_v56 = vrot.slane %v2549_v48, 1  ;;  %v240_v8 = vld [vmem:[%s2683_s18 + $0x30] sm:$0xf] }
  0x6a   : > { %v1058_v55 = vor.u32 %v1057_v47, %v1053_v38  ;;  %v521_v58 = vrot.slane %v519_v21, 7  ;;  %v1153_v33 = vsel %vm1108_vm8, %v1151_v49, %v1152_v16  ;;  %v692_v11 = vsel %vm2691_vm5, %v517_v0, %v691_v61  ;;  %v694_v14 = vld [vmem:[#allocation2 + $0xc0] sm:$0xf]  ;;  %v241_v29 = vld [vmem:[%s2683_s18 + $0x34] sm:$0xf] }
  0x6b   : > { %v949_v62 = vrot.slane %v947_v54, 1  ;;  %v954_v5 = vrot.slane %v952_v59, 1  ;;  %v522_v13 = vshll.u32 %v2893_v63, 16  ;;  %v1126_v22 = vsel %vm1108_vm8, %v1124_v60, %v1125_v56  ;;  %693 = vst [vmem:[#allocation2 + $0xbc] sm:$0x1] %v692_v11 }
  0x6c   : > { %v1063_v4 = vsel %vm883_vm9, %v1058_v55, %v1062_v51  ;;  %v2936_v6 = vld [vmem:[#allocation2 + $0x48] sm:$0xff]   ;;  %v2551_v10 = vld [vmem:[#allocation2 + $0x50] ss:$0 sps:$4 sm:$0x11]   ;;  %v525_v63 = vrot.slane %v521_v58, 4  ;;  %v527_v28 = vshrl.u32 %v259_v1, 16 }
  0x6d   : > { %1104 = vrot.lane.b32.xlu1 %v1063_v4, %s2581_s20  ;;  %v950_v7 = vor.u32 %v949_v62, %v945_v53  ;;  %1183 = vrot.lane.b32.xlu0 %v1150_v57, %s2580_s19  ;;  %v957_v18 = vshrl.u32 %v2936_v6, 16  ;;  %v959_v21 = vshll.u32 %v2936_v6, 16  ;;  %v1127_v23 = vrot.slane %v2936_v6, 1  ;;  %v698_v40 = vld [vmem:[#allocation2 + $0xc8] sm:$0x1] }
  0x6e   : > { %v964_v24 = vshll.u32 %v2551_v10, 16  ;;  %v524_v26 = vor.u32 %v522_v13, %v521_v58  ;;  %v530_v52 = vshll.u32 %v259_v1, 16  ;;  %v366_v31 = vshrl.u32 %v240_v8, 16  ;;  %v242_v48 = vld [vmem:[%s2683_s18 + $0x38] sm:$0xf] }
  0x6f   : > { %v955_v34 = vsel %vm883_vm9, %v950_v7, %v954_v5  ;;  %v2949_v25 = vld [vmem:[#allocation2 + $0xb4] sm:$0xff]   ;;  %v961_v27 = vrot.slane %v959_v21, 1  ;;  %v1128_v35 = vrot.slane %v2551_v10, 1  ;;  %v529_v38 = vrot.slane %v527_v28, 7  ;;  %v243_v54 = vld [vmem:[%s2683_s18 + $0x3c] sm:$0xf] }
  0x70   : > { %v966_v32 = vrot.slane %v964_v24, 1  ;;  %v1065_v19 = vshrl.u32 %v2949_v25, 16  ;;  %v1067_v36 = vshll.u32 %v2949_v25, 16  ;;  %v1154_v20 = vrot.slane %v2949_v25, 1  ;;  %v631_v53 = vld [vmem:[#allocation2 + $0x54] sm:$0xf] }
  0x71   : > { %1086 = vrot.lane.b32.xlu1 %v955_v34, %s2581_s20  ;;  %1185 = vrot.lane.b32.xlu0 %v1153_v33, %s2580_s19  ;;  %v962_v37 = vor.u32 %v961_v27, %v957_v18  ;;  %v695_v39 = vsel %vm2702_vm7, %v524_v26, %v694_v14  ;;  %v368_v42 = vrot.slane %v366_v31, 7  ;;  %v369_v46 = vshll.u32 %v240_v8, 16  ;;  %v635_v5 = vld [vmem:[#allocation2 + $0x5c] sm:$0x1]  ;;  %v638_v21 = vld [vmem:[#allocation2 + $0x60] sm:$0xf] }
  0x72   : > { %v1069_v44 = vrot.slane %v1067_v36, 1  ;;  %696 = vst [vmem:[#allocation2 + $0xc0] sm:$0xf] %v695_v39  ;;  %v374_v47 = vshrl.u32 %v241_v29, 16  ;;  %v532_v16 = vor.u32 %v530_v52, %v529_v38  ;;  %v534_v50 = vrot.slane %v529_v38, 4 }
  0x73   : > { %v967_v49 = vsel %vm883_vm9, %v962_v37, %v966_v32  ;;  %v377_v51 = vshll.u32 %v241_v29, 16  ;;  %v1129_v55 = vsel %vm1108_vm8, %v1127_v23, %v1128_v35  ;;  %v2553_v57 = vld [vmem:[#allocation2 + $0xbc] ss:$0 sps:$4 sm:$0x11]   ;;  %v371_v60 = vor.u32 %v369_v46, %v368_v42  ;;  %v642_v52 = vld [vmem:[#allocation2 + $0x68] sm:$0x1] }
  0x74   : > { %v1070_v59 = vor.u32 %v1069_v44, %v1065_v19  ;;  %v372_v61 = vrot.slane %v368_v42, 4  ;;  %v533_v62 = vsel %vm2696_vm6, %v525_v63, %v532_v16  ;;  %v699_v56 = vsel %vm2691_vm5, %v534_v50, %v698_v40  ;;  %v2984_v32 = vld [vmem:[#allocation2] sm:$0xff]   ;;  %v2995_v38 = vld [vmem:[#allocation2 + $0x8] ss:$0 sps:$4 sm:$0x11]   ;;  %v2999_v42 = vld [vmem:[#allocation2 + $0xcc] sm:$0xff]  }
  0x75   : > { %1088 = vrot.lane.b32.xlu1 %v967_v49, %s2581_s20  ;;  %1167 = vrot.lane.b32.xlu0 %v1126_v22, %s2580_s19  ;;  %v376_v0 = vrot.slane %v374_v47, 7  ;;  %v383_v1 = vshrl.u32 %v242_v48, 16  ;;  %v1072_v58 = vshll.u32 %v2553_v57, 16  ;;  %v1155_v8 = vrot.slane %v2553_v57, 1  ;;  %697 = vst.msk [vmem:[#allocation2 + $0xc4] sm:$0xf] %vm172_vm0, %v533_v62 }
  0x76   : > { %700 = vst [vmem:[#allocation2 + $0xc8] sm:$0x1] %v699_v56  ;;  %v632_v4 = vsel %vm2702_vm7, %v371_v60, %v631_v53  ;;  %v386_v7 = vshll.u32 %v242_v48, 16  ;;  %v391_v13 = vshrl.u32 %v243_v54, 16  ;;  %v394_v18 = vshll.u32 %v243_v54, 16 }
  0x77   : > { %v379_v33 = vor.u32 %v377_v51, %v376_v0  ;;  %v381_v10 = vrot.slane %v376_v0, 4  ;;  %633 = vst [vmem:[#allocation2 + $0x54] sm:$0xf] %v632_v4  ;;  %v385_v11 = vrot.slane %v383_v1, 7  ;;  %v1074_v14 = vrot.slane %v1072_v58, 1 }
  0x78   : > { %v1156_v22 = vsel %vm1108_vm8, %v1154_v20, %v1155_v8  ;;  %v393_v27 = vrot.slane %v391_v13, 7  ;;  %v885_v40 = vshrl.u32 %v2984_v32, 16  ;;  %v887_v44 = vshll.u32 %v2984_v32, 16  ;;  %v3007_v57 = vld [vmem:[#allocation2 + $0xd4] ss:$0 sps:$4 sm:$0x11]  }
  0x79   : > { %1169 = vrot.lane.b32.xlu1 %v1129_v55, %s2580_s19  ;;  %v380_v23 = vsel %vm2696_vm6, %v372_v61, %v379_v33  ;;  %v636_v34 = vsel %vm2691_vm5, %v381_v10, %v635_v5  ;;  %v388_v24 = vor.u32 %v386_v7, %v385_v11  ;;  %v1075_v26 = vsel %vm883_vm9, %v1070_v59, %v1074_v14  ;;  %v2564_v61 = vld [vmem:[%s3381_s1 + $0x8] sm:$0x1f]   ;;  %v2565_v62 = vld [vmem:[%s3381_s1] sm:$0x1f]   ;;  %v2566_v58 = vld [vmem:[%s3381_s1 + $0x10] sm:$0x1f]  }
  0x7a   : > { %634 = vst.msk [vmem:[#allocation2 + $0x58] sm:$0xf] %vm172_vm0, %v380_v23  ;;  %637 = vst [vmem:[#allocation2 + $0x5c] sm:$0x1] %v636_v34  ;;  %v389_v63 = vrot.slane %v385_v11, 4  ;;  %1106 = vrot.lane.b32.xlu0 %v1075_v26, %s2581_s20  ;;  %v396_v29 = vor.u32 %v394_v18, %v393_v27  ;;  %v398_v31 = vrot.slane %v393_v27, 4 }
  0x7b   : > { %v639_v28 = vsel %vm2702_vm7, %v388_v24, %v638_v21  ;;  %v892_v53 = vshll.u32 %v2995_v38, 16  ;;  %v889_v55 = vrot.slane %v887_v44, 1  ;;  %v1677_v59 = vshrl.u32 %v2999_v42, 16 }
  0x7c   : > { %640 = vst [vmem:[#allocation2 + $0x60] sm:$0xf] %v639_v28  ;;  %v2986_v35 = vld [vmem:[#allocation2 + $0xc0] sm:$0xff]   ;;  %v397_v36 = vsel %vm2696_vm6, %v389_v63, %v396_v29  ;;  %v643_v37 = vsel %vm2691_vm5, %v398_v31, %v642_v52  ;;  %v1679_v60 = vshll.u32 %v2999_v42, 16  ;;  %vm1329_vm10 = vcmask 1043456  }
  0x7d   : > { %1187 = vrot.lane.b32.xlu1 %v1156_v22, %s2580_s19  ;;  %v2555_v19 = vld [vmem:[#allocation2 + $0xc8] ss:$0 sps:$4 sm:$0x11]   ;;  %v1266_v17 = vshrl.u32 %v2986_v35, 16  ;;  %v1268_v20 = vshll.u32 %v2986_v35, 16  ;;  %v1279_v48 = vrot.slane %v2986_v35, 1  ;;  %v890_v34 = vor.u32 %v889_v55, %v885_v40 }
  0x7e   : > { %641 = vst.msk [vmem:[#allocation2 + $0x64] sm:$0xf] %vm172_vm0, %v397_v36  ;;  %644 = vst [vmem:[#allocation2 + $0x68] sm:$0x1] %v643_v37  ;;  %v1273_v39 = vshll.u32 %v2555_v19, 16  ;;  %v1280_v49 = vrot.slane %v2555_v19, 1 }
  0x7f   : > { %v1270_v12 = vrot.slane %v1268_v20, 1  ;;  %vm1330_vm11 = vcmask 1044480   ;;  %v894_v14 = vrot.slane %v892_v53, 1  ;;  %v2582_v18 = vmov 65535  }
  0x80   : > { %v1275_v9 = vrot.slane %v1273_v39, 1  ;;  %v1281_v4 = vsel %vm1108_vm8, %v1279_v48, %v1280_v49  ;;  %v1331_v21 = vsel %vm1329_vm10, 4294967295, %v2582_v18  ;;  %v1684_v63 = vshll.u32 %v3007_v57, 16 }
  0x81   : > { %v3001_v46 = vld [vmem:[#allocation2 + $0x54] sm:$0xff]   ;;  %v2557_v47 = vld [vmem:[#allocation2 + $0x5c] ss:$0 sps:$4 sm:$0x11]   ;;  %v1271_v16 = vor.u32 %v1270_v12, %v1266_v17  ;;  %v1332_v24 = vsel %vm1330_vm11, %v1331_v21, 0  ;;  %v1681_v31 = vrot.slane %v1679_v60, 1  ;;  %v895_v39 = vsel %vm883_vm9, %v890_v34, %v894_v14 }
  0x82   : > { %v969_v50 = vshrl.u32 %v3001_v46, 16  ;;  %v971_v51 = vshll.u32 %v3001_v46, 16  ;;  %v976_v54 = vshll.u32 %v2557_v47, 16  ;;  %v1130_v1 = vrot.slane %v3001_v46, 1  ;;  %v2570_v34 = vld [vmem:[#allocation2 + $0x78] sm:$0xff]  }
  0x83   : > { %v1276_v56 = vsel %vm883_vm9, %v1271_v16, %v1275_v9  ;;  %v1131_v10 = vrot.slane %v2557_v47, 1  ;;  %v1334_v27 = vand.u32 %v2564_v61, %v1332_v24  ;;  %v3032_v28 = vand.u32 %v2565_v62, %v1332_v24 }
  0x84   : > { %v973_v0 = vrot.slane %v971_v51, 1  ;;  %1277 = vrot.lane.b32.xlu0 %v1276_v56, %s2581_s20  ;;  %v978_v8 = vrot.slane %v976_v54, 1  ;;  %v1710_v19 = vand.u32 %v2566_v58, %v1332_v24  ;;  %v1682_v40 = vor.u32 %v1681_v31, %v1677_v59 }
  0x85   : > { %v3024_v5 = vld [vmem:[#allocation2 + $0x60] sm:$0xff]   ;;  %v2559_v33 = vld [vmem:[#allocation2 + $0x68] ss:$0 sps:$4 sm:$0x11]   ;;  %v1132_v29 = vsel %vm1108_vm8, %v1130_v1, %v1131_v10  ;;  %2412 = vmatprep.subr.bf16.mxu0 %v1334_v27  ;;  %2514 = vmatprep.subr.bf16.mxu1 %v1334_v27  ;;  %v1686_v44 = vrot.slane %v1684_v63, 1  ;;  %v1109_v9 = vrot.slane %v2984_v32, 1 }
  0x86   : > { %v974_v7 = vor.u32 %v973_v0, %v969_v50  ;;  %v981_v11 = vshrl.u32 %v3024_v5, 16  ;;  %v983_v13 = vshll.u32 %v3024_v5, 16  ;;  %v988_v23 = vshll.u32 %v2559_v33, 16  ;;  %2413 = vmatpush3.bf16.msra.mxu0 %v1334_v27  ;;  %2515 = vmatpush3.bf16.msra.mxu1 %v1334_v27  ;;  %v2567_v0 = vld [vmem:[#allocation2 + $0x18] sm:$0xff]  }
  0x87   : > { %v1133_v37 = vrot.slane %v3024_v5, 1  ;;  %v1134_v17 = vrot.slane %v2559_v33, 1  ;;  %2446 = vmatprep.subr.bf16.mxu1 %v3032_v28  ;;  %2480 = vmatprep.subr.bf16.mxu0 %v1710_v19  ;;  %v1110_v47 = vrot.slane %v2995_v38, 1  ;;  %v1687_v48 = vsel %vm883_vm9, %v1682_v40, %v1686_v44 }
  0x88   : > { %v979_v22 = vsel %vm883_vm9, %v974_v7, %v978_v8  ;;  %1282 = vrot.lane.b32.xlu0 %v1281_v4, %s2580_s19  ;;  %v985_v26 = vrot.slane %v983_v13, 1  ;;  %v990_v52 = vrot.slane %v988_v23, 1  ;;  %v1690_v16 = vrot.slane %v2999_v42, 1  ;;  %v2569_v23 = vld [vmem:[#allocation2 + $0x30] sm:$0xff]  }
  0x89   : > { %1090 = vrot.lane.b32.xlu1 %v979_v22, %s2581_s20  ;;  %v1135_v12 = vsel %vm1108_vm8, %v1133_v37, %v1134_v17  ;;  %v1111_v49 = vsel %vm1108_vm8, %v1109_v9, %v1110_v47  ;;  %v1691_v50 = vrot.slane %v3007_v57, 1  ;;  %vm1189_vm12 = vcmask 23552  }
  0x8a   : > { %v986_v36 = vor.u32 %v985_v26, %v981_v11  ;;  %vm1222_vm13 = vcmask 48128   ;;  %vm1296_vm14 = vcmask 72704   ;;  %v2568_v11 = vld [vmem:[#allocation2 + $0x6c] sm:$0xff]   ;;  %vm2104_vm15 = vcmask 257024  }
  0x8b   : > { %v1692_v51 = vsel %vm1108_vm8, %v1690_v16, %v1691_v50 }
  0x8c   : > { %v991_v20 = vsel %vm883_vm9, %v986_v36, %v990_v52  ;;  %1171 = vrot.lane.b32.xlu0 %v1132_v29, %s2580_s19 }
  0x8d   : > { %1092 = vrot.lane.b32.xlu1 %v991_v20, %s2581_s20 }
  0x90   : > { %1076 = vrot.lane.b32.xlu0 %v895_v39, %s2581_s20 }
  0x91   : > { %1173 = vrot.lane.b32.xlu1 %v1135_v12, %s2580_s19 }
  0x94   : > { %1688 = vrot.lane.b32.xlu0 %v1687_v48, %s2581_s20 }
  0x95   : > { %1157 = vrot.lane.b32.xlu1 %v1111_v49, %s2580_s19 }
  0x99   : > { %1693 = vrot.lane.b32.xlu1 %v1692_v51, %s2580_s19 }
  0xa8   : > { %v1178_v54 = vpop.permute.xlu0 %1177 }
  0xab   : > { %v1176_v38 = vpop.permute.xlu1 %1175 }
  0xaf   : > { %v1162_v53 = vpop.permute.xlu1 %1161 }
  0xb1   : > { %v1160_v59 = vpop.permute.xlu0 %1159 }
  0xb3   : > { %v1166_v55 = vpop.permute.xlu1 %1165 }
  0xb7   : > { %v1079_v60 = vpop.permute.xlu1 %1078 }
  0xb8   : > { %v1193_v57 = vsel %vm1189_vm12, %v2775_v3, %v1079_v60 }
  0xb9   : > { %v3057_v61 = vsel %vm1222_vm13, %v1193_v57, %v1160_v59  ;;  %v1180_v62 = vpop.permute.xlu0 %1179 }
  0xba   : > { %2414 = vmatprep.mubr.msk.bf16.mxu0 %vm1296_vm14, %v3057_v61 }
  0xbb   : > { %v1081_v56 = vpop.permute.xlu1 %1080 }
  0xbc   : > { %v1195_v1 = vsel %vm1189_vm12, %v2567_v0, %v1081_v56 }
  0xbd   : > { %v3063_v58 = vsel %vm1222_vm13, %v1195_v1, %v1162_v53 }
  0xbe   : > { %2415 = vmatmul.mubr.msk.bf16.vlgmr.msra.gmra.mxu0 %vm1296_vm14, %v3063_v58  ;;  %v1182_v8 = vpop.permute.xlu0 %1181 }
  0xbf   : > { %2481 = vmatpush3.bf16.msra.mxu0 %v1710_v19 }
  0xc3   : > { %v1101_v3 = vpop.permute.xlu1 %1100 }
  0xc4   : > { %v1215_v31 = vsel %vm1189_vm12, %v2820_v2, %v1101_v3 }
  0xc5   : > { %v3103_v19 = vsel %vm1222_vm13, %v1215_v31, %v1182_v8 }
  0xc6   : > { %v1164_v4 = vpop.permute.xlu0 %1163 }
  0xca   : > { %v1083_v7 = vpop.permute.xlu1 %1082  ;;  %v1095_v33 = vpop.permute.xlu0 %1094 }
  0xcb   : > { %v1197_v10 = vsel %vm1189_vm12, %v2845_v41, %v1083_v7  ;;  %v1209_v13 = vsel %vm1189_vm12, %v2568_v11, %v1095_v33 }
  0xcc   : > { %v3071_v14 = vsel %vm1222_vm13, %v1197_v10, %v1164_v4  ;;  %v3074_v18 = vsel %vm1222_vm13, %v1209_v13, %v1176_v38 }
  0xcd   : > { %2418 = vmatprep.mubr.msk.bf16.mxu0 %vm1296_vm14, %v3071_v14  ;;  %2430 = vmatprep.mubr.msk.bf16.mxu1 %vm1296_vm14, %v3074_v18 }
  0xce   : > { %v1085_v21 = vpop.permute.xlu1 %1084  ;;  %v1097_v22 = vpop.permute.xlu0 %1096 }
  0xcf   : > { %v1199_v41 = vsel %vm1189_vm12, %v2569_v23, %v1085_v21  ;;  %v1211_v24 = vsel %vm1189_vm12, %v2570_v34, %v1097_v22 }
  0xd0   : > { %v3083_v26 = vsel %vm1222_vm13, %v1199_v41, %v1166_v55  ;;  %v3086_v63 = vsel %vm1222_vm13, %v1211_v24, %v1178_v54 }
  0xd1   : > { %2419 = vmatmul.mubr.msk.bf16.gmra.mxu0 %vm1296_vm14, %v3083_v26  ;;  %2431 = vmatmul.mubr.msk.bf16.vlgmr.msra.gmra.mxu1 %vm1296_vm14, %v3086_v63 }
  0xd2   : > { %v1099_v27 = vpop.permute.xlu0 %1098  ;;  %2447 = vmatpush3.bf16.msra.mxu1 %v3032_v28 }
  0xd3   : > { %v1213_v52 = vsel %vm1189_vm12, %v2806_v43, %v1099_v27 }
  0xd4   : > { %v3096_v29 = vsel %vm1222_vm13, %v1213_v52, %v1180_v62 }
  0xd5   : > { %2434 = vmatprep.mubr.msk.bf16.mxu1 %vm1296_vm14, %v3096_v29 }
  0xd9   : > { %2435 = vmatmul.mubr.msk.bf16.gmra.mxu1 %vm1296_vm14, %v3103_v19 }
  0xdb   : > { %v1103_v36 = vpop.permute.xlu0 %1102 }
  0xdc   : > { %v1217_v43 = vsel %vm1189_vm12, %v2902_v15, %v1103_v36 }
  0xdf   : > { %v1105_v28 = vpop.permute.xlu1 %1104  ;;  %v1184_v37 = vpop.permute.xlu0 %1183 }
  0xe0   : > { %v3110_v17 = vsel %vm1222_vm13, %v1217_v43, %v1184_v37  ;;  %v1219_v20 = vsel %vm1189_vm12, %v2910_v30, %v1105_v28 }
  0xe1   : > { %2438 = vmatprep.mubr.msk.bf16.mxu1 %vm1296_vm14, %v3110_v17 }
  0xe3   : > { %v1087_v2 = vpop.permute.xlu1 %1086  ;;  %v1186_v39 = vpop.permute.xlu0 %1185 }
  0xe4   : > { %v1252_v40 = vsel %vm1222_vm13, %v1219_v20, %v1186_v39  ;;  %v1201_v15 = vsel %vm1189_vm12, %v2921_v45, %v1087_v2 }
  0xe5   : > { %2439 = vmatmul.mubr.msk.bf16.gmra.mxu1 %vm1296_vm14, %v1252_v40 }
  0xe7   : > { %v1089_v44 = vpop.permute.xlu1 %1088  ;;  %v1168_v12 = vpop.permute.xlu0 %1167 }
  0xe8   : > { %v1234_v9 = vsel %vm1222_vm13, %v1201_v15, %v1168_v12  ;;  %v1203_v47 = vsel %vm1189_vm12, %v2936_v6, %v1089_v44 }
  0xe9   : > { %2422 = vmatprep.mubr.msk.bf16.mxu0 %vm1296_vm14, %v1234_v9 }
  0xeb   : > { %v1170_v48 = vpop.permute.xlu1 %1169 }
  0xec   : > { %v1236_v30 = vsel %vm1222_vm13, %v1203_v47, %v1170_v48  ;;  %v1107_v49 = vpop.permute.xlu0 %1106  ;;  %v3248_v47 = vld [vmem:[%s3382_s2] ss:$0 sm:$0xff] }
  0xed   : > { %2423 = vmatmul.mubr.msk.bf16.gmra.mxu0 %vm1296_vm14, %v1236_v30  ;;  %v1221_v16 = vsel %vm1189_vm12, %v2949_v25, %v1107_v49 }
  0xef   : > { %v1188_v50 = vpop.permute.xlu1 %1187 }
  0xf0   : > { %v1254_v45 = vsel %vm1222_vm13, %v1221_v16, %v1188_v50 }
  0xf1   : > { %2442 = vmatprep.mubr.msk.bf16.mxu1 %vm1296_vm14, %v1254_v45 }
  0xf6   : > { %v1278_v51 = vpop.permute.xlu0 %1277 }
  0xf7   : > { %v1285_v38 = vsel %vm1189_vm12, %v2986_v35, %v1278_v51 }
  0xfa   : > { %v1283_v6 = vpop.permute.xlu0 %1282 }
  0xfb   : > { %v1091_v53 = vpop.permute.xlu1 %1090  ;;  %v1287_v54 = vsel %vm1222_vm13, %v1285_v38, %v1283_v6 }
  0xfc   : > { %2443 = vmatmul.mubr.msk.bf16.gmra.mxu1 %vm1296_vm14, %v1287_v54  ;;  %v1205_v55 = vsel %vm1189_vm12, %v3001_v46, %v1091_v53 }
  0xfe   : > { %v1172_v59 = vpop.permute.xlu0 %1171 }
  0xff   : > { %v1093_v25 = vpop.permute.xlu1 %1092  ;;  %v1238_v60 = vsel %vm1222_vm13, %v1205_v55, %v1172_v59 }
 0x100   : > { %2426 = vmatprep.mubr.msk.bf16.mxu0 %vm1296_vm14, %v1238_v60  ;;  %v1207_v62 = vsel %vm1189_vm12, %v3024_v5, %v1093_v25 }
 0x102   : > { %v1077_v57 = vpop.permute.xlu0 %1076 }
 0x103   : > { %v1174_v35 = vpop.permute.xlu1 %1173  ;;  %v1191_v0 = vsel %vm1189_vm12, %v2984_v32, %v1077_v57 }
 0x104   : > { %v1240_v56 = vsel %vm1222_vm13, %v1207_v62, %v1174_v35 }
 0x105   : > { %2427 = vmatmul.mubr.msk.bf16.gmra.mxu0 %vm1296_vm14, %v1240_v56 }
 0x106   : > { %2482 = vmatprep.mubr.msk.bf16.mxu0 %vm1296_vm14, %v3063_v58  ;;  %v1689_v32 = vpop.permute.xlu0 %1688 }
 0x107   : > { %v1158_v46 = vpop.permute.xlu1 %1157  ;;  %v1696_v5 = vsel %vm1189_vm12, %v2999_v42, %v1689_v32 }
 0x108   : > { %v1224_v1 = vsel %vm1222_vm13, %v1191_v0, %v1158_v46 }
 0x109   : > { %2448 = vmatprep.mubr.msk.bf16.mxu1 %vm1296_vm14, %v1224_v1 }
 0x10a   : > { %2449 = vmatmul.mubr.msk.bf16.vlgmr.msra.gmra.mxu1 %vm1296_vm14, %v3057_v61 }
 0x10b   : > { %2452 = vmatprep.mubr.msk.bf16.mxu1 %vm1296_vm14, %v3063_v58  ;;  %v1694_v61 = vpop.permute.xlu1 %1693 }
 0x10c   : > { %v1698_v58 = vsel %vm1222_vm13, %v1696_v5, %v1694_v61 }
 0x10d   : > { %2483 = vmatmul.mubr.msk.bf16.vlgmr.msra.gmra.mxu0 %vm1296_vm14, %v3071_v14 }
 0x10e   : > { %2486 = vmatprep.mubr.msk.bf16.mxu0 %vm1296_vm14, %v3083_v26 }
 0x112   : > { %2453 = vmatmul.mubr.msk.bf16.gmra.mxu1 %vm1296_vm14, %v3071_v14 }
 0x113   : > { %2456 = vmatprep.mubr.msk.bf16.mxu1 %vm1296_vm14, %v3083_v26 }
 0x115   : > { %2487 = vmatmul.mubr.msk.bf16.gmra.mxu0 %vm1296_vm14, %v1234_v9 }
 0x116   : > { %2490 = vmatprep.mubr.msk.bf16.mxu0 %vm1296_vm14, %v1236_v30 }
 0x11a   : > { %2457 = vmatmul.mubr.msk.bf16.gmra.mxu1 %vm1296_vm14, %v1234_v9 }
 0x11b   : > { %2460 = vmatprep.mubr.msk.bf16.mxu1 %vm1296_vm14, %v1236_v30 }
 0x11d   : > { %2491 = vmatmul.mubr.msk.bf16.gmra.mxu0 %vm1296_vm14, %v1238_v60 }
 0x11e   : > { %2494 = vmatprep.mubr.msk.bf16.mxu0 %vm1296_vm14, %v1240_v56 }
 0x122   : > { %2461 = vmatmul.mubr.msk.bf16.gmra.mxu1 %vm1296_vm14, %v1238_v60 }
 0x123   : > { %2464 = vmatprep.mubr.msk.bf16.mxu1 %vm1296_vm14, %v1240_v56 }
 0x125   : > { %2495 = vmatmul.mubr.msk.bf16.gmra.mxu0 %vm1296_vm14, %v3074_v18 }
 0x126   : > { %2498 = vmatprep.mubr.msk.bf16.mxu0 %vm1296_vm14, %v3086_v63 }
 0x12a   : > { %2465 = vmatmul.mubr.msk.bf16.gmra.mxu1 %vm1296_vm14, %v3074_v18 }
 0x12b   : > { %2468 = vmatprep.mubr.msk.bf16.mxu1 %vm1296_vm14, %v3086_v63 }
 0x12d   : > { %2499 = vmatmul.mubr.msk.bf16.gmra.mxu0 %vm1296_vm14, %v3096_v29 }
 0x12e   : > { %2502 = vmatprep.mubr.msk.bf16.mxu0 %vm1296_vm14, %v3103_v19 }
 0x132   : > { %2469 = vmatmul.mubr.msk.bf16.gmra.mxu1 %vm1296_vm14, %v3096_v29 }
 0x133   : > { %2472 = vmatprep.mubr.msk.bf16.mxu1 %vm1296_vm14, %v3103_v19 }
 0x135   : > { %2503 = vmatmul.mubr.msk.bf16.gmra.mxu0 %vm1296_vm14, %v3110_v17 }
 0x136   : > { %2506 = vmatprep.mubr.msk.bf16.mxu0 %vm1296_vm14, %v1252_v40 }
 0x13a   : > { %2473 = vmatmul.mubr.msk.bf16.gmra.mxu1 %vm1296_vm14, %v3110_v17 }
 0x13b   : > { %2476 = vmatprep.mubr.msk.bf16.mxu1 %vm1296_vm14, %v1252_v40 }
 0x13d   : > { %2507 = vmatmul.mubr.msk.bf16.gmra.mxu0 %vm1296_vm14, %v1254_v45 }
 0x13e   : > { %2510 = vmatprep.mubr.msk.bf16.mxu0 %vm1296_vm14, %v1287_v54 }
 0x142   : > { %2477 = vmatmul.mubr.msk.bf16.gmra.mxu1 %vm1296_vm14, %v1254_v45 }
 0x145   : > { %2511 = vmatmul.mubr.msk.bf16.gmra.mxu0 %vm1296_vm14, %v1698_v58 }
 0x17e   : > { %v2416_v33 = vpop.f32.mrf.mxu0 }
 0x180   : > { %v1370_v11 = vpop.f32.mrf.mxu0 }
 0x182   : > { %v2417_v13 = vpop.f32.mrf.mxu0 }
 0x184   : > { %v1373_v18 = vpop.f32.mrf.mxu0 }
 0x191   : > { %v3197_v8 = vpop.f32.mrf.mxu1  ;;  %v2420_v21 = vpop.f32.mrf.mxu0 }
 0x193   : > { %v3199_v3 = vpop.f32.mrf.mxu1  ;;  %v1386_v23 = vpop.f32.mrf.mxu0 }
 0x195   : > { %v3201_v4 = vpop.f32.mrf.mxu1  ;;  %v2421_v34 = vpop.f32.mrf.mxu0 }
 0x197   : > { %v3203_v7 = vpop.f32.mrf.mxu1  ;;  %v1389_v26 = vpop.f32.mrf.mxu0 }
 0x199   : > { %v3205_v10 = vpop.f32.mrf.mxu1 }
 0x19b   : > { %v3207_v42 = vpop.f32.mrf.mxu1 }
 0x19d   : > { %v3209_v14 = vpop.f32.mrf.mxu1 }
 0x19f   : > { %v3211_v22 = vpop.f32.mrf.mxu1 }
 0x1a5   : > { %v3213_v41 = vpop.f32.mrf.mxu1 }
 0x1a7   : > { %v3215_v24 = vpop.f32.mrf.mxu1 }
 0x1a9   : > { %v3217_v63 = vpop.f32.mrf.mxu1 }
 0x1ab   : > { %v3221_v52 = vpop.f32.mrf.mxu1 }
 0x1ad   : > { %v3219_v27 = vpop.f32.mrf.mxu0 }
 0x1af   : > { %v3223_v29 = vpop.f32.mrf.mxu0 }
 0x1b1   : > { %v3227_v19 = vpop.f32.mrf.mxu0 }
 0x1b3   : > { %v3231_v28 = vpop.f32.mrf.mxu0 }
 0x1bc   : > { %v3225_v31 = vpop.f32.mrf.mxu1 }
 0x1be   : > { %v3229_v36 = vpop.f32.mrf.mxu1 }
 0x1c0   : > { %v3233_v43 = vpop.f32.mrf.mxu1 }
 0x1c2   : > { %v3239_v2 = vpop.f32.mrf.mxu1 }
 0x1c5   : > { %v3235_v37 = vpop.f32.mrf.mxu0 }
 0x1c7   : > { %v3237_v17 = vpop.f32.mrf.mxu0 }
 0x1c9   : > { %v3241_v20 = vpop.f32.mrf.mxu0 }
 0x1ca   : > { %v2450_v39 = vpop.f32.mrf.mxu1 }
 0x1cb   : > { %v1550_v40 = vadd.f32 %v2450_v39, %v2416_v33  ;;  %v3243_v44 = vpop.f32.mrf.mxu0 }
 0x1cc   : > { %v1541_v15 = vpop.f32.mrf.mxu1 }
 0x1cd   : > { %v1542_v12 = vadd.f32 %v1541_v15, %v1370_v11  ;;  %v2484_v9 = vpop.f32.mrf.mxu0 }
 0x1ce   : > { %v1875_v48 = vadd.f32 %v2484_v9, %v1550_v40  ;;  %v2451_v30 = vpop.f32.mrf.mxu1 }
 0x1cf   : > { %v1553_v49 = vadd.f32 %v2451_v30, %v2417_v13  ;;  %v1746_v16 = vpop.f32.mrf.mxu0 }
 0x1d0   : > { %v1914_v50 = vadd.f32 %v3248_v47, %v1875_v48  ;;  %v1873_v45 = vadd.f32 %v1746_v16, %v1542_v12  ;;  %v1544_v51 = vpop.f32.mrf.mxu1 }
 0x1d1   : > { %v1545_v38 = vadd.f32 %v1544_v51, %v1373_v18  ;;  %v2485_v53 = vpop.f32.mrf.mxu0 }
 0x1d2   : > { %v1946_v6 = vmax.f32 %v1914_v50, 0.0  ;;  %v1912_v54 = vadd.f32 %v3248_v47, %v1873_v45  ;;  %v1876_v55 = vadd.f32 %v2485_v53, %v1553_v49  ;;  %v2454_v59 = vpop.f32.mrf.mxu1 }
 0x1d3   : > { %v1566_v25 = vadd.f32 %v2454_v59, %v2420_v21  ;;  %v1749_v60 = vpop.f32.mrf.mxu0 }
 0x1d4   : > { %v2331_v57 = vpack.c.bf16 %v1946_v6, %v1946_v6  ;;  %v1944_v62 = vmax.f32 %v1912_v54, 0.0  ;;  %v1915_v35 = vadd.f32 %v3248_v47, %v1876_v55  ;;  %v1874_v56 = vadd.f32 %v1749_v60, %v1545_v38  ;;  %v1557_v0 = vpop.f32.mrf.mxu1 }
 0x1d5   : > { %v1558_v46 = vadd.f32 %v1557_v0, %v1386_v23  ;;  %v2488_v1 = vpop.f32.mrf.mxu0 }
 0x1d6   : > { %2107 = vst.msk [vmem:[%s3257_s4 + $0x8] sm:$0xf] %vm2104_vm15, %v2331_v57  ;;  %v2329_v32 = vpack.c.bf16 %v1944_v62, %v1944_v62  ;;  %v1947_v5 = vmax.f32 %v1915_v35, 0.0  ;;  %v1913_v61 = vadd.f32 %v3248_v47, %v1874_v56  ;;  %v1879_v58 = vadd.f32 %v2488_v1, %v1566_v25  ;;  %v2455_v33 = vpop.f32.mrf.mxu1 }
 0x1d7   : > { %v1569_v11 = vadd.f32 %v2455_v33, %v2421_v34  ;;  %v1762_v13 = vpop.f32.mrf.mxu0 }
 0x1d8   : > { %2105 = vst.msk [vmem:[%s3257_s4] sm:$0xf] %vm2104_vm15, %v2329_v32  ;;  %v2332_v18 = vpack.c.bf16 %v1947_v5, %v1947_v5  ;;  %v1945_v21 = vmax.f32 %v1913_v61, 0.0  ;;  %v1918_v39 = vadd.f32 %v3248_v47, %v1879_v58  ;;  %v1877_v23 = vadd.f32 %v1762_v13, %v1558_v46  ;;  %v1560_v40 = vpop.f32.mrf.mxu1 }
 0x1d9   : > { %v1561_v15 = vadd.f32 %v1560_v40, %v1389_v26  ;;  %v2489_v12 = vpop.f32.mrf.mxu0 }
 0x1da   : > { %2108 = vst.msk [vmem:[%s3257_s4 + $0xc] sm:$0xf] %vm2104_vm15, %v2332_v18  ;;  %v2330_v9 = vpack.c.bf16 %v1945_v21, %v1945_v21  ;;  %v1950_v48 = vmax.f32 %v1918_v39, 0.0  ;;  %v1916_v30 = vadd.f32 %v3248_v47, %v1877_v23  ;;  %v1880_v34 = vadd.f32 %v2489_v12, %v1569_v11  ;;  %v2458_v49 = vpop.f32.mrf.mxu1 }
 0x1db   : > { %v1582_v16 = vadd.f32 %v2458_v49, %v3219_v27  ;;  %v1765_v50 = vpop.f32.mrf.mxu0 }
 0x1dc   : > { %2106 = vst.msk [vmem:[%s3257_s4 + $0x4] sm:$0xf] %vm2104_vm15, %v2330_v9  ;;  %v2335_v45 = vpack.c.bf16 %v1950_v48, %v1950_v48  ;;  %v1948_v51 = vmax.f32 %v1916_v30, 0.0  ;;  %v1919_v26 = vadd.f32 %v3248_v47, %v1880_v34  ;;  %v1878_v38 = vadd.f32 %v1765_v50, %v1561_v15  ;;  %v1573_v53 = vpop.f32.mrf.mxu1 }
 0x1dd   : > { %v1574_v6 = vadd.f32 %v1573_v53, %v3223_v29  ;;  %v2492_v54 = vpop.f32.mrf.mxu0 }
 0x1de   : > { %2111 = vst.msk [vmem:[%s3257_s4 + $0x18] sm:$0xf] %vm2104_vm15, %v2335_v45  ;;  %v2333_v55 = vpack.c.bf16 %v1948_v51, %v1948_v51  ;;  %v1951_v59 = vmax.f32 %v1919_v26, 0.0  ;;  %v1917_v27 = vadd.f32 %v3248_v47, %v1878_v38  ;;  %v1883_v25 = vadd.f32 %v2492_v54, %v1582_v16  ;;  %v2459_v60 = vpop.f32.mrf.mxu1 }
 0x1df   : > { %v1585_v57 = vadd.f32 %v2459_v60, %v3227_v19  ;;  %v1778_v62 = vpop.f32.mrf.mxu0 }
 0x1e0   : > { %2109 = vst.msk [vmem:[%s3257_s4 + $0x10] sm:$0xf] %vm2104_vm15, %v2333_v55  ;;  %v2336_v35 = vpack.c.bf16 %v1951_v59, %v1951_v59  ;;  %v1949_v56 = vmax.f32 %v1917_v27, 0.0  ;;  %v1922_v29 = vadd.f32 %v3248_v47, %v1883_v25  ;;  %v1881_v0 = vadd.f32 %v1778_v62, %v1574_v6  ;;  %v1576_v46 = vpop.f32.mrf.mxu1 }
 0x1e1   : > { %v1577_v1 = vadd.f32 %v1576_v46, %v3231_v28  ;;  %v2493_v32 = vpop.f32.mrf.mxu0 }
 0x1e2   : > { %2112 = vst.msk [vmem:[%s3257_s4 + $0x1c] sm:$0xf] %vm2104_vm15, %v2336_v35  ;;  %v2334_v5 = vpack.c.bf16 %v1949_v56, %v1949_v56  ;;  %v1954_v61 = vmax.f32 %v1922_v29, 0.0  ;;  %v1920_v19 = vadd.f32 %v3248_v47, %v1881_v0  ;;  %v1884_v58 = vadd.f32 %v2493_v32, %v1585_v57  ;;  %v2462_v33 = vpop.f32.mrf.mxu1 }
 0x1e3   : > { %v1598_v11 = vadd.f32 %v2462_v33, %v3235_v37  ;;  %v1781_v13 = vpop.f32.mrf.mxu0 }
 0x1e4   : > { %2110 = vst.msk [vmem:[%s3257_s4 + $0x14] sm:$0xf] %vm2104_vm15, %v2334_v5  ;;  %v2339_v18 = vpack.c.bf16 %v1954_v61, %v1954_v61  ;;  %v1952_v21 = vmax.f32 %v1920_v19, 0.0  ;;  %v1923_v28 = vadd.f32 %v3248_v47, %v1884_v58  ;;  %v1882_v39 = vadd.f32 %v1781_v13, %v1577_v1  ;;  %v1589_v23 = vpop.f32.mrf.mxu1 }
 0x1e5   : > { %v1590_v40 = vadd.f32 %v1589_v23, %v3237_v17  ;;  %v2496_v15 = vpop.f32.mrf.mxu0 }
 0x1e6   : > { %2115 = vst.msk [vmem:[%s3257_s4 + $0x28] sm:$0xf] %vm2104_vm15, %v2339_v18  ;;  %v2337_v12 = vpack.c.bf16 %v1952_v21, %v1952_v21  ;;  %v1955_v9 = vmax.f32 %v1923_v28, 0.0  ;;  %v1921_v37 = vadd.f32 %v3248_v47, %v1882_v39  ;;  %v1887_v48 = vadd.f32 %v2496_v15, %v1598_v11  ;;  %v2463_v30 = vpop.f32.mrf.mxu1 }
 0x1e7   : > { %v1601_v34 = vadd.f32 %v2463_v30, %v3241_v20  ;;  %v1794_v49 = vpop.f32.mrf.mxu0 }
 0x1e8   : > { %2113 = vst.msk [vmem:[%s3257_s4 + $0x20] sm:$0xf] %vm2104_vm15, %v2337_v12  ;;  %v2340_v16 = vpack.c.bf16 %v1955_v9, %v1955_v9  ;;  %v1953_v50 = vmax.f32 %v1921_v37, 0.0  ;;  %v1926_v17 = vadd.f32 %v3248_v47, %v1887_v48  ;;  %v1885_v45 = vadd.f32 %v1794_v49, %v1590_v40  ;;  %v1592_v51 = vpop.f32.mrf.mxu1 }
 0x1e9   : > { %v1593_v26 = vadd.f32 %v1592_v51, %v3243_v44  ;;  %v2497_v38 = vpop.f32.mrf.mxu0 }
 0x1ea   : > { %2116 = vst.msk [vmem:[%s3257_s4 + $0x2c] sm:$0xf] %vm2104_vm15, %v2340_v16  ;;  %v2338_v53 = vpack.c.bf16 %v1953_v50, %v1953_v50  ;;  %v1958_v6 = vmax.f32 %v1926_v17, 0.0  ;;  %v1924_v20 = vadd.f32 %v3248_v47, %v1885_v45  ;;  %v1888_v54 = vadd.f32 %v2497_v38, %v1601_v34  ;;  %v2466_v55 = vpop.f32.mrf.mxu1 }
 0x1eb   : > { %v1614_v59 = vadd.f32 %v2466_v55, %v3197_v8  ;;  %v1797_v27 = vpop.f32.mrf.mxu0 }
 0x1ec   : > { %2114 = vst.msk [vmem:[%s3257_s4 + $0x24] sm:$0xf] %vm2104_vm15, %v2338_v53  ;;  %v2343_v25 = vpack.c.bf16 %v1958_v6, %v1958_v6  ;;  %v1956_v60 = vmax.f32 %v1924_v20, 0.0  ;;  %v1927_v44 = vadd.f32 %v3248_v47, %v1888_v54  ;;  %v1886_v57 = vadd.f32 %v1797_v27, %v1593_v26  ;;  %v1605_v62 = vpop.f32.mrf.mxu1 }
 0x1ed   : > { %v1606_v35 = vadd.f32 %v1605_v62, %v3199_v3  ;;  %v2500_v56 = vpop.f32.mrf.mxu0 }
 0x1ee   : > { %2119 = vst.msk [vmem:[%s3257_s4 + $0x38] sm:$0xf] %vm2104_vm15, %v2343_v25  ;;  %v2341_v29 = vpack.c.bf16 %v1956_v60, %v1956_v60  ;;  %v1959_v0 = vmax.f32 %v1927_v44, 0.0  ;;  %v1925_v8 = vadd.f32 %v3248_v47, %v1886_v57  ;;  %v1891_v46 = vadd.f32 %v2500_v56, %v1614_v59  ;;  %v2467_v1 = vpop.f32.mrf.mxu1 }
 0x1ef   : > { %v1617_v32 = vadd.f32 %v2467_v1, %v3201_v4  ;;  %v1810_v5 = vpop.f32.mrf.mxu0 }
 0x1f0   : > { %2117 = vst.msk [vmem:[%s3257_s4 + $0x30] sm:$0xf] %vm2104_vm15, %v2341_v29  ;;  %v2344_v61 = vpack.c.bf16 %v1959_v0, %v1959_v0  ;;  %v1957_v19 = vmax.f32 %v1925_v8, 0.0  ;;  %v1930_v3 = vadd.f32 %v3248_v47, %v1891_v46  ;;  %v1889_v58 = vadd.f32 %v1810_v5, %v1606_v35  ;;  %v1608_v33 = vpop.f32.mrf.mxu1 }
 0x1f1   : > { %v1609_v11 = vadd.f32 %v1608_v33, %v3203_v7  ;;  %v2501_v13 = vpop.f32.mrf.mxu0 }
 0x1f2   : > { %2120 = vst.msk [vmem:[%s3257_s4 + $0x3c] sm:$0xf] %vm2104_vm15, %v2344_v61  ;;  %v2342_v18 = vpack.c.bf16 %v1957_v19, %v1957_v19  ;;  %v1962_v21 = vmax.f32 %v1930_v3, 0.0  ;;  %v1928_v4 = vadd.f32 %v3248_v47, %v1889_v58  ;;  %v1892_v28 = vadd.f32 %v2501_v13, %v1617_v32  ;;  %v2470_v39 = vpop.f32.mrf.mxu1 }
 0x1f3   : > { %v1630_v23 = vadd.f32 %v2470_v39, %v3205_v10  ;;  %v1813_v40 = vpop.f32.mrf.mxu0 }
 0x1f4   : > { %2118 = vst.msk [vmem:[%s3257_s4 + $0x34] sm:$0xf] %vm2104_vm15, %v2342_v18  ;;  %v2347_v15 = vpack.c.bf16 %v1962_v21, %v1962_v21  ;;  %v1960_v12 = vmax.f32 %v1928_v4, 0.0  ;;  %v1931_v7 = vadd.f32 %v3248_v47, %v1892_v28  ;;  %v1890_v9 = vadd.f32 %v1813_v40, %v1609_v11  ;;  %v1621_v37 = vpop.f32.mrf.mxu1 }
 0x1f5   : > { %v1622_v48 = vadd.f32 %v1621_v37, %v3207_v42  ;;  %v2504_v30 = vpop.f32.mrf.mxu0 }
 0x1f6   : > { %2123 = vst.msk [vmem:[%s3257_s4 + $0x48] sm:$0xf] %vm2104_vm15, %v2347_v15  ;;  %v2345_v34 = vpack.c.bf16 %v1960_v12, %v1960_v12  ;;  %v1963_v49 = vmax.f32 %v1931_v7, 0.0  ;;  %v1929_v10 = vadd.f32 %v3248_v47, %v1890_v9  ;;  %v1895_v16 = vadd.f32 %v2504_v30, %v1630_v23  ;;  %v2471_v50 = vpop.f32.mrf.mxu1 }
 0x1f7   : > { %v1633_v17 = vadd.f32 %v2471_v50, %v3209_v14  ;;  %v1826_v45 = vpop.f32.mrf.mxu0 }
 0x1f8   : > { %2121 = vst.msk [vmem:[%s3257_s4 + $0x40] sm:$0xf] %vm2104_vm15, %v2345_v34  ;;  %v2348_v51 = vpack.c.bf16 %v1963_v49, %v1963_v49  ;;  %v1961_v26 = vmax.f32 %v1929_v10, 0.0  ;;  %v1934_v42 = vadd.f32 %v3248_v47, %v1895_v16  ;;  %v1893_v38 = vadd.f32 %v1826_v45, %v1622_v48  ;;  %v1624_v53 = vpop.f32.mrf.mxu1 }
 0x1f9   : > { %v1625_v6 = vadd.f32 %v1624_v53, %v3211_v22  ;;  %v2505_v20 = vpop.f32.mrf.mxu0 }
 0x1fa   : > { %2124 = vst.msk [vmem:[%s3257_s4 + $0x4c] sm:$0xf] %vm2104_vm15, %v2348_v51  ;;  %v2346_v54 = vpack.c.bf16 %v1961_v26, %v1961_v26  ;;  %v1966_v55 = vmax.f32 %v1934_v42, 0.0  ;;  %v1932_v14 = vadd.f32 %v3248_v47, %v1893_v38  ;;  %v1896_v59 = vadd.f32 %v2505_v20, %v1633_v17  ;;  %v2474_v27 = vpop.f32.mrf.mxu1 }
 0x1fb   : > { %v1646_v25 = vadd.f32 %v2474_v27, %v3213_v41  ;;  %v1829_v60 = vpop.f32.mrf.mxu0 }
 0x1fc   : > { %2122 = vst.msk [vmem:[%s3257_s4 + $0x44] sm:$0xf] %vm2104_vm15, %v2346_v54  ;;  %v2351_v44 = vpack.c.bf16 %v1966_v55, %v1966_v55  ;;  %v1964_v57 = vmax.f32 %v1932_v14, 0.0  ;;  %v1935_v22 = vadd.f32 %v3248_v47, %v1896_v59  ;;  %v1894_v62 = vadd.f32 %v1829_v60, %v1625_v6  ;;  %v1637_v35 = vpop.f32.mrf.mxu1 }
 0x1fd   : > { %v1638_v56 = vadd.f32 %v1637_v35, %v3215_v24  ;;  %v2508_v29 = vpop.f32.mrf.mxu0 }
 0x1fe   : > { %2127 = vst.msk [vmem:[%s3257_s4 + $0x58] sm:$0xf] %vm2104_vm15, %v2351_v44  ;;  %v2349_v0 = vpack.c.bf16 %v1964_v57, %v1964_v57  ;;  %v1967_v8 = vmax.f32 %v1935_v22, 0.0  ;;  %v1933_v41 = vadd.f32 %v3248_v47, %v1894_v62  ;;  %v1899_v46 = vadd.f32 %v2508_v29, %v1646_v25  ;;  %v2475_v1 = vpop.f32.mrf.mxu1 }
 0x1ff   : > { %v1649_v32 = vadd.f32 %v2475_v1, %v3217_v63  ;;  %v1842_v5 = vpop.f32.mrf.mxu0 }
 0x200   : > { %2125 = vst.msk [vmem:[%s3257_s4 + $0x50] sm:$0xf] %vm2104_vm15, %v2349_v0  ;;  %v2352_v61 = vpack.c.bf16 %v1967_v8, %v1967_v8  ;;  %v1965_v19 = vmax.f32 %v1933_v41, 0.0  ;;  %v1938_v24 = vadd.f32 %v3248_v47, %v1899_v46  ;;  %v1897_v3 = vadd.f32 %v1842_v5, %v1638_v56  ;;  %v1640_v58 = vpop.f32.mrf.mxu1 }
 0x201   : > { %v1641_v33 = vadd.f32 %v1640_v58, %v3221_v52  ;;  %v2509_v11 = vpop.f32.mrf.mxu0 }
 0x202   : > { %2128 = vst.msk [vmem:[%s3257_s4 + $0x5c] sm:$0xf] %vm2104_vm15, %v2352_v61  ;;  %v2350_v13 = vpack.c.bf16 %v1965_v19, %v1965_v19  ;;  %v1970_v18 = vmax.f32 %v1938_v24, 0.0  ;;  %v1936_v63 = vadd.f32 %v3248_v47, %v1897_v3  ;;  %v1900_v21 = vadd.f32 %v2509_v11, %v1649_v32  ;;  %v2478_v4 = vpop.f32.mrf.mxu1 }
 0x203   : > { %v1662_v28 = vadd.f32 %v2478_v4, %v3225_v31  ;;  %v1845_v39 = vpop.f32.mrf.mxu0 }
 0x204   : > { %2126 = vst.msk [vmem:[%s3257_s4 + $0x54] sm:$0xf] %vm2104_vm15, %v2350_v13  ;;  %v2355_v23 = vpack.c.bf16 %v1970_v18, %v1970_v18  ;;  %v1968_v40 = vmax.f32 %v1936_v63, 0.0  ;;  %v1939_v52 = vadd.f32 %v3248_v47, %v1900_v21  ;;  %v1898_v15 = vadd.f32 %v1845_v39, %v1641_v33  ;;  %v1653_v12 = vpop.f32.mrf.mxu1 }
 0x205   : > { %v1654_v7 = vadd.f32 %v1653_v12, %v3229_v36  ;;  %v2512_v9 = vpop.f32.mrf.mxu0 }
 0x206   : > { %2131 = vst.msk [vmem:[%s3257_s4 + $0x68] sm:$0xf] %vm2104_vm15, %v2355_v23  ;;  %v2353_v37 = vpack.c.bf16 %v1968_v40, %v1968_v40  ;;  %v1971_v48 = vmax.f32 %v1939_v52, 0.0  ;;  %v1937_v31 = vadd.f32 %v3248_v47, %v1898_v15  ;;  %v1903_v30 = vadd.f32 %v2512_v9, %v1662_v28  ;;  %v2479_v34 = vpop.f32.mrf.mxu1 }
 0x207   : > { %v1665_v49 = vadd.f32 %v2479_v34, %v3233_v43  ;;  %v1858_v10 = vpop.f32.mrf.mxu0 }
 0x208   : > { %2129 = vst.msk [vmem:[%s3257_s4 + $0x60] sm:$0xf] %vm2104_vm15, %v2353_v37  ;;  %v2356_v16 = vpack.c.bf16 %v1971_v48, %v1971_v48  ;;  %v1969_v50 = vmax.f32 %v1937_v31, 0.0  ;;  %v1942_v36 = vadd.f32 %v3248_v47, %v1903_v30  ;;  %v1901_v17 = vadd.f32 %v1858_v10, %v1654_v7  ;;  %v1656_v45 = vpop.f32.mrf.mxu1 }
 0x209   : > { %v1657_v51 = vadd.f32 %v1656_v45, %v3239_v2  ;;  %v2513_v26 = vpop.f32.mrf.mxu0 }
 0x20a   : > { %2132 = vst.msk [vmem:[%s3257_s4 + $0x6c] sm:$0xf] %vm2104_vm15, %v2356_v16  ;;  %v2354_v42 = vpack.c.bf16 %v1969_v50, %v1969_v50  ;;  %v1974_v38 = vmax.f32 %v1942_v36, 0.0  ;;  %v1940_v43 = vadd.f32 %v3248_v47, %v1901_v17  ;;  %v1904_v53 = vadd.f32 %v2513_v26, %v1665_v49 }
 0x20b   : > { %v1861_v6 = vpop.f32.mrf.mxu0 }
 0x20c   : > { %2130 = vst.msk [vmem:[%s3257_s4 + $0x64] sm:$0xf] %vm2104_vm15, %v2354_v42  ;;  %v2359_v20 = vpack.c.bf16 %v1974_v38, %v1974_v38  ;;  %v1972_v54 = vmax.f32 %v1940_v43, 0.0  ;;  %v1943_v55 = vadd.f32 %v3248_v47, %v1904_v53  ;;  %v1902_v14 = vadd.f32 %v1861_v6, %v1657_v51 }
 0x20e   : > { %2135 = vst.msk [vmem:[%s3257_s4 + $0x78] sm:$0xf] %vm2104_vm15, %v2359_v20  ;;  %v2357_v2 = vpack.c.bf16 %v1972_v54, %v1972_v54  ;;  %v1975_v59 = vmax.f32 %v1943_v55, 0.0  ;;  %v1941_v27 = vadd.f32 %v3248_v47, %v1902_v14 }
 0x210   : > { %2133 = vst.msk [vmem:[%s3257_s4 + $0x70] sm:$0xf] %vm2104_vm15, %v2357_v2  ;;  %v2360_v25 = vpack.c.bf16 %v1975_v59, %v1975_v59  ;;  %v1973_v60 = vmax.f32 %v1941_v27, 0.0 }
 0x212   : > { %2136 = vst.msk [vmem:[%s3257_s4 + $0x7c] sm:$0xf] %vm2104_vm15, %v2360_v25  ;;  %v2358_v44 = vpack.c.bf16 %v1973_v60, %v1973_v60 }
 0x214   : > { %2134 = vst.msk [vmem:[%s3257_s4 + $0x74] sm:$0xf] %vm2104_vm15, %v2358_v44 }
 0x215 PF: > { %s13_s12 = sadd.s32 1, %s2577_s12  }
 0x216   : > { %p10_p4 = scmp.ge.s32.totalorder %s13_s12, 4  }
 0x218   :  { %12 = sbr.rel (!%p10_p4) target bundleno = 1 (0x1), region = 65 }

// kernel: model_forward.7
= control target key start
LH: loop header
LB: loop body
LE: loop exit
PB: predicated region body
PF: predicated region fallthrough
CT: control target
= control target key end

     0   :  { %s2818_s12 = smov 0   ;;  %s3643_s0 = inlined_call_operand.vmem [shape: bf16[2,16,16,32], index: 0, kind: input, shape index: {}]   ;;  %s3644_s1 = inlined_call_operand.vmem [shape: bf16[3,96,16], index: 1, kind: input, shape index: {}]   ;;  %s3645_s2 = inlined_call_operand.vmem [shape: f32[1,16], index: 2, kind: input, shape index: {}]   ;;  %s3646_s3 = inlined_call_operand.vmem [shape: bf16[2,16,16,16], index: 3, kind: output, shape index: {}]  }
   0x1 LB: > { %s2302_s13 = sadd.s32 4294967295, %s2793_s12   ;;  %p2306_p0 = scmp.ge.s32.totalorder %s2793_s12, 1  ;;  %s2793_s12 = sphi %s2818_s12, %s13_s12  }
   0x2   : > { %p137_p1 = scmp.lt.s32.totalorder %s2793_s12, 3 }
   0x4   : > { %p138_p2 = pnand %p2306_p0, %p137_p1 }
   0x5   : > { %p2828_p3 = scmp.lt.s32.totalorder (!%p138_p2), %s2302_s13, 1  ;;  %s2796_s27 = smov (!%p138_p2), 64  }
   0x6   : > { %141 = sbr.rel (%p138_p2) target bundleno = 534 (0x216), region = 32  ;;  %s2797_s5 = smov (!%p138_p2), 32  }
   0xb   : > { %vm172_vm0 = vcmask 257024   ;;  %vm175_vm1 = vcmask 253952   ;;  %v2795_v0 = vmov 0   ;;  %vm260_vm2 = vsmask.f32 256  ;;  %s3655_s13 = smov (!%p2828_p3, %s2302_s13), 1 }
   0xc   : > { %204 = vst.msk [vmem:[#allocation2 + $0x78] sm:$0xf] %vm172_vm0, %v2795_v0  ;;  %205 = vst.msk [vmem:[#allocation2 + $0x7c] sm:$0xf] %vm172_vm0, %v2795_v0  ;;  %vm261_vm3 = vsmask.f32 4368 }
   0xd   : > { %206 = vst.msk [vmem:[#allocation2 + $0x80] sm:$0x1] %vm175_vm1, %v2795_v0  ;;  %176 = vst.msk [vmem:[#allocation2 + $0x8] sm:$0x1] %vm175_vm1, %v2795_v0  ;;  %v2761_v1 = vld [vmem:[%s3644_s1 + $0x58] sm:$0xff]   ;;  %s2472_s17 = sshll.u32 %s3655_s13, 7 }
   0xe   : > { %173 = vst.msk [vmem:[#allocation2] sm:$0xf] %vm172_vm0, %v2795_v0  ;;  %174 = vst.msk [vmem:[#allocation2 + $0x4] sm:$0xf] %vm172_vm0, %v2795_v0  ;;  %vm585_vm4 = vsmask.f32 7938  ;;  %2572 = vmatprep.subr.bf16.mxu0 %v2761_v1  ;;  %2704 = vmatprep.subr.bf16.mxu1 %v2761_v1  ;;  %s2904_s22 = scalar_lea.vmem %s3643_s0, %s2472_s17  ;;  %s3520_s10 = scalar_lea.vmem %s3646_s3, %s2472_s17 }
   0xf   : > { %177 = vst.msk [vmem:[#allocation2 + $0xc] sm:$0xf] %vm172_vm0, %v2795_v0  ;;  %178 = vst.msk [vmem:[#allocation2 + $0x10] sm:$0xf] %vm172_vm0, %v2795_v0  ;;  %v2762_v2 = vld [vmem:[%s3644_s1 + $0x50] sm:$0xff]   ;;  %2573 = vmatpush3.bf16.msra.mxu0 %v2761_v1  ;;  %2710 = vmatpush3.bf16.msra.mxu1 %v2761_v1  ;;  %vm1108_vm8 = vcmask 1046528  }
  0x10   : > { %179 = vst.msk [vmem:[#allocation2 + $0x14] sm:$0x1] %vm175_vm1, %v2795_v0  ;;  %182 = vst.msk [vmem:[#allocation2 + $0x20] sm:$0x1] %vm175_vm1, %v2795_v0  ;;  %v246_v3 = vld [vmem:[%s2904_s22 + $0x48] sm:$0xf]  ;;  %2574 = vmatprep.subr.bf16.mxu0 %v2762_v2  ;;  %2705 = vmatprep.subr.bf16.mxu1 %v2762_v2 }
  0x11   : > { %180 = vst.msk [vmem:[#allocation2 + $0x18] sm:$0xf] %vm172_vm0, %v2795_v0  ;;  %181 = vst.msk [vmem:[#allocation2 + $0x1c] sm:$0xf] %vm172_vm0, %v2795_v0  ;;  %v247_v4 = vld [vmem:[%s2904_s22 + $0x4c] sm:$0xf] }
  0x12   : > { %183 = vst.msk [vmem:[#allocation2 + $0x24] sm:$0xf] %vm172_vm0, %v2795_v0  ;;  %184 = vst.msk [vmem:[#allocation2 + $0x28] sm:$0xf] %vm172_vm0, %v2795_v0  ;;  %v244_v5 = vld [vmem:[%s2904_s22 + $0x40] sm:$0xf] }
  0x13   : > { %185 = vst.msk [vmem:[#allocation2 + $0x2c] sm:$0x1] %vm175_vm1, %v2795_v0  ;;  %188 = vst.msk [vmem:[#allocation2 + $0x38] sm:$0x1] %vm175_vm1, %v2795_v0  ;;  %v417_v6 = vshrl.u32 %v246_v3, 16  ;;  %v420_v7 = vshll.u32 %v246_v3, 16  ;;  %2575 = vmatpush3.bf16.msra.mxu0 %v2762_v2  ;;  %2711 = vmatpush3.bf16.msra.mxu1 %v2762_v2 }
  0x14   : > { %186 = vst.msk [vmem:[#allocation2 + $0x30] sm:$0xf] %vm172_vm0, %v2795_v0  ;;  %187 = vst.msk [vmem:[#allocation2 + $0x34] sm:$0xf] %vm172_vm0, %v2795_v0  ;;  %v425_v8 = vshrl.u32 %v247_v4, 16  ;;  %v428_v9 = vshll.u32 %v247_v4, 16 }
  0x15   : > { %189 = vst.msk [vmem:[#allocation2 + $0x3c] sm:$0xf] %vm172_vm0, %v2795_v0  ;;  %190 = vst.msk [vmem:[#allocation2 + $0x40] sm:$0xf] %vm172_vm0, %v2795_v0  ;;  %v245_v10 = vld [vmem:[%s2904_s22 + $0x44] sm:$0xf] }
  0x16   : > { %191 = vst.msk [vmem:[#allocation2 + $0x44] sm:$0x1] %vm175_vm1, %v2795_v0  ;;  %194 = vst.msk [vmem:[#allocation2 + $0x50] sm:$0x1] %vm175_vm1, %v2795_v0  ;;  %v400_v12 = vshrl.u32 %v244_v5, 16  ;;  %v403_v13 = vshll.u32 %v244_v5, 16 }
  0x17   : > { %192 = vst.msk [vmem:[#allocation2 + $0x48] sm:$0xf] %vm172_vm0, %v2795_v0  ;;  %193 = vst.msk [vmem:[#allocation2 + $0x4c] sm:$0xf] %vm172_vm0, %v2795_v0  ;;  %v419_v15 = vrot.slane %v417_v6, 7  ;;  %v427_v16 = vrot.slane %v425_v8, 7 }
  0x18   : > { %195 = vst.msk [vmem:[#allocation2 + $0x54] sm:$0xf] %vm172_vm0, %v2795_v0  ;;  %196 = vst.msk [vmem:[#allocation2 + $0x58] sm:$0xf] %vm172_vm0, %v2795_v0  ;;  %v652_v17 = vld [vmem:[#allocation2 + $0x78] sm:$0xf] }
  0x19   : > { %197 = vst.msk [vmem:[#allocation2 + $0x5c] sm:$0x1] %vm175_vm1, %v2795_v0  ;;  %200 = vst.msk [vmem:[#allocation2 + $0x68] sm:$0x1] %vm175_vm1, %v2795_v0  ;;  %v408_v18 = vshrl.u32 %v245_v10, 16  ;;  %v402_v21 = vrot.slane %v400_v12, 7  ;;  %v422_v24 = vor.u32 %v420_v7, %v419_v15  ;;  %v430_v26 = vor.u32 %v428_v9, %v427_v16 }
  0x1a   : > { %198 = vst.msk [vmem:[#allocation2 + $0x60] sm:$0xf] %vm172_vm0, %v2795_v0  ;;  %199 = vst.msk [vmem:[#allocation2 + $0x64] sm:$0xf] %vm172_vm0, %v2795_v0  ;;  %v656_v20 = vld [vmem:[#allocation2 + $0x80] sm:$0x1] }
  0x1b   : > { %201 = vst.msk [vmem:[#allocation2 + $0x6c] sm:$0xf] %vm172_vm0, %v2795_v0  ;;  %202 = vst.msk [vmem:[#allocation2 + $0x70] sm:$0xf] %vm172_vm0, %v2795_v0  ;;  %v411_v22 = vshll.u32 %v245_v10, 16  ;;  %v423_v25 = vrot.slane %v419_v15, 4  ;;  %v405_v29 = vor.u32 %v403_v13, %v402_v21 }
  0x1c   : > { %203 = vst.msk [vmem:[#allocation2 + $0x74] sm:$0x1] %vm175_vm1, %v2795_v0  ;;  %209 = vst.msk [vmem:[#allocation2 + $0x8c] sm:$0x1] %vm175_vm1, %v2795_v0  ;;  %v230_v23 = vld [vmem:[%s2904_s22 + $0x8] sm:$0xf] }
  0x1d   : > { %207 = vst.msk [vmem:[#allocation2 + $0x84] sm:$0xf] %vm172_vm0, %v2795_v0  ;;  %208 = vst.msk [vmem:[#allocation2 + $0x88] sm:$0xf] %vm172_vm0, %v2795_v0  ;;  %v432_v27 = vrot.slane %v427_v16, 4  ;;  %v406_v30 = vrot.slane %v402_v21, 4 }
  0x1e   : > { %210 = vst.msk [vmem:[#allocation2 + $0x90] sm:$0xf] %vm172_vm0, %v2795_v0  ;;  %211 = vst.msk [vmem:[#allocation2 + $0x94] sm:$0xf] %vm172_vm0, %v2795_v0  ;;  %v410_v31 = vrot.slane %v408_v18, 7  ;;  %v281_v33 = vshrl.u32 %v230_v23, 16 }
  0x1f   : > { %212 = vst.msk [vmem:[#allocation2 + $0x98] sm:$0x1] %vm175_vm1, %v2795_v0  ;;  %215 = vst.msk [vmem:[#allocation2 + $0xa4] sm:$0x1] %vm175_vm1, %v2795_v0  ;;  %v231_v32 = vld [vmem:[%s2904_s22 + $0xc] sm:$0xf] }
  0x20   : > { %213 = vst.msk [vmem:[#allocation2 + $0x9c] sm:$0xf] %vm172_vm0, %v2795_v0  ;;  %214 = vst.msk [vmem:[#allocation2 + $0xa0] sm:$0xf] %vm172_vm0, %v2795_v0  ;;  %v284_v38 = vshll.u32 %v230_v23, 16  ;;  %v413_v40 = vor.u32 %v411_v22, %v410_v31  ;;  %v415_v41 = vrot.slane %v410_v31, 4 }
  0x21   : > { %216 = vst.msk [vmem:[#allocation2 + $0xa8] sm:$0xf] %vm172_vm0, %v2795_v0  ;;  %217 = vst.msk [vmem:[#allocation2 + $0xac] sm:$0xf] %vm172_vm0, %v2795_v0  ;;  %v228_v39 = vld [vmem:[%s2904_s22] sm:$0xf] }
  0x22   : > { %218 = vst.msk [vmem:[#allocation2 + $0xb0] sm:$0x1] %vm175_vm1, %v2795_v0  ;;  %221 = vst.msk [vmem:[#allocation2 + $0xbc] sm:$0x1] %vm175_vm1, %v2795_v0  ;;  %v645_v28 = vld [vmem:[#allocation2 + $0x6c] sm:$0xf] }
  0x23   : > { %219 = vst.msk [vmem:[#allocation2 + $0xb4] sm:$0xf] %vm172_vm0, %v2795_v0  ;;  %220 = vst.msk [vmem:[#allocation2 + $0xb8] sm:$0xf] %vm172_vm0, %v2795_v0  ;;  %v649_v37 = vld [vmem:[#allocation2 + $0x74] sm:$0x1] }
  0x24   : > { %222 = vst.msk [vmem:[#allocation2 + $0xc0] sm:$0xf] %vm172_vm0, %v2795_v0  ;;  %223 = vst.msk [vmem:[#allocation2 + $0xc4] sm:$0xf] %vm172_vm0, %v2795_v0  ;;  %v283_v43 = vrot.slane %v281_v33, 7  ;;  %v289_v46 = vshrl.u32 %v231_v32, 16 }
  0x25   : > { %224 = vst.msk [vmem:[#allocation2 + $0xc8] sm:$0x1] %vm175_vm1, %v2795_v0  ;;  %227 = vst.msk [vmem:[#allocation2 + $0xd4] sm:$0x1] %vm175_vm1, %v2795_v0  ;;  %v596_v44 = vld [vmem:[#allocation2 + $0x18] sm:$0xf] }
  0x26   : > { %225 = vst.msk [vmem:[#allocation2 + $0xcc] sm:$0xf] %vm172_vm0, %v2795_v0  ;;  %226 = vst.msk [vmem:[#allocation2 + $0xd0] sm:$0xf] %vm172_vm0, %v2795_v0  ;;  %v229_v45 = vld [vmem:[%s2904_s22 + $0x4] sm:$0xf]  ;;  %v286_v53 = vor.u32 %v284_v38, %v283_v43 }
  0x27   : > { %vm2912_vm5 = vmand %vm175_vm1, %vm260_vm2  ;;  %v292_v47 = vshll.u32 %v231_v32, 16  ;;  %v264_v48 = vshrl.u32 %v228_v39, 16  ;;  %v267_v49 = vshll.u32 %v228_v39, 16  ;;  %v234_v50 = vld [vmem:[%s2904_s22 + $0x18] sm:$0xf]  ;;  %v287_v54 = vrot.slane %v283_v43, 4 }
  0x28   : > { %vm2918_vm6 = vmor %vm260_vm2, %vm261_vm3  ;;  %v657_v36 = vsel %vm2912_vm5, %v432_v27, %v656_v20  ;;  %v650_v52 = vsel %vm2912_vm5, %v415_v41, %v649_v37  ;;  %v235_v55 = vld [vmem:[%s2904_s22 + $0x1c] sm:$0xf]  ;;  %v2763_v56 = vld [vmem:[%s3644_s1 + $0x48] sm:$0xff]   ;;  %v291_v57 = vrot.slane %v289_v46, 7  ;;  %v272_v60 = vshrl.u32 %v229_v45, 16 }
  0x29   : > { %vm2924_vm7 = vmand %vm172_vm0, %vm585_vm4  ;;  %v431_v34 = vsel %vm2918_vm6, %v423_v25, %v430_v26  ;;  %658 = vst [vmem:[#allocation2 + $0x80] sm:$0x1] %v657_v36  ;;  %v414_v51 = vsel %vm2918_vm6, %v406_v30, %v413_v40  ;;  %v600_v58 = vld [vmem:[#allocation2 + $0x20] sm:$0x1]  ;;  %v266_v59 = vrot.slane %v264_v48, 7  ;;  %v275_v61 = vshll.u32 %v229_v45, 16  ;;  %2576 = vmatprep.subr.bf16.mxu0 %v2763_v56  ;;  %2706 = vmatprep.subr.bf16.mxu1 %v2763_v56 }
  0x2a   : > { %v653_v35 = vsel %vm2924_vm7, %v422_v24, %v652_v17  ;;  %655 = vst.msk [vmem:[#allocation2 + $0x7c] sm:$0xf] %vm172_vm0, %v431_v34  ;;  %v646_v42 = vsel %vm2924_vm7, %v405_v29, %v645_v28  ;;  %648 = vst.msk [vmem:[#allocation2 + $0x70] sm:$0xf] %vm172_vm0, %v414_v51  ;;  %v597_v62 = vsel %vm2924_vm7, %v286_v53, %v596_v44  ;;  %v587_v63 = vld [vmem:[#allocation2 + $0xc] sm:$0xf]  ;;  %2577 = vmatpush3.bf16.msra.mxu0 %v2763_v56 }
  0x2b   : > { %654 = vst [vmem:[#allocation2 + $0x78] sm:$0xf] %v653_v35  ;;  %647 = vst [vmem:[#allocation2 + $0x6c] sm:$0xf] %v646_v42  ;;  %v315_v0 = vshrl.u32 %v234_v50, 16  ;;  %v318_v1 = vshll.u32 %v234_v50, 16  ;;  %v294_v3 = vor.u32 %v292_v47, %v291_v57  ;;  %v269_v5 = vor.u32 %v267_v49, %v266_v59  ;;  %2712 = vmatpush3.bf16.msra.mxu1 %v2763_v56 }
  0x2c   : > { %651 = vst [vmem:[#allocation2 + $0x74] sm:$0x1] %v650_v52  ;;  %v323_v2 = vshrl.u32 %v235_v55, 16  ;;  %v296_v4 = vrot.slane %v291_v57, 4  ;;  %598 = vst [vmem:[#allocation2 + $0x18] sm:$0xf] %v597_v62 }
  0x2d   : > { %v270_v6 = vrot.slane %v266_v59, 4  ;;  %v610_v7 = vld [vmem:[#allocation2 + $0x30] sm:$0xf]  ;;  %v274_v8 = vrot.slane %v272_v60, 7  ;;  %v593_v9 = vld [vmem:[#allocation2 + $0x14] sm:$0x1]  ;;  %v295_v17 = vsel %vm2918_vm6, %v287_v54, %v294_v3  ;;  %v588_v20 = vsel %vm2924_vm7, %v269_v5, %v587_v63 }
  0x2e   : > { %v317_v10 = vrot.slane %v315_v0, 7  ;;  %v325_v12 = vrot.slane %v323_v2, 7  ;;  %v326_v13 = vshll.u32 %v235_v55, 16  ;;  %v614_v15 = vld [vmem:[#allocation2 + $0x38] sm:$0x1]  ;;  %v601_v18 = vsel %vm2912_vm5, %v296_v4, %v600_v58  ;;  %v2764_v43 = vld [vmem:[%s3644_s1 + $0x40] sm:$0xff]  }
  0x2f   : > { %v248_v16 = vld [vmem:[%s2904_s22 + $0x50] sm:$0xf]  ;;  %v249_v21 = vld [vmem:[%s2904_s22 + $0x54] sm:$0xf]  ;;  %599 = vst.msk [vmem:[#allocation2 + $0x1c] sm:$0xf] %vm172_vm0, %v295_v17  ;;  %v277_v24 = vor.u32 %v275_v61, %v274_v8  ;;  %2578 = vmatprep.subr.bf16.mxu0 %v2764_v43  ;;  %2707 = vmatprep.subr.bf16.mxu1 %v2764_v43 }
  0x30   : > { %v2963_v23 = vld [vmem:[#allocation2 + $0x80] ss:$0 sps:$4 sm:$0x11]   ;;  %602 = vst [vmem:[#allocation2 + $0x20] sm:$0x1] %v601_v18  ;;  %v320_v25 = vor.u32 %v318_v1, %v317_v10  ;;  %v328_v26 = vor.u32 %v326_v13, %v325_v12  ;;  %v279_v27 = vrot.slane %v274_v8, 4  ;;  %2579 = vmatpush3.bf16.msra.mxu0 %v2764_v43  ;;  %2713 = vmatpush3.bf16.msra.mxu1 %v2764_v43 }
  0x31   : > { %589 = vst [vmem:[#allocation2 + $0xc] sm:$0xf] %v588_v20  ;;  %v321_v28 = vrot.slane %v317_v10, 4  ;;  %v330_v29 = vrot.slane %v325_v12, 4  ;;  %v434_v30 = vshrl.u32 %v248_v16, 16  ;;  %v1140_v33 = vrot.slane %v2963_v23, 1 }
  0x32   : > { %v2961_v22 = vld [vmem:[#allocation2 + $0x78] sm:$0xff]   ;;  %v278_v34 = vsel %vm2918_vm6, %v270_v6, %v277_v24  ;;  %v611_v35 = vsel %vm2924_vm7, %v320_v25, %v610_v7  ;;  %v2973_v36 = vld [vmem:[#allocation2 + $0x6c] sm:$0xff]   ;;  %v594_v38 = vsel %vm2912_vm5, %v279_v27, %v593_v9  ;;  %v659_v42 = vld [vmem:[#allocation2 + $0x84] sm:$0xf]  ;;  %v437_v45 = vshll.u32 %v248_v16, 16 }
  0x33   : > { %v250_v31 = vld [vmem:[%s2904_s22 + $0x58] sm:$0xf]  ;;  %v1139_v32 = vrot.slane %v2961_v22, 1  ;;  %v2975_v37 = vld [vmem:[#allocation2 + $0x74] ss:$0 sps:$4 sm:$0x11]   ;;  %v329_v39 = vsel %vm2918_vm6, %v321_v28, %v328_v26  ;;  %v615_v40 = vsel %vm2912_vm5, %v330_v29, %v614_v15 }
  0x34   : > { %590 = vst.msk [vmem:[#allocation2 + $0x10] sm:$0xf] %vm172_vm0, %v278_v34  ;;  %612 = vst [vmem:[#allocation2 + $0x30] sm:$0xf] %v611_v35  ;;  %v436_v41 = vrot.slane %v434_v30, 7  ;;  %v442_v46 = vshrl.u32 %v249_v21, 16 }
  0x35   : > { %v1141_v44 = vsel %vm1108_vm8, %v1139_v32, %v1140_v33  ;;  %595 = vst [vmem:[#allocation2 + $0x14] sm:$0x1] %v594_v38  ;;  %613 = vst.msk [vmem:[#allocation2 + $0x34] sm:$0xf] %vm172_vm0, %v329_v39  ;;  %v445_v47 = vshll.u32 %v249_v21, 16  ;;  %v1136_v48 = vrot.slane %v2973_v36, 1 }
  0x36   : > { %616 = vst [vmem:[#allocation2 + $0x38] sm:$0x1] %v615_v40  ;;  %1177 = vrot.lane.b32.xlu0 %v1141_v44, %s2796_s27  ;;  %v1137_v49 = vrot.slane %v2975_v37, 1  ;;  %v440_v50 = vrot.slane %v436_v41, 4  ;;  %v663_v51 = vld [vmem:[#allocation2 + $0x8c] sm:$0x1]  ;;  %v439_v54 = vor.u32 %v437_v45, %v436_v41 }
  0x37   : > { %v251_v52 = vld [vmem:[%s2904_s22 + $0x5c] sm:$0xf]  ;;  %v451_v53 = vshrl.u32 %v250_v31, 16  ;;  %v444_v55 = vrot.slane %v442_v46, 7  ;;  %v454_v56 = vshll.u32 %v250_v31, 16  ;;  %vm1189_vm10 = vcmask 261120  }
  0x38   : > { %v459_v57 = vshrl.u32 %v251_v52, 16  ;;  %v666_v58 = vld [vmem:[#allocation2 + $0x90] sm:$0xf]  ;;  %v1138_v59 = vsel %vm1108_vm8, %v1136_v48, %v1137_v49  ;;  %v2994_v60 = vld [vmem:[#allocation2 + $0x18] sm:$0xff]   ;;  %v660_v1 = vsel %vm2924_vm7, %v439_v54, %v659_v42  ;;  %vm883_vm9 = vsmask.f32 7424 }
  0x39   : > { %v453_v61 = vrot.slane %v451_v53, 7  ;;  %1175 = vrot.lane.b32.xlu1 %v1138_v59, %s2796_s27  ;;  %v2997_v62 = vld [vmem:[#allocation2 + $0x20] ss:$0 sps:$4 sm:$0x11]   ;;  %v447_v63 = vor.u32 %v445_v47, %v444_v55  ;;  %v449_v0 = vrot.slane %v444_v55, 4  ;;  %v1115_v2 = vrot.slane %v2994_v60, 1 }
  0x3a   : > { %661 = vst [vmem:[#allocation2 + $0x84] sm:$0xf] %v660_v1  ;;  %v461_v5 = vrot.slane %v459_v57, 7  ;;  %v1116_v6 = vrot.slane %v2997_v62, 1  ;;  %v670_v10 = vld [vmem:[#allocation2 + $0x98] sm:$0x1] }
  0x3b   : > { %v456_v3 = vor.u32 %v454_v56, %v453_v61  ;;  %v457_v4 = vrot.slane %v453_v61, 4  ;;  %v2733_v7 = vld [vmem:[#allocation2 + $0xc] sm:$0xff]   ;;  %v448_v8 = vsel %vm2918_vm6, %v440_v50, %v447_v63  ;;  %v664_v9 = vsel %vm2912_vm5, %v449_v0, %v663_v51  ;;  %v233_v34 = vld [vmem:[%s2904_s22 + $0x14] sm:$0xf]  ;;  %v2767_v42 = vld [vmem:[%s3644_s1 + $0x38] sm:$0xff]  }
  0x3c   : > { %v2734_v12 = vld [vmem:[#allocation2 + $0x14] ss:$0 sps:$4 sm:$0x11]   ;;  %662 = vst.msk [vmem:[#allocation2 + $0x88] sm:$0xf] %vm172_vm0, %v448_v8  ;;  %v1117_v16 = vsel %vm1108_vm8, %v1115_v2, %v1116_v6  ;;  %v1112_v17 = vrot.slane %v2733_v7, 1  ;;  %2580 = vmatprep.subr.bf16.mxu0 %v2767_v42  ;;  %2708 = vmatprep.subr.bf16.mxu1 %v2767_v42 }
  0x3d   : > { %v3007_v13 = vld [vmem:[#allocation2 + $0x30] sm:$0xff]   ;;  %665 = vst [vmem:[#allocation2 + $0x8c] sm:$0x1] %v664_v9  ;;  %v667_v15 = vsel %vm2924_vm7, %v456_v3, %v666_v58  ;;  %v462_v18 = vshll.u32 %v251_v52, 16  ;;  %1161 = vrot.lane.b32.xlu1 %v1117_v16, %s2796_s27  ;;  %v1113_v20 = vrot.slane %v2734_v12, 1  ;;  %v466_v25 = vrot.slane %v461_v5, 4  ;;  %2581 = vmatpush3.bf16.msra.mxu0 %v2767_v42 }
  0x3e   : > { %668 = vst [vmem:[#allocation2 + $0x90] sm:$0xf] %v667_v15  ;;  %v3014_v21 = vld [vmem:[#allocation2 + $0x38] ss:$0 sps:$4 sm:$0x11]   ;;  %v1121_v24 = vrot.slane %v3007_v13, 1  ;;  %2714 = vmatpush3.bf16.msra.mxu1 %v2767_v42 }
  0x3f   : > { %v464_v26 = vor.u32 %v462_v18, %v461_v5  ;;  %v897_v27 = vshrl.u32 %v2733_v7, 16  ;;  %v899_v28 = vshll.u32 %v2733_v7, 16  ;;  %v904_v29 = vshll.u32 %v2734_v12, 16  ;;  %v232_v30 = vld [vmem:[%s2904_s22 + $0x10] sm:$0xf] }
  0x40   : > { %v1114_v31 = vsel %vm1108_vm8, %v1112_v17, %v1113_v20  ;;  %v1122_v32 = vrot.slane %v3014_v21, 1  ;;  %v671_v33 = vsel %vm2912_vm5, %v466_v25, %v670_v10  ;;  %v298_v35 = vshrl.u32 %v232_v30, 16  ;;  %v603_v47 = vld [vmem:[#allocation2 + $0x24] sm:$0xf]  ;;  %v2768_v48 = vld [vmem:[%s3644_s1 + $0x30] sm:$0xff]  }
  0x41   : > { %1159 = vrot.lane.b32.xlu0 %v1114_v31, %s2796_s27  ;;  %v465_v38 = vsel %vm2918_vm6, %v457_v4, %v464_v26  ;;  %672 = vst [vmem:[#allocation2 + $0x98] sm:$0x1] %v671_v33  ;;  %v901_v39 = vrot.slane %v899_v28, 1  ;;  %v906_v40 = vrot.slane %v904_v29, 1  ;;  %v301_v41 = vshll.u32 %v232_v30, 16  ;;  %2582 = vmatprep.subr.bf16.mxu0 %v2768_v48 }
  0x42   : > { %v1123_v43 = vsel %vm1108_vm8, %v1121_v24, %v1122_v32  ;;  %669 = vst.msk [vmem:[#allocation2 + $0x94] sm:$0xf] %vm172_vm0, %v465_v38  ;;  %v300_v44 = vrot.slane %v298_v35, 7  ;;  %v306_v45 = vshrl.u32 %v233_v34, 16  ;;  %v309_v46 = vshll.u32 %v233_v34, 16  ;;  %2709 = vmatprep.subr.bf16.mxu1 %v2768_v48  ;;  %2583 = vmatpush3.bf16.msra.mxu0 %v2768_v48 }
  0x43   : > { %1165 = vrot.lane.b32.xlu1 %v1123_v43, %s2796_s27  ;;  %v3035_v49 = vld [vmem:[#allocation2 + $0x84] sm:$0xff]   ;;  %v902_v50 = vor.u32 %v901_v39, %v897_v27  ;;  %v909_v51 = vshrl.u32 %v2994_v60, 16  ;;  %v911_v58 = vshll.u32 %v2994_v60, 16  ;;  %v607_v63 = vld [vmem:[#allocation2 + $0x2c] sm:$0x1]  ;;  %v916_v0 = vshll.u32 %v2997_v62, 16  ;;  %2715 = vmatpush3.bf16.msra.mxu1 %v2768_v48 }
  0x44   : > { %v3038_v52 = vld [vmem:[#allocation2 + $0x8c] ss:$0 sps:$4 sm:$0x11]   ;;  %v303_v53 = vor.u32 %v301_v41, %v300_v44  ;;  %v304_v54 = vrot.slane %v300_v44, 4  ;;  %v1142_v55 = vrot.slane %v3035_v49, 1  ;;  %v308_v57 = vrot.slane %v306_v45, 7 }
  0x45   : > { %v907_v56 = vsel %vm883_vm9, %v902_v50, %v906_v40  ;;  %v1143_v59 = vrot.slane %v3038_v52, 1  ;;  %v993_v1 = vshrl.u32 %v2973_v36, 16  ;;  %v913_v60 = vrot.slane %v911_v58, 1  ;;  %v252_v41 = vld [vmem:[%s2904_s22 + $0x60] sm:$0xf] }
  0x46   : > { %v604_v61 = vsel %vm2924_vm7, %v303_v53, %v603_v47  ;;  %v311_v2 = vor.u32 %v309_v46, %v308_v57  ;;  %v313_v3 = vrot.slane %v308_v57, 4  ;;  %v995_v4 = vshll.u32 %v2973_v36, 16  ;;  %v253_v45 = vld [vmem:[%s2904_s22 + $0x64] sm:$0xf]  ;;  %v254_v57 = vld [vmem:[%s2904_s22 + $0x68] sm:$0xf] }
  0x47   : > { %1078 = vrot.lane.b32.xlu1 %v907_v56, %s2797_s5  ;;  %605 = vst [vmem:[#allocation2 + $0x24] sm:$0xf] %v604_v61  ;;  %v1144_v5 = vsel %vm1108_vm8, %v1142_v55, %v1143_v59  ;;  %v918_v7 = vrot.slane %v916_v0, 1  ;;  %v914_v10 = vor.u32 %v913_v60, %v909_v51  ;;  %v1000_v36 = vshll.u32 %v2975_v37, 16  ;;  %v255_v0 = vld [vmem:[%s2904_s22 + $0x6c] sm:$0xf] }
  0x48   : > { %v2740_v6 = vld [vmem:[#allocation2 + $0x98] ss:$0 sps:$4 sm:$0x11]   ;;  %1179 = vrot.lane.b32.xlu0 %v1144_v5, %s2796_s27  ;;  %v312_v8 = vsel %vm2918_vm6, %v304_v54, %v311_v2  ;;  %v608_v9 = vsel %vm2912_vm5, %v313_v3, %v607_v63  ;;  %v997_v12 = vrot.slane %v995_v4, 1  ;;  %v1005_v24 = vshrl.u32 %v2961_v22, 16 }
  0x49   : > { %v3052_v62 = vld [vmem:[#allocation2 + $0x90] sm:$0xff]   ;;  %v1146_v15 = vrot.slane %v2740_v6, 1  ;;  %606 = vst.msk [vmem:[#allocation2 + $0x28] sm:$0xf] %vm172_vm0, %v312_v8  ;;  %609 = vst [vmem:[#allocation2 + $0x2c] sm:$0x1] %v608_v9  ;;  %v919_v18 = vsel %vm883_vm9, %v914_v10, %v918_v7 }
  0x4a   : > { %v1036_v16 = vshll.u32 %v2740_v6, 16  ;;  %v1145_v17 = vrot.slane %v3052_v62, 1  ;;  %v998_v20 = vor.u32 %v997_v12, %v993_v1  ;;  %v1002_v25 = vrot.slane %v1000_v36, 1  ;;  %v236_v4 = vld [vmem:[%s2904_s22 + $0x20] sm:$0xf] }
  0x4b   : > { %1080 = vrot.lane.b32.xlu1 %v919_v18, %s2797_s5  ;;  %v1029_v26 = vshrl.u32 %v3052_v62, 16  ;;  %v1031_v27 = vshll.u32 %v3052_v62, 16  ;;  %v1007_v28 = vshll.u32 %v2961_v22, 16  ;;  %v1012_v29 = vshll.u32 %v2963_v23, 16  ;;  %v673_v9 = vld [vmem:[#allocation2 + $0x9c] sm:$0xf] }
  0x4c   : > { %v1147_v37 = vsel %vm1108_vm8, %v1145_v17, %v1146_v15  ;;  %v1017_v30 = vshrl.u32 %v3035_v49, 16  ;;  %v1019_v31 = vshll.u32 %v3035_v49, 16  ;;  %v1038_v33 = vrot.slane %v1036_v16, 1  ;;  %v677_v36 = vld [vmem:[#allocation2 + $0xa4] sm:$0x1] }
  0x4d   : > { %1181 = vrot.lane.b32.xlu0 %v1147_v37, %s2796_s27  ;;  %v1033_v32 = vrot.slane %v1031_v27, 1  ;;  %v1009_v34 = vrot.slane %v1007_v28, 1  ;;  %v1024_v35 = vshll.u32 %v3038_v52, 16  ;;  %v1014_v38 = vrot.slane %v1012_v29, 1 }
  0x4e   : > { %v1021_v39 = vrot.slane %v1019_v31, 1  ;;  %v933_v22 = vshrl.u32 %v3007_v13, 16  ;;  %v935_v40 = vshll.u32 %v3007_v13, 16  ;;  %v940_v44 = vshll.u32 %v3014_v21, 16 }
  0x4f   : > { %v1034_v23 = vor.u32 %v1033_v32, %v1029_v26  ;;  %v1010_v42 = vor.u32 %v1009_v34, %v1005_v24  ;;  %v1026_v43 = vrot.slane %v1024_v35, 1  ;;  %v1003_v47 = vsel %vm883_vm9, %v998_v20, %v1002_v25  ;;  %v237_v24 = vld [vmem:[%s2904_s22 + $0x24] sm:$0xf] }
  0x50   : > { %v3078_v46 = vld [vmem:[#allocation2 + $0x24] sm:$0xff]   ;;  %v1022_v48 = vor.u32 %v1021_v39, %v1017_v30  ;;  %v937_v49 = vrot.slane %v935_v40, 1  ;;  %v2742_v50 = vld [vmem:[#allocation2 + $0x2c] ss:$0 sps:$4 sm:$0x11]   ;;  %v942_v52 = vrot.slane %v940_v44, 1 }
  0x51   : > { %v1039_v51 = vsel %vm883_vm9, %v1034_v23, %v1038_v33  ;;  %v3083_v13 = vsel %vm883_vm9, %v1010_v42, %v1014_v38  ;;  %v468_v53 = vshrl.u32 %v252_v41, 16  ;;  %v1118_v21 = vrot.slane %v3078_v46, 1  ;;  %v238_v33 = vld [vmem:[%s2904_s22 + $0x28] sm:$0xf]  ;;  %v684_v39 = vld [vmem:[#allocation2 + $0xb0] sm:$0x1] }
  0x52   : > { %1100 = vrot.lane.b32.xlu1 %v1039_v51, %s2797_s5  ;;  %v921_v54 = vshrl.u32 %v3078_v46, 16  ;;  %v923_v55 = vshll.u32 %v3078_v46, 16  ;;  %v3090_v56 = vsel %vm883_vm9, %v1022_v48, %v1026_v43  ;;  %v1119_v58 = vrot.slane %v2742_v50, 1  ;;  %v680_v38 = vld [vmem:[#allocation2 + $0xa8] sm:$0xf] }
  0x53   : > { %v928_v59 = vshll.u32 %v2742_v50, 16  ;;  %v938_v61 = vor.u32 %v937_v49, %v933_v22  ;;  %v470_v63 = vrot.slane %v468_v53, 7  ;;  %v471_v2 = vshll.u32 %v252_v41, 16  ;;  %v617_v44 = vld [vmem:[#allocation2 + $0x3c] sm:$0xf] }
  0x54   : > { %v925_v1 = vrot.slane %v923_v55, 1  ;;  %v476_v3 = vshrl.u32 %v253_v45, 16  ;;  %v479_v60 = vshll.u32 %v253_v45, 16  ;;  %v1120_v5 = vsel %vm1108_vm8, %v1118_v21, %v1119_v58  ;;  %v239_v45 = vld [vmem:[%s2904_s22 + $0x2c] sm:$0xf] }
  0x55   : > { %v930_v6 = vrot.slane %v928_v59, 1  ;;  %v943_v7 = vsel %vm883_vm9, %v938_v61, %v942_v52  ;;  %v474_v8 = vrot.slane %v470_v63, 4  ;;  %1163 = vrot.lane.b32.xlu0 %v1120_v5, %s2796_s27  ;;  %v473_v12 = vor.u32 %v471_v2, %v470_v63  ;;  %v256_v51 = vld [vmem:[%s2904_s22 + $0x70] sm:$0xf] }
  0x56   : > { %v926_v10 = vor.u32 %v925_v1, %v921_v54  ;;  %v478_v15 = vrot.slane %v476_v3, 7  ;;  %v485_v16 = vshrl.u32 %v254_v57, 16  ;;  %v488_v17 = vshll.u32 %v254_v57, 16  ;;  %v621_v54 = vld [vmem:[#allocation2 + $0x44] sm:$0x1] }
  0x57   : > { %v493_v18 = vshrl.u32 %v255_v0, 16  ;;  %v496_v20 = vshll.u32 %v255_v0, 16  ;;  %v332_v25 = vshrl.u32 %v236_v4, 16  ;;  %v674_v37 = vsel %vm2924_vm7, %v473_v12, %v673_v9  ;;  %v624_v57 = vld [vmem:[#allocation2 + $0x48] sm:$0xf] }
  0x58   : > { %v931_v26 = vsel %vm883_vm9, %v926_v10, %v930_v6  ;;  %v481_v27 = vor.u32 %v479_v60, %v478_v15  ;;  %v483_v28 = vrot.slane %v478_v15, 4  ;;  %675 = vst [vmem:[#allocation2 + $0x9c] sm:$0xf] %v674_v37  ;;  %v487_v29 = vrot.slane %v485_v16, 7  ;;  %v257_v0 = vld [vmem:[%s2904_s22 + $0x74] sm:$0xf] }
  0x59   : > { %1082 = vrot.lane.b32.xlu1 %v931_v26, %s2797_s5  ;;  %v495_v30 = vrot.slane %v493_v18, 7  ;;  %v334_v31 = vrot.slane %v332_v25, 7  ;;  %v335_v32 = vshll.u32 %v236_v4, 16  ;;  %1094 = vrot.lane.b32.xlu0 %v1003_v47, %s2797_s5  ;;  %v340_v22 = vshrl.u32 %v237_v24, 16  ;;  %v3126_v1 = vld [vmem:[%s2904_s22 + $0x78] sm:$0xf] }
  0x5a   : > { %v482_v34 = vsel %vm2918_vm6, %v474_v8, %v481_v27  ;;  %v678_v35 = vsel %vm2912_vm5, %v483_v28, %v677_v36  ;;  %v343_v40 = vshll.u32 %v237_v24, 16  ;;  %v490_v41 = vor.u32 %v488_v17, %v487_v29  ;;  %v628_v8 = vld [vmem:[#allocation2 + $0x50] sm:$0x1]  ;;  %v687_v9 = vld [vmem:[#allocation2 + $0xb4] sm:$0xf]  ;;  %v3143_v28 = vld [vmem:[%s3644_s1 + $0x28] sm:$0xff]  }
  0x5b   : > { %676 = vst.msk [vmem:[#allocation2 + $0xa0] sm:$0xf] %vm172_vm0, %v482_v34  ;;  %679 = vst [vmem:[#allocation2 + $0xa4] sm:$0x1] %v678_v35  ;;  %v491_v23 = vrot.slane %v487_v29, 4  ;;  %v498_v42 = vor.u32 %v496_v20, %v495_v30  ;;  %v500_v43 = vrot.slane %v495_v30, 4  ;;  %v337_v47 = vor.u32 %v335_v32, %v334_v31  ;;  %2616 = vmatprep.subr.bf16.mxu1 %v3143_v28 }
  0x5c   : > { %v338_v48 = vrot.slane %v334_v31, 4  ;;  %v342_v49 = vrot.slane %v340_v22, 7  ;;  %v349_v50 = vshrl.u32 %v238_v33, 16  ;;  %v681_v53 = vsel %vm2924_vm7, %v490_v41, %v680_v38 }
  0x5d   : > { %1084 = vrot.lane.b32.xlu1 %v943_v7, %s2797_s5  ;;  %v499_v52 = vsel %vm2918_vm6, %v491_v23, %v498_v42  ;;  %v685_v21 = vsel %vm2912_vm5, %v500_v43, %v684_v39  ;;  %v352_v55 = vshll.u32 %v238_v33, 16  ;;  %1096 = vrot.lane.b32.xlu0 %v3083_v13, %s2797_s5  ;;  %682 = vst [vmem:[#allocation2 + $0xa8] sm:$0xf] %v681_v53  ;;  %v357_v2 = vshrl.u32 %v239_v45, 16 }
  0x5e   : > { %683 = vst.msk [vmem:[#allocation2 + $0xac] sm:$0xf] %vm172_vm0, %v499_v52  ;;  %686 = vst [vmem:[#allocation2 + $0xb0] sm:$0x1] %v685_v21  ;;  %v345_v58 = vor.u32 %v343_v40, %v342_v49  ;;  %v347_v59 = vrot.slane %v342_v49, 4  ;;  %v618_v61 = vsel %vm2924_vm7, %v337_v47, %v617_v44  ;;  %v351_v63 = vrot.slane %v349_v50, 7 }
  0x5f   : > { %619 = vst [vmem:[#allocation2 + $0x3c] sm:$0xf] %v618_v61  ;;  %v360_v3 = vshll.u32 %v239_v45, 16  ;;  %v502_v60 = vshrl.u32 %v256_v51, 16  ;;  %v505_v4 = vshll.u32 %v256_v51, 16  ;;  %v359_v10 = vrot.slane %v357_v2, 7 }
  0x60   : > { %v346_v13 = vsel %vm2918_vm6, %v338_v48, %v345_v58  ;;  %v622_v5 = vsel %vm2912_vm5, %v347_v59, %v621_v54  ;;  %v354_v6 = vor.u32 %v352_v55, %v351_v63  ;;  %v355_v7 = vrot.slane %v351_v63, 4  ;;  %v3172_v55 = vld [vmem:[%s3644_s1 + $0x88] sm:$0xff]   ;;  %v691_v63 = vld [vmem:[#allocation2 + $0xbc] sm:$0x1] }
  0x61   : > { %620 = vst.msk [vmem:[#allocation2 + $0x40] sm:$0xf] %vm172_vm0, %v346_v13  ;;  %623 = vst [vmem:[#allocation2 + $0x44] sm:$0x1] %v622_v5  ;;  %v504_v12 = vrot.slane %v502_v60, 7  ;;  %v510_v15 = vshrl.u32 %v257_v0, 16  ;;  %1098 = vrot.lane.b32.xlu0 %v3090_v56, %s2797_s5  ;;  %v362_v24 = vor.u32 %v360_v3, %v359_v10  ;;  %2660 = vmatprep.subr.bf16.mxu0 %v3172_v55 }
  0x62   : > { %v513_v36 = vshll.u32 %v257_v0, 16  ;;  %v3135_v16 = vld [vmem:[#allocation2 + $0x9c] sm:$0xff]   ;;  %v625_v17 = vsel %vm2924_vm7, %v354_v6, %v624_v57  ;;  %v519_v18 = vshrl.u32 %v3126_v1, 16  ;;  %v2744_v20 = vld [vmem:[#allocation2 + $0xa4] ss:$0 sps:$4 sm:$0x11]  }
  0x63   : > { %v364_v25 = vrot.slane %v359_v10, 4  ;;  %626 = vst [vmem:[#allocation2 + $0x48] sm:$0xf] %v625_v17  ;;  %v507_v26 = vor.u32 %v505_v4, %v504_v12  ;;  %v508_v27 = vrot.slane %v504_v12, 4  ;;  %v1041_v56 = vshrl.u32 %v3135_v16, 16 }
  0x64   : > { %v1043_v37 = vshll.u32 %v3135_v16, 16  ;;  %v1148_v29 = vrot.slane %v3135_v16, 1  ;;  %v512_v30 = vrot.slane %v510_v15, 7  ;;  %v1048_v31 = vshll.u32 %v2744_v20, 16  ;;  %v259_v60 = vld [vmem:[%s2904_s22 + $0x7c] sm:$0xf] }
  0x65   : > { %v3148_v32 = vld [vmem:[#allocation2 + $0xa8] sm:$0xff]   ;;  %v363_v33 = vsel %vm2918_vm6, %v355_v7, %v362_v24  ;;  %v629_v34 = vsel %vm2912_vm5, %v364_v25, %v628_v8  ;;  %v688_v35 = vsel %vm2924_vm7, %v507_v26, %v687_v9  ;;  %v2746_v39 = vld [vmem:[#allocation2 + $0xb0] ss:$0 sps:$4 sm:$0x11]   ;;  %v1149_v42 = vrot.slane %v2744_v20, 1 }
  0x66   : > { %v1045_v38 = vrot.slane %v1043_v37, 1  ;;  %627 = vst.msk [vmem:[#allocation2 + $0x4c] sm:$0xf] %vm172_vm0, %v363_v33  ;;  %630 = vst [vmem:[#allocation2 + $0x50] sm:$0x1] %v629_v34  ;;  %v515_v22 = vor.u32 %v513_v36, %v512_v30  ;;  %v1050_v40 = vrot.slane %v1048_v31, 1 }
  0x67   : > { %689 = vst [vmem:[#allocation2 + $0xb4] sm:$0xf] %v688_v35  ;;  %v1053_v41 = vshrl.u32 %v3148_v32, 16  ;;  %v1055_v23 = vshll.u32 %v3148_v32, 16  ;;  %v1060_v44 = vshll.u32 %v2746_v39, 16  ;;  %v1151_v50 = vrot.slane %v3148_v32, 1 }
  0x68   : > { %v1046_v43 = vor.u32 %v1045_v38, %v1041_v56  ;;  %v3160_v45 = vld [vmem:[#allocation2 + $0x3c] sm:$0xff]   ;;  %v516_v47 = vsel %vm2918_vm6, %v508_v27, %v515_v22  ;;  %v2748_v49 = vld [vmem:[#allocation2 + $0x44] ss:$0 sps:$4 sm:$0x11]   ;;  %v1152_v51 = vrot.slane %v2746_v39, 1  ;;  %v1150_v58 = vsel %vm1108_vm8, %v1148_v29, %v1149_v42 }
  0x69   : > { %v1057_v48 = vrot.slane %v1055_v23, 1  ;;  %690 = vst.msk [vmem:[#allocation2 + $0xb8] sm:$0xf] %vm172_vm0, %v516_v47  ;;  %v1062_v53 = vrot.slane %v1060_v44, 1  ;;  %v945_v21 = vshrl.u32 %v3160_v45, 16  ;;  %v947_v54 = vshll.u32 %v3160_v45, 16 }
  0x6a   : > { %v1051_v52 = vsel %vm883_vm9, %v1046_v43, %v1050_v40  ;;  %v952_v59 = vshll.u32 %v2748_v49, 16  ;;  %v1124_v61 = vrot.slane %v3160_v45, 1  ;;  %v1125_v2 = vrot.slane %v2748_v49, 1  ;;  %v240_v13 = vld [vmem:[%s2904_s22 + $0x30] sm:$0xf] }
  0x6b   : > { %1102 = vrot.lane.b32.xlu0 %v1051_v52, %s2797_s5  ;;  %v1058_v57 = vor.u32 %v1057_v48, %v1053_v41  ;;  %v949_v0 = vrot.slane %v947_v54, 1  ;;  %v517_v3 = vrot.slane %v512_v30, 4  ;;  %v521_v4 = vrot.slane %v519_v18, 7  ;;  %v694_v36 = vld [vmem:[#allocation2 + $0xc0] sm:$0xf] }
  0x6c   : > { %v954_v6 = vrot.slane %v952_v59, 1  ;;  %v1153_v9 = vsel %vm1108_vm8, %v1151_v50, %v1152_v51  ;;  %v522_v15 = vshll.u32 %v3126_v1, 16  ;;  %v1126_v20 = vsel %vm1108_vm8, %v1124_v61, %v1125_v2  ;;  %v241_v25 = vld [vmem:[%s2904_s22 + $0x34] sm:$0xf]  ;;  %v698_v22 = vld [vmem:[#allocation2 + $0xc8] sm:$0x1] }
  0x6d   : > { %v1063_v5 = vsel %vm883_vm9, %v1058_v57, %v1062_v53  ;;  %v3181_v7 = vld [vmem:[#allocation2 + $0x48] sm:$0xff]   ;;  %v950_v8 = vor.u32 %v949_v0, %v945_v21  ;;  %v2750_v10 = vld [vmem:[#allocation2 + $0x50] ss:$0 sps:$4 sm:$0x11]   ;;  %v692_v12 = vsel %vm2912_vm5, %v517_v3, %v691_v63  ;;  %v525_v37 = vrot.slane %v521_v4, 4 }
  0x6e   : > { %1104 = vrot.lane.b32.xlu1 %v1063_v5, %s2797_s5  ;;  %v957_v17 = vshrl.u32 %v3181_v7, 16  ;;  %v959_v18 = vshll.u32 %v3181_v7, 16  ;;  %v1127_v24 = vrot.slane %v3181_v7, 1  ;;  %693 = vst [vmem:[#allocation2 + $0xbc] sm:$0x1] %v692_v12  ;;  %v964_v27 = vshll.u32 %v2750_v10, 16 }
  0x6f   : > { %1183 = vrot.lane.b32.xlu0 %v1150_v58, %s2796_s27  ;;  %v955_v26 = vsel %vm883_vm9, %v950_v8, %v954_v6  ;;  %v524_v1 = vor.u32 %v522_v15, %v521_v4  ;;  %v527_v30 = vshrl.u32 %v259_v60, 16  ;;  %v530_v31 = vshll.u32 %v259_v60, 16  ;;  %v242_v40 = vld [vmem:[%s2904_s22 + $0x38] sm:$0xf]  ;;  %v631_v44 = vld [vmem:[#allocation2 + $0x54] sm:$0xf] }
  0x70   : > { %v3195_v56 = vld [vmem:[#allocation2 + $0xb4] sm:$0xff]   ;;  %v961_v29 = vrot.slane %v959_v18, 1  ;;  %v366_v33 = vshrl.u32 %v240_v13, 16  ;;  %v966_v34 = vrot.slane %v964_v27, 1  ;;  %v1128_v35 = vrot.slane %v2750_v10, 1 }
  0x71   : > { %v1065_v38 = vshrl.u32 %v3195_v56, 16  ;;  %v1067_v39 = vshll.u32 %v3195_v56, 16  ;;  %v1154_v23 = vrot.slane %v3195_v56, 1  ;;  %v529_v42 = vrot.slane %v527_v30, 7  ;;  %v243_v51 = vld [vmem:[%s2904_s22 + $0x3c] sm:$0xf] }
  0x72   : > { %1086 = vrot.lane.b32.xlu1 %v955_v26, %s2797_s5  ;;  %v962_v41 = vor.u32 %v961_v29, %v957_v17  ;;  %v695_v43 = vsel %vm2924_vm7, %v524_v1, %v694_v36  ;;  %v368_v48 = vrot.slane %v366_v33, 7  ;;  %v369_v49 = vshll.u32 %v240_v13, 16  ;;  %v635_v0 = vld [vmem:[#allocation2 + $0x5c] sm:$0x1]  ;;  %v638_v18 = vld [vmem:[#allocation2 + $0x60] sm:$0xf] }
  0x73   : > { %1185 = vrot.lane.b32.xlu0 %v1153_v9, %s2796_s27  ;;  %v1069_v47 = vrot.slane %v1067_v39, 1  ;;  %696 = vst [vmem:[#allocation2 + $0xc0] sm:$0xf] %v695_v43  ;;  %v374_v50 = vshrl.u32 %v241_v25, 16  ;;  %v532_v53 = vor.u32 %v530_v31, %v529_v42  ;;  %v534_v21 = vrot.slane %v529_v42, 4  ;;  %v3228_v31 = vld [vmem:[#allocation2] sm:$0xff]  }
  0x74   : > { %v967_v52 = vsel %vm883_vm9, %v962_v41, %v966_v34  ;;  %v377_v54 = vshll.u32 %v241_v25, 16  ;;  %v1129_v57 = vsel %vm1108_vm8, %v1127_v24, %v1128_v35  ;;  %v371_v61 = vor.u32 %v369_v49, %v368_v48  ;;  %v642_v30 = vld [vmem:[#allocation2 + $0x68] sm:$0x1] }
  0x75   : > { %v2752_v58 = vld [vmem:[#allocation2 + $0xbc] ss:$0 sps:$4 sm:$0x11]   ;;  %v1070_v59 = vor.u32 %v1069_v47, %v1065_v38  ;;  %v372_v63 = vrot.slane %v368_v48, 4  ;;  %v533_v2 = vsel %vm2918_vm6, %v525_v37, %v532_v53  ;;  %v699_v3 = vsel %vm2912_vm5, %v534_v21, %v698_v22 }
  0x76   : > { %1088 = vrot.lane.b32.xlu1 %v967_v52, %s2797_s5  ;;  %v376_v60 = vrot.slane %v374_v50, 7  ;;  %v383_v4 = vshrl.u32 %v242_v40, 16  ;;  %v1072_v13 = vshll.u32 %v2752_v58, 16  ;;  %v1155_v5 = vrot.slane %v2752_v58, 1  ;;  %697 = vst.msk [vmem:[#allocation2 + $0xc4] sm:$0xf] %vm172_vm0, %v533_v2 }
  0x77   : > { %1167 = vrot.lane.b32.xlu0 %v1126_v20, %s2796_s27  ;;  %700 = vst [vmem:[#allocation2 + $0xc8] sm:$0x1] %v699_v3  ;;  %v632_v6 = vsel %vm2924_vm7, %v371_v61, %v631_v44  ;;  %v386_v8 = vshll.u32 %v242_v40, 16  ;;  %v391_v15 = vshrl.u32 %v243_v51, 16  ;;  %v394_v17 = vshll.u32 %v243_v51, 16  ;;  %v3244_v44 = vld [vmem:[#allocation2 + $0xcc] sm:$0xff]  }
  0x78   : > { %v379_v9 = vor.u32 %v377_v54, %v376_v60  ;;  %v381_v10 = vrot.slane %v376_v60, 4  ;;  %633 = vst [vmem:[#allocation2 + $0x54] sm:$0xf] %v632_v6  ;;  %v385_v12 = vrot.slane %v383_v4, 7  ;;  %v1074_v36 = vrot.slane %v1072_v13, 1 }
  0x79   : > { %v1156_v20 = vsel %vm1108_vm8, %v1154_v23, %v1155_v5  ;;  %v393_v37 = vrot.slane %v391_v15, 7  ;;  %v3231_v35 = vld [vmem:[#allocation2 + $0x8] ss:$0 sps:$4 sm:$0x11]   ;;  %v885_v42 = vshrl.u32 %v3228_v31, 16  ;;  %v887_v43 = vshll.u32 %v3228_v31, 16 }
  0x7a   : > { %1169 = vrot.lane.b32.xlu1 %v1129_v57, %s2796_s27  ;;  %v380_v24 = vsel %vm2918_vm6, %v372_v63, %v379_v9  ;;  %v636_v25 = vsel %vm2912_vm5, %v381_v10, %v635_v0  ;;  %v388_v26 = vor.u32 %v386_v8, %v385_v12  ;;  %v1075_v27 = vsel %vm883_vm9, %v1070_v59, %v1074_v36  ;;  %v2766_v58 = vld [vmem:[#allocation2 + $0xd4] ss:$0 sps:$4 sm:$0x11]  }
  0x7b   : > { %634 = vst.msk [vmem:[#allocation2 + $0x58] sm:$0xf] %vm172_vm0, %v380_v24  ;;  %637 = vst [vmem:[#allocation2 + $0x5c] sm:$0x1] %v636_v25  ;;  %v389_v1 = vrot.slane %v385_v12, 4  ;;  %1106 = vrot.lane.b32.xlu0 %v1075_v27, %s2797_s5  ;;  %v396_v33 = vor.u32 %v394_v17, %v393_v37  ;;  %v398_v34 = vrot.slane %v393_v37, 4 }
  0x7c   : > { %v639_v29 = vsel %vm2924_vm7, %v388_v26, %v638_v18  ;;  %v892_v50 = vshll.u32 %v3231_v35, 16  ;;  %v889_v57 = vrot.slane %v887_v43, 1  ;;  %v1751_v0 = vshll.u32 %v3244_v44, 16 }
  0x7d   : > { %640 = vst [vmem:[#allocation2 + $0x60] sm:$0xf] %v639_v29  ;;  %v3233_v38 = vld [vmem:[#allocation2 + $0xc0] sm:$0xff]   ;;  %v397_v22 = vsel %vm2918_vm6, %v389_v1, %v396_v33  ;;  %v643_v19 = vsel %vm2912_vm5, %v398_v34, %v642_v30  ;;  %v1749_v9 = vshrl.u32 %v3244_v44, 16  ;;  %v1756_v17 = vshll.u32 %v2766_v58, 16 }
  0x7e   : > { %1187 = vrot.lane.b32.xlu1 %v1156_v20, %s2796_s27  ;;  %v2754_v39 = vld [vmem:[#allocation2 + $0xc8] ss:$0 sps:$4 sm:$0x11]   ;;  %v1276_v40 = vshrl.u32 %v3233_v38, 16  ;;  %v1278_v41 = vshll.u32 %v3233_v38, 16  ;;  %v1289_v49 = vrot.slane %v3233_v38, 1  ;;  %v890_v24 = vor.u32 %v889_v57, %v885_v42 }
  0x7f   : > { %641 = vst.msk [vmem:[#allocation2 + $0x64] sm:$0xf] %vm172_vm0, %v397_v22  ;;  %644 = vst [vmem:[#allocation2 + $0x68] sm:$0x1] %v643_v19  ;;  %v1283_v23 = vshll.u32 %v2754_v39, 16  ;;  %v1290_v21 = vrot.slane %v2754_v39, 1 }
  0x80   : > { %v1280_v47 = vrot.slane %v1278_v41, 1  ;;  %v894_v15 = vrot.slane %v892_v50, 1  ;;  %v1753_v25 = vrot.slane %v1751_v0, 1  ;;  %v1758_v33 = vrot.slane %v1756_v17, 1  ;;  %v2781_v50 = vld [vmem:[#allocation2 + $0xc] sm:$0xff]  }
  0x81   : > { %v1285_v48 = vrot.slane %v1283_v23, 1  ;;  %v1291_v4 = vsel %vm1108_vm8, %v1289_v49, %v1290_v21  ;;  %v1109_v39 = vrot.slane %v3228_v31, 1  ;;  %v1110_v22 = vrot.slane %v3231_v35, 1 }
  0x82   : > { %v3246_v14 = vld [vmem:[#allocation2 + $0x54] sm:$0xff]   ;;  %v2756_v11 = vld [vmem:[#allocation2 + $0x5c] ss:$0 sps:$4 sm:$0x11]   ;;  %v1281_v51 = vor.u32 %v1280_v47, %v1276_v40  ;;  %v895_v29 = vsel %vm883_vm9, %v890_v24, %v894_v15  ;;  %v1754_v30 = vor.u32 %v1753_v25, %v1749_v9  ;;  %v1762_v41 = vrot.slane %v3244_v44, 1  ;;  %v2771_v25 = vld [vmem:[%s3644_s1 + $0x20] sm:$0xff]  }
  0x83   : > { %v969_v52 = vshrl.u32 %v3246_v14, 16  ;;  %v971_v53 = vshll.u32 %v3246_v14, 16  ;;  %v976_v54 = vshll.u32 %v2756_v11, 16  ;;  %v1130_v63 = vrot.slane %v3246_v14, 1 }
  0x84   : > { %v1286_v59 = vsel %vm883_vm9, %v1281_v51, %v1285_v48  ;;  %v1131_v5 = vrot.slane %v2756_v11, 1  ;;  %v1759_v19 = vsel %vm883_vm9, %v1754_v30, %v1758_v33  ;;  %v1111_v40 = vsel %vm1108_vm8, %v1109_v39, %v1110_v22 }
  0x85   : > { %v973_v61 = vrot.slane %v971_v53, 1  ;;  %1287 = vrot.lane.b32.xlu0 %v1286_v59, %s2797_s5  ;;  %v978_v2 = vrot.slane %v976_v54, 1  ;;  %v1763_v23 = vrot.slane %v2766_v58, 1  ;;  %vm1222_vm11 = vcmask 523264   ;;  %v2782_v54 = vld [vmem:[#allocation2 + $0x18] sm:$0xff]   ;;  %v2772_v58 = vld [vmem:[%s3644_s1 + $0x80] sm:$0xff]  }
  0x86   : > { %v3256_v3 = vld [vmem:[#allocation2 + $0x60] sm:$0xff]   ;;  %v2758_v13 = vld [vmem:[#allocation2 + $0x68] ss:$0 sps:$4 sm:$0x11]   ;;  %v1132_v20 = vsel %vm1108_vm8, %v1130_v63, %v1131_v5  ;;  %vm1347_vm12 = vcmask 785408   ;;  %v2774_v63 = vld [vmem:[%s3644_s1 + $0x78] sm:$0xff]  }
  0x87   : > { %v974_v60 = vor.u32 %v973_v61, %v969_v52  ;;  %v981_v6 = vshrl.u32 %v3256_v3, 16  ;;  %v983_v8 = vshll.u32 %v3256_v3, 16  ;;  %v988_v12 = vshll.u32 %v2758_v13, 16 }
  0x88   : > { %v1133_v27 = vrot.slane %v3256_v3, 1  ;;  %v1134_v1 = vrot.slane %v2758_v13, 1  ;;  %v1764_v42 = vsel %vm1108_vm8, %v1762_v41, %v1763_v23  ;;  %v2779_v41 = vld [vmem:[%s3644_s1] sm:$0xff]   ;;  %vm2214_vm13 = vcmask 125952  }
  0x89   : > { %v979_v10 = vsel %vm883_vm9, %v974_v60, %v978_v2  ;;  %1292 = vrot.lane.b32.xlu0 %v1291_v4, %s2796_s27  ;;  %v985_v36 = vrot.slane %v983_v8, 1  ;;  %v990_v18 = vrot.slane %v988_v12, 1  ;;  %v2776_v2 = vld [vmem:[%s3644_s1 + $0x70] sm:$0xff]   ;;  %v2780_v12 = vld [vmem:[%s3644_s1 + $0x60] sm:$0xff]  }
  0x8a   : > { %1090 = vrot.lane.b32.xlu1 %v979_v10, %s2797_s5  ;;  %v1135_v34 = vsel %vm1108_vm8, %v1133_v27, %v1134_v1  ;;  %v2786_v1 = vld [vmem:[#allocation2 + $0x84] sm:$0xff]  }
  0x8b   : > { %v986_v26 = vor.u32 %v985_v36, %v981_v6  ;;  %v2783_v6 = vld [vmem:[#allocation2 + $0x6c] sm:$0xff]  }
  0x8c   : > { %v2784_v36 = vld [vmem:[#allocation2 + $0x30] sm:$0xff]  }
  0x8d   : > { %v991_v37 = vsel %vm883_vm9, %v986_v26, %v990_v18  ;;  %1171 = vrot.lane.b32.xlu0 %v1132_v20, %s2796_s27  ;;  %v2785_v18 = vld [vmem:[#allocation2 + $0x78] sm:$0xff]  }
  0x8e   : > { %1092 = vrot.lane.b32.xlu1 %v991_v37, %s2797_s5 }
  0x91   : > { %1076 = vrot.lane.b32.xlu0 %v895_v29, %s2797_s5  ;;  %v2773_v29 = vld [vmem:[%s3644_s1 + $0x18] sm:$0xff]  }
  0x92   : > { %1173 = vrot.lane.b32.xlu1 %v1135_v34, %s2796_s27 }
  0x95   : > { %1760 = vrot.lane.b32.xlu0 %v1759_v19, %s2797_s5 }
  0x96   : > { %1157 = vrot.lane.b32.xlu1 %v1111_v40, %s2796_s27 }
  0x9a   : > { %1765 = vrot.lane.b32.xlu1 %v1764_v42, %s2796_s27 }
  0xa8   : > { %v1178_v47 = vpop.permute.xlu0 %1177 }
  0xab   : > { %v1176_v35 = vpop.permute.xlu1 %1175 }
  0xaf   : > { %v1162_v43 = vpop.permute.xlu1 %1161 }
  0xb3   : > { %v1160_v11 = vpop.permute.xlu0 %1159 }
  0xb5   : > { %v1166_v48 = vpop.permute.xlu1 %1165 }
  0xb9   : > { %v1079_v49 = vpop.permute.xlu1 %1078 }
  0xba   : > { %v1193_v51 = vsel %vm1189_vm10, %v2781_v50, %v1079_v49  ;;  %v1180_v53 = vpop.permute.xlu0 %1179 }
  0xbb   : > { %v3285_v52 = vsel %vm1222_vm11, %v1193_v51, %v1160_v11 }
  0xbc   : > { %2584 = vmatprep.mubr.msk.bf16.mxu0 %vm1347_vm12, %v3285_v52 }
  0xbd   : > { %v1081_v21 = vpop.permute.xlu1 %1080 }
  0xbe   : > { %v1195_v57 = vsel %vm1189_vm10, %v2782_v54, %v1081_v21 }
  0xbf   : > { %v3294_v59 = vsel %vm1222_vm11, %v1195_v57, %v1162_v43  ;;  %v1182_v61 = vpop.permute.xlu0 %1181 }
  0xc0   : > { %2585 = vmatmul.mubr.msk.bf16.vlgmr.msra.gmra.mxu0 %vm1347_vm12, %v3294_v59 }
  0xc1   : > { %2661 = vmatpush3.bf16.msra.mxu0 %v3172_v55  ;;  %v2778_v55 = vld [vmem:[%s3644_s1 + $0x68] sm:$0xff]  }
  0xc2   : > { %2662 = vmatprep.subr.bf16.mxu0 %v2772_v58 }
  0xc4   : > { %v1101_v0 = vpop.permute.xlu1 %1100 }
  0xc5   : > { %2663 = vmatpush3.bf16.msra.mxu0 %v2772_v58  ;;  %v1215_v33 = vsel %vm1189_vm10, %v3052_v62, %v1101_v0  ;;  %v2777_v62 = vld [vmem:[%s3644_s1 + $0x8] sm:$0xff]  }
  0xc6   : > { %2664 = vmatprep.subr.bf16.mxu0 %v2774_v63  ;;  %v3355_v34 = vsel %vm1222_vm11, %v1215_v33, %v1182_v61 }
  0xc7   : > { %v1164_v60 = vpop.permute.xlu0 %1163 }
  0xc9   : > { %2665 = vmatpush3.bf16.msra.mxu0 %v2774_v63 }
  0xca   : > { %2666 = vmatprep.subr.bf16.mxu0 %v2776_v2 }
  0xcb   : > { %v1083_v4 = vpop.permute.xlu1 %1082  ;;  %v1095_v13 = vpop.permute.xlu0 %1094 }
  0xcc   : > { %v1197_v5 = vsel %vm1189_vm10, %v3078_v46, %v1083_v4  ;;  %v1209_v8 = vsel %vm1189_vm10, %v2783_v6, %v1095_v13 }
  0xcd   : > { %v3312_v9 = vsel %vm1222_vm11, %v1197_v5, %v1164_v60  ;;  %2667 = vmatpush3.bf16.msra.mxu0 %v2776_v2  ;;  %v3315_v10 = vsel %vm1222_vm11, %v1209_v8, %v1176_v35 }
  0xce   : > { %2588 = vmatprep.mubr.msk.bf16.mxu0 %vm1347_vm12, %v3312_v9  ;;  %2668 = vmatprep.subr.bf16.mxu0 %v2778_v55 }
  0xcf   : > { %2600 = vmatprep.mubr.msk.bf16.mxu1 %vm1347_vm12, %v3315_v10  ;;  %v1085_v46 = vpop.permute.xlu1 %1084  ;;  %v1097_v15 = vpop.permute.xlu0 %1096 }
  0xd0   : > { %v1199_v17 = vsel %vm1189_vm10, %v2784_v36, %v1085_v46  ;;  %v1211_v20 = vsel %vm1189_vm10, %v2785_v18, %v1097_v15 }
  0xd1   : > { %v3327_v24 = vsel %vm1222_vm11, %v1199_v17, %v1166_v48  ;;  %2669 = vmatpush3.bf16.msra.mxu0 %v2778_v55  ;;  %v3333_v26 = vsel %vm1222_vm11, %v1211_v20, %v1178_v47 }
  0xd2   : > { %2589 = vmatmul.mubr.msk.bf16.gmra.mxu0 %vm1347_vm12, %v3327_v24  ;;  %2670 = vmatprep.subr.bf16.mxu0 %v2780_v12 }
  0xd3   : > { %2601 = vmatmul.mubr.msk.bf16.vlgmr.msra.gmra.mxu1 %vm1347_vm12, %v3333_v26  ;;  %v1099_v27 = vpop.permute.xlu0 %1098 }
  0xd4   : > { %2617 = vmatpush3.bf16.msra.mxu1 %v3143_v28  ;;  %v1213_v37 = vsel %vm1189_vm10, %v2786_v1, %v1099_v27  ;;  %v2775_v28 = vld [vmem:[%s3644_s1 + $0x10] sm:$0xff]  }
  0xd5   : > { %2618 = vmatprep.subr.bf16.mxu1 %v2771_v25  ;;  %2671 = vmatpush3.bf16.msra.mxu0 %v2780_v12  ;;  %v3345_v30 = vsel %vm1222_vm11, %v1213_v37, %v1180_v53 }
  0xd6   : > { %2604 = vmatprep.mubr.msk.bf16.mxu1 %vm1347_vm12, %v3345_v30 }
  0xd8   : > { %2619 = vmatpush3.bf16.msra.mxu1 %v2771_v25 }
  0xd9   : > { %2620 = vmatprep.subr.bf16.mxu1 %v2773_v29 }
  0xdb   : > { %2605 = vmatmul.mubr.msk.bf16.gmra.mxu1 %vm1347_vm12, %v3355_v34 }
  0xdc   : > { %2621 = vmatpush3.bf16.msra.mxu1 %v2773_v29 }
  0xdd   : > { %v1103_v39 = vpop.permute.xlu0 %1102  ;;  %2622 = vmatprep.subr.bf16.mxu1 %v2775_v28 }
  0xde   : > { %v1217_v19 = vsel %vm1189_vm10, %v3135_v16, %v1103_v39 }
  0xe0   : > { %v1105_v22 = vpop.permute.xlu1 %1104  ;;  %2623 = vmatpush3.bf16.msra.mxu1 %v2775_v28 }
  0xe1   : > { %v1184_v40 = vpop.permute.xlu0 %1183  ;;  %2624 = vmatprep.subr.bf16.mxu1 %v2777_v62  ;;  %v1219_v35 = vsel %vm1189_vm10, %v3148_v32, %v1105_v22 }
  0xe2   : > { %v3368_v23 = vsel %vm1222_vm11, %v1217_v19, %v1184_v40 }
  0xe3   : > { %2608 = vmatprep.mubr.msk.bf16.mxu1 %vm1347_vm12, %v3368_v23 }
  0xe4   : > { %v1087_v42 = vpop.permute.xlu1 %1086  ;;  %2625 = vmatpush3.bf16.msra.mxu1 %v2777_v62 }
  0xe5   : > { %v1186_v43 = vpop.permute.xlu0 %1185  ;;  %2626 = vmatprep.subr.bf16.mxu1 %v2779_v41  ;;  %v1201_v48 = vsel %vm1189_vm10, %v3160_v45, %v1087_v42 }
  0xe6   : > { %v3375_v16 = vsel %vm1222_vm11, %v1219_v35, %v1186_v43 }
  0xe7   : > { %2609 = vmatmul.mubr.msk.bf16.gmra.mxu1 %vm1347_vm12, %v3375_v16 }
  0xe8   : > { %v1089_v47 = vpop.permute.xlu1 %1088  ;;  %2627 = vmatpush3.bf16.msra.mxu1 %v2779_v41 }
  0xe9   : > { %v1168_v11 = vpop.permute.xlu0 %1167  ;;  %v1203_v32 = vsel %vm1189_vm10, %v3181_v7, %v1089_v47 }
  0xea   : > { %v1234_v49 = vsel %vm1222_vm11, %v1201_v48, %v1168_v11 }
  0xeb   : > { %2592 = vmatprep.mubr.msk.bf16.mxu0 %vm1347_vm12, %v1234_v49 }
  0xec   : > { %v1170_v50 = vpop.permute.xlu1 %1169 }
  0xed   : > { %v1236_v51 = vsel %vm1222_vm11, %v1203_v32, %v1170_v50  ;;  %v1107_v53 = vpop.permute.xlu0 %1106  ;;  %v3511_v32 = vld [vmem:[%s3645_s2] ss:$0 sm:$0xff] }
  0xee   : > { %2593 = vmatmul.mubr.msk.bf16.gmra.mxu0 %vm1347_vm12, %v1236_v51  ;;  %v1221_v21 = vsel %vm1189_vm10, %v3195_v56, %v1107_v53 }
  0xf0   : > { %v1188_v54 = vpop.permute.xlu1 %1187 }
  0xf1   : > { %v1254_v45 = vsel %vm1222_vm11, %v1221_v21, %v1188_v54 }
  0xf2   : > { %2612 = vmatprep.mubr.msk.bf16.mxu1 %vm1347_vm12, %v1254_v45 }
  0xf7   : > { %v1288_v57 = vpop.permute.xlu0 %1287 }
  0xf8   : > { %v1295_v58 = vsel %vm1189_vm10, %v3233_v38, %v1288_v57 }
  0xfb   : > { %v1293_v7 = vpop.permute.xlu0 %1292 }
  0xfc   : > { %v1091_v61 = vpop.permute.xlu1 %1090  ;;  %v1297_v63 = vsel %vm1222_vm11, %v1295_v58, %v1293_v7 }
  0xfd   : > { %2613 = vmatmul.mubr.msk.bf16.gmra.mxu1 %vm1347_vm12, %v1297_v63  ;;  %v1205_v0 = vsel %vm1189_vm10, %v3246_v14, %v1091_v61 }
  0xff   : > { %v1172_v2 = vpop.permute.xlu0 %1171 }
 0x100   : > { %v1093_v56 = vpop.permute.xlu1 %1092  ;;  %v1238_v60 = vsel %vm1222_vm11, %v1205_v0, %v1172_v2 }
 0x101   : > { %2596 = vmatprep.mubr.msk.bf16.mxu0 %vm1347_vm12, %v1238_v60  ;;  %v1207_v4 = vsel %vm1189_vm10, %v3256_v3, %v1093_v56 }
 0x103   : > { %v1077_v55 = vpop.permute.xlu0 %1076 }
 0x104   : > { %v1174_v38 = vpop.permute.xlu1 %1173  ;;  %v1191_v5 = vsel %vm1189_vm10, %v3228_v31, %v1077_v55 }
 0x105   : > { %v1240_v13 = vsel %vm1222_vm11, %v1207_v4, %v1174_v38 }
 0x106   : > { %2597 = vmatmul.mubr.msk.bf16.gmra.mxu0 %vm1347_vm12, %v1240_v13 }
 0x107   : > { %2672 = vmatprep.mubr.msk.bf16.mxu0 %vm1347_vm12, %v3294_v59  ;;  %v1761_v31 = vpop.permute.xlu0 %1760 }
 0x108   : > { %v1158_v14 = vpop.permute.xlu1 %1157  ;;  %v1768_v3 = vsel %vm1189_vm10, %v3244_v44, %v1761_v31 }
 0x109   : > { %v1224_v6 = vsel %vm1222_vm11, %v1191_v5, %v1158_v14 }
 0x10a   : > { %2628 = vmatprep.mubr.msk.bf16.mxu1 %vm1347_vm12, %v1224_v6 }
 0x10b   : > { %2629 = vmatmul.mubr.msk.bf16.vlgmr.msra.gmra.mxu1 %vm1347_vm12, %v3285_v52 }
 0x10c   : > { %2632 = vmatprep.mubr.msk.bf16.mxu1 %vm1347_vm12, %v3294_v59  ;;  %v1766_v52 = vpop.permute.xlu1 %1765 }
 0x10d   : > { %v1770_v59 = vsel %vm1222_vm11, %v1768_v3, %v1766_v52 }
 0x10e   : > { %2673 = vmatmul.mubr.msk.bf16.vlgmr.msra.gmra.mxu0 %vm1347_vm12, %v3312_v9 }
 0x10f   : > { %2676 = vmatprep.mubr.msk.bf16.mxu0 %vm1347_vm12, %v3327_v24 }
 0x113   : > { %2633 = vmatmul.mubr.msk.bf16.gmra.mxu1 %vm1347_vm12, %v3312_v9 }
 0x114   : > { %2636 = vmatprep.mubr.msk.bf16.mxu1 %vm1347_vm12, %v3327_v24 }
 0x116   : > { %2677 = vmatmul.mubr.msk.bf16.gmra.mxu0 %vm1347_vm12, %v1234_v49 }
 0x117   : > { %2680 = vmatprep.mubr.msk.bf16.mxu0 %vm1347_vm12, %v1236_v51 }
 0x11b   : > { %2637 = vmatmul.mubr.msk.bf16.gmra.mxu1 %vm1347_vm12, %v1234_v49 }
 0x11c   : > { %2640 = vmatprep.mubr.msk.bf16.mxu1 %vm1347_vm12, %v1236_v51 }
 0x11e   : > { %2681 = vmatmul.mubr.msk.bf16.gmra.mxu0 %vm1347_vm12, %v1238_v60 }
 0x11f   : > { %2684 = vmatprep.mubr.msk.bf16.mxu0 %vm1347_vm12, %v1240_v13 }
 0x123   : > { %2641 = vmatmul.mubr.msk.bf16.gmra.mxu1 %vm1347_vm12, %v1238_v60 }
 0x124   : > { %2644 = vmatprep.mubr.msk.bf16.mxu1 %vm1347_vm12, %v1240_v13 }
 0x126   : > { %2685 = vmatmul.mubr.msk.bf16.gmra.mxu0 %vm1347_vm12, %v3315_v10 }
 0x127   : > { %2688 = vmatprep.mubr.msk.bf16.mxu0 %vm1347_vm12, %v3333_v26 }
 0x12b   : > { %2645 = vmatmul.mubr.msk.bf16.gmra.mxu1 %vm1347_vm12, %v3315_v10 }
 0x12c   : > { %2648 = vmatprep.mubr.msk.bf16.mxu1 %vm1347_vm12, %v3333_v26 }
 0x12e   : > { %2689 = vmatmul.mubr.msk.bf16.gmra.mxu0 %vm1347_vm12, %v3345_v30 }
 0x12f   : > { %2692 = vmatprep.mubr.msk.bf16.mxu0 %vm1347_vm12, %v3355_v34 }
 0x133   : > { %2649 = vmatmul.mubr.msk.bf16.gmra.mxu1 %vm1347_vm12, %v3345_v30 }
 0x134   : > { %2652 = vmatprep.mubr.msk.bf16.mxu1 %vm1347_vm12, %v3355_v34 }
 0x136   : > { %2693 = vmatmul.mubr.msk.bf16.gmra.mxu0 %vm1347_vm12, %v3368_v23 }
 0x137   : > { %2696 = vmatprep.mubr.msk.bf16.mxu0 %vm1347_vm12, %v3375_v16 }
 0x13b   : > { %2653 = vmatmul.mubr.msk.bf16.gmra.mxu1 %vm1347_vm12, %v3368_v23 }
 0x13c   : > { %2656 = vmatprep.mubr.msk.bf16.mxu1 %vm1347_vm12, %v3375_v16 }
 0x13e   : > { %2697 = vmatmul.mubr.msk.bf16.gmra.mxu0 %vm1347_vm12, %v1254_v45 }
 0x13f   : > { %2700 = vmatprep.mubr.msk.bf16.mxu0 %vm1347_vm12, %v1297_v63 }
 0x143   : > { %2657 = vmatmul.mubr.msk.bf16.gmra.mxu1 %vm1347_vm12, %v1254_v45 }
 0x146   : > { %2701 = vmatmul.mubr.msk.bf16.gmra.mxu0 %vm1347_vm12, %v1770_v59 }
 0x180   : > { %v2586_v46 = vpop.f32.mrf.mxu0 }
 0x182   : > { %v1414_v36 = vpop.f32.mrf.mxu0 }
 0x184   : > { %v2587_v17 = vpop.f32.mrf.mxu0 }
 0x186   : > { %v1417_v20 = vpop.f32.mrf.mxu0 }
 0x192   : > { %v2590_v24 = vpop.f32.mrf.mxu0 }
 0x193   : > { %v3460_v8 = vpop.f32.mrf.mxu1 }
 0x194   : > { %v1430_v26 = vpop.f32.mrf.mxu0 }
 0x195   : > { %v3462_v9 = vpop.f32.mrf.mxu1 }
 0x196   : > { %v2591_v1 = vpop.f32.mrf.mxu0 }
 0x197   : > { %v3464_v10 = vpop.f32.mrf.mxu1 }
 0x198   : > { %v1433_v29 = vpop.f32.mrf.mxu0 }
 0x199   : > { %v3466_v12 = vpop.f32.mrf.mxu1 }
 0x19b   : > { %v3468_v15 = vpop.f32.mrf.mxu1 }
 0x19d   : > { %v3470_v44 = vpop.f32.mrf.mxu1 }
 0x19f   : > { %v3472_v18 = vpop.f32.mrf.mxu1 }
 0x1a1   : > { %v3474_v25 = vpop.f32.mrf.mxu1 }
 0x1a7   : > { %v3476_v27 = vpop.f32.mrf.mxu1 }
 0x1a9   : > { %v3478_v37 = vpop.f32.mrf.mxu1 }
 0x1ab   : > { %v3480_v30 = vpop.f32.mrf.mxu1 }
 0x1ad   : > { %v3484_v28 = vpop.f32.mrf.mxu1 }
 0x1ae   : > { %v3482_v33 = vpop.f32.mrf.mxu0 }
 0x1b0   : > { %v3486_v34 = vpop.f32.mrf.mxu0 }
 0x1b2   : > { %v3490_v62 = vpop.f32.mrf.mxu0 }
 0x1b4   : > { %v3494_v19 = vpop.f32.mrf.mxu0 }
 0x1bd   : > { %v3488_v39 = vpop.f32.mrf.mxu1 }
 0x1bf   : > { %v3492_v22 = vpop.f32.mrf.mxu1 }
 0x1c1   : > { %v3496_v40 = vpop.f32.mrf.mxu1 }
 0x1c3   : > { %v3502_v42 = vpop.f32.mrf.mxu1 }
 0x1c6   : > { %v3498_v41 = vpop.f32.mrf.mxu0 }
 0x1c8   : > { %v3500_v23 = vpop.f32.mrf.mxu0 }
 0x1ca   : > { %v3504_v35 = vpop.f32.mrf.mxu0 }
 0x1cb   : > { %v2630_v43 = vpop.f32.mrf.mxu1 }
 0x1cc   : > { %v1622_v16 = vadd.f32 %v2630_v43, %v2586_v46  ;;  %v3506_v47 = vpop.f32.mrf.mxu0 }
 0x1cd   : > { %v1613_v48 = vpop.f32.mrf.mxu1 }
 0x1ce   : > { %v1614_v11 = vadd.f32 %v1613_v48, %v1414_v36  ;;  %v2674_v49 = vpop.f32.mrf.mxu0 }
 0x1cf   : > { %v1985_v50 = vadd.f32 %v2674_v49, %v1622_v16  ;;  %v2631_v51 = vpop.f32.mrf.mxu1 }
 0x1d0   : > { %v1625_v53 = vadd.f32 %v2631_v51, %v2587_v17  ;;  %v1856_v21 = vpop.f32.mrf.mxu0 }
 0x1d1   : > { %v2024_v54 = vadd.f32 %v3511_v32, %v1985_v50  ;;  %v1983_v45 = vadd.f32 %v1856_v21, %v1614_v11  ;;  %v1616_v57 = vpop.f32.mrf.mxu1 }
 0x1d2   : > { %v1617_v58 = vadd.f32 %v1616_v57, %v1417_v20  ;;  %v2675_v61 = vpop.f32.mrf.mxu0 }
 0x1d3   : > { %v2056_v7 = vmax.f32 %v2024_v54, 0.0  ;;  %v2022_v63 = vadd.f32 %v3511_v32, %v1983_v45  ;;  %v1986_v0 = vadd.f32 %v2675_v61, %v1625_v53  ;;  %v2634_v2 = vpop.f32.mrf.mxu1 }
 0x1d4   : > { %v1638_v56 = vadd.f32 %v2634_v2, %v2590_v24  ;;  %v1859_v60 = vpop.f32.mrf.mxu0 }
 0x1d5   : > { %v2476_v55 = vpack.c.bf16 %v2056_v7, %v2056_v7  ;;  %v2054_v4 = vmax.f32 %v2022_v63, 0.0  ;;  %v2025_v38 = vadd.f32 %v3511_v32, %v1986_v0  ;;  %v1984_v13 = vadd.f32 %v1859_v60, %v1617_v58  ;;  %v1629_v5 = vpop.f32.mrf.mxu1 }
 0x1d6   : > { %v1630_v14 = vadd.f32 %v1629_v5, %v1430_v26  ;;  %v2678_v6 = vpop.f32.mrf.mxu0 }
 0x1d7   : > { %2217 = vst.msk [vmem:[%s3520_s10 + $0x8] sm:$0xf] %vm2214_vm13, %v2476_v55  ;;  %v2474_v31 = vpack.c.bf16 %v2054_v4, %v2054_v4  ;;  %v2057_v3 = vmax.f32 %v2025_v38, 0.0  ;;  %v2023_v52 = vadd.f32 %v3511_v32, %v1984_v13  ;;  %v1989_v59 = vadd.f32 %v2678_v6, %v1638_v56  ;;  %v2635_v46 = vpop.f32.mrf.mxu1 }
 0x1d8   : > { %v1641_v36 = vadd.f32 %v2635_v46, %v2591_v1  ;;  %v1872_v17 = vpop.f32.mrf.mxu0 }
 0x1d9   : > { %2215 = vst.msk [vmem:[%s3520_s10] sm:$0xf] %vm2214_vm13, %v2474_v31  ;;  %v2477_v20 = vpack.c.bf16 %v2057_v3, %v2057_v3  ;;  %v2055_v24 = vmax.f32 %v2023_v52, 0.0  ;;  %v2028_v43 = vadd.f32 %v3511_v32, %v1989_v59  ;;  %v1987_v26 = vadd.f32 %v1872_v17, %v1630_v14  ;;  %v1632_v16 = vpop.f32.mrf.mxu1 }
 0x1da   : > { %v1633_v48 = vadd.f32 %v1632_v16, %v1433_v29  ;;  %v2679_v11 = vpop.f32.mrf.mxu0 }
 0x1db   : > { %2218 = vst.msk [vmem:[%s3520_s10 + $0xc] sm:$0xf] %vm2214_vm13, %v2477_v20  ;;  %v2475_v49 = vpack.c.bf16 %v2055_v24, %v2055_v24  ;;  %v2060_v50 = vmax.f32 %v2028_v43, 0.0  ;;  %v2026_v51 = vadd.f32 %v3511_v32, %v1987_v26  ;;  %v1990_v1 = vadd.f32 %v2679_v11, %v1641_v36  ;;  %v2638_v53 = vpop.f32.mrf.mxu1 }
 0x1dc   : > { %v1654_v21 = vadd.f32 %v2638_v53, %v3482_v33  ;;  %v1875_v54 = vpop.f32.mrf.mxu0 }
 0x1dd   : > { %2216 = vst.msk [vmem:[%s3520_s10 + $0x4] sm:$0xf] %vm2214_vm13, %v2475_v49  ;;  %v2480_v45 = vpack.c.bf16 %v2060_v50, %v2060_v50  ;;  %v2058_v57 = vmax.f32 %v2026_v51, 0.0  ;;  %v2029_v29 = vadd.f32 %v3511_v32, %v1990_v1  ;;  %v1988_v58 = vadd.f32 %v1875_v54, %v1633_v48  ;;  %v1645_v61 = vpop.f32.mrf.mxu1 }
 0x1de   : > { %v1646_v7 = vadd.f32 %v1645_v61, %v3486_v34  ;;  %v2682_v63 = vpop.f32.mrf.mxu0 }
 0x1df   : > { %2221 = vst.msk [vmem:[%s3520_s10 + $0x18] sm:$0xf] %vm2214_vm13, %v2480_v45  ;;  %v2478_v0 = vpack.c.bf16 %v2058_v57, %v2058_v57  ;;  %v2061_v2 = vmax.f32 %v2029_v29, 0.0  ;;  %v2027_v33 = vadd.f32 %v3511_v32, %v1988_v58  ;;  %v1993_v56 = vadd.f32 %v2682_v63, %v1654_v21  ;;  %v2639_v60 = vpop.f32.mrf.mxu1 }
 0x1e0   : > { %v1657_v55 = vadd.f32 %v2639_v60, %v3490_v62  ;;  %v1888_v4 = vpop.f32.mrf.mxu0 }
 0x1e1   : > { %2219 = vst.msk [vmem:[%s3520_s10 + $0x10] sm:$0xf] %vm2214_vm13, %v2478_v0  ;;  %v2481_v38 = vpack.c.bf16 %v2061_v2, %v2061_v2  ;;  %v2059_v13 = vmax.f32 %v2027_v33, 0.0  ;;  %v2032_v34 = vadd.f32 %v3511_v32, %v1993_v56  ;;  %v1991_v5 = vadd.f32 %v1888_v4, %v1646_v7  ;;  %v1648_v14 = vpop.f32.mrf.mxu1 }
 0x1e2   : > { %v1649_v6 = vadd.f32 %v1648_v14, %v3494_v19  ;;  %v2683_v31 = vpop.f32.mrf.mxu0 }
 0x1e3   : > { %2222 = vst.msk [vmem:[%s3520_s10 + $0x1c] sm:$0xf] %vm2214_vm13, %v2481_v38  ;;  %v2479_v3 = vpack.c.bf16 %v2059_v13, %v2059_v13  ;;  %v2064_v52 = vmax.f32 %v2032_v34, 0.0  ;;  %v2030_v62 = vadd.f32 %v3511_v32, %v1991_v5  ;;  %v1994_v59 = vadd.f32 %v2683_v31, %v1657_v55  ;;  %v2642_v46 = vpop.f32.mrf.mxu1 }
 0x1e4   : > { %v1670_v36 = vadd.f32 %v2642_v46, %v3498_v41  ;;  %v1891_v17 = vpop.f32.mrf.mxu0 }
 0x1e5   : > { %2220 = vst.msk [vmem:[%s3520_s10 + $0x14] sm:$0xf] %vm2214_vm13, %v2479_v3  ;;  %v2484_v20 = vpack.c.bf16 %v2064_v52, %v2064_v52  ;;  %v2062_v24 = vmax.f32 %v2030_v62, 0.0  ;;  %v2033_v19 = vadd.f32 %v3511_v32, %v1994_v59  ;;  %v1992_v43 = vadd.f32 %v1891_v17, %v1649_v6  ;;  %v1661_v26 = vpop.f32.mrf.mxu1 }
 0x1e6   : > { %v1662_v16 = vadd.f32 %v1661_v26, %v3500_v23  ;;  %v2686_v48 = vpop.f32.mrf.mxu0 }
 0x1e7   : > { %2225 = vst.msk [vmem:[%s3520_s10 + $0x28] sm:$0xf] %vm2214_vm13, %v2484_v20  ;;  %v2482_v11 = vpack.c.bf16 %v2062_v24, %v2062_v24  ;;  %v2065_v49 = vmax.f32 %v2033_v19, 0.0  ;;  %v2031_v41 = vadd.f32 %v3511_v32, %v1992_v43  ;;  %v1997_v50 = vadd.f32 %v2686_v48, %v1670_v36  ;;  %v2643_v51 = vpop.f32.mrf.mxu1 }
 0x1e8   : > { %v1673_v1 = vadd.f32 %v2643_v51, %v3504_v35  ;;  %v1904_v53 = vpop.f32.mrf.mxu0 }
 0x1e9   : > { %2223 = vst.msk [vmem:[%s3520_s10 + $0x20] sm:$0xf] %vm2214_vm13, %v2482_v11  ;;  %v2485_v21 = vpack.c.bf16 %v2065_v49, %v2065_v49  ;;  %v2063_v54 = vmax.f32 %v2031_v41, 0.0  ;;  %v2036_v23 = vadd.f32 %v3511_v32, %v1997_v50  ;;  %v1995_v45 = vadd.f32 %v1904_v53, %v1662_v16  ;;  %v1664_v57 = vpop.f32.mrf.mxu1 }
 0x1ea   : > { %v1665_v29 = vadd.f32 %v1664_v57, %v3506_v47  ;;  %v2687_v58 = vpop.f32.mrf.mxu0 }
 0x1eb   : > { %2226 = vst.msk [vmem:[%s3520_s10 + $0x2c] sm:$0xf] %vm2214_vm13, %v2485_v21  ;;  %v2483_v61 = vpack.c.bf16 %v2063_v54, %v2063_v54  ;;  %v2068_v7 = vmax.f32 %v2036_v23, 0.0  ;;  %v2034_v35 = vadd.f32 %v3511_v32, %v1995_v45  ;;  %v1998_v63 = vadd.f32 %v2687_v58, %v1673_v1  ;;  %v2646_v0 = vpop.f32.mrf.mxu1 }
 0x1ec   : > { %v1686_v2 = vadd.f32 %v2646_v0, %v3460_v8  ;;  %v1907_v33 = vpop.f32.mrf.mxu0 }
 0x1ed   : > { %2224 = vst.msk [vmem:[%s3520_s10 + $0x24] sm:$0xf] %vm2214_vm13, %v2483_v61  ;;  %v2488_v56 = vpack.c.bf16 %v2068_v7, %v2068_v7  ;;  %v2066_v60 = vmax.f32 %v2034_v35, 0.0  ;;  %v2037_v47 = vadd.f32 %v3511_v32, %v1998_v63  ;;  %v1996_v55 = vadd.f32 %v1907_v33, %v1665_v29  ;;  %v1677_v4 = vpop.f32.mrf.mxu1 }
 0x1ee   : > { %v1678_v38 = vadd.f32 %v1677_v4, %v3462_v9  ;;  %v2690_v13 = vpop.f32.mrf.mxu0 }
 0x1ef   : > { %2229 = vst.msk [vmem:[%s3520_s10 + $0x38] sm:$0xf] %vm2214_vm13, %v2488_v56  ;;  %v2486_v34 = vpack.c.bf16 %v2066_v60, %v2066_v60  ;;  %v2069_v5 = vmax.f32 %v2037_v47, 0.0  ;;  %v2035_v8 = vadd.f32 %v3511_v32, %v1996_v55  ;;  %v2001_v14 = vadd.f32 %v2690_v13, %v1686_v2  ;;  %v2647_v6 = vpop.f32.mrf.mxu1 }
 0x1f0   : > { %v1689_v31 = vadd.f32 %v2647_v6, %v3464_v10  ;;  %v1920_v3 = vpop.f32.mrf.mxu0 }
 0x1f1   : > { %2227 = vst.msk [vmem:[%s3520_s10 + $0x30] sm:$0xf] %vm2214_vm13, %v2486_v34  ;;  %v2489_v52 = vpack.c.bf16 %v2069_v5, %v2069_v5  ;;  %v2067_v62 = vmax.f32 %v2035_v8, 0.0  ;;  %v2040_v9 = vadd.f32 %v3511_v32, %v2001_v14  ;;  %v1999_v59 = vadd.f32 %v1920_v3, %v1678_v38  ;;  %v1680_v46 = vpop.f32.mrf.mxu1 }
 0x1f2   : > { %v1681_v36 = vadd.f32 %v1680_v46, %v3466_v12  ;;  %v2691_v17 = vpop.f32.mrf.mxu0 }
 0x1f3   : > { %2230 = vst.msk [vmem:[%s3520_s10 + $0x3c] sm:$0xf] %vm2214_vm13, %v2489_v52  ;;  %v2487_v20 = vpack.c.bf16 %v2067_v62, %v2067_v62  ;;  %v2072_v24 = vmax.f32 %v2040_v9, 0.0  ;;  %v2038_v10 = vadd.f32 %v3511_v32, %v1999_v59  ;;  %v2002_v19 = vadd.f32 %v2691_v17, %v1689_v31  ;;  %v2650_v43 = vpop.f32.mrf.mxu1 }
 0x1f4   : > { %v1702_v26 = vadd.f32 %v2650_v43, %v3468_v15  ;;  %v1923_v16 = vpop.f32.mrf.mxu0 }
 0x1f5   : > { %2228 = vst.msk [vmem:[%s3520_s10 + $0x34] sm:$0xf] %vm2214_vm13, %v2487_v20  ;;  %v2492_v48 = vpack.c.bf16 %v2072_v24, %v2072_v24  ;;  %v2070_v11 = vmax.f32 %v2038_v10, 0.0  ;;  %v2041_v12 = vadd.f32 %v3511_v32, %v2002_v19  ;;  %v2000_v49 = vadd.f32 %v1923_v16, %v1681_v36  ;;  %v1693_v41 = vpop.f32.mrf.mxu1 }
 0x1f6   : > { %v1694_v50 = vadd.f32 %v1693_v41, %v3470_v44  ;;  %v2694_v51 = vpop.f32.mrf.mxu0 }
 0x1f7   : > { %2233 = vst.msk [vmem:[%s3520_s10 + $0x48] sm:$0xf] %vm2214_vm13, %v2492_v48  ;;  %v2490_v1 = vpack.c.bf16 %v2070_v11, %v2070_v11  ;;  %v2073_v53 = vmax.f32 %v2041_v12, 0.0  ;;  %v2039_v15 = vadd.f32 %v3511_v32, %v2000_v49  ;;  %v2005_v21 = vadd.f32 %v2694_v51, %v1702_v26  ;;  %v2651_v54 = vpop.f32.mrf.mxu1 }
 0x1f8   : > { %v1705_v23 = vadd.f32 %v2651_v54, %v3472_v18  ;;  %v1936_v45 = vpop.f32.mrf.mxu0 }
 0x1f9   : > { %2231 = vst.msk [vmem:[%s3520_s10 + $0x40] sm:$0xf] %vm2214_vm13, %v2490_v1  ;;  %v2493_v57 = vpack.c.bf16 %v2073_v53, %v2073_v53  ;;  %v2071_v29 = vmax.f32 %v2039_v15, 0.0  ;;  %v2044_v44 = vadd.f32 %v3511_v32, %v2005_v21  ;;  %v2003_v58 = vadd.f32 %v1936_v45, %v1694_v50  ;;  %v1696_v61 = vpop.f32.mrf.mxu1 }
 0x1fa   : > { %v1697_v7 = vadd.f32 %v1696_v61, %v3474_v25  ;;  %v2695_v35 = vpop.f32.mrf.mxu0 }
 0x1fb   : > { %2234 = vst.msk [vmem:[%s3520_s10 + $0x4c] sm:$0xf] %vm2214_vm13, %v2493_v57  ;;  %v2491_v63 = vpack.c.bf16 %v2071_v29, %v2071_v29  ;;  %v2076_v0 = vmax.f32 %v2044_v44, 0.0  ;;  %v2042_v18 = vadd.f32 %v3511_v32, %v2003_v58  ;;  %v2006_v2 = vadd.f32 %v2695_v35, %v1705_v23  ;;  %v2654_v33 = vpop.f32.mrf.mxu1 }
 0x1fc   : > { %v1718_v56 = vadd.f32 %v2654_v33, %v3476_v27  ;;  %v1939_v60 = vpop.f32.mrf.mxu0 }
 0x1fd   : > { %2232 = vst.msk [vmem:[%s3520_s10 + $0x44] sm:$0xf] %vm2214_vm13, %v2491_v63  ;;  %v2496_v47 = vpack.c.bf16 %v2076_v0, %v2076_v0  ;;  %v2074_v55 = vmax.f32 %v2042_v18, 0.0  ;;  %v2045_v25 = vadd.f32 %v3511_v32, %v2006_v2  ;;  %v2004_v4 = vadd.f32 %v1939_v60, %v1697_v7  ;;  %v1709_v38 = vpop.f32.mrf.mxu1 }
 0x1fe   : > { %v1710_v13 = vadd.f32 %v1709_v38, %v3478_v37  ;;  %v2698_v34 = vpop.f32.mrf.mxu0 }
 0x1ff   : > { %2237 = vst.msk [vmem:[%s3520_s10 + $0x58] sm:$0xf] %vm2214_vm13, %v2496_v47  ;;  %v2494_v5 = vpack.c.bf16 %v2074_v55, %v2074_v55  ;;  %v2077_v8 = vmax.f32 %v2045_v25, 0.0  ;;  %v2043_v27 = vadd.f32 %v3511_v32, %v2004_v4  ;;  %v2009_v14 = vadd.f32 %v2698_v34, %v1718_v56  ;;  %v2655_v6 = vpop.f32.mrf.mxu1 }
 0x200   : > { %v1721_v31 = vadd.f32 %v2655_v6, %v3480_v30  ;;  %v1952_v3 = vpop.f32.mrf.mxu0 }
 0x201   : > { %2235 = vst.msk [vmem:[%s3520_s10 + $0x50] sm:$0xf] %vm2214_vm13, %v2494_v5  ;;  %v2497_v52 = vpack.c.bf16 %v2077_v8, %v2077_v8  ;;  %v2075_v62 = vmax.f32 %v2043_v27, 0.0  ;;  %v2048_v37 = vadd.f32 %v3511_v32, %v2009_v14  ;;  %v2007_v9 = vadd.f32 %v1952_v3, %v1710_v13  ;;  %v1712_v59 = vpop.f32.mrf.mxu1 }
 0x202   : > { %v1713_v46 = vadd.f32 %v1712_v59, %v3484_v28  ;;  %v2699_v36 = vpop.f32.mrf.mxu0 }
 0x203   : > { %2238 = vst.msk [vmem:[%s3520_s10 + $0x5c] sm:$0xf] %vm2214_vm13, %v2497_v52  ;;  %v2495_v17 = vpack.c.bf16 %v2075_v62, %v2075_v62  ;;  %v2080_v20 = vmax.f32 %v2048_v37, 0.0  ;;  %v2046_v30 = vadd.f32 %v3511_v32, %v2007_v9  ;;  %v2010_v24 = vadd.f32 %v2699_v36, %v1721_v31  ;;  %v2658_v10 = vpop.f32.mrf.mxu1 }
 0x204   : > { %v1734_v19 = vadd.f32 %v2658_v10, %v3488_v39  ;;  %v1955_v43 = vpop.f32.mrf.mxu0 }
 0x205   : > { %2236 = vst.msk [vmem:[%s3520_s10 + $0x54] sm:$0xf] %vm2214_vm13, %v2495_v17  ;;  %v2500_v26 = vpack.c.bf16 %v2080_v20, %v2080_v20  ;;  %v2078_v16 = vmax.f32 %v2046_v30, 0.0  ;;  %v2049_v28 = vadd.f32 %v3511_v32, %v2010_v24  ;;  %v2008_v48 = vadd.f32 %v1955_v43, %v1713_v46  ;;  %v1725_v11 = vpop.f32.mrf.mxu1 }
 0x206   : > { %v1726_v12 = vadd.f32 %v1725_v11, %v3492_v22  ;;  %v2702_v49 = vpop.f32.mrf.mxu0 }
 0x207   : > { %2241 = vst.msk [vmem:[%s3520_s10 + $0x68] sm:$0xf] %vm2214_vm13, %v2500_v26  ;;  %v2498_v41 = vpack.c.bf16 %v2078_v16, %v2078_v16  ;;  %v2081_v50 = vmax.f32 %v2049_v28, 0.0  ;;  %v2047_v39 = vadd.f32 %v3511_v32, %v2008_v48  ;;  %v2013_v51 = vadd.f32 %v2702_v49, %v1734_v19  ;;  %v2659_v1 = vpop.f32.mrf.mxu1 }
 0x208   : > { %v1737_v53 = vadd.f32 %v2659_v1, %v3496_v40  ;;  %v1968_v15 = vpop.f32.mrf.mxu0 }
 0x209   : > { %2239 = vst.msk [vmem:[%s3520_s10 + $0x60] sm:$0xf] %vm2214_vm13, %v2498_v41  ;;  %v2501_v21 = vpack.c.bf16 %v2081_v50, %v2081_v50  ;;  %v2079_v54 = vmax.f32 %v2047_v39, 0.0  ;;  %v2052_v22 = vadd.f32 %v3511_v32, %v2013_v51  ;;  %v2011_v23 = vadd.f32 %v1968_v15, %v1726_v12  ;;  %v1728_v45 = vpop.f32.mrf.mxu1 }
 0x20a   : > { %v1729_v57 = vadd.f32 %v1728_v45, %v3502_v42  ;;  %v2703_v29 = vpop.f32.mrf.mxu0 }
 0x20b   : > { %2242 = vst.msk [vmem:[%s3520_s10 + $0x6c] sm:$0xf] %vm2214_vm13, %v2501_v21  ;;  %v2499_v44 = vpack.c.bf16 %v2079_v54, %v2079_v54  ;;  %v2084_v58 = vmax.f32 %v2052_v22, 0.0  ;;  %v2050_v40 = vadd.f32 %v3511_v32, %v2011_v23  ;;  %v2014_v61 = vadd.f32 %v2703_v29, %v1737_v53 }
 0x20c   : > { %v1971_v7 = vpop.f32.mrf.mxu0 }
 0x20d   : > { %2240 = vst.msk [vmem:[%s3520_s10 + $0x64] sm:$0xf] %vm2214_vm13, %v2499_v44  ;;  %v2504_v35 = vpack.c.bf16 %v2084_v58, %v2084_v58  ;;  %v2082_v63 = vmax.f32 %v2050_v40, 0.0  ;;  %v2053_v0 = vadd.f32 %v3511_v32, %v2014_v61  ;;  %v2012_v18 = vadd.f32 %v1971_v7, %v1729_v57 }
 0x20f   : > { %2245 = vst.msk [vmem:[%s3520_s10 + $0x78] sm:$0xf] %vm2214_vm13, %v2504_v35  ;;  %v2502_v42 = vpack.c.bf16 %v2082_v63, %v2082_v63  ;;  %v2085_v2 = vmax.f32 %v2053_v0, 0.0  ;;  %v2051_v33 = vadd.f32 %v3511_v32, %v2012_v18 }
 0x211   : > { %2243 = vst.msk [vmem:[%s3520_s10 + $0x70] sm:$0xf] %vm2214_vm13, %v2502_v42  ;;  %v2505_v56 = vpack.c.bf16 %v2085_v2, %v2085_v2  ;;  %v2083_v60 = vmax.f32 %v2051_v33, 0.0 }
 0x213   : > { %2246 = vst.msk [vmem:[%s3520_s10 + $0x7c] sm:$0xf] %vm2214_vm13, %v2505_v56  ;;  %v2503_v47 = vpack.c.bf16 %v2083_v60, %v2083_v60 }
 0x215   : > { %2244 = vst.msk [vmem:[%s3520_s10 + $0x74] sm:$0xf] %vm2214_vm13, %v2503_v47 }
 0x216 PF: > { %s13_s12 = sadd.s32 1, %s2793_s12  }
 0x217   : > { %p10_p4 = scmp.ge.s32.totalorder %s13_s12, 4  }
 0x219   :  { %12 = sbr.rel (!%p10_p4) target bundleno = 1 (0x1), region = 65 }

// kernel: model_forward.8
= control target key start
LH: loop header
LB: loop body
LE: loop exit
PB: predicated region body
PF: predicated region fallthrough
CT: control target
= control target key end

     0   :  { %9 = vsyncpa [#allocation4], 0  ;;  %s5161_s0 = inlined_call_operand.vmem [shape: bf16[2,16,16,16], index: 0, kind: input, shape index: {}]   ;;  %s5162_s1 = inlined_call_operand.hbm [shape: bf16[3,48,32], index: 1, kind: input, shape index: {}]   ;;  %s5163_s2 = inlined_call_operand.hbm [shape: f32[1,32], index: 2, kind: input, shape index: {}]   ;;  %s5164_s3 = inlined_call_operand.vmem [shape: bf16[2,16,16,32], index: 3, kind: input, shape index: {}]   ;;  %s5165_s4 = inlined_call_operand.vmem [shape: bf16[2,8,8,32], index: 4, kind: output, shape index: {}]  }
   0x1   :  { %10 = vsyncpa [#allocation6], 0  ;;  %s4111_s15 = smov 0  }
   0x2 LB: > { %s4117_s16 = sadd.s32 4294967295, %s4076_s15   ;;  %p3364_p0 = scmp.ge.s32.totalorder %s4076_s15, 1  ;;  %s4076_s15 = sphi %s4111_s15, %s16_s15  }
   0x3   : > { %p141_p1 = scmp.lt.s32.totalorder %s4076_s15, 3  ;;  %s4078_s17 = smov [#allocation3]  }
   0x4   : > { %s153_s18 = sshll.u32 %s4078_s17, 4  ;;  %p3939_p3 = scmp.eq.s32.totalorder %s4117_s16, 0  ;;  %s154_s18 = int_to_ptr.vmem [resolvable:$true] %s153_s18 }
   0x5   : > { %p4121_p2 = pnand %p3364_p0, %p141_p1  ;;  %s4079_s20 = smov [#allocation5]  }
   0x6   : > { %s167_s21 = sshll.u32 %s4079_s20, 4  ;;  %s4021_s23 = scalar_lea.vmem %s154_s18, 1152  ;;  %s168_s21 = int_to_ptr.vmem [resolvable:$true] %s167_s21 }
   0x7   : > { %p3932_p4 = pneg %p4121_p2  ;;  %p4022_p7 = scmp.ne.s32.totalorder %s154_s18, %s4021_s23 }
   0x8   : > { %p4029_p10 = scmp.lt.s32.totalorder %s154_s18, %s154_s18  ;;  %p4030_p11 = scmp.lt.s32.totalorder %s4021_s23, %s4021_s23 }
   0x9   : > { %p4130_p5 = pnand %p3939_p3, %p3932_p4 }
   0xa   : > { %p4031_p12 = por %p4030_p11, %p4029_p10 }
   0xb   : > { %p4012_p6 = pneg %p4130_p5 }
   0xd   : > { %p4024_p8 = pnand %p4022_p7, %p4012_p6 }
   0xf   : > { %p4025_p9 = pneg %p4024_p8 }
  0x11   : > { %p4032_p13 = pnand %p4031_p12, %p4025_p9 }
  0x13   : > { %4035 = shalt.err (!%p4032_p13)
}
  0x14   : > { %s4080_s24 = smov 64   ;;  %s4081_s25 = smov 4  }
  0x15   : > { %3935 = dma.hbm_to_vmem [thread:$0]  (!%p4130_p5), %s5162_s1, 1152, %s154_s18, [#allocation4], %s4080_s24, %s4080_s24, %s4081_s25  }
  0x16   : > { %s4047_s28 = scalar_lea.vmem %s168_s21, 16  ;;  %s4054_s29 = scalar_lea.vmem %s168_s21, 32 }
  0x17   : > { %p4048_p0 = scmp.ne.s32.totalorder %s168_s21, %s4047_s28  ;;  %p4055_p7 = scmp.lt.s32.totalorder %s168_s21, %s168_s21 }
  0x18   : > { %p4056_p8 = scmp.lt.s32.totalorder %s4054_s29, %s4047_s28 }
  0x19   : > { %p4050_p1 = pnand %p4048_p0, %p4012_p6 }
  0x1a   : > { %p4057_p9 = por %p4056_p8, %p4055_p7 }
  0x1b   : > { %p4051_p4 = pneg %p4050_p1 }
  0x1d   : > { %p4058_p10 = pnand %p4057_p9, %p4051_p4 }
  0x1f   : > { %4061 = shalt.err (!%p4058_p10)
}
  0x20   : > { %3938 = dma.hbm_to_vmem [thread:$0]  (!%p4130_p5), %s5163_s2, 16, %s168_s21, [#allocation6]  }
  0x21   : > { %196 = sbr.rel (%p4121_p2) target bundleno = 674 (0x2a2), region = 36 }
  0x26   : > { %4067 = dma.done.wait (%p3939_p3), [#allocation4], 1152  }
  0x27   : > { %4069 = vsyncadd (%p3939_p3), [#allocation4], 4294966144 }
  0x28   : > { %4071 = dma.done.wait (%p3939_p3), [#allocation6], 16  }
  0x29   : > { %4073 = vsyncadd (%p3939_p3), [#allocation6], 4294967280  ;;  %p231_p6 = scmp.lt.s32.totalorder %s4117_s16, 1  ;;  %vm247_vm0 = vcmask 125952   ;;  %vm250_vm1 = vcmask 122880   ;;  %v4082_v0 = vmov 0  }
  0x2a   : > { %279 = vst.msk [vmem:[#allocation2 + $0x78] sm:$0xf] %vm247_vm0, %v4082_v0  ;;  %280 = vst.msk [vmem:[#allocation2 + $0x7c] sm:$0xf] %vm247_vm0, %v4082_v0  ;;  %vm335_vm2 = vsmask.f32 256 }
  0x2b   : > { %281 = vst.msk [vmem:[#allocation2 + $0x80] sm:$0x1] %vm250_vm1, %v4082_v0  ;;  %251 = vst.msk [vmem:[#allocation2 + $0x8] sm:$0x1] %vm250_vm1, %v4082_v0  ;;  %s5222_s16 = smov (!%p231_p6, %s4117_s16), 1  ;;  %vm1183_vm8 = vcmask 1046528  }
  0x2c   : > { %248 = vst.msk [vmem:[#allocation2] sm:$0xf] %vm247_vm0, %v4082_v0  ;;  %249 = vst.msk [vmem:[#allocation2 + $0x4] sm:$0xf] %vm247_vm0, %v4082_v0  ;;  %s3601_s6 = sshll.u32 %s5222_s16, 7  ;;  %s4083_s10 = smov 32  }
  0x2d   : > { %252 = vst.msk [vmem:[#allocation2 + $0xc] sm:$0xf] %vm247_vm0, %v4082_v0  ;;  %253 = vst.msk [vmem:[#allocation2 + $0x10] sm:$0xf] %vm247_vm0, %v4082_v0  ;;  %s4228_s9 = scalar_lea.vmem %s5161_s0, %s3601_s6  ;;  %vm336_vm3 = vsmask.f32 4368  ;;  %s4785_s14 = scalar_lea.vmem %s5164_s3, %s3601_s6 }
  0x2e   : > { %254 = vst.msk [vmem:[#allocation2 + $0x14] sm:$0x1] %vm250_vm1, %v4082_v0  ;;  %257 = vst.msk [vmem:[#allocation2 + $0x20] sm:$0x1] %vm250_vm1, %v4082_v0  ;;  %vm660_vm4 = vsmask.f32 7938 }
  0x2f   : > { %255 = vst.msk [vmem:[#allocation2 + $0x18] sm:$0xf] %vm247_vm0, %v4082_v0  ;;  %256 = vst.msk [vmem:[#allocation2 + $0x1c] sm:$0xf] %vm247_vm0, %v4082_v0  ;;  %v321_v1 = vld [vmem:[%s4228_s9 + $0x48] sm:$0xf] }
  0x30   : > { %258 = vst.msk [vmem:[#allocation2 + $0x24] sm:$0xf] %vm247_vm0, %v4082_v0  ;;  %259 = vst.msk [vmem:[#allocation2 + $0x28] sm:$0xf] %vm247_vm0, %v4082_v0  ;;  %v322_v2 = vld [vmem:[%s4228_s9 + $0x4c] sm:$0xf] }
  0x31   : > { %260 = vst.msk [vmem:[#allocation2 + $0x2c] sm:$0x1] %vm250_vm1, %v4082_v0  ;;  %263 = vst.msk [vmem:[#allocation2 + $0x38] sm:$0x1] %vm250_vm1, %v4082_v0  ;;  %v319_v3 = vld [vmem:[%s4228_s9 + $0x40] sm:$0xf] }
  0x32   : > { %261 = vst.msk [vmem:[#allocation2 + $0x30] sm:$0xf] %vm247_vm0, %v4082_v0  ;;  %262 = vst.msk [vmem:[#allocation2 + $0x34] sm:$0xf] %vm247_vm0, %v4082_v0  ;;  %v492_v4 = vshrl.u32 %v321_v1, 16  ;;  %v495_v5 = vshll.u32 %v321_v1, 16 }
  0x33   : > { %264 = vst.msk [vmem:[#allocation2 + $0x3c] sm:$0xf] %vm247_vm0, %v4082_v0  ;;  %265 = vst.msk [vmem:[#allocation2 + $0x40] sm:$0xf] %vm247_vm0, %v4082_v0  ;;  %v500_v6 = vshrl.u32 %v322_v2, 16  ;;  %v503_v7 = vshll.u32 %v322_v2, 16 }
  0x34   : > { %266 = vst.msk [vmem:[#allocation2 + $0x44] sm:$0x1] %vm250_vm1, %v4082_v0  ;;  %269 = vst.msk [vmem:[#allocation2 + $0x50] sm:$0x1] %vm250_vm1, %v4082_v0  ;;  %v320_v9 = vld [vmem:[%s4228_s9 + $0x44] sm:$0xf] }
  0x35   : > { %267 = vst.msk [vmem:[#allocation2 + $0x48] sm:$0xf] %vm247_vm0, %v4082_v0  ;;  %268 = vst.msk [vmem:[#allocation2 + $0x4c] sm:$0xf] %vm247_vm0, %v4082_v0  ;;  %v475_v10 = vshrl.u32 %v319_v3, 16  ;;  %v478_v11 = vshll.u32 %v319_v3, 16 }
  0x36   : > { %270 = vst.msk [vmem:[#allocation2 + $0x54] sm:$0xf] %vm247_vm0, %v4082_v0  ;;  %271 = vst.msk [vmem:[#allocation2 + $0x58] sm:$0xf] %vm247_vm0, %v4082_v0  ;;  %v494_v12 = vrot.slane %v492_v4, 7  ;;  %v502_v13 = vrot.slane %v500_v6, 7 }
  0x37   : > { %272 = vst.msk [vmem:[#allocation2 + $0x5c] sm:$0x1] %vm250_vm1, %v4082_v0  ;;  %275 = vst.msk [vmem:[#allocation2 + $0x68] sm:$0x1] %vm250_vm1, %v4082_v0  ;;  %v727_v15 = vld [vmem:[#allocation2 + $0x78] sm:$0xf] }
  0x38   : > { %273 = vst.msk [vmem:[#allocation2 + $0x60] sm:$0xf] %vm247_vm0, %v4082_v0  ;;  %274 = vst.msk [vmem:[#allocation2 + $0x64] sm:$0xf] %vm247_vm0, %v4082_v0  ;;  %v483_v16 = vshrl.u32 %v320_v9, 16  ;;  %v477_v19 = vrot.slane %v475_v10, 7  ;;  %v497_v22 = vor.u32 %v495_v5, %v494_v12  ;;  %v505_v24 = vor.u32 %v503_v7, %v502_v13 }
  0x39   : > { %276 = vst.msk [vmem:[#allocation2 + $0x6c] sm:$0xf] %vm247_vm0, %v4082_v0  ;;  %277 = vst.msk [vmem:[#allocation2 + $0x70] sm:$0xf] %vm247_vm0, %v4082_v0  ;;  %v731_v18 = vld [vmem:[#allocation2 + $0x80] sm:$0x1] }
  0x3a   : > { %278 = vst.msk [vmem:[#allocation2 + $0x74] sm:$0x1] %vm250_vm1, %v4082_v0  ;;  %284 = vst.msk [vmem:[#allocation2 + $0x8c] sm:$0x1] %vm250_vm1, %v4082_v0  ;;  %v486_v20 = vshll.u32 %v320_v9, 16  ;;  %v498_v23 = vrot.slane %v494_v12, 4  ;;  %v480_v27 = vor.u32 %v478_v11, %v477_v19 }
  0x3b   : > { %282 = vst.msk [vmem:[#allocation2 + $0x84] sm:$0xf] %vm247_vm0, %v4082_v0  ;;  %283 = vst.msk [vmem:[#allocation2 + $0x88] sm:$0xf] %vm247_vm0, %v4082_v0  ;;  %v305_v21 = vld [vmem:[%s4228_s9 + $0x8] sm:$0xf] }
  0x3c   : > { %285 = vst.msk [vmem:[#allocation2 + $0x90] sm:$0xf] %vm247_vm0, %v4082_v0  ;;  %286 = vst.msk [vmem:[#allocation2 + $0x94] sm:$0xf] %vm247_vm0, %v4082_v0  ;;  %v507_v25 = vrot.slane %v502_v13, 4  ;;  %v481_v28 = vrot.slane %v477_v19, 4 }
  0x3d   : > { %287 = vst.msk [vmem:[#allocation2 + $0x98] sm:$0x1] %vm250_vm1, %v4082_v0  ;;  %290 = vst.msk [vmem:[#allocation2 + $0xa4] sm:$0x1] %vm250_vm1, %v4082_v0  ;;  %v485_v29 = vrot.slane %v483_v16, 7  ;;  %v356_v31 = vshrl.u32 %v305_v21, 16 }
  0x3e   : > { %288 = vst.msk [vmem:[#allocation2 + $0x9c] sm:$0xf] %vm247_vm0, %v4082_v0  ;;  %289 = vst.msk [vmem:[#allocation2 + $0xa0] sm:$0xf] %vm247_vm0, %v4082_v0  ;;  %v306_v30 = vld [vmem:[%s4228_s9 + $0xc] sm:$0xf] }
  0x3f   : > { %291 = vst.msk [vmem:[#allocation2 + $0xa8] sm:$0xf] %vm247_vm0, %v4082_v0  ;;  %292 = vst.msk [vmem:[#allocation2 + $0xac] sm:$0xf] %vm247_vm0, %v4082_v0  ;;  %v359_v36 = vshll.u32 %v305_v21, 16  ;;  %v488_v38 = vor.u32 %v486_v20, %v485_v29  ;;  %v490_v39 = vrot.slane %v485_v29, 4 }
  0x40   : > { %293 = vst.msk [vmem:[#allocation2 + $0xb0] sm:$0x1] %vm250_vm1, %v4082_v0  ;;  %296 = vst.msk [vmem:[#allocation2 + $0xbc] sm:$0x1] %vm250_vm1, %v4082_v0  ;;  %v720_v26 = vld [vmem:[#allocation2 + $0x6c] sm:$0xf] }
  0x41   : > { %294 = vst.msk [vmem:[#allocation2 + $0xb4] sm:$0xf] %vm247_vm0, %v4082_v0  ;;  %295 = vst.msk [vmem:[#allocation2 + $0xb8] sm:$0xf] %vm247_vm0, %v4082_v0  ;;  %v724_v35 = vld [vmem:[#allocation2 + $0x74] sm:$0x1] }
  0x42   : > { %297 = vst.msk [vmem:[#allocation2 + $0xc0] sm:$0xf] %vm247_vm0, %v4082_v0  ;;  %298 = vst.msk [vmem:[#allocation2 + $0xc4] sm:$0xf] %vm247_vm0, %v4082_v0  ;;  %v303_v37 = vld [vmem:[%s4228_s9] sm:$0xf] }
  0x43   : > { %299 = vst.msk [vmem:[#allocation2 + $0xc8] sm:$0x1] %vm250_vm1, %v4082_v0  ;;  %302 = vst.msk [vmem:[#allocation2 + $0xd4] sm:$0x1] %vm250_vm1, %v4082_v0  ;;  %v358_v41 = vrot.slane %v356_v31, 7  ;;  %v364_v44 = vshrl.u32 %v306_v30, 16 }
  0x44   : > { %300 = vst.msk [vmem:[#allocation2 + $0xcc] sm:$0xf] %vm247_vm0, %v4082_v0  ;;  %301 = vst.msk [vmem:[#allocation2 + $0xd0] sm:$0xf] %vm247_vm0, %v4082_v0  ;;  %v671_v42 = vld [vmem:[#allocation2 + $0x18] sm:$0xf] }
  0x45   : > { %vm4234_vm5 = vmor %vm335_vm2, %vm336_vm3  ;;  %v304_v43 = vld [vmem:[%s4228_s9 + $0x4] sm:$0xf]  ;;  %v367_v45 = vshll.u32 %v306_v30, 16  ;;  %v339_v46 = vshrl.u32 %v303_v37, 16  ;;  %v342_v47 = vshll.u32 %v303_v37, 16  ;;  %v361_v51 = vor.u32 %v359_v36, %v358_v41  ;;  %s4084_s11 = smov 16  }
  0x46   : > { %vm4240_vm6 = vmand %vm247_vm0, %vm660_vm4  ;;  %v506_v32 = vsel %vm4234_vm5, %v498_v23, %v505_v24  ;;  %v309_v48 = vld [vmem:[%s4228_s9 + $0x18] sm:$0xf]  ;;  %v489_v49 = vsel %vm4234_vm5, %v481_v28, %v488_v38  ;;  %v362_v52 = vrot.slane %v358_v41, 4  ;;  %v310_v53 = vld [vmem:[%s4228_s9 + $0x1c] sm:$0xf]  ;;  %v366_v54 = vrot.slane %v364_v44, 7 }
  0x47   : > { %vm4246_vm7 = vmand %vm250_vm1, %vm335_vm2  ;;  %v728_v33 = vsel %vm4240_vm6, %v497_v22, %v727_v15  ;;  %730 = vst.msk [vmem:[#allocation2 + $0x7c] sm:$0xf] %vm247_vm0, %v506_v32  ;;  %v721_v40 = vsel %vm4240_vm6, %v480_v27, %v720_v26  ;;  %v675_v55 = vld [vmem:[#allocation2 + $0x20] sm:$0x1]  ;;  %v341_v56 = vrot.slane %v339_v46, 7  ;;  %v347_v57 = vshrl.u32 %v304_v43, 16 }
  0x48   : > { %v732_v34 = vsel %vm4246_vm7, %v507_v25, %v731_v18  ;;  %729 = vst [vmem:[#allocation2 + $0x78] sm:$0xf] %v728_v33  ;;  %722 = vst [vmem:[#allocation2 + $0x6c] sm:$0xf] %v721_v40  ;;  %v725_v50 = vsel %vm4246_vm7, %v490_v39, %v724_v35  ;;  %v350_v58 = vshll.u32 %v304_v43, 16  ;;  %v672_v59 = vsel %vm4240_vm6, %v361_v51, %v671_v42  ;;  %v3993_v40 = vld [vmem:[#allocation3 + $0x28] sm:$0xff]  }
  0x49   : > { %733 = vst [vmem:[#allocation2 + $0x80] sm:$0x1] %v732_v34  ;;  %723 = vst.msk [vmem:[#allocation2 + $0x70] sm:$0xf] %vm247_vm0, %v489_v49  ;;  %v662_v60 = vld [vmem:[#allocation2 + $0xc] sm:$0xf]  ;;  %v369_v0 = vor.u32 %v367_v45, %v366_v54  ;;  %v344_v2 = vor.u32 %v342_v47, %v341_v56  ;;  %3804 = vmatprep.subr.bf16.mxu0 %v3993_v40  ;;  %3918 = vmatprep.subr.bf16.mxu1 %v3993_v40 }
  0x4a   : > { %726 = vst [vmem:[#allocation2 + $0x74] sm:$0x1] %v725_v50  ;;  %v390_v61 = vshrl.u32 %v309_v48, 16  ;;  %v393_v62 = vshll.u32 %v309_v48, 16  ;;  %v398_v63 = vshrl.u32 %v310_v53, 16  ;;  %v371_v1 = vrot.slane %v366_v54, 4  ;;  %3805 = vmatpush3.bf16.msra.mxu0 %v3993_v40  ;;  %3921 = vmatpush3.bf16.msra.mxu1 %v3993_v40 }
  0x4b   : > { %673 = vst [vmem:[#allocation2 + $0x18] sm:$0xf] %v672_v59  ;;  %v345_v3 = vrot.slane %v341_v56, 4  ;;  %v685_v4 = vld [vmem:[#allocation2 + $0x30] sm:$0xf]  ;;  %v349_v5 = vrot.slane %v347_v57, 7  ;;  %v370_v13 = vsel %vm4234_vm5, %v362_v52, %v369_v0  ;;  %v663_v16 = vsel %vm4240_vm6, %v344_v2, %v662_v60 }
  0x4c   : > { %v668_v6 = vld [vmem:[#allocation2 + $0x14] sm:$0x1]  ;;  %v392_v7 = vrot.slane %v390_v61, 7  ;;  %v400_v9 = vrot.slane %v398_v63, 7  ;;  %v401_v10 = vshll.u32 %v310_v53, 16  ;;  %v676_v15 = vsel %vm4246_vm7, %v371_v1, %v675_v55  ;;  %s3603_s17 = sshll.u32 %s5222_s16, 5 }
  0x4d   : > { %v689_v11 = vld [vmem:[#allocation2 + $0x38] sm:$0x1]  ;;  %v323_v12 = vld [vmem:[%s4228_s9 + $0x50] sm:$0xf]  ;;  %v324_v18 = vld [vmem:[%s4228_s9 + $0x54] sm:$0xf]  ;;  %v352_v21 = vor.u32 %v350_v58, %v349_v5  ;;  %s4919_s19 = scalar_lea.vmem %s5165_s4, %s3603_s17 }
  0x4e   : > { %674 = vst.msk [vmem:[#allocation2 + $0x1c] sm:$0xf] %vm247_vm0, %v370_v13  ;;  %677 = vst [vmem:[#allocation2 + $0x20] sm:$0x1] %v676_v15  ;;  %v395_v22 = vor.u32 %v393_v62, %v392_v7  ;;  %v403_v23 = vor.u32 %v401_v10, %v400_v9  ;;  %v354_v24 = vrot.slane %v349_v5, 4  ;;  %v396_v25 = vrot.slane %v392_v7, 4 }
  0x4f   : > { %v4280_v19 = vld [vmem:[#allocation2 + $0x78] sm:$0xff]   ;;  %664 = vst [vmem:[#allocation2 + $0xc] sm:$0xf] %v663_v16  ;;  %v405_v26 = vrot.slane %v400_v9, 4  ;;  %v509_v27 = vshrl.u32 %v323_v12, 16  ;;  %v353_v31 = vsel %vm4234_vm5, %v345_v3, %v352_v21  ;;  %v512_v42 = vshll.u32 %v323_v12, 16 }
  0x50   : > { %v4282_v20 = vld [vmem:[#allocation2 + $0x80] ss:$0 sps:$4 sm:$0x11]   ;;  %v325_v28 = vld [vmem:[%s4228_s9 + $0x58] sm:$0xf]  ;;  %v1214_v29 = vrot.slane %v4280_v19, 1  ;;  %v686_v32 = vsel %vm4240_vm6, %v395_v22, %v685_v4  ;;  %v669_v35 = vsel %vm4246_vm7, %v354_v24, %v668_v6  ;;  %v404_v36 = vsel %vm4234_vm5, %v396_v25, %v403_v23 }
  0x51   : > { %v1215_v30 = vrot.slane %v4282_v20, 1  ;;  %v4292_v33 = vld [vmem:[#allocation2 + $0x6c] sm:$0xff]   ;;  %v4294_v34 = vld [vmem:[#allocation2 + $0x74] ss:$0 sps:$4 sm:$0x11]   ;;  %v690_v37 = vsel %vm4246_vm7, %v405_v26, %v689_v11  ;;  %v511_v38 = vrot.slane %v509_v27, 7 }
  0x52   : > { %665 = vst.msk [vmem:[#allocation2 + $0x10] sm:$0xf] %vm247_vm0, %v353_v31  ;;  %687 = vst [vmem:[#allocation2 + $0x30] sm:$0xf] %v686_v32  ;;  %v734_v39 = vld [vmem:[#allocation2 + $0x84] sm:$0xf] }
  0x53   : > { %v1216_v41 = vsel %vm1183_vm8, %v1214_v29, %v1215_v30  ;;  %670 = vst [vmem:[#allocation2 + $0x14] sm:$0x1] %v669_v35  ;;  %688 = vst.msk [vmem:[#allocation2 + $0x34] sm:$0xf] %vm247_vm0, %v404_v36  ;;  %v517_v43 = vshrl.u32 %v324_v18, 16  ;;  %v520_v44 = vshll.u32 %v324_v18, 16  ;;  %v514_v51 = vor.u32 %v512_v42, %v511_v38 }
  0x54   : > { %691 = vst [vmem:[#allocation2 + $0x38] sm:$0x1] %v690_v37  ;;  %1252 = vrot.lane.b32.xlu0 %v1216_v41, %s4083_s10  ;;  %v1211_v45 = vrot.slane %v4292_v33, 1  ;;  %v1212_v46 = vrot.slane %v4294_v34, 1  ;;  %v515_v47 = vrot.slane %v511_v38, 4  ;;  %v526_v50 = vshrl.u32 %v325_v28, 16 }
  0x55   : > { %v738_v48 = vld [vmem:[#allocation2 + $0x8c] sm:$0x1]  ;;  %v326_v49 = vld [vmem:[%s4228_s9 + $0x5c] sm:$0xf]  ;;  %v519_v52 = vrot.slane %v517_v43, 7  ;;  %v529_v53 = vshll.u32 %v325_v28, 16  ;;  %v735_v62 = vsel %vm4240_vm6, %v514_v51, %v734_v39 }
  0x56   : > { %v534_v54 = vshrl.u32 %v326_v49, 16  ;;  %v741_v55 = vld [vmem:[#allocation2 + $0x90] sm:$0xf]  ;;  %v1213_v56 = vsel %vm1183_vm8, %v1211_v45, %v1212_v46  ;;  %v4310_v57 = vld [vmem:[#allocation2 + $0x18] sm:$0xff]   ;;  %v528_v58 = vrot.slane %v526_v50, 7  ;;  %v537_v15 = vshll.u32 %v326_v49, 16 }
  0x57   : > { %1250 = vrot.lane.b32.xlu1 %v1213_v56, %s4083_s10  ;;  %v4313_v59 = vld [vmem:[#allocation2 + $0x20] ss:$0 sps:$4 sm:$0x11]   ;;  %v522_v60 = vor.u32 %v520_v44, %v519_v52  ;;  %v524_v61 = vrot.slane %v519_v52, 4  ;;  %v1190_v63 = vrot.slane %v4310_v57, 1  ;;  %v3996_v39 = vld [vmem:[#allocation3 + $0x20] sm:$0xff]  }
  0x58   : > { %736 = vst [vmem:[#allocation2 + $0x84] sm:$0xf] %v735_v62  ;;  %v531_v0 = vor.u32 %v529_v53, %v528_v58  ;;  %v532_v1 = vrot.slane %v528_v58, 4  ;;  %v536_v2 = vrot.slane %v534_v54, 7  ;;  %vm958_vm9 = vsmask.f32 7424  ;;  %3806 = vmatprep.subr.bf16.mxu0 %v3996_v39  ;;  %3919 = vmatprep.subr.bf16.mxu1 %v3996_v39 }
  0x59   : > { %v1191_v3 = vrot.slane %v4313_v59, 1  ;;  %v3965_v4 = vld [vmem:[#allocation2 + $0xc] sm:$0xff]   ;;  %v523_v5 = vsel %vm4234_vm5, %v515_v47, %v522_v60  ;;  %v739_v6 = vsel %vm4246_vm7, %v524_v61, %v738_v48  ;;  %v745_v7 = vld [vmem:[#allocation2 + $0x98] sm:$0x1]  ;;  %v308_v31 = vld [vmem:[%s4228_s9 + $0x14] sm:$0xf]  ;;  %3807 = vmatpush3.bf16.msra.mxu0 %v3996_v39  ;;  %3922 = vmatpush3.bf16.msra.mxu1 %v3996_v39 }
  0x5a   : > { %v3966_v9 = vld [vmem:[#allocation2 + $0x14] ss:$0 sps:$4 sm:$0x11]   ;;  %737 = vst.msk [vmem:[#allocation2 + $0x88] sm:$0xf] %vm247_vm0, %v523_v5  ;;  %v742_v11 = vsel %vm4240_vm6, %v531_v0, %v741_v55  ;;  %v1187_v13 = vrot.slane %v3965_v4, 1  ;;  %v539_v23 = vor.u32 %v537_v15, %v536_v2 }
  0x5b   : > { %v4323_v10 = vld [vmem:[#allocation2 + $0x30] sm:$0xff]   ;;  %740 = vst [vmem:[#allocation2 + $0x8c] sm:$0x1] %v739_v6  ;;  %v1192_v12 = vsel %vm1183_vm8, %v1190_v63, %v1191_v3  ;;  %743 = vst [vmem:[#allocation2 + $0x90] sm:$0xf] %v742_v11  ;;  %v1188_v16 = vrot.slane %v3966_v9, 1 }
  0x5c   : > { %1236 = vrot.lane.b32.xlu1 %v1192_v12, %s4083_s10  ;;  %v4330_v18 = vld [vmem:[#allocation2 + $0x38] ss:$0 sps:$4 sm:$0x11]   ;;  %v1196_v21 = vrot.slane %v4323_v10, 1  ;;  %v541_v22 = vrot.slane %v536_v2, 4  ;;  %v972_v24 = vshrl.u32 %v3965_v4, 16  ;;  %v540_v35 = vsel %vm4234_vm5, %v532_v1, %v539_v23 }
  0x5d   : > { %v974_v25 = vshll.u32 %v3965_v4, 16  ;;  %v979_v26 = vshll.u32 %v3966_v9, 16  ;;  %v307_v27 = vld [vmem:[%s4228_s9 + $0x10] sm:$0xf]  ;;  %v1189_v28 = vsel %vm1183_vm8, %v1187_v13, %v1188_v16  ;;  %v1197_v29 = vrot.slane %v4330_v18, 1 }
  0x5e   : > { %v746_v30 = vsel %vm4246_vm7, %v541_v22, %v745_v7  ;;  %v373_v32 = vshrl.u32 %v307_v27, 16  ;;  %1234 = vrot.lane.b32.xlu0 %v1189_v28, %s4083_s10  ;;  %v376_v38 = vshll.u32 %v307_v27, 16  ;;  %744 = vst.msk [vmem:[#allocation2 + $0x94] sm:$0xf] %vm247_vm0, %v540_v35  ;;  %v381_v42 = vshrl.u32 %v308_v31, 16  ;;  %v3997_v45 = vld [vmem:[#allocation3 + $0x18] sm:$0xff]  }
  0x5f   : > { %747 = vst [vmem:[#allocation2 + $0x98] sm:$0x1] %v746_v30  ;;  %v976_v36 = vrot.slane %v974_v25, 1  ;;  %v981_v37 = vrot.slane %v979_v26, 1  ;;  %v1198_v40 = vsel %vm1183_vm8, %v1196_v21, %v1197_v29  ;;  %v384_v43 = vshll.u32 %v308_v31, 16  ;;  %3808 = vmatprep.subr.bf16.mxu0 %v3997_v45  ;;  %3920 = vmatprep.subr.bf16.mxu1 %v3997_v45 }
  0x60   : > { %v375_v41 = vrot.slane %v373_v32, 7  ;;  %v678_v44 = vld [vmem:[#allocation2 + $0x24] sm:$0xf]  ;;  %1240 = vrot.lane.b32.xlu1 %v1198_v40, %s4083_s10  ;;  %v984_v48 = vshrl.u32 %v4310_v57, 16  ;;  %v383_v54 = vrot.slane %v381_v42, 7  ;;  %v986_v55 = vshll.u32 %v4310_v57, 16  ;;  %3809 = vmatpush3.bf16.msra.mxu0 %v3997_v45 }
  0x61   : > { %v4345_v46 = vld [vmem:[#allocation2 + $0x84] sm:$0xff]   ;;  %v977_v47 = vor.u32 %v976_v36, %v972_v24  ;;  %v682_v60 = vld [vmem:[#allocation2 + $0x2c] sm:$0x1]  ;;  %v991_v61 = vshll.u32 %v4313_v59, 16  ;;  %v1068_v62 = vshrl.u32 %v4292_v33, 16  ;;  %v1070_v1 = vshll.u32 %v4292_v33, 16  ;;  %3923 = vmatpush3.bf16.msra.mxu1 %v3997_v45 }
  0x62   : > { %v4348_v49 = vld [vmem:[#allocation2 + $0x8c] ss:$0 sps:$4 sm:$0x11]   ;;  %v378_v50 = vor.u32 %v376_v38, %v375_v41  ;;  %v379_v51 = vrot.slane %v375_v41, 4  ;;  %v1217_v52 = vrot.slane %v4345_v46, 1  ;;  %v386_v63 = vor.u32 %v384_v43, %v383_v54 }
  0x63   : > { %v982_v53 = vsel %vm958_vm9, %v977_v47, %v981_v37  ;;  %v1218_v56 = vrot.slane %v4348_v49, 1  ;;  %v388_v0 = vrot.slane %v383_v54, 4  ;;  %v988_v57 = vrot.slane %v986_v55, 1  ;;  %v327_v38 = vld [vmem:[%s4228_s9 + $0x60] sm:$0xf] }
  0x64   : > { %v679_v58 = vsel %vm4240_vm6, %v378_v50, %v678_v44  ;;  %1153 = vrot.lane.b32.xlu1 %v982_v53, %s4084_s11  ;;  %v993_v4 = vrot.slane %v991_v61, 1  ;;  %v387_v5 = vsel %vm4234_vm5, %v379_v51, %v386_v63  ;;  %v1072_v9 = vrot.slane %v1070_v1, 1  ;;  %v328_v42 = vld [vmem:[%s4228_s9 + $0x64] sm:$0xf]  ;;  %v329_v55 = vld [vmem:[%s4228_s9 + $0x68] sm:$0xf] }
  0x65   : > { %680 = vst [vmem:[#allocation2 + $0x24] sm:$0xf] %v679_v58  ;;  %v1219_v2 = vsel %vm1183_vm8, %v1217_v52, %v1218_v56  ;;  %v4362_v59 = vld [vmem:[#allocation2 + $0x90] sm:$0xff]   ;;  %v683_v6 = vsel %vm4246_vm7, %v388_v0, %v682_v60  ;;  %v989_v7 = vor.u32 %v988_v57, %v984_v48  ;;  %681 = vst.msk [vmem:[#allocation2 + $0x28] sm:$0xf] %vm247_vm0, %v387_v5  ;;  %v1075_v33 = vshll.u32 %v4294_v34, 16 }
  0x66   : > { %v3972_v3 = vld [vmem:[#allocation2 + $0x98] ss:$0 sps:$4 sm:$0x11]   ;;  %1254 = vrot.lane.b32.xlu0 %v1219_v2, %s4083_s10  ;;  %684 = vst [vmem:[#allocation2 + $0x2c] sm:$0x1] %v683_v6  ;;  %v1220_v13 = vrot.slane %v4362_v59, 1  ;;  %v1073_v16 = vor.u32 %v1072_v9, %v1068_v62 }
  0x67   : > { %v1221_v11 = vrot.slane %v3972_v3, 1  ;;  %v1111_v12 = vshll.u32 %v3972_v3, 16  ;;  %v994_v15 = vsel %vm958_vm9, %v989_v7, %v993_v4  ;;  %v1080_v21 = vshrl.u32 %v4280_v19, 16  ;;  %v330_v62 = vld [vmem:[%s4228_s9 + $0x6c] sm:$0xf] }
  0x68   : > { %1155 = vrot.lane.b32.xlu1 %v994_v15, %s4084_s11  ;;  %v1077_v22 = vrot.slane %v1075_v33, 1  ;;  %v1104_v23 = vshrl.u32 %v4362_v59, 16  ;;  %v1106_v24 = vshll.u32 %v4362_v59, 16  ;;  %v1082_v25 = vshll.u32 %v4280_v19, 16  ;;  %v311_v2 = vld [vmem:[%s4228_s9 + $0x20] sm:$0xf] }
  0x69   : > { %v1222_v34 = vsel %vm1183_vm8, %v1220_v13, %v1221_v11  ;;  %v1087_v26 = vshll.u32 %v4282_v20, 16  ;;  %v1092_v27 = vshrl.u32 %v4345_v46, 16  ;;  %v1094_v28 = vshll.u32 %v4345_v46, 16  ;;  %v748_v7 = vld [vmem:[#allocation2 + $0x9c] sm:$0xf] }
  0x6a   : > { %1256 = vrot.lane.b32.xlu0 %v1222_v34, %s4083_s10  ;;  %v1108_v29 = vrot.slane %v1106_v24, 1  ;;  %v1113_v30 = vrot.slane %v1111_v12, 1  ;;  %v1084_v31 = vrot.slane %v1082_v25, 1  ;;  %v1099_v32 = vshll.u32 %v4348_v49, 16  ;;  %v752_v12 = vld [vmem:[#allocation2 + $0xa4] sm:$0x1] }
  0x6b   : > { %v1089_v35 = vrot.slane %v1087_v26, 1  ;;  %v1096_v36 = vrot.slane %v1094_v28, 1  ;;  %v1008_v19 = vshrl.u32 %v4323_v10, 16  ;;  %v1010_v37 = vshll.u32 %v4323_v10, 16 }
  0x6c   : > { %v1109_v20 = vor.u32 %v1108_v29, %v1104_v23  ;;  %v1085_v39 = vor.u32 %v1084_v31, %v1080_v21  ;;  %v1101_v40 = vrot.slane %v1099_v32, 1  ;;  %v1015_v41 = vshll.u32 %v4330_v18, 16  ;;  %v4388_v43 = vld [vmem:[#allocation2 + $0x24] sm:$0xff]  }
  0x6d   : > { %v1078_v44 = vsel %vm958_vm9, %v1073_v16, %v1077_v22  ;;  %v1097_v45 = vor.u32 %v1096_v36, %v1092_v27  ;;  %v1012_v47 = vrot.slane %v1010_v37, 1  ;;  %v3974_v48 = vld [vmem:[#allocation2 + $0x2c] ss:$0 sps:$4 sm:$0x11]   ;;  %v543_v51 = vshrl.u32 %v327_v38, 16 }
  0x6e   : > { %v1114_v49 = vsel %vm958_vm9, %v1109_v20, %v1113_v30  ;;  %v4393_v10 = vsel %vm958_vm9, %v1085_v39, %v1089_v35  ;;  %v1017_v50 = vrot.slane %v1015_v41, 1  ;;  %v1193_v18 = vrot.slane %v4388_v43, 1  ;;  %v312_v22 = vld [vmem:[%s4228_s9 + $0x24] sm:$0xf]  ;;  %v313_v31 = vld [vmem:[%s4228_s9 + $0x28] sm:$0xf] }
  0x6f   : > { %1175 = vrot.lane.b32.xlu1 %v1114_v49, %s4084_s11  ;;  %v996_v52 = vshrl.u32 %v4388_v43, 16  ;;  %v998_v53 = vshll.u32 %v4388_v43, 16  ;;  %v4400_v54 = vsel %vm958_vm9, %v1097_v45, %v1101_v40  ;;  %v1194_v56 = vrot.slane %v3974_v48, 1  ;;  %v755_v36 = vld [vmem:[#allocation2 + $0xa8] sm:$0xf] }
  0x70   : > { %v1003_v58 = vshll.u32 %v3974_v48, 16  ;;  %v1013_v60 = vor.u32 %v1012_v47, %v1008_v19  ;;  %v545_v61 = vrot.slane %v543_v51, 7  ;;  %v546_v0 = vshll.u32 %v327_v38, 16  ;;  %v759_v19 = vld [vmem:[#allocation2 + $0xb0] sm:$0x1] }
  0x71   : > { %v1000_v63 = vrot.slane %v998_v53, 1  ;;  %v551_v57 = vshrl.u32 %v328_v42, 16  ;;  %v554_v1 = vshll.u32 %v328_v42, 16  ;;  %v1195_v3 = vsel %vm1183_vm8, %v1193_v18, %v1194_v56  ;;  %v692_v42 = vld [vmem:[#allocation2 + $0x3c] sm:$0xf] }
  0x72   : > { %v1005_v4 = vrot.slane %v1003_v58, 1  ;;  %v1018_v5 = vsel %vm958_vm9, %v1013_v60, %v1017_v50  ;;  %v549_v6 = vrot.slane %v545_v61, 4  ;;  %1238 = vrot.lane.b32.xlu0 %v1195_v3, %s4083_s10  ;;  %v548_v11 = vor.u32 %v546_v0, %v545_v61  ;;  %v331_v50 = vld [vmem:[%s4228_s9 + $0x70] sm:$0xf]  ;;  %v696_v53 = vld [vmem:[#allocation2 + $0x44] sm:$0x1] }
  0x73   : > { %v1001_v9 = vor.u32 %v1000_v63, %v996_v52  ;;  %v553_v33 = vrot.slane %v551_v57, 7  ;;  %v560_v13 = vshrl.u32 %v329_v55, 16  ;;  %v563_v15 = vshll.u32 %v329_v55, 16  ;;  %v699_v56 = vld [vmem:[#allocation2 + $0x48] sm:$0xf] }
  0x74   : > { %v568_v16 = vshrl.u32 %v330_v62, 16  ;;  %v571_v21 = vshll.u32 %v330_v62, 16  ;;  %v407_v23 = vshrl.u32 %v311_v2, 16  ;;  %v749_v26 = vsel %vm4240_vm6, %v548_v11, %v748_v7  ;;  %v332_v63 = vld [vmem:[%s4228_s9 + $0x74] sm:$0xf] }
  0x75   : > { %v1006_v24 = vsel %vm958_vm9, %v1001_v9, %v1005_v4  ;;  %v556_v25 = vor.u32 %v554_v1, %v553_v33  ;;  %v558_v34 = vrot.slane %v553_v33, 4  ;;  %750 = vst [vmem:[#allocation2 + $0x9c] sm:$0xf] %v749_v26  ;;  %v562_v27 = vrot.slane %v560_v13, 7  ;;  %v4436_v0 = vld [vmem:[%s4228_s9 + $0x78] sm:$0xf] }
  0x76   : > { %1157 = vrot.lane.b32.xlu1 %v1006_v24, %s4084_s11  ;;  %v570_v28 = vrot.slane %v568_v16, 7  ;;  %v409_v29 = vrot.slane %v407_v23, 7  ;;  %v410_v30 = vshll.u32 %v311_v2, 16  ;;  %1169 = vrot.lane.b32.xlu0 %v1078_v44, %s4084_s11  ;;  %v415_v37 = vshrl.u32 %v312_v22, 16  ;;  %v314_v44 = vld [vmem:[%s4228_s9 + $0x2c] sm:$0xf] }
  0x77   : > { %v557_v32 = vsel %vm4234_vm5, %v549_v6, %v556_v25  ;;  %v753_v35 = vsel %vm4246_vm7, %v558_v34, %v752_v12  ;;  %v418_v38 = vshll.u32 %v312_v22, 16  ;;  %v565_v20 = vor.u32 %v563_v15, %v562_v27  ;;  %v703_v7 = vld [vmem:[#allocation2 + $0x50] sm:$0x1]  ;;  %v762_v9 = vld [vmem:[#allocation2 + $0xb4] sm:$0xf]  ;;  %v4450_v26 = vld [vmem:[#allocation3 + $0x10] sm:$0xff]  }
  0x78   : > { %751 = vst.msk [vmem:[#allocation2 + $0xa0] sm:$0xf] %vm247_vm0, %v557_v32  ;;  %754 = vst [vmem:[#allocation2 + $0xa4] sm:$0x1] %v753_v35  ;;  %v566_v39 = vrot.slane %v562_v27, 4  ;;  %v573_v40 = vor.u32 %v571_v21, %v570_v28  ;;  %v575_v41 = vrot.slane %v570_v28, 4  ;;  %v412_v45 = vor.u32 %v410_v30, %v409_v29  ;;  %3842 = vmatprep.subr.bf16.mxu1 %v4450_v26 }
  0x79   : > { %v413_v47 = vrot.slane %v409_v29, 4  ;;  %v417_v48 = vrot.slane %v415_v37, 7  ;;  %v424_v49 = vshrl.u32 %v313_v31, 16  ;;  %v756_v18 = vsel %vm4240_vm6, %v565_v20, %v755_v36 }
  0x7a   : > { %1159 = vrot.lane.b32.xlu1 %v1018_v5, %s4084_s11  ;;  %v574_v51 = vsel %vm4234_vm5, %v566_v39, %v573_v40  ;;  %v760_v52 = vsel %vm4246_vm7, %v575_v41, %v759_v19  ;;  %v427_v55 = vshll.u32 %v313_v31, 16  ;;  %1171 = vrot.lane.b32.xlu0 %v4393_v10, %s4084_s11  ;;  %757 = vst [vmem:[#allocation2 + $0xa8] sm:$0xf] %v756_v18  ;;  %v432_v57 = vshrl.u32 %v314_v44, 16 }
  0x7b   : > { %758 = vst.msk [vmem:[#allocation2 + $0xac] sm:$0xf] %vm247_vm0, %v574_v51  ;;  %761 = vst [vmem:[#allocation2 + $0xb0] sm:$0x1] %v760_v52  ;;  %v420_v58 = vor.u32 %v418_v38, %v417_v48  ;;  %v422_v60 = vrot.slane %v417_v48, 4  ;;  %v693_v61 = vsel %vm4240_vm6, %v412_v45, %v692_v42  ;;  %v426_v62 = vrot.slane %v424_v49, 7 }
  0x7c   : > { %694 = vst [vmem:[#allocation2 + $0x3c] sm:$0xf] %v693_v61  ;;  %v435_v1 = vshll.u32 %v314_v44, 16  ;;  %v577_v2 = vshrl.u32 %v331_v50, 16  ;;  %v580_v3 = vshll.u32 %v331_v50, 16  ;;  %v434_v11 = vrot.slane %v432_v57, 7 }
  0x7d   : > { %v421_v10 = vsel %vm4234_vm5, %v413_v47, %v420_v58  ;;  %v697_v4 = vsel %vm4246_vm7, %v422_v60, %v696_v53  ;;  %v429_v5 = vor.u32 %v427_v55, %v426_v62  ;;  %v430_v6 = vrot.slane %v426_v62, 4 }
  0x7e   : > { %695 = vst.msk [vmem:[#allocation2 + $0x40] sm:$0xf] %vm247_vm0, %v421_v10  ;;  %698 = vst [vmem:[#allocation2 + $0x44] sm:$0x1] %v697_v4  ;;  %v579_v33 = vrot.slane %v577_v2, 7  ;;  %v585_v12 = vshrl.u32 %v332_v63, 16  ;;  %1173 = vrot.lane.b32.xlu0 %v4400_v54, %s4084_s11  ;;  %v437_v23 = vor.u32 %v435_v1, %v434_v11 }
  0x7f   : > { %v588_v13 = vshll.u32 %v332_v63, 16  ;;  %v4445_v15 = vld [vmem:[#allocation2 + $0x9c] sm:$0xff]   ;;  %v700_v16 = vsel %vm4240_vm6, %v429_v5, %v699_v56  ;;  %v594_v21 = vshrl.u32 %v4436_v0, 16  ;;  %v3976_v22 = vld [vmem:[#allocation2 + $0xa4] ss:$0 sps:$4 sm:$0x11]  }
  0x80   : > { %v439_v24 = vrot.slane %v434_v11, 4  ;;  %701 = vst [vmem:[#allocation2 + $0x48] sm:$0xf] %v700_v16  ;;  %v582_v25 = vor.u32 %v580_v3, %v579_v33  ;;  %v583_v34 = vrot.slane %v579_v33, 4  ;;  %v1116_v27 = vshrl.u32 %v4445_v15, 16  ;;  %v4476_v56 = vld [vmem:[#allocation3 + $0x40] sm:$0xff]  }
  0x81   : > { %v1118_v28 = vshll.u32 %v4445_v15, 16  ;;  %v1223_v54 = vrot.slane %v4445_v15, 1  ;;  %v587_v29 = vrot.slane %v585_v12, 7  ;;  %v1123_v30 = vshll.u32 %v3976_v22, 16  ;;  %v766_v63 = vld [vmem:[#allocation2 + $0xbc] sm:$0x1]  ;;  %3880 = vmatprep.subr.bf16.mxu0 %v4476_v56 }
  0x82   : > { %v4455_v31 = vld [vmem:[#allocation2 + $0xa8] sm:$0xff]   ;;  %v438_v32 = vsel %vm4234_vm5, %v430_v6, %v437_v23  ;;  %v704_v35 = vsel %vm4246_vm7, %v439_v24, %v703_v7  ;;  %v763_v36 = vsel %vm4240_vm6, %v582_v25, %v762_v9  ;;  %v3978_v37 = vld [vmem:[#allocation2 + $0xb0] ss:$0 sps:$4 sm:$0x11]   ;;  %v1224_v41 = vrot.slane %v3976_v22, 1 }
  0x83   : > { %v1120_v19 = vrot.slane %v1118_v28, 1  ;;  %702 = vst.msk [vmem:[#allocation2 + $0x4c] sm:$0xf] %vm247_vm0, %v438_v32  ;;  %705 = vst [vmem:[#allocation2 + $0x50] sm:$0x1] %v704_v35  ;;  %v590_v38 = vor.u32 %v588_v13, %v587_v29  ;;  %v1125_v20 = vrot.slane %v1123_v30, 1 }
  0x84   : > { %764 = vst [vmem:[#allocation2 + $0xb4] sm:$0xf] %v763_v36  ;;  %v1128_v39 = vshrl.u32 %v4455_v31, 16  ;;  %v1130_v40 = vshll.u32 %v4455_v31, 16  ;;  %v1135_v44 = vshll.u32 %v3978_v37, 16  ;;  %v1226_v50 = vrot.slane %v4455_v31, 1 }
  0x85   : > { %v1121_v42 = vor.u32 %v1120_v19, %v1116_v27  ;;  %v4467_v45 = vld [vmem:[#allocation2 + $0x3c] sm:$0xff]   ;;  %v591_v47 = vsel %vm4234_vm5, %v583_v34, %v590_v38  ;;  %v3980_v49 = vld [vmem:[#allocation2 + $0x44] ss:$0 sps:$4 sm:$0x11]   ;;  %v1227_v51 = vrot.slane %v3978_v37, 1  ;;  %v1225_v60 = vsel %vm1183_vm8, %v1223_v54, %v1224_v41 }
  0x86   : > { %v1132_v48 = vrot.slane %v1130_v40, 1  ;;  %765 = vst.msk [vmem:[#allocation2 + $0xb8] sm:$0xf] %vm247_vm0, %v591_v47  ;;  %v1137_v52 = vrot.slane %v1135_v44, 1  ;;  %v1020_v53 = vshrl.u32 %v4467_v45, 16  ;;  %v1022_v55 = vshll.u32 %v4467_v45, 16 }
  0x87   : > { %v1126_v18 = vsel %vm958_vm9, %v1121_v42, %v1125_v20  ;;  %v1027_v61 = vshll.u32 %v3980_v49, 16  ;;  %v1199_v62 = vrot.slane %v4467_v45, 1  ;;  %v1200_v1 = vrot.slane %v3980_v49, 1  ;;  %v334_v3 = vld [vmem:[%s4228_s9 + $0x7c] sm:$0xf] }
  0x88   : > { %1177 = vrot.lane.b32.xlu0 %v1126_v18, %s4084_s11  ;;  %v1133_v58 = vor.u32 %v1132_v48, %v1128_v39  ;;  %v1024_v57 = vrot.slane %v1022_v55, 1  ;;  %v592_v2 = vrot.slane %v587_v29, 4  ;;  %v596_v10 = vrot.slane %v594_v21, 7  ;;  %v315_v4 = vld [vmem:[%s4228_s9 + $0x30] sm:$0xf] }
  0x89   : > { %v1029_v6 = vrot.slane %v1027_v61, 1  ;;  %v1228_v11 = vsel %vm1183_vm8, %v1226_v50, %v1227_v51  ;;  %v597_v13 = vshll.u32 %v4436_v0, 16  ;;  %v769_v16 = vld [vmem:[#allocation2 + $0xc0] sm:$0xf]  ;;  %v1201_v23 = vsel %vm1183_vm8, %v1199_v62, %v1200_v1  ;;  %v316_v25 = vld [vmem:[%s4228_s9 + $0x34] sm:$0xf] }
  0x8a   : > { %v1138_v5 = vsel %vm958_vm9, %v1133_v58, %v1137_v52  ;;  %v4485_v7 = vld [vmem:[#allocation2 + $0x48] sm:$0xff]   ;;  %v1025_v9 = vor.u32 %v1024_v57, %v1020_v53  ;;  %v3982_v33 = vld [vmem:[#allocation2 + $0x50] ss:$0 sps:$4 sm:$0x11]   ;;  %v767_v12 = vsel %vm4246_vm7, %v592_v2, %v766_v63  ;;  %v600_v0 = vrot.slane %v596_v10, 4 }
  0x8b   : > { %1179 = vrot.lane.b32.xlu1 %v1138_v5, %s4084_s11  ;;  %v1032_v21 = vshrl.u32 %v4485_v7, 16  ;;  %v1034_v22 = vshll.u32 %v4485_v7, 16  ;;  %v1202_v24 = vrot.slane %v4485_v7, 1  ;;  %768 = vst [vmem:[#allocation2 + $0xbc] sm:$0x1] %v767_v12  ;;  %v1039_v27 = vshll.u32 %v3982_v33, 16 }
  0x8c   : > { %1258 = vrot.lane.b32.xlu0 %v1225_v60, %s4083_s10  ;;  %v1030_v34 = vsel %vm958_vm9, %v1025_v9, %v1029_v6  ;;  %v599_v54 = vor.u32 %v597_v13, %v596_v10  ;;  %v602_v30 = vshrl.u32 %v334_v3, 16  ;;  %v605_v32 = vshll.u32 %v334_v3, 16  ;;  %v773_v20 = vld [vmem:[#allocation2 + $0xc8] sm:$0x1]  ;;  %v706_v44 = vld [vmem:[#allocation2 + $0x54] sm:$0xf] }
  0x8d   : > { %v4499_v28 = vld [vmem:[#allocation2 + $0xb4] sm:$0xff]   ;;  %v1036_v29 = vrot.slane %v1034_v22, 1  ;;  %v441_v35 = vshrl.u32 %v315_v4, 16  ;;  %v1041_v36 = vrot.slane %v1039_v27, 1  ;;  %v1203_v19 = vrot.slane %v3982_v33, 1 }
  0x8e   : > { %v1140_v37 = vshrl.u32 %v4499_v28, 16  ;;  %v1142_v38 = vshll.u32 %v4499_v28, 16  ;;  %v1229_v40 = vrot.slane %v4499_v28, 1  ;;  %v604_v41 = vrot.slane %v602_v30, 7  ;;  %v317_v47 = vld [vmem:[%s4228_s9 + $0x38] sm:$0xf] }
  0x8f   : > { %1161 = vrot.lane.b32.xlu1 %v1030_v34, %s4084_s11  ;;  %v1037_v39 = vor.u32 %v1036_v29, %v1032_v21  ;;  %v770_v42 = vsel %vm4240_vm6, %v599_v54, %v769_v16  ;;  %v443_v49 = vrot.slane %v441_v35, 7  ;;  %v444_v50 = vshll.u32 %v315_v4, 16  ;;  %v318_v18 = vld [vmem:[%s4228_s9 + $0x3c] sm:$0xf] }
  0x90   : > { %1260 = vrot.lane.b32.xlu0 %v1228_v11, %s4083_s10  ;;  %v1144_v48 = vrot.slane %v1142_v38, 1  ;;  %771 = vst [vmem:[#allocation2 + $0xc0] sm:$0xf] %v770_v42  ;;  %v449_v51 = vshrl.u32 %v316_v25, 16  ;;  %v607_v53 = vor.u32 %v605_v32, %v604_v41  ;;  %v609_v55 = vrot.slane %v604_v41, 4 }
  0x91   : > { %v1042_v52 = vsel %vm958_vm9, %v1037_v39, %v1041_v36  ;;  %v452_v58 = vshll.u32 %v316_v25, 16  ;;  %v1204_v60 = vsel %vm1183_vm8, %v1202_v24, %v1203_v19  ;;  %v446_v63 = vor.u32 %v444_v50, %v443_v49  ;;  %v710_v1 = vld [vmem:[#allocation2 + $0x5c] sm:$0x1]  ;;  %v717_v32 = vld [vmem:[#allocation2 + $0x68] sm:$0x1]  ;;  %v4533_v19 = vld [vmem:[#allocation2] sm:$0xff]  }
  0x92   : > { %v3984_v61 = vld [vmem:[#allocation2 + $0xbc] ss:$0 sps:$4 sm:$0x11]   ;;  %v1145_v62 = vor.u32 %v1144_v48, %v1140_v37  ;;  %v447_v57 = vrot.slane %v443_v49, 4  ;;  %v608_v2 = vsel %vm4234_vm5, %v600_v0, %v607_v53  ;;  %v774_v3 = vsel %vm4246_vm7, %v609_v55, %v773_v20 }
  0x93   : > { %1163 = vrot.lane.b32.xlu1 %v1042_v52, %s4084_s11  ;;  %v451_v10 = vrot.slane %v449_v51, 7  ;;  %v458_v4 = vshrl.u32 %v317_v47, 16  ;;  %v1147_v5 = vshll.u32 %v3984_v61, 16  ;;  %v1230_v6 = vrot.slane %v3984_v61, 1  ;;  %772 = vst.msk [vmem:[#allocation2 + $0xc4] sm:$0xf] %vm247_vm0, %v608_v2 }
  0x94   : > { %1242 = vrot.lane.b32.xlu0 %v1201_v23, %s4083_s10  ;;  %775 = vst [vmem:[#allocation2 + $0xc8] sm:$0x1] %v774_v3  ;;  %v707_v9 = vsel %vm4240_vm6, %v446_v63, %v706_v44  ;;  %v461_v11 = vshll.u32 %v317_v47, 16  ;;  %v466_v16 = vshrl.u32 %v318_v18, 16  ;;  %v469_v22 = vshll.u32 %v318_v18, 16  ;;  %v4547_v47 = vld [vmem:[#allocation2 + $0xcc] sm:$0xff]  }
  0x95   : > { %v454_v33 = vor.u32 %v452_v58, %v451_v10  ;;  %v456_v12 = vrot.slane %v451_v10, 4  ;;  %708 = vst [vmem:[#allocation2 + $0x54] sm:$0xf] %v707_v9  ;;  %v460_v13 = vrot.slane %v458_v4, 7  ;;  %v1149_v21 = vrot.slane %v1147_v5, 1 }
  0x96   : > { %v713_v23 = vld [vmem:[#allocation2 + $0x60] sm:$0xf]  ;;  %v1231_v24 = vsel %vm1183_vm8, %v1229_v40, %v1230_v6  ;;  %v468_v29 = vrot.slane %v466_v16, 7  ;;  %v4541_v40 = vld [vmem:[#allocation2 + $0x8] ss:$0 sps:$4 sm:$0x11]  }
  0x97   : > { %1244 = vrot.lane.b32.xlu1 %v1204_v60, %s4083_s10  ;;  %v455_v25 = vsel %vm4234_vm5, %v447_v57, %v454_v33  ;;  %v711_v34 = vsel %vm4246_vm7, %v456_v12, %v710_v1  ;;  %v463_v27 = vor.u32 %v461_v11, %v460_v13  ;;  %v1150_v54 = vsel %vm958_vm9, %v1145_v62, %v1149_v21  ;;  %v3995_v57 = vld [vmem:[#allocation2 + $0xd4] ss:$0 sps:$4 sm:$0x11]  }
  0x98   : > { %709 = vst.msk [vmem:[#allocation2 + $0x58] sm:$0xf] %vm247_vm0, %v455_v25  ;;  %712 = vst [vmem:[#allocation2 + $0x5c] sm:$0x1] %v711_v34  ;;  %v464_v0 = vrot.slane %v460_v13, 4  ;;  %1181 = vrot.lane.b32.xlu0 %v1150_v54, %s4084_s11  ;;  %v471_v35 = vor.u32 %v469_v22, %v468_v29  ;;  %v473_v36 = vrot.slane %v468_v29, 4 }
  0x99   : > { %v714_v30 = vsel %vm4240_vm6, %v463_v27, %v713_v23  ;;  %v962_v44 = vshll.u32 %v4533_v19, 16  ;;  %v960_v51 = vshrl.u32 %v4533_v19, 16  ;;  %v967_v60 = vshll.u32 %v4541_v40, 16 }
  0x9a   : > { %715 = vst [vmem:[#allocation2 + $0x60] sm:$0xf] %v714_v30  ;;  %v4535_v37 = vld [vmem:[#allocation2 + $0xc0] sm:$0xff]   ;;  %v472_v20 = vsel %vm4234_vm5, %v464_v0, %v471_v35  ;;  %v718_v39 = vsel %vm4246_vm7, %v473_v36, %v717_v32  ;;  %v1778_v1 = vshll.u32 %v4547_v47, 16  ;;  %v1776_v23 = vshrl.u32 %v4547_v47, 16 }
  0x9b   : > { %1262 = vrot.lane.b32.xlu1 %v1231_v24, %s4083_s10  ;;  %v3986_v38 = vld [vmem:[#allocation2 + $0xc8] ss:$0 sps:$4 sm:$0x11]   ;;  %v1345_v14 = vshrl.u32 %v4535_v37, 16  ;;  %v1347_v41 = vshll.u32 %v4535_v37, 16  ;;  %v1358_v50 = vrot.slane %v4535_v37, 1 }
  0x9c   : > { %716 = vst.msk [vmem:[#allocation2 + $0x64] sm:$0xf] %vm247_vm0, %v472_v20  ;;  %719 = vst [vmem:[#allocation2 + $0x68] sm:$0x1] %v718_v39  ;;  %v1352_v42 = vshll.u32 %v3986_v38, 16  ;;  %v1359_v55 = vrot.slane %v3986_v38, 1 }
  0x9d   : > { %v1349_v48 = vrot.slane %v1347_v41, 1  ;;  %v964_v63 = vrot.slane %v962_v44, 1  ;;  %v969_v22 = vrot.slane %v967_v60, 1  ;;  %v1780_v34 = vrot.slane %v1778_v1, 1 }
  0x9e   : > { %v1354_v49 = vrot.slane %v1352_v42, 1  ;;  %v1360_v4 = vsel %vm1183_vm8, %v1358_v50, %v1359_v55  ;;  %v1783_v27 = vshll.u32 %v3995_v57, 16  ;;  %v1184_v20 = vrot.slane %v4533_v19, 1 }
  0x9f   : > { %v4549_v8 = vld [vmem:[#allocation2 + $0x54] sm:$0xff]   ;;  %v3988_v17 = vld [vmem:[#allocation2 + $0x5c] ss:$0 sps:$4 sm:$0x11]   ;;  %v1350_v18 = vor.u32 %v1349_v48, %v1345_v14  ;;  %v965_v21 = vor.u32 %v964_v63, %v960_v51  ;;  %v1781_v35 = vor.u32 %v1780_v34, %v1776_v23  ;;  %v1185_v39 = vrot.slane %v4541_v40, 1 }
  0xa0   : > { %v1044_v52 = vshrl.u32 %v4549_v8, 16  ;;  %v1046_v53 = vshll.u32 %v4549_v8, 16  ;;  %v1051_v58 = vshll.u32 %v3988_v17, 16  ;;  %v1205_v6 = vrot.slane %v4549_v8, 1  ;;  %v4001_v63 = vld [vmem:[#allocation3 + $0x38] sm:$0xff]  }
  0xa1   : > { %v1355_v61 = vsel %vm958_vm9, %v1350_v18, %v1354_v49  ;;  %v1206_v9 = vrot.slane %v3988_v17, 1  ;;  %v970_v32 = vsel %vm958_vm9, %v965_v21, %v969_v22  ;;  %v1785_v36 = vrot.slane %v1783_v27, 1  ;;  %v4007_v21 = vld [vmem:[#allocation2 + $0x30] sm:$0xff]   ;;  %v4008_v22 = vld [vmem:[#allocation2 + $0x78] sm:$0xff]  }
  0xa2   : > { %v1048_v62 = vrot.slane %v1046_v53, 1  ;;  %1356 = vrot.lane.b32.xlu0 %v1355_v61, %s4084_s11  ;;  %v1053_v2 = vrot.slane %v1051_v58, 1  ;;  %v1186_v41 = vsel %vm1183_vm8, %v1184_v20, %v1185_v39  ;;  %v1789_v42 = vrot.slane %v4547_v47, 1  ;;  %v4005_v61 = vld [vmem:[#allocation2 + $0x18] sm:$0xff]  }
  0xa3   : > { %v4559_v3 = vld [vmem:[#allocation2 + $0x60] sm:$0xff]   ;;  %v3990_v5 = vld [vmem:[#allocation2 + $0x68] ss:$0 sps:$4 sm:$0x11]   ;;  %v1207_v25 = vsel %vm1183_vm8, %v1205_v6, %v1206_v9  ;;  %v1786_v14 = vsel %vm958_vm9, %v1781_v35, %v1785_v36  ;;  %v1790_v44 = vrot.slane %v3995_v57, 1  ;;  %vm1264_vm10 = vcmask 130048  }
  0xa4   : > { %v1049_v10 = vor.u32 %v1048_v62, %v1044_v52  ;;  %v1056_v11 = vshrl.u32 %v4559_v3, 16  ;;  %v1058_v33 = vshll.u32 %v4559_v3, 16  ;;  %v1063_v13 = vshll.u32 %v3990_v5, 16  ;;  %v4004_v52 = vld [vmem:[#allocation2 + $0xc] sm:$0xff]  }
  0xa5   : > { %v1208_v0 = vrot.slane %v4559_v3, 1  ;;  %v1209_v29 = vrot.slane %v3990_v5, 1  ;;  %v1791_v48 = vsel %vm1183_vm8, %v1789_v42, %v1790_v44  ;;  %vm1297_vm11 = vcmask 261120  }
  0xa6   : > { %v1054_v12 = vsel %vm958_vm9, %v1049_v10, %v1053_v2  ;;  %1361 = vrot.lane.b32.xlu0 %v1360_v4, %s4083_s10  ;;  %v1060_v16 = vrot.slane %v1058_v33, 1  ;;  %v1065_v24 = vrot.slane %v1063_v13, 1  ;;  %vm1392_vm12 = vcmask 392192   ;;  %v4003_v2 = vld [vmem:[#allocation3 + $0x30] sm:$0xff]  }
  0xa7   : > { %1165 = vrot.lane.b32.xlu1 %v1054_v12, %s4084_s11  ;;  %v1210_v38 = vsel %vm1183_vm8, %v1208_v0, %v1209_v29  ;;  %v4002_v0 = vld [vmem:[#allocation3] sm:$0xff]   ;;  %vm3130_vm13 = vcmask 1041409   ;;  %vm3133_vm14 = vcmask 1042434   ;;  %vm3136_vm15 = vcmask 1043459  }
  0xa8   : > { %v1061_v54 = vor.u32 %v1060_v16, %v1056_v11  ;;  %v4006_v11 = vld [vmem:[#allocation2 + $0x6c] sm:$0xff]   ;;  %vm3139_vm0 = vcmask 1044484   ;;  %vm3142_vm1 = vcmask 1045509   ;;  %vm3145_vm2 = vcmask 1046534  }
  0xa9   : > { %vm3148_vm3 = vcmask 1047559   ;;  %vm3264_vm4 = vcmask 257024  }
  0xaa   : > { %v1066_v30 = vsel %vm958_vm9, %v1061_v54, %v1065_v24  ;;  %1246 = vrot.lane.b32.xlu0 %v1207_v25, %s4083_s10  ;;  %v4000_v25 = vld [vmem:[#allocation3 + $0x8] sm:$0xff]  }
  0xab   : > { %1167 = vrot.lane.b32.xlu1 %v1066_v30, %s4084_s11 }
  0xae   : > { %1151 = vrot.lane.b32.xlu0 %v970_v32, %s4084_s11 }
  0xaf   : > { %1248 = vrot.lane.b32.xlu1 %v1210_v38, %s4083_s10 }
  0xb2   : > { %1787 = vrot.lane.b32.xlu0 %v1786_v14, %s4084_s11 }
  0xb3   : > { %1232 = vrot.lane.b32.xlu1 %v1186_v41, %s4083_s10 }
  0xb7   : > { %1792 = vrot.lane.b32.xlu1 %v1791_v48, %s4083_s10 }
  0xc6   : > { %v1253_v17 = vpop.permute.xlu0 %1252 }
  0xc9   : > { %v1251_v40 = vpop.permute.xlu1 %1250 }
  0xce   : > { %v1237_v49 = vpop.permute.xlu1 %1236 }
  0xd0   : > { %v1235_v51 = vpop.permute.xlu0 %1234 }
  0xd2   : > { %v1241_v50 = vpop.permute.xlu1 %1240 }
  0xd6   : > { %v1154_v18 = vpop.permute.xlu1 %1153 }
  0xd7   : > { %v1268_v53 = vsel %vm1264_vm10, %v4004_v52, %v1154_v18 }
  0xd8   : > { %v4589_v55 = vsel %vm1297_vm11, %v1268_v53, %v1235_v51  ;;  %v1255_v58 = vpop.permute.xlu0 %1254 }
  0xd9   : > { %3810 = vmatprep.mubr.msk.bf16.mxu0 %vm1392_vm12, %v4589_v55 }
  0xda   : > { %v1156_v60 = vpop.permute.xlu1 %1155 }
  0xdb   : > { %v1270_v62 = vsel %vm1264_vm10, %v4005_v61, %v1156_v60 }
  0xdc   : > { %v4595_v57 = vsel %vm1297_vm11, %v1270_v62, %v1237_v49  ;;  %v1257_v1 = vpop.permute.xlu0 %1256 }
  0xdd   : > { %3811 = vmatmul.mubr.msk.bf16.vlgmr.msra.gmra.mxu0 %vm1392_vm12, %v4595_v57 }
  0xde   : > { %3881 = vmatpush3.bf16.msra.mxu0 %v4476_v56 }
  0xdf   : > { %3882 = vmatprep.subr.bf16.mxu0 %v4001_v63 }
  0xe1   : > { %v1176_v10 = vpop.permute.xlu1 %1175 }
  0xe2   : > { %3883 = vmatpush3.bf16.msra.mxu0 %v4001_v63  ;;  %v1290_v30 = vsel %vm1264_vm10, %v4362_v59, %v1176_v10 }
  0xe3   : > { %3884 = vmatprep.subr.bf16.mxu0 %v4003_v2  ;;  %v4636_v32 = vsel %vm1297_vm11, %v1290_v30, %v1257_v1 }
  0xe4   : > { %v1239_v4 = vpop.permute.xlu0 %1238 }
  0xe6   : > { %3885 = vmatpush3.bf16.msra.mxu0 %v4003_v2 }
  0xe8   : > { %v1158_v5 = vpop.permute.xlu1 %1157  ;;  %v1170_v6 = vpop.permute.xlu0 %1169 }
  0xe9   : > { %v1272_v9 = vsel %vm1264_vm10, %v4388_v43, %v1158_v5  ;;  %v1284_v33 = vsel %vm1264_vm10, %v4006_v11, %v1170_v6 }
  0xea   : > { %v4604_v12 = vsel %vm1297_vm11, %v1272_v9, %v1239_v4  ;;  %v4607_v56 = vsel %vm1297_vm11, %v1284_v33, %v1251_v40 }
  0xeb   : > { %3814 = vmatprep.mubr.msk.bf16.mxu0 %vm1392_vm12, %v4604_v12  ;;  %3826 = vmatprep.mubr.msk.bf16.mxu1 %vm1392_vm12, %v4607_v56 }
  0xec   : > { %v1160_v13 = vpop.permute.xlu1 %1159  ;;  %v1172_v16 = vpop.permute.xlu0 %1171 }
  0xed   : > { %v1274_v43 = vsel %vm1264_vm10, %v4007_v21, %v1160_v13  ;;  %v1286_v23 = vsel %vm1264_vm10, %v4008_v22, %v1172_v16 }
  0xee   : > { %v4616_v24 = vsel %vm1297_vm11, %v1274_v43, %v1241_v50  ;;  %v4619_v34 = vsel %vm1297_vm11, %v1286_v23, %v1253_v17 }
  0xef   : > { %3815 = vmatmul.mubr.msk.bf16.gmra.mxu0 %vm1392_vm12, %v4616_v24  ;;  %3827 = vmatmul.mubr.msk.bf16.vlgmr.msra.gmra.mxu1 %vm1392_vm12, %v4619_v34 }
  0xf0   : > { %v1174_v27 = vpop.permute.xlu0 %1173  ;;  %3843 = vmatpush3.bf16.msra.mxu1 %v4450_v26 }
  0xf1   : > { %v1288_v54 = vsel %vm1264_vm10, %v4345_v46, %v1174_v27  ;;  %3844 = vmatprep.subr.bf16.mxu1 %v4000_v25 }
  0xf2   : > { %v4629_v29 = vsel %vm1297_vm11, %v1288_v54, %v1255_v58 }
  0xf3   : > { %3830 = vmatprep.mubr.msk.bf16.mxu1 %vm1392_vm12, %v4629_v29 }
  0xf4   : > { %3845 = vmatpush3.bf16.msra.mxu1 %v4000_v25 }
  0xf5   : > { %3846 = vmatprep.subr.bf16.mxu1 %v4002_v0 }
  0xf7   : > { %3831 = vmatmul.mubr.msk.bf16.gmra.mxu1 %vm1392_vm12, %v4636_v32 }
  0xf8   : > { %3847 = vmatpush3.bf16.msra.mxu1 %v4002_v0 }
  0xfa   : > { %v1178_v46 = vpop.permute.xlu0 %1177 }
  0xfb   : > { %v1292_v35 = vsel %vm1264_vm10, %v4445_v15, %v1178_v46 }
  0xfd   : > { %v1180_v26 = vpop.permute.xlu1 %1179 }
  0xfe   : > { %v1259_v36 = vpop.permute.xlu0 %1258  ;;  %v1294_v20 = vsel %vm1264_vm10, %v4455_v31, %v1180_v26 }
  0xff   : > { %v4643_v59 = vsel %vm1297_vm11, %v1292_v35, %v1259_v36 }
 0x100   : > { %3834 = vmatprep.mubr.msk.bf16.mxu1 %vm1392_vm12, %v4643_v59 }
 0x101   : > { %v1162_v38 = vpop.permute.xlu1 %1161 }
 0x102   : > { %v1261_v39 = vpop.permute.xlu0 %1260  ;;  %v1276_v15 = vsel %vm1264_vm10, %v4467_v45, %v1162_v38 }
 0x103   : > { %v1327_v14 = vsel %vm1297_vm11, %v1294_v20, %v1261_v39  ;;  %v2221_v20 = vlaneseq }
 0x104   : > { %3835 = vmatmul.mubr.msk.bf16.gmra.mxu1 %vm1392_vm12, %v1327_v14 }
 0x105   : > { %v1164_v41 = vpop.permute.xlu1 %1163 }
 0x106   : > { %v1243_v42 = vpop.permute.xlu0 %1242  ;;  %v1278_v48 = vsel %vm1264_vm10, %v4485_v7, %v1164_v41 }
 0x107   : > { %v1309_v44 = vsel %vm1297_vm11, %v1276_v15, %v1243_v42  ;;  %v4794_v15 = vld [vmem:[%s4785_s14 + $0x8] sm:$0xff]   ;;  %v4797_v42 = vld [vmem:[%s4785_s14] sm:$0xff]  }
 0x108   : > { %3818 = vmatprep.mubr.msk.bf16.mxu0 %vm1392_vm12, %v1309_v44 }
 0x109   : > { %v1245_v40 = vpop.permute.xlu1 %1244 }
 0x10a   : > { %v1311_v31 = vsel %vm1297_vm11, %v1278_v48, %v1245_v40  ;;  %v1182_v49 = vpop.permute.xlu0 %1181  ;;  %v2222_v48 = vshrl.u32 %v2221_v20, 7 }
 0x10b   : > { %3819 = vmatmul.mubr.msk.bf16.gmra.mxu0 %vm1392_vm12, %v1311_v31  ;;  %v1296_v17 = vsel %vm1264_vm10, %v4499_v28, %v1182_v49 }
 0x10d   : > { %v1263_v50 = vpop.permute.xlu1 %1262 }
 0x10e   : > { %v1329_v45 = vsel %vm1297_vm11, %v1296_v17, %v1263_v50  ;;  %v4802_v17 = vld [vmem:[%s4785_s14 + $0x18] sm:$0xff]   ;;  %v4805_v50 = vld [vmem:[%s4785_s14 + $0x10] sm:$0xff]  }
 0x10f   : > { %3838 = vmatprep.mubr.msk.bf16.mxu1 %vm1392_vm12, %v1329_v45 }
 0x114   : > { %v1357_v51 = vpop.permute.xlu0 %1356 }
 0x115   : > { %v1364_v18 = vsel %vm1264_vm10, %v4535_v37, %v1357_v51  ;;  %v3674_v51 = vunpack.c.l.bf16 %v4794_v15 }
 0x118   : > { %v1362_v7 = vpop.permute.xlu0 %1361 }
 0x119   : > { %v1166_v52 = vpop.permute.xlu1 %1165  ;;  %v1366_v53 = vsel %vm1297_vm11, %v1364_v18, %v1362_v7  ;;  %v3670_v18 = vunpack.c.l.bf16 %v4797_v42  ;;  %v4813_v7 = vld [vmem:[%s4785_s14 + $0x20] sm:$0xff]  }
 0x11a   : > { %3839 = vmatmul.mubr.msk.bf16.gmra.mxu1 %vm1392_vm12, %v1366_v53  ;;  %v1280_v58 = vsel %vm1264_vm10, %v4549_v8, %v1166_v52  ;;  %v4810_v52 = vld [vmem:[%s4785_s14 + $0x28] sm:$0xff]  }
 0x11c   : > { %v1247_v60 = vpop.permute.xlu0 %1246 }
 0x11d   : > { %v1168_v28 = vpop.permute.xlu1 %1167  ;;  %v1313_v61 = vsel %vm1297_vm11, %v1280_v58, %v1247_v60  ;;  %v4815_v60 = vld [vmem:[#allocation5] ss:$0 sm:$0xff] }
 0x11e   : > { %3822 = vmatprep.mubr.msk.bf16.mxu0 %vm1392_vm12, %v1313_v61  ;;  %v1282_v63 = vsel %vm1264_vm10, %v4559_v3, %v1168_v28 }
 0x120   : > { %v1152_v62 = vpop.permute.xlu0 %1151 }
 0x121   : > { %v1249_v37 = vpop.permute.xlu1 %1248  ;;  %v1266_v2 = vsel %vm1264_vm10, %v4533_v19, %v1152_v62 }
 0x122   : > { %v1315_v1 = vsel %vm1297_vm11, %v1282_v63, %v1249_v37 }
 0x123   : > { %3823 = vmatmul.mubr.msk.bf16.gmra.mxu0 %vm1392_vm12, %v1315_v1 }
 0x124   : > { %3886 = vmatprep.mubr.msk.bf16.mxu0 %vm1392_vm12, %v4595_v57  ;;  %v1788_v19 = vpop.permute.xlu0 %1787 }
 0x125   : > { %v1233_v8 = vpop.permute.xlu1 %1232  ;;  %v1795_v3 = vsel %vm1264_vm10, %v4547_v47, %v1788_v19  ;;  %v4828_v19 = vld [vmem:[%s4785_s14 + $0x30] sm:$0xff]  }
 0x126   : > { %v1299_v10 = vsel %vm1297_vm11, %v1266_v2, %v1233_v8  ;;  %v4861_v8 = vld [vmem:[%s4785_s14 + $0x68] sm:$0xff]  }
 0x127   : > { %3848 = vmatprep.mubr.msk.bf16.mxu1 %vm1392_vm12, %v1299_v10  ;;  %v4825_v10 = vld [vmem:[%s4785_s14 + $0x38] sm:$0xff]   ;;  %5184 = vst [vmem:[#allocation15_spill] sm:$0xff] %v4861_v8 }
 0x128   : > { %3849 = vmatmul.mubr.msk.bf16.vlgmr.msra.gmra.mxu1 %vm1392_vm12, %v4589_v55 }
 0x129   : > { %3852 = vmatprep.mubr.msk.bf16.mxu1 %vm1392_vm12, %v4595_v57  ;;  %v1793_v55 = vpop.permute.xlu1 %1792 }
 0x12a   : > { %v1797_v57 = vsel %vm1297_vm11, %v1795_v3, %v1793_v55 }
 0x12b   : > { %3887 = vmatmul.mubr.msk.bf16.vlgmr.msra.gmra.mxu0 %vm1392_vm12, %v4604_v12 }
 0x12c   : > { %3890 = vmatprep.mubr.msk.bf16.mxu0 %vm1392_vm12, %v4616_v24 }
 0x130   : > { %3853 = vmatmul.mubr.msk.bf16.gmra.mxu1 %vm1392_vm12, %v4604_v12 }
 0x131   : > { %3856 = vmatprep.mubr.msk.bf16.mxu1 %vm1392_vm12, %v4616_v24 }
 0x133   : > { %3891 = vmatmul.mubr.msk.bf16.gmra.mxu0 %vm1392_vm12, %v1309_v44 }
 0x134   : > { %3894 = vmatprep.mubr.msk.bf16.mxu0 %vm1392_vm12, %v1311_v31 }
 0x138   : > { %3857 = vmatmul.mubr.msk.bf16.gmra.mxu1 %vm1392_vm12, %v1309_v44 }
 0x139   : > { %3860 = vmatprep.mubr.msk.bf16.mxu1 %vm1392_vm12, %v1311_v31 }
 0x13b   : > { %3895 = vmatmul.mubr.msk.bf16.gmra.mxu0 %vm1392_vm12, %v1313_v61 }
 0x13c   : > { %3898 = vmatprep.mubr.msk.bf16.mxu0 %vm1392_vm12, %v1315_v1 }
 0x140   : > { %3861 = vmatmul.mubr.msk.bf16.gmra.mxu1 %vm1392_vm12, %v1313_v61 }
 0x141   : > { %3864 = vmatprep.mubr.msk.bf16.mxu1 %vm1392_vm12, %v1315_v1 }
 0x143   : > { %3899 = vmatmul.mubr.msk.bf16.gmra.mxu0 %vm1392_vm12, %v4607_v56 }
 0x144   : > { %3902 = vmatprep.mubr.msk.bf16.mxu0 %vm1392_vm12, %v4619_v34 }
 0x148   : > { %3865 = vmatmul.mubr.msk.bf16.gmra.mxu1 %vm1392_vm12, %v4607_v56 }
 0x149   : > { %3868 = vmatprep.mubr.msk.bf16.mxu1 %vm1392_vm12, %v4619_v34 }
 0x14b   : > { %3903 = vmatmul.mubr.msk.bf16.gmra.mxu0 %vm1392_vm12, %v4629_v29 }
 0x14c   : > { %3906 = vmatprep.mubr.msk.bf16.mxu0 %vm1392_vm12, %v4636_v32 }
 0x150   : > { %3869 = vmatmul.mubr.msk.bf16.gmra.mxu1 %vm1392_vm12, %v4629_v29 }
 0x151   : > { %3872 = vmatprep.mubr.msk.bf16.mxu1 %vm1392_vm12, %v4636_v32 }
 0x153   : > { %3907 = vmatmul.mubr.msk.bf16.gmra.mxu0 %vm1392_vm12, %v4643_v59 }
 0x154   : > { %3910 = vmatprep.mubr.msk.bf16.mxu0 %vm1392_vm12, %v1327_v14 }
 0x158   : > { %3873 = vmatmul.mubr.msk.bf16.gmra.mxu1 %vm1392_vm12, %v4643_v59  ;;  %v4085_v59 = vmov 1983009808  }
 0x159   : > { %3876 = vmatprep.mubr.msk.bf16.mxu1 %vm1392_vm12, %v1327_v14  ;;  %v2219_v38 = vunpack.c.l.s4 %v4085_v59 }
 0x15b   : > { %3911 = vmatmul.mubr.msk.bf16.gmra.mxu0 %vm1392_vm12, %v1329_v45  ;;  %v2220_v44 = vunpack.c.0.s8 %v2219_v38 }
 0x15c   : > { %3914 = vmatprep.mubr.msk.bf16.mxu0 %vm1392_vm12, %v1366_v53 }
 0x15d   : > { %v4817_v28 = vsub.s32 %v2220_v44, %v2222_v48 }
 0x160   : > { %3877 = vmatmul.mubr.msk.bf16.gmra.mxu1 %vm1392_vm12, %v1329_v45 }
 0x163   : > { %3915 = vmatmul.mubr.msk.bf16.gmra.mxu0 %vm1392_vm12, %v1797_v57  ;;  %v4852_v57 = vld [vmem:[%s4785_s14 + $0x50] sm:$0xff]  }
 0x19d   : > { %v3812_v11 = vpop.f32.mrf.mxu0 }
 0x19f   : > { %v1459_v12 = vpop.f32.mrf.mxu0 }
 0x1a1   : > { %v3813_v56 = vpop.f32.mrf.mxu0 }
 0x1a3   : > { %v4744_v16 = vpop.f32.mrf.mxu0 }
 0x1af   : > { %v4730_v4 = vpop.f32.mrf.mxu1  ;;  %v4746_v21 = vpop.f32.mrf.mxu0 }
 0x1b1   : > { %v4732_v5 = vpop.f32.mrf.mxu1  ;;  %v4750_v22 = vpop.f32.mrf.mxu0 }
 0x1b3   : > { %v4734_v6 = vpop.f32.mrf.mxu1  ;;  %v4754_v24 = vpop.f32.mrf.mxu0 }
 0x1b5   : > { %v4736_v9 = vpop.f32.mrf.mxu1  ;;  %v4758_v34 = vpop.f32.mrf.mxu0 }
 0x1b7   : > { %v4738_v33 = vpop.f32.mrf.mxu1 }
 0x1b9   : > { %v4740_v47 = vpop.f32.mrf.mxu1 }
 0x1bb   : > { %v4742_v13 = vpop.f32.mrf.mxu1 }
 0x1bd   : > { %v4748_v43 = vpop.f32.mrf.mxu1 }
 0x1c4   : > { %v4752_v23 = vpop.f32.mrf.mxu1 }
 0x1c6   : > { %v4756_v25 = vpop.f32.mrf.mxu1 }
 0x1c8   : > { %v4760_v27 = vpop.f32.mrf.mxu1 }
 0x1c9   : > { %5178 = vst [vmem:[#allocation9_spill] sm:$0xff] %v4760_v27 }
 0x1ca   : > { %v4764_v0 = vpop.f32.mrf.mxu1 }
 0x1cb   : > { %v4762_v54 = vpop.f32.mrf.mxu0  ;;  %5179 = vst [vmem:[#allocation10_spill] sm:$0xff] %v4764_v0 }
 0x1cd   : > { %v4766_v29 = vpop.f32.mrf.mxu0 }
 0x1cf   : > { %v4770_v32 = vpop.f32.mrf.mxu0 }
 0x1d1   : > { %v4774_v26 = vpop.f32.mrf.mxu0 }
 0x1da   : > { %v4768_v30 = vpop.f32.mrf.mxu1 }
 0x1db   : > { %5180 = vst [vmem:[#allocation11_spill] sm:$0xff] %v4768_v30 }
 0x1dc   : > { %v4772_v46 = vpop.f32.mrf.mxu1 }
 0x1dd   : > { %5181 = vst [vmem:[#allocation12_spill] sm:$0xff] %v4772_v46 }
 0x1de   : > { %v4776_v35 = vpop.f32.mrf.mxu1 }
 0x1df   : > { %5182 = vst [vmem:[#allocation13_spill] sm:$0xff] %v4776_v35 }
 0x1e0   : > { %v4789_v14 = vpop.f32.mrf.mxu1 }
 0x1e1   : > { %5183 = vst [vmem:[#allocation14_spill] sm:$0xff] %v4789_v14 }
 0x1e3   : > { %v4778_v36 = vpop.f32.mrf.mxu0 }
 0x1e5   : > { %v4787_v39 = vpop.f32.mrf.mxu0 }
 0x1e7   : > { %v4791_v41 = vpop.f32.mrf.mxu0 }
 0x1e8   : > { %v3850_v40 = vpop.f32.mrf.mxu1 }
 0x1e9   : > { %v1649_v31 = vadd.f32 %v3850_v40, %v3812_v11  ;;  %v4799_v49 = vpop.f32.mrf.mxu0  ;;  %v4837_v40 = vld [vmem:[%s4785_s14 + $0x48] sm:$0xff]   ;;  %v4849_v11 = vld [vmem:[%s4785_s14 + $0x58] sm:$0xff]  }
 0x1ea   : > { %v1640_v45 = vpop.f32.mrf.mxu1 }
 0x1eb   : > { %v1641_v53 = vadd.f32 %v1640_v45, %v1459_v12  ;;  %v3888_v58 = vpop.f32.mrf.mxu0 }
 0x1ec   : > { %v1988_v63 = vadd.f32 %v3888_v58, %v1649_v31  ;;  %v3851_v37 = vpop.f32.mrf.mxu1 }
 0x1ed   : > { %v1652_v3 = vadd.f32 %v3851_v37, %v3813_v56  ;;  %v1859_v55 = vpop.f32.mrf.mxu0  ;;  %v4840_v56 = vld [vmem:[%s4785_s14 + $0x40] sm:$0xff]  }
 0x1ee   : > { %v2027_v59 = vadd.f32 %v4815_v60, %v1988_v63  ;;  %v1986_v38 = vadd.f32 %v1859_v55, %v1641_v53  ;;  %v1643_v20 = vpop.f32.mrf.mxu1  ;;  %v4867_v53 = vld [vmem:[%s4785_s14 + $0x60] sm:$0xff]  }
 0x1ef   : > { %v1644_v31 = vadd.f32 %v1643_v20, %v4744_v16  ;;  %v3889_v45 = vpop.f32.mrf.mxu0  ;;  %5185 = vst [vmem:[#allocation16_spill] sm:$0xff] %v4867_v53 }
 0x1f0   : > { %v2059_v63 = vmax.f32 %v2027_v59, 0.0  ;;  %v2025_v55 = vadd.f32 %v4815_v60, %v1986_v38  ;;  %v1989_v44 = vadd.f32 %v3889_v45, %v1652_v3  ;;  %v3854_v12 = vpop.f32.mrf.mxu1 }
 0x1f1   : > { %v1665_v16 = vadd.f32 %v3854_v12, %v4746_v21  ;;  %v1862_v20 = vpop.f32.mrf.mxu0 }
 0x1f2   : > { %v2057_v38 = vmax.f32 %v2025_v55, 0.0  ;;  %v2028_v3 = vadd.f32 %v4815_v60, %v1989_v44  ;;  %v1987_v45 = vadd.f32 %v1862_v20, %v1644_v31  ;;  %v1656_v58 = vpop.f32.mrf.mxu1  ;;  %v2155_v2 = vadd.f32 %v3674_v51, %v2059_v63 }
 0x1f3   : > { %v1657_v21 = vadd.f32 %v1656_v58, %v4750_v22  ;;  %v3892_v12 = vpop.f32.mrf.mxu0 }
 0x1f4   : > { %v2153_v59 = vadd.f32 %v3670_v18, %v2057_v38  ;;  %v2060_v55 = vmax.f32 %v2028_v3, 0.0  ;;  %v2026_v44 = vadd.f32 %v4815_v60, %v1987_v45  ;;  %v1992_v31 = vadd.f32 %v3892_v12, %v1665_v16  ;;  %v3855_v20 = vpop.f32.mrf.mxu1 }
 0x1f5   : > { %v1668_v48 = vadd.f32 %v3855_v20, %v4754_v24  ;;  %v1875_v62 = vpop.f32.mrf.mxu0  ;;  %v5186_v38 = vunpack.c.h.bf16 %v4794_v15 }
 0x1f6   : > { %v2185_v63 = vmax.f32 %v2153_v59, %v2155_v2  ;;  %v2058_v1 = vmax.f32 %v2026_v44, 0.0  ;;  %v2031_v37 = vadd.f32 %v4815_v60, %v1992_v31  ;;  %v1659_v61 = vpop.f32.mrf.mxu1  ;;  %v1990_v3 = vadd.f32 %v1875_v62, %v1657_v21 }
 0x1f7   : > { %v2156_v16 = vadd.f32 %v5186_v38, %v2060_v55  ;;  %v1660_v24 = vadd.f32 %v1659_v61, %v4758_v34  ;;  %v3893_v45 = vpop.f32.mrf.mxu0  ;;  %v5187_v2 = vunpack.c.h.bf16 %v4797_v42  ;;  %v5188_v42 = vunpack.c.l.bf16 %v4802_v17 }
 0x1f8   : > { %v2217_v20 = vcombine.high %v2185_v63, %v2185_v63  ;;  %v2224_v22 = vrot.slane %v2185_v63, %v4817_v28  ;;  %v2063_v44 = vmax.f32 %v2031_v37, 0.0  ;;  %v3858_v31 = vpop.f32.mrf.mxu1  ;;  %v2029_v58 = vadd.f32 %v4815_v60, %v1990_v3 }
 0x1f9   : > { %v2154_v59 = vadd.f32 %v5187_v2, %v2058_v1  ;;  %v1993_v18 = vadd.f32 %v3893_v45, %v1668_v48  ;;  %v4885_v15 = vadd.f32 %v3858_v31, %v4762_v54  ;;  %v1878_v62 = vpop.f32.mrf.mxu0 }
 0x1fa   : > { %v2231_v61 = vrot.slane %v2217_v20, %v4817_v28  ;;  %v2232_v21 = vcombine.high %v2224_v22, %v2224_v22  ;;  %v3471_v55 = vrot.slane %v2224_v22, 9  ;;  %v2159_v1 = vadd.f32 %v5188_v42, %v2063_v44  ;;  %v4901_v35 = vpop.f32.mrf.mxu1 }
 0x1fb   : > { %v2186_v38 = vmax.f32 %v2154_v59, %v2156_v16  ;;  %v2061_v37 = vmax.f32 %v2029_v58, 0.0  ;;  %v4892_v63 = vadd.f32 %v4815_v60, %v1993_v18  ;;  %v4894_v48 = vadd.f32 %v1878_v62, %v1660_v24 }
 0x1fc   : > { %v2233_v54 = vcombine.high %v2231_v61, %v2231_v61  ;;  %v3472_v3 = vrot.slane %v2232_v21, 9  ;;  %v3473_v45 = vrot.slane %v2231_v61, 9  ;;  %v2745_v2 = vmax.f32 %v2224_v22, %v3471_v55  ;;  %v3859_v30 = vpop.f32.mrf.mxu1 }
 0x1fd   : > { %v2234_v31 = vcombine.high %v2186_v38, %v2186_v38  ;;  %v2241_v20 = vrot.slane %v2186_v38, %v4817_v28  ;;  %v5189_v16 = vunpack.c.l.bf16 %v4805_v50 }
 0x1fe   : > { %v3474_v58 = vrot.slane %v2233_v54, 9  ;;  %v2746_v42 = vmax.f32 %v2232_v21, %v3472_v3  ;;  %v2747_v18 = vmax.f32 %v2231_v61, %v3473_v45  ;;  %v3604_v34 = vpack.c.bf16 %v2745_v2, %v2745_v2 }
 0x1ff   : > { %v2157_v59 = vadd.f32 %v5189_v16, %v2061_v37  ;;  %v2248_v24 = vrot.slane %v2234_v31, %v4817_v28  ;;  %v2249_v62 = vcombine.high %v2241_v20, %v2241_v20  ;;  %v3475_v12 = vrot.slane %v2241_v20, 9 }
 0x200   : > { %v2748_v55 = vmax.f32 %v2233_v54, %v3474_v58  ;;  %v3605_v51 = vpack.c.bf16 %v2746_v42, %v2746_v42  ;;  %v3606_v14 = vpack.c.bf16 %v2747_v18, %v2747_v18  ;;  %v3065_v38 = vunpack.c.l.b16 %v3604_v34 }
 0x201   : > { %v2187_v22 = vmax.f32 %v2157_v59, %v2159_v1  ;;  %v2250_v37 = vcombine.high %v2248_v24, %v2248_v24  ;;  %v3476_v16 = vrot.slane %v2249_v62, 9  ;;  %v3477_v44 = vrot.slane %v2248_v24, 9  ;;  %v3896_v59 = vpop.f32.mrf.mxu0 }
 0x202   : > { %v2749_v46 = vmax.f32 %v2241_v20, %v3475_v12  ;;  %v3607_v61 = vpack.c.bf16 %v2748_v55, %v2748_v55  ;;  %v3066_v21 = vunpack.c.l.b16 %v3605_v51  ;;  %v3067_v3 = vunpack.c.l.b16 %v3606_v14 }
 0x203   : > { %v2251_v45 = vcombine.high %v2187_v22, %v2187_v22  ;;  %v3478_v2 = vrot.slane %v2250_v37, 9  ;;  %v2750_v31 = vmax.f32 %v2249_v62, %v3476_v16  ;;  %v2751_v1 = vmax.f32 %v2248_v24, %v3477_v44 }
 0x204   : > { %v3608_v54 = vpack.c.bf16 %v2749_v46, %v2749_v46  ;;  %v3068_v58 = vunpack.c.l.b16 %v3607_v61  ;;  %v3129_v34 = vrot.slane %v3066_v21, 7  ;;  %v3132_v42 = vrot.slane %v3067_v3, 6  ;;  %v1891_v61 = vpop.f32.mrf.mxu0 }
 0x205   : > { %v2258_v18 = vrot.slane %v2187_v22, %v4817_v28  ;;  %v2752_v53 = vmax.f32 %v2250_v37, %v3478_v2  ;;  %v3609_v8 = vpack.c.bf16 %v2750_v31, %v2750_v31  ;;  %v3610_v12 = vpack.c.bf16 %v2751_v1, %v2751_v1  ;;  %v1675_v2 = vpop.f32.mrf.mxu1 }
 0x206   : > { %v3069_v20 = vunpack.c.l.b16 %v3608_v54  ;;  %v3131_v14 = vsel %vm3130_vm13, %v3129_v34, %v3065_v38  ;;  %v3135_v51 = vrot.slane %v3068_v58, 5  ;;  %v2265_v55 = vrot.slane %v2251_v45, %v4817_v28 }
 0x207   : > { %v2266_v44 = vcombine.high %v2258_v18, %v2258_v18  ;;  %v3134_v46 = vsel %vm3133_vm14, %v3132_v42, %v3131_v14  ;;  %v3611_v24 = vpack.c.bf16 %v2752_v53, %v2752_v53  ;;  %v3070_v62 = vunpack.c.l.b16 %v3609_v8  ;;  %v3862_v27 = vpop.f32.mrf.mxu1 }
 0x208   : > { %v3071_v16 = vunpack.c.l.b16 %v3610_v12  ;;  %v3137_v22 = vsel %vm3136_vm15, %v3135_v51, %v3134_v46  ;;  %v3138_v37 = vrot.slane %v3069_v20, 4  ;;  %v2267_v21 = vcombine.high %v2265_v55, %v2265_v55  ;;  %v3897_v46 = vpop.f32.mrf.mxu0 }
 0x209   : > { %v3479_v3 = vrot.slane %v2258_v18, 9  ;;  %v3072_v31 = vunpack.c.l.b16 %v3611_v24  ;;  %v3141_v1 = vrot.slane %v3070_v62, 3  ;;  %v3480_v54 = vrot.slane %v2266_v44, 9 }
 0x20a   : > { %v3144_v38 = vrot.slane %v3071_v16, 2  ;;  %v3140_v45 = vsel %vm3139_vm0, %v3138_v37, %v3137_v22  ;;  %v3481_v58 = vrot.slane %v2265_v55, 9  ;;  %v3482_v34 = vrot.slane %v2267_v21, 9 }
 0x20b   : > { %v2753_v42 = vmax.f32 %v2258_v18, %v3479_v3  ;;  %v3143_v8 = vsel %vm3142_vm1, %v3141_v1, %v3140_v45  ;;  %v3147_v53 = vrot.slane %v3072_v31, 1  ;;  %v2754_v12 = vmax.f32 %v2266_v44, %v3480_v54  ;;  %v1894_v54 = vpop.f32.mrf.mxu0 }
 0x20c   : > { %v5190_v14 = vmax.f32 %v4892_v63, 0.0  ;;  %v5191_v20 = vunpack.c.h.bf16 %v4802_v17  ;;  %v3146_v24 = vsel %vm3145_vm2, %v3144_v38, %v3143_v8  ;;  %v2755_v62 = vmax.f32 %v2265_v55, %v3481_v58 }
 0x20d   : > { %v2756_v16 = vmax.f32 %v2267_v21, %v3482_v34  ;;  %v3612_v0 = vpack.c.bf16 %v2753_v42, %v2753_v42  ;;  %v3149_v18 = vsel %vm3148_vm3, %v3147_v53, %v3146_v24  ;;  %v3613_v44 = vpack.c.bf16 %v2754_v12, %v2754_v12  ;;  %v1688_v42 = vpop.f32.mrf.mxu1 }
 0x20e   : > { %v2160_v51 = vadd.f32 %v5191_v20, %v5190_v14  ;;  %v2030_v17 = vadd.f32 %v4815_v60, %v4894_v48  ;;  %v1673_v63 = vadd.f32 %v4901_v35, %v4766_v29  ;;  %v3248_v22 = vpack.c.b16 %v3149_v18, %v3149_v18 }
 0x20f   : > { %v3614_v55 = vpack.c.bf16 %v2755_v62, %v2755_v62  ;;  %v3615_v37 = vpack.c.bf16 %v2756_v16, %v2756_v16  ;;  %v3073_v21 = vunpack.c.l.b16 %v3612_v0  ;;  %v3074_v3 = vunpack.c.l.b16 %v3613_v44 }
 0x210   : > { %v2062_v31 = vmax.f32 %v2030_v17, 0.0  ;;  %v1996_v1 = vadd.f32 %v3896_v59, %v4885_v15  ;;  %v1684_v38 = vadd.f32 %v3859_v30, %v4770_v32  ;;  %3265 = vst.msk [vmem:[%s4919_s19] sm:$0xf] %vm3264_vm4, %v3248_v22  ;;  %v1994_v34 = vadd.f32 %v1891_v61, %v1673_v63 }
 0x211   : > { %v3075_v45 = vunpack.c.l.b16 %v3614_v55  ;;  %v3076_v58 = vunpack.c.l.b16 %v3615_v37  ;;  %v1676_v48 = vadd.f32 %v1675_v2, %v4774_v26  ;;  %v3150_v29 = vrot.slane %v3074_v3, 7  ;;  %v3900_v2 = vpop.f32.mrf.mxu0 }
 0x212   : > { %v5192_v35 = vunpack.c.h.bf16 %v4805_v50  ;;  %v2035_v0 = vadd.f32 %v4815_v60, %v1996_v1  ;;  %v1997_v53 = vadd.f32 %v3897_v46, %v1684_v38  ;;  %v2033_v30 = vadd.f32 %v4815_v60, %v1994_v34  ;;  %v3863_v46 = vpop.f32.mrf.mxu1 }
 0x213   : > { %v3152_v12 = vrot.slane %v3075_v45, 6  ;;  %v3154_v15 = vrot.slane %v3076_v58, 5  ;;  %v1697_v32 = vadd.f32 %v3862_v27, %v4778_v36  ;;  %v3151_v59 = vsel %vm3130_vm13, %v3150_v29, %v3073_v21 }
 0x214   : > { %v2158_v8 = vadd.f32 %v5192_v35, %v2062_v31  ;;  %v2067_v61 = vmax.f32 %v2035_v0, 0.0  ;;  %v2036_v26 = vadd.f32 %v4815_v60, %v1997_v53  ;;  %v2065_v50 = vmax.f32 %v2033_v30, 0.0 }
 0x215   : > { %v3153_v20 = vsel %vm3133_vm14, %v3152_v12, %v3151_v59  ;;  %v1995_v24 = vadd.f32 %v1894_v54, %v1676_v48  ;;  %v4940_v62 = vadd.f32 %v1688_v42, %v4787_v39  ;;  %v5193_v36 = vunpack.c.l.bf16 %v4810_v52 }
 0x216   : > { %v2188_v14 = vmax.f32 %v2158_v8, %v2160_v51  ;;  %v3155_v27 = vsel %vm3136_vm15, %v3154_v15, %v3153_v20  ;;  %v5194_v44 = vunpack.c.l.bf16 %v4813_v7  ;;  %v2068_v63 = vmax.f32 %v2036_v26, 0.0 }
 0x217   : > { %v2163_v51 = vadd.f32 %v5193_v36, %v2067_v61  ;;  %v2034_v22 = vadd.f32 %v4815_v60, %v1995_v24  ;;  %v2000_v55 = vadd.f32 %v3900_v2, %v1697_v32  ;;  %v4951_v3 = vadd.f32 %v3863_v46, %v4791_v41 }
 0x218   : > { %v2268_v16 = vcombine.high %v2188_v14, %v2188_v14  ;;  %v2275_v18 = vrot.slane %v2188_v14, %v4817_v28  ;;  %v2161_v17 = vadd.f32 %v5194_v44, %v2065_v50  ;;  %v5195_v1 = vunpack.c.h.bf16 %v4810_v52  ;;  %v1907_v50 = vpop.f32.mrf.mxu0 }
 0x219   : > { %v2066_v54 = vmax.f32 %v2034_v22, 0.0  ;;  %v4956_v45 = vadd.f32 %v4815_v60, %v2000_v55  ;;  %v5196_v8 = vunpack.c.h.bf16 %v4813_v7 }
 0x21a   : > { %v2282_v37 = vrot.slane %v2268_v16, %v4817_v28  ;;  %v2283_v39 = vcombine.high %v2275_v18, %v2275_v18  ;;  %v3483_v21 = vrot.slane %v2275_v18, 9  ;;  %v2189_v31 = vmax.f32 %v2161_v17, %v2163_v51  ;;  %v1691_v17 = vpop.f32.mrf.mxu1 }
 0x21b   : > { %v2164_v38 = vadd.f32 %v5195_v1, %v2068_v63  ;;  %v2162_v0 = vadd.f32 %v5196_v8, %v2066_v54  ;;  %v2071_v41 = vmax.f32 %v4956_v45, 0.0 }
 0x21c   : > { %v2284_v58 = vcombine.high %v2282_v37, %v2282_v37  ;;  %v3484_v34 = vrot.slane %v2283_v39, 9  ;;  %v3485_v48 = vrot.slane %v2282_v37, 9  ;;  %v2757_v42 = vmax.f32 %v2275_v18, %v3483_v21  ;;  %v3866_v8 = vpop.f32.mrf.mxu1 }
 0x21d   : > { %v2285_v29 = vcombine.high %v2189_v31, %v2189_v31  ;;  %v2292_v35 = vrot.slane %v2189_v31, %v4817_v28  ;;  %v2190_v14 = vmax.f32 %v2162_v0, %v2164_v38  ;;  %v3901_v38 = vpop.f32.mrf.mxu0 }
 0x21e   : > { %v3486_v53 = vrot.slane %v2284_v58, 9  ;;  %v2758_v12 = vmax.f32 %v2283_v39, %v3484_v34  ;;  %v2759_v52 = vmax.f32 %v2282_v37, %v3485_v48  ;;  %v3616_v15 = vpack.c.bf16 %v2757_v42, %v2757_v42 }
 0x21f   : > { %v2299_v30 = vrot.slane %v2285_v29, %v4817_v28  ;;  %v2300_v32 = vcombine.high %v2292_v35, %v2292_v35  ;;  %v3487_v59 = vrot.slane %v2292_v35, 9  ;;  %v2302_v29 = vcombine.high %v2190_v14, %v2190_v14 }
 0x220   : > { %v2760_v61 = vmax.f32 %v2284_v58, %v3486_v53  ;;  %v3617_v26 = vpack.c.bf16 %v2758_v12, %v2758_v12  ;;  %v3618_v2 = vpack.c.bf16 %v2759_v52, %v2759_v52  ;;  %v3077_v20 = vunpack.c.l.b16 %v3616_v15 }
 0x221   : > { %v2301_v24 = vcombine.high %v2299_v30, %v2299_v30  ;;  %v3488_v46 = vrot.slane %v2300_v32, 9  ;;  %v3489_v7 = vrot.slane %v2299_v30, 9  ;;  %v2761_v16 = vmax.f32 %v2292_v35, %v3487_v59  ;;  %v1910_v59 = vpop.f32.mrf.mxu0 }
 0x222   : > { %v3619_v18 = vpack.c.bf16 %v2760_v61, %v2760_v61  ;;  %v3078_v36 = vunpack.c.l.b16 %v3617_v26  ;;  %v3079_v51 = vunpack.c.l.b16 %v3618_v2  ;;  %v3156_v44 = vrot.slane %v3077_v20, 4 }
 0x223   : > { %v3490_v63 = vrot.slane %v2301_v24, 9  ;;  %v2762_v22 = vmax.f32 %v2300_v32, %v3488_v46  ;;  %v2763_v55 = vmax.f32 %v2299_v30, %v3489_v7  ;;  %v3620_v37 = vpack.c.bf16 %v2761_v16, %v2761_v16  ;;  %v1704_v16 = vpop.f32.mrf.mxu1 }
 0x224   : > { %v3080_v39 = vunpack.c.l.b16 %v3619_v18  ;;  %v3157_v21 = vsel %vm3139_vm0, %v3156_v44, %v3155_v27  ;;  %v3158_v31 = vrot.slane %v3078_v36, 3  ;;  %v3160_v1 = vrot.slane %v3079_v51, 2 }
 0x225   : > { %v2764_v54 = vmax.f32 %v2301_v24, %v3490_v63  ;;  %v3621_v45 = vpack.c.bf16 %v2762_v22, %v2762_v22  ;;  %v3622_v58 = vpack.c.bf16 %v2763_v55, %v2763_v55  ;;  %v3081_v34 = vunpack.c.l.b16 %v3620_v37 }
 0x226   : > { %v3159_v48 = vsel %vm3142_vm1, %v3158_v31, %v3157_v21  ;;  %v3162_v42 = vrot.slane %v3080_v39, 1  ;;  %v2309_v35 = vrot.slane %v2190_v14, %v4817_v28  ;;  %v2316_v15 = vrot.slane %v2302_v29, %v4817_v28  ;;  %v3904_v21 = vpop.f32.mrf.mxu0 }
 0x227   : > { %v3161_v0 = vsel %vm3145_vm2, %v3160_v1, %v3159_v48  ;;  %v3623_v53 = vpack.c.bf16 %v2764_v54, %v2764_v54  ;;  %v3082_v12 = vunpack.c.l.b16 %v3621_v45  ;;  %v3083_v27 = vunpack.c.l.b16 %v3622_v58 }
 0x228   : > { %v3163_v52 = vsel %vm3148_vm3, %v3162_v42, %v3161_v0  ;;  %v2317_v30 = vcombine.high %v2309_v35, %v2309_v35  ;;  %v3491_v32 = vrot.slane %v2309_v35, 9  ;;  %v2318_v24 = vcombine.high %v2316_v15, %v2316_v15  ;;  %v3867_v42 = vpop.f32.mrf.mxu1 }
 0x229   : > { %v3249_v61 = vpack.c.b16 %v3163_v52, %v3163_v52  ;;  %v3084_v26 = vunpack.c.l.b16 %v3623_v53  ;;  %v3164_v2 = vrot.slane %v3082_v12, 7  ;;  %v3166_v20 = vrot.slane %v3083_v27, 6  ;;  %v1923_v52 = vpop.f32.mrf.mxu0 }
 0x22a   : > { %v3492_v14 = vrot.slane %v2317_v30, 9  ;;  %v3493_v46 = vrot.slane %v2316_v15, 9  ;;  %v2765_v7 = vmax.f32 %v2309_v35, %v3491_v32  ;;  %v5197_v51 = vunpack.c.l.bf16 %v4825_v10 }
 0x22b   : > { %3266 = vst.msk [vmem:[%s4919_s19 + $0x4] sm:$0xf] %vm3264_vm4, %v3249_v61  ;;  %v3165_v18 = vsel %vm3130_vm13, %v3164_v2, %v3081_v34  ;;  %v3168_v36 = vrot.slane %v3084_v26, 5  ;;  %v1998_v63 = vadd.f32 %v1907_v50, %v4940_v62  ;;  %v3494_v55 = vrot.slane %v2318_v24, 9 }
 0x22c   : > { %v2167_v44 = vadd.f32 %v5197_v51, %v2071_v41  ;;  %v3167_v22 = vsel %vm3133_vm14, %v3166_v20, %v3165_v18  ;;  %v2766_v37 = vmax.f32 %v2317_v30, %v3492_v14  ;;  %v2767_v39 = vmax.f32 %v2316_v15, %v3493_v46 }
 0x22d   : > { %v3624_v31 = vpack.c.bf16 %v2765_v7, %v2765_v7  ;;  %v3169_v1 = vsel %vm3136_vm15, %v3168_v36, %v3167_v22  ;;  %v2037_v54 = vadd.f32 %v4815_v60, %v1998_v63  ;;  %v1692_v45 = vadd.f32 %v1691_v17, %v4799_v49  ;;  %v3905_v36 = vpop.f32.mrf.mxu0 }
 0x22e   : > { %v2768_v58 = vmax.f32 %v2318_v24, %v3494_v55  ;;  %v3625_v34 = vpack.c.bf16 %v2766_v37, %v2766_v37  ;;  %v3626_v48 = vpack.c.bf16 %v2767_v39, %v2767_v39  ;;  %v2001_v41 = vadd.f32 %v3901_v38, %v4951_v3 }
 0x22f   : > { %v3085_v62 = vunpack.c.l.b16 %v3624_v31  ;;  %v2069_v50 = vmax.f32 %v2037_v54, 0.0  ;;  %v1713_v29 = vadd.f32 %v3866_v8, %v4730_v4  ;;  %v1999_v35 = vadd.f32 %v1910_v59, %v1692_v45  ;;  %v1707_v4 = vpop.f32.mrf.mxu1 }
 0x230   : > { %v3627_v0 = vpack.c.bf16 %v2768_v58, %v2768_v58  ;;  %v3086_v53 = vunpack.c.l.b16 %v3625_v34  ;;  %v3087_v12 = vunpack.c.l.b16 %v3626_v48  ;;  %v2040_v27 = vadd.f32 %v4815_v60, %v2001_v41  ;;  %v5006_v34 = vpop.f32.mrf.mxu0 }
 0x231   : > { %v3170_v15 = vrot.slane %v3085_v62, 4  ;;  %v5198_v49 = vunpack.c.l.bf16 %v4828_v19  ;;  %v2038_v30 = vadd.f32 %v4815_v60, %v1999_v35  ;;  %v1705_v3 = vadd.f32 %v1704_v16, %v4732_v5  ;;  %v5000_v39 = vpop.f32.mrf.mxu1 }
 0x232   : > { %v3088_v38 = vunpack.c.l.b16 %v3627_v0  ;;  %v3172_v32 = vrot.slane %v3086_v53, 3  ;;  %v3174_v61 = vrot.slane %v3087_v12, 2  ;;  %v2072_v26 = vmax.f32 %v2040_v27, 0.0 }
 0x233   : > { %v2165_v17 = vadd.f32 %v5198_v49, %v2069_v50  ;;  %v3171_v8 = vsel %vm3139_vm0, %v3170_v15, %v3169_v1  ;;  %v2070_v2 = vmax.f32 %v2038_v30, 0.0  ;;  %v2004_v20 = vadd.f32 %v3904_v21, %v1713_v29  ;;  %v5013_v53 = vpop.f32.mrf.mxu1 }
 0x234   : > { %v3173_v24 = vsel %vm3142_vm1, %v3172_v32, %v3171_v8  ;;  %v3176_v14 = vrot.slane %v3088_v38, 1  ;;  %v5199_v46 = vunpack.c.h.bf16 %v4825_v10  ;;  %v1716_v18 = vadd.f32 %v3867_v42, %v4734_v6  ;;  %v5018_v32 = vpop.f32.mrf.mxu0 }
 0x235   : > { %v2191_v59 = vmax.f32 %v2165_v17, %v2167_v44  ;;  %v3175_v5 = vsel %vm3145_vm2, %v3174_v61, %v3173_v24  ;;  %v5200_v63 = vunpack.c.h.bf16 %v4828_v19  ;;  %v2043_v55 = vadd.f32 %v4815_v60, %v2004_v20 }
 0x236   : > { %v2168_v7 = vadd.f32 %v5199_v46, %v2072_v26  ;;  %v3177_v22 = vsel %vm3148_vm3, %v3176_v14, %v3175_v5  ;;  %v2002_v37 = vadd.f32 %v1923_v52, %v1705_v3  ;;  %v4998_v10 = vadd.f32 %v1707_v4, %v4736_v9  ;;  %v5020_v14 = vpop.f32.mrf.mxu1 }
 0x237   : > { %v2319_v16 = vcombine.high %v2191_v59, %v2191_v59  ;;  %v2326_v51 = vrot.slane %v2191_v59, %v4817_v28  ;;  %v2166_v44 = vadd.f32 %v5200_v63, %v2070_v2  ;;  %v3250_v6 = vpack.c.b16 %v3177_v22, %v3177_v22 }
 0x238   : > { %v2075_v45 = vmax.f32 %v2043_v55, 0.0  ;;  %v2041_v19 = vadd.f32 %v4815_v60, %v2002_v37  ;;  %v5004_v58 = vadd.f32 %v3905_v36, %v1716_v18  ;;  %v5201_v29 = vunpack.c.l.bf16 %v4837_v40 }
 0x239   : > { %v2333_v21 = vrot.slane %v2319_v16, %v4817_v28  ;;  %v2334_v31 = vcombine.high %v2326_v51, %v2326_v51  ;;  %v3495_v1 = vrot.slane %v2326_v51, 9  ;;  %v2192_v54 = vmax.f32 %v2166_v44, %v2168_v7  ;;  %3267 = vst.msk [vmem:[%s4919_s19 + $0x8] sm:$0xf] %vm3264_vm4, %v3250_v6  ;;  %v1939_v44 = vpop.f32.mrf.mxu0 }
 0x23a   : > { %v2171_v35 = vadd.f32 %v5201_v29, %v2075_v45  ;;  %v2073_v0 = vmax.f32 %v2041_v19, 0.0  ;;  %v5202_v3 = vunpack.c.l.bf16 %v4840_v56  ;;  %v1723_v45 = vpop.f32.mrf.mxu1 }
 0x23b   : > { %v2335_v48 = vcombine.high %v2333_v21, %v2333_v21  ;;  %v3496_v9 = vrot.slane %v2334_v31, 9  ;;  %v3497_v41 = vrot.slane %v2333_v21, 9  ;;  %v2769_v42 = vmax.f32 %v2326_v51, %v3495_v1 }
 0x23c   : > { %v2336_v62 = vcombine.high %v2192_v54, %v2192_v54  ;;  %v2343_v50 = vrot.slane %v2192_v54, %v4817_v28  ;;  %v2169_v38 = vadd.f32 %v5202_v3, %v2073_v0  ;;  %v3874_v3 = vpop.f32.mrf.mxu1 }
 0x23d   : > { %v3498_v12 = vrot.slane %v2335_v48, 9  ;;  %v2770_v27 = vmax.f32 %v2334_v31, %v3496_v9  ;;  %v2771_v52 = vmax.f32 %v2333_v21, %v3497_v41  ;;  %v3628_v15 = vpack.c.bf16 %v2769_v42, %v2769_v42 }
 0x23e   : > { %v2350_v49 = vrot.slane %v2336_v62, %v4817_v28  ;;  %v2351_v17 = vcombine.high %v2343_v50, %v2343_v50  ;;  %v3499_v30 = vrot.slane %v2343_v50, 9  ;;  %v2193_v36 = vmax.f32 %v2169_v38, %v2171_v35  ;;  %v3909_v35 = vpop.f32.mrf.mxu0 }
 0x23f   : > { %v2772_v61 = vmax.f32 %v2335_v48, %v3498_v12  ;;  %v3629_v26 = vpack.c.bf16 %v2770_v27, %v2770_v27  ;;  %v3630_v4 = vpack.c.bf16 %v2771_v52, %v2771_v52  ;;  %v3089_v8 = vunpack.c.l.b16 %v3628_v15 }
 0x240   : > { %v2352_v59 = vcombine.high %v2350_v49, %v2350_v49  ;;  %v3500_v2 = vrot.slane %v2351_v17, 9  ;;  %v3501_v20 = vrot.slane %v2350_v49, 9  ;;  %v2773_v24 = vmax.f32 %v2343_v50, %v3499_v30 }
 0x241   : > { %v3631_v46 = vpack.c.bf16 %v2772_v61, %v2772_v61  ;;  %v3090_v7 = vunpack.c.l.b16 %v3629_v26  ;;  %v3091_v18 = vunpack.c.l.b16 %v3630_v4  ;;  %v2353_v6 = vcombine.high %v2193_v36, %v2193_v36 }
 0x242   : > { %v3502_v5 = vrot.slane %v2352_v59, 9  ;;  %v2774_v16 = vmax.f32 %v2351_v17, %v3500_v2  ;;  %v2775_v51 = vmax.f32 %v2350_v49, %v3501_v20  ;;  %v3632_v63 = vpack.c.bf16 %v2773_v24, %v2773_v24  ;;  %v1942_v24 = vpop.f32.mrf.mxu0 }
 0x243   : > { %v3092_v22 = vunpack.c.l.b16 %v3631_v46  ;;  %v3178_v55 = vrot.slane %v3090_v7, 7  ;;  %v3180_v37 = vrot.slane %v3091_v18, 6  ;;  %v2360_v9 = vrot.slane %v2193_v36, %v4817_v28 }
 0x244   : > { %v2776_v21 = vmax.f32 %v2352_v59, %v3502_v5  ;;  %v3633_v31 = vpack.c.bf16 %v2774_v16, %v2774_v16  ;;  %v3634_v1 = vpack.c.bf16 %v2775_v51, %v2775_v51  ;;  %v3093_v54 = vunpack.c.l.b16 %v3632_v63 }
 0x245   : > { %v3179_v19 = vsel %vm3130_vm13, %v3178_v55, %v3089_v8  ;;  %v3182_v48 = vrot.slane %v3092_v22, 5  ;;  %v2367_v41 = vrot.slane %v2353_v6, %v4817_v28  ;;  %v2368_v27 = vcombine.high %v2360_v9, %v2360_v9  ;;  %v1736_v22 = vpop.f32.mrf.mxu1 }
 0x246   : > { %v3181_v42 = vsel %vm3133_vm14, %v3180_v37, %v3179_v19  ;;  %v3635_v62 = vpack.c.bf16 %v2776_v21, %v2776_v21  ;;  %v3094_v50 = vunpack.c.l.b16 %v3633_v31  ;;  %v3095_v29 = vunpack.c.l.b16 %v3634_v1 }
 0x247   : > { %v3183_v0 = vsel %vm3136_vm15, %v3182_v48, %v3181_v42  ;;  %v3184_v12 = vrot.slane %v3093_v54, 4  ;;  %v2369_v52 = vcombine.high %v2367_v41, %v2367_v41  ;;  %v3503_v30 = vrot.slane %v2360_v9, 9  ;;  %v3912_v48 = vpop.f32.mrf.mxu0 }
 0x248   : > { %v3096_v15 = vunpack.c.l.b16 %v3635_v62  ;;  %v3186_v49 = vrot.slane %v3094_v50, 3  ;;  %v3188_v17 = vrot.slane %v3095_v29, 2  ;;  %v3504_v61 = vrot.slane %v2368_v27, 9 }
 0x249   : > { %v3185_v38 = vsel %vm3139_vm0, %v3184_v12, %v3183_v0  ;;  %v3505_v26 = vrot.slane %v2367_v41, 9  ;;  %v3506_v4 = vrot.slane %v2369_v52, 9  ;;  %v2777_v2 = vmax.f32 %v2360_v9, %v3503_v30 }
 0x24a   : > { %v3187_v8 = vsel %vm3142_vm1, %v3186_v49, %v3185_v38  ;;  %v3190_v59 = vrot.slane %v3096_v15, 1  ;;  %v2044_v20 = vadd.f32 %v4815_v60, %v5004_v58  ;;  %v2778_v7 = vmax.f32 %v2368_v27, %v3504_v61 }
 0x24b   : > { %v3189_v46 = vsel %vm3145_vm2, %v3188_v17, %v3187_v8  ;;  %v2779_v18 = vmax.f32 %v2367_v41, %v3505_v26  ;;  %v2780_v36 = vmax.f32 %v2369_v52, %v3506_v4  ;;  %v3636_v16 = vpack.c.bf16 %v2777_v2, %v2777_v2  ;;  %v1955_v52 = vpop.f32.mrf.mxu0 }
 0x24c   : > { %v3191_v5 = vsel %vm3148_vm3, %v3190_v59, %v3189_v46  ;;  %v2076_v51 = vmax.f32 %v2044_v20, 0.0  ;;  %v1729_v63 = vadd.f32 %v5000_v39, %v4738_v33  ;;  %v3637_v37 = vpack.c.bf16 %v2778_v7, %v2778_v7 }
 0x24d   : > { %v3251_v55 = vpack.c.b16 %v3191_v5, %v3191_v5  ;;  %v3638_v6 = vpack.c.bf16 %v2779_v18, %v2779_v18  ;;  %v3639_v21 = vpack.c.bf16 %v2780_v36, %v2780_v36  ;;  %v3097_v58 = vunpack.c.l.b16 %v3636_v16  ;;  %v3913_v20 = vpop.f32.mrf.mxu0  ;;  %v5208_v18 = vld [vmem:[#allocation10_spill] sm:$0xff] }
 0x24e   : > { %v5203_v31 = vunpack.c.h.bf16 %v4837_v40  ;;  %v2003_v54 = vadd.f32 %v5006_v34, %v4998_v10  ;;  %v1721_v19 = vadd.f32 %v5013_v53, %v4740_v47  ;;  %v3098_v9 = vunpack.c.l.b16 %v3637_v37  ;;  %v3875_v10 = vpop.f32.mrf.mxu1 }
 0x24f   : > { %3268 = vst.msk [vmem:[%s4919_s19 + $0xc] sm:$0xf] %vm3264_vm4, %v3251_v55  ;;  %v3099_v33 = vunpack.c.l.b16 %v3638_v6  ;;  %v3100_v39 = vunpack.c.l.b16 %v3639_v21  ;;  %v2008_v41 = vadd.f32 %v5018_v32, %v1729_v63  ;;  %v1732_v40 = vadd.f32 %v5020_v14, %v4742_v13 }
 0x250   : > { %v2172_v1 = vadd.f32 %v5203_v31, %v2076_v51  ;;  %v2042_v42 = vadd.f32 %v4815_v60, %v2003_v54  ;;  %v2006_v62 = vadd.f32 %v1939_v44, %v1721_v19  ;;  %v1724_v50 = vadd.f32 %v1723_v45, %v4748_v43  ;;  %v1739_v38 = vpop.f32.mrf.mxu1 }
 0x251   : > { %v3192_v34 = vrot.slane %v3098_v9, 7  ;;  %v3194_v29 = vrot.slane %v3099_v33, 6  ;;  %v3196_v47 = vrot.slane %v3100_v39, 5  ;;  %v2047_v53 = vadd.f32 %v4815_v60, %v2008_v41  ;;  %v5211_v33 = vld [vmem:[#allocation15_spill] sm:$0xff] }
 0x252   : > { %v2074_v0 = vmax.f32 %v2042_v42, 0.0  ;;  %v2045_v12 = vadd.f32 %v4815_v60, %v2006_v62  ;;  %v2009_v27 = vadd.f32 %v3909_v35, %v1732_v40  ;;  %v1745_v32 = vadd.f32 %v3874_v3, %v4752_v23 }
 0x253   : > { %v3193_v15 = vsel %vm3130_vm13, %v3192_v34, %v3097_v58  ;;  %v2079_v49 = vmax.f32 %v2047_v53, 0.0  ;;  %v2007_v13 = vadd.f32 %v1942_v24, %v1724_v50  ;;  %v1737_v14 = vadd.f32 %v1736_v22, %v4756_v25 }
 0x254   : > { %v3195_v43 = vsel %vm3133_vm14, %v3194_v29, %v3193_v15  ;;  %v5204_v44 = vunpack.c.h.bf16 %v4840_v56  ;;  %v2077_v17 = vmax.f32 %v2045_v12, 0.0  ;;  %v2048_v30 = vadd.f32 %v4815_v60, %v2009_v27  ;;  %v5207_v56 = vld [vmem:[#allocation9_spill] sm:$0xff] }
 0x255   : > { %v5058_v35 = vsel %vm3136_vm15, %v3196_v47, %v3195_v43  ;;  %v5205_v23 = vunpack.c.l.bf16 %v4849_v11  ;;  %v2046_v61 = vadd.f32 %v4815_v60, %v2007_v13  ;;  %v2012_v26 = vadd.f32 %v3912_v48, %v1745_v32 }
 0x256   : > { %v2170_v45 = vadd.f32 %v5204_v44, %v2074_v0  ;;  %v5206_v25 = vunpack.c.l.bf16 %v4852_v57  ;;  %v2080_v59 = vmax.f32 %v2048_v30, 0.0  ;;  %v1748_v2 = vadd.f32 %v3875_v10, %v5207_v56 }
 0x257   : > { %v2175_v3 = vadd.f32 %v5205_v23, %v2079_v49  ;;  %v2078_v24 = vmax.f32 %v2046_v61, 0.0  ;;  %v2051_v46 = vadd.f32 %v4815_v60, %v2012_v26  ;;  %v2010_v7 = vadd.f32 %v1955_v52, %v1737_v14 }
 0x258   : > { %v2194_v4 = vmax.f32 %v2170_v45, %v2172_v1  ;;  %v2173_v8 = vadd.f32 %v5206_v25, %v2077_v17  ;;  %v5068_v36 = vadd.f32 %v1739_v38, %v5208_v18  ;;  %v5209_v63 = vunpack.c.h.bf16 %v4849_v11 }
 0x259   : > { %v5210_v55 = vunpack.c.h.bf16 %v4852_v57  ;;  %v2083_v6 = vmax.f32 %v2051_v46, 0.0  ;;  %v2049_v21 = vadd.f32 %v4815_v60, %v2010_v7  ;;  %v5076_v58 = vadd.f32 %v3913_v20, %v1748_v2 }
 0x25a   : > { %v2370_v5 = vcombine.high %v2194_v4, %v2194_v4  ;;  %v2377_v16 = vrot.slane %v2194_v4, %v4817_v28  ;;  %v2195_v51 = vmax.f32 %v2173_v8, %v2175_v3  ;;  %v2176_v22 = vadd.f32 %v5209_v63, %v2080_v59 }
 0x25b   : > { %v2174_v37 = vadd.f32 %v5210_v55, %v2078_v24  ;;  %v5212_v39 = vunpack.c.l.bf16 %v5211_v33  ;;  %v2081_v41 = vmax.f32 %v2049_v21, 0.0 }
 0x25c   : > { %v2384_v31 = vrot.slane %v2370_v5, %v4817_v28  ;;  %v2385_v1 = vcombine.high %v2377_v16, %v2377_v16  ;;  %v3507_v54 = vrot.slane %v2377_v16, 9  ;;  %v2387_v19 = vcombine.high %v2195_v51, %v2195_v51 }
 0x25d   : > { %v2394_v48 = vrot.slane %v2195_v51, %v4817_v28  ;;  %v2196_v9 = vmax.f32 %v2174_v37, %v2176_v22  ;;  %v5082_v11 = vadd.f32 %v5212_v39, %v2083_v6  ;;  %v5213_v51 = vld [vmem:[#allocation16_spill] sm:$0xff] }
 0x25e   : > { %v2386_v57 = vcombine.high %v2384_v31, %v2384_v31  ;;  %v3508_v42 = vrot.slane %v2385_v1, 9  ;;  %v3509_v40 = vrot.slane %v2384_v31, 9  ;;  %v2781_v62 = vmax.f32 %v2377_v16, %v3507_v54 }
 0x25f   : > { %v2401_v60 = vrot.slane %v2387_v19, %v4817_v28  ;;  %v2402_v50 = vcombine.high %v2394_v48, %v2394_v48  ;;  %v3511_v10 = vrot.slane %v2394_v48, 9  ;;  %v2404_v34 = vcombine.high %v2196_v9, %v2196_v9  ;;  %v1958_v19 = vpop.f32.mrf.mxu0 }
 0x260   : > { %v3510_v29 = vrot.slane %v2386_v57, 9  ;;  %v2782_v47 = vmax.f32 %v2385_v1, %v3508_v42  ;;  %v2783_v53 = vmax.f32 %v2384_v31, %v3509_v40  ;;  %v3640_v0 = vpack.c.bf16 %v2781_v62, %v2781_v62 }
 0x261   : > { %v2403_v12 = vcombine.high %v2401_v60, %v2401_v60  ;;  %v3512_v27 = vrot.slane %v2402_v50, 9  ;;  %v3513_v32 = vrot.slane %v2401_v60, 9  ;;  %v2785_v52 = vmax.f32 %v2394_v48, %v3511_v10  ;;  %v5095_v48 = vld [vmem:[%s4785_s14 + $0x78] sm:$0xff]  }
 0x262   : > { %v2784_v15 = vmax.f32 %v2386_v57, %v3510_v29  ;;  %v3641_v49 = vpack.c.bf16 %v2782_v47, %v2782_v47  ;;  %v3642_v13 = vpack.c.bf16 %v2783_v53, %v2783_v53  ;;  %v3101_v14 = vunpack.c.l.b16 %v3640_v0 }
 0x263   : > { %v3514_v43 = vrot.slane %v2403_v12, 9  ;;  %v2786_v44 = vmax.f32 %v2402_v50, %v3512_v27  ;;  %v2787_v45 = vmax.f32 %v2401_v60, %v3513_v32  ;;  %v3644_v17 = vpack.c.bf16 %v2785_v52, %v2785_v52  ;;  %v3878_v50 = vpop.f32.mrf.mxu1  ;;  %v5104_v27 = vld [vmem:[#allocation5] ss:$0 sm:$0xff]  ;;  %v3916_v52 = vpop.f32.mrf.mxu0 }
 0x264   : > { %v3643_v30 = vpack.c.bf16 %v2784_v15, %v2784_v15  ;;  %v3102_v38 = vunpack.c.l.b16 %v3641_v49  ;;  %v3103_v23 = vunpack.c.l.b16 %v3642_v13  ;;  %v3198_v3 = vrot.slane %v3101_v14, 4  ;;  %v5215_v14 = vld [vmem:[#allocation11_spill] sm:$0xff] }
 0x265   : > { %v2788_v61 = vmax.f32 %v2403_v12, %v3514_v43  ;;  %v3645_v26 = vpack.c.bf16 %v2786_v44, %v2786_v44  ;;  %v3646_v4 = vpack.c.bf16 %v2787_v45, %v2787_v45  ;;  %v3105_v25 = vunpack.c.l.b16 %v3644_v17 }
 0x266   : > { %v3104_v8 = vunpack.c.l.b16 %v3643_v30  ;;  %v3199_v59 = vsel %vm3139_vm0, %v3198_v3, %v5058_v35  ;;  %v3200_v56 = vrot.slane %v3102_v38, 3  ;;  %v3202_v2 = vrot.slane %v3103_v23, 2  ;;  %v1752_v30 = vpop.f32.mrf.mxu1 }
 0x267   : > { %v3647_v20 = vpack.c.bf16 %v2788_v61, %v2788_v61  ;;  %v3106_v24 = vunpack.c.l.b16 %v3645_v26  ;;  %v3107_v46 = vunpack.c.l.b16 %v3646_v4  ;;  %v2411_v7 = vrot.slane %v2196_v9, %v4817_v28 }
 0x268   : > { %v3201_v18 = vsel %vm3142_vm1, %v3200_v56, %v3199_v59  ;;  %v3204_v5 = vrot.slane %v3104_v8, 1  ;;  %v2418_v16 = vrot.slane %v2404_v34, %v4817_v28  ;;  %v5214_v63 = vunpack.c.l.bf16 %v5213_v51  ;;  %v1971_v8 = vpop.f32.mrf.mxu0 }
 0x269   : > { %v3203_v55 = vsel %vm3145_vm2, %v3202_v2, %v3201_v18  ;;  %v3108_v37 = vunpack.c.l.b16 %v3647_v20  ;;  %v3206_v35 = vrot.slane %v3106_v24, 7  ;;  %v3208_v6 = vrot.slane %v3107_v46, 6  ;;  %v3879_v18 = vpop.f32.mrf.mxu1 }
 0x26a   : > { %v2177_v22 = vadd.f32 %v5214_v63, %v2081_v41  ;;  %v3205_v21 = vsel %vm3148_vm3, %v3204_v5, %v3203_v55  ;;  %v2419_v31 = vcombine.high %v2411_v7, %v2411_v7  ;;  %v2420_v1 = vcombine.high %v2418_v16, %v2418_v16 }
 0x26b   : > { %v3515_v54 = vrot.slane %v2411_v7, 9  ;;  %v3252_v9 = vpack.c.b16 %v3205_v21, %v3205_v21  ;;  %v3207_v39 = vsel %vm3130_vm13, %v3206_v35, %v3105_v25  ;;  %v3210_v57 = vrot.slane %v3108_v37, 5 }
 0x26c   : > { %v3517_v42 = vrot.slane %v2418_v16, 9  ;;  %v3209_v41 = vsel %vm3133_vm14, %v3208_v6, %v3207_v39  ;;  %v3516_v40 = vrot.slane %v2419_v31, 9  ;;  %v3518_v62 = vrot.slane %v2420_v1, 9  ;;  %v5217_v6 = vld [vmem:[#allocation12_spill] sm:$0xff] }
 0x26d   : > { %v2789_v60 = vmax.f32 %v2411_v7, %v3515_v54  ;;  %3269 = vst.msk [vmem:[%s4919_s19 + $0x10] sm:$0xf] %vm3264_vm4, %v3252_v9  ;;  %v3211_v34 = vsel %vm3136_vm15, %v3210_v57, %v3209_v41  ;;  %v2197_v29 = vmax.f32 %v2177_v22, %v5082_v11  ;;  %v3730_v47 = vunpack.c.l.bf16 %v5095_v48 }
 0x26e   : > { %v2791_v10 = vmax.f32 %v2418_v16, %v3517_v42  ;;  %v2790_v53 = vmax.f32 %v2419_v31, %v3516_v40  ;;  %v2792_v0 = vmax.f32 %v2420_v1, %v3518_v62  ;;  %v2052_v32 = vadd.f32 %v5104_v27, %v5076_v58  ;;  %v3917_v1 = vpop.f32.mrf.mxu0  ;;  %v3745_v62 = vld [vmem:[%s4785_s14 + $0x70] sm:$0xff]  }
 0x26f   : > { %v3648_v12 = vpack.c.bf16 %v2789_v60, %v2789_v60  ;;  %v2421_v49 = vcombine.high %v2197_v29, %v2197_v29  ;;  %v2428_v13 = vrot.slane %v2197_v29, %v4817_v28  ;;  %v1761_v43 = vadd.f32 %v3878_v50, %v5215_v14  ;;  %v1755_v60 = vpop.f32.mrf.mxu1  ;;  %v5220_v14 = vld [vmem:[#allocation14_spill] sm:$0xff] }
 0x270   : > { %v3650_v15 = vpack.c.bf16 %v2791_v10, %v2791_v10  ;;  %v3649_v44 = vpack.c.bf16 %v2790_v53, %v2790_v53  ;;  %v3651_v45 = vpack.c.bf16 %v2792_v0, %v2792_v0  ;;  %v2011_v17 = vadd.f32 %v1958_v19, %v5068_v36 }
 0x271   : > { %v3109_v11 = vunpack.c.l.b16 %v3648_v12  ;;  %v2435_v23 = vrot.slane %v2421_v49, %v4817_v28  ;;  %v2436_v3 = vcombine.high %v2428_v13, %v2428_v13  ;;  %v3519_v61 = vrot.slane %v2428_v13, 9  ;;  %v5219_v12 = vld [vmem:[#allocation13_spill] sm:$0xff] }
 0x272   : > { %v3111_v38 = vunpack.c.l.b16 %v3650_v15  ;;  %v3110_v26 = vunpack.c.l.b16 %v3649_v44  ;;  %v3112_v58 = vunpack.c.l.b16 %v3651_v45  ;;  %v2084_v25 = vmax.f32 %v2052_v32, 0.0  ;;  %v1974_v15 = vpop.f32.mrf.mxu0 }
 0x273   : > { %v3212_v4 = vrot.slane %v3109_v11, 4  ;;  %v2437_v56 = vcombine.high %v2435_v23, %v2435_v23  ;;  %v3520_v2 = vrot.slane %v2436_v3, 9  ;;  %v3521_v20 = vrot.slane %v2435_v23, 9 }
 0x274   : > { %v3216_v59 = vrot.slane %v3111_v38, 2  ;;  %v3214_v46 = vrot.slane %v3110_v26, 3  ;;  %v3218_v7 = vrot.slane %v3112_v58, 1  ;;  %v2793_v36 = vmax.f32 %v2428_v13, %v3519_v61 }
 0x275   : > { %v3213_v24 = vsel %vm3139_vm0, %v3212_v4, %v3211_v34  ;;  %v3522_v5 = vrot.slane %v2437_v56, 9  ;;  %v2794_v16 = vmax.f32 %v2436_v3, %v3520_v2  ;;  %v2795_v63 = vmax.f32 %v2435_v23, %v3521_v20 }
 0x276   : > { %v2050_v22 = vadd.f32 %v5104_v27, %v2011_v17  ;;  %v3215_v55 = vsel %vm3142_vm1, %v3214_v46, %v3213_v24  ;;  %v5216_v37 = vunpack.c.h.bf16 %v5211_v33  ;;  %v1753_v21 = vadd.f32 %v1752_v30, %v5217_v6 }
 0x277   : > { %v2016_v31 = vadd.f32 %v3916_v52, %v1761_v43  ;;  %v3217_v54 = vsel %vm3145_vm2, %v3216_v59, %v3215_v55  ;;  %v2796_v19 = vmax.f32 %v2437_v56, %v3522_v5  ;;  %v3653_v9 = vpack.c.bf16 %v2794_v16, %v2794_v16 }
 0x278   : > { %v2180_v35 = vadd.f32 %v5216_v37, %v2084_v25  ;;  %v3654_v39 = vpack.c.bf16 %v2795_v63, %v2795_v63  ;;  %v3219_v57 = vsel %vm3148_vm3, %v3218_v7, %v3217_v54  ;;  %v3652_v42 = vpack.c.bf16 %v2793_v36, %v2793_v36 }
 0x279   : > { %v2082_v41 = vmax.f32 %v2050_v22, 0.0  ;;  %v2055_v40 = vadd.f32 %v5104_v27, %v2016_v31  ;;  %v3253_v33 = vpack.c.b16 %v3219_v57, %v3219_v57  ;;  %v3655_v50 = vpack.c.bf16 %v2796_v19, %v2796_v19 }
 0x27a   : > { %v3114_v10 = vunpack.c.l.b16 %v3653_v9  ;;  %v3115_v34 = vunpack.c.l.b16 %v3654_v39  ;;  %v5218_v29 = vunpack.c.h.bf16 %v5213_v51  ;;  %v1764_v32 = vadd.f32 %v3879_v18, %v5219_v12 }
 0x27b   : > { %v2087_v0 = vmax.f32 %v2055_v40, 0.0  ;;  %v2014_v52 = vadd.f32 %v1971_v8, %v1753_v21  ;;  %3270 = vst.msk [vmem:[%s4919_s19 + $0x14] sm:$0xf] %vm3264_vm4, %v3253_v33  ;;  %v3726_v13 = vunpack.c.l.bf16 %v3745_v62  ;;  %v1756_v43 = vadd.f32 %v1755_v60, %v5220_v14 }
 0x27c   : > { %v2178_v53 = vadd.f32 %v5218_v29, %v2082_v41  ;;  %v3220_v49 = vrot.slane %v3114_v10, 7  ;;  %v3113_v44 = vunpack.c.l.b16 %v3652_v42  ;;  %v2017_v17 = vadd.f32 %v3917_v1, %v1764_v32 }
 0x27d   : > { %v2053_v11 = vadd.f32 %v5104_v27, %v2014_v52  ;;  %v3116_v30 = vunpack.c.l.b16 %v3655_v50  ;;  %v3222_v38 = vrot.slane %v3115_v34, 6  ;;  %v2183_v51 = vadd.f32 %v3730_v47, %v2087_v0 }
 0x27e   : > { %v2198_v45 = vmax.f32 %v2178_v53, %v2180_v35  ;;  %v2015_v23 = vadd.f32 %v1974_v15, %v1756_v43  ;;  %v3221_v3 = vsel %vm3130_vm13, %v3220_v49, %v3113_v44  ;;  %v2056_v4 = vadd.f32 %v5104_v27, %v2017_v17 }
 0x27f   : > { %v2085_v58 = vmax.f32 %v2053_v11, 0.0  ;;  %v3731_v25 = vunpack.c.h.bf16 %v5095_v48  ;;  %v3727_v59 = vunpack.c.h.bf16 %v3745_v62  ;;  %v3223_v47 = vsel %vm3133_vm14, %v3222_v38, %v3221_v3 }
 0x280   : > { %v2438_v61 = vcombine.high %v2198_v45, %v2198_v45  ;;  %v2445_v26 = vrot.slane %v2198_v45, %v4817_v28  ;;  %v2054_v8 = vadd.f32 %v5104_v27, %v2015_v23  ;;  %v3224_v46 = vrot.slane %v3116_v30, 5 }
 0x281   : > { %v2181_v24 = vadd.f32 %v3726_v13, %v2085_v58  ;;  %v2088_v7 = vmax.f32 %v2056_v4, 0.0 }
 0x282   : > { %v2452_v56 = vrot.slane %v2438_v61, %v4817_v28  ;;  %v2453_v2 = vcombine.high %v2445_v26, %v2445_v26  ;;  %v3523_v20 = vrot.slane %v2445_v26, 9  ;;  %v2086_v36 = vmax.f32 %v2054_v8, 0.0 }
 0x283   : > { %v2199_v22 = vmax.f32 %v2181_v24, %v2183_v51  ;;  %v2184_v55 = vadd.f32 %v3731_v25, %v2088_v7  ;;  %v3225_v21 = vsel %vm3136_vm15, %v3224_v46, %v3223_v47 }
 0x284   : > { %v2454_v18 = vcombine.high %v2452_v56, %v2452_v56  ;;  %v3524_v5 = vrot.slane %v2453_v2, 9  ;;  %v3525_v16 = vrot.slane %v2452_v56, 9  ;;  %v2797_v63 = vmax.f32 %v2445_v26, %v3523_v20 }
 0x285   : > { %v2182_v48 = vadd.f32 %v3727_v59, %v2086_v36  ;;  %v2455_v31 = vcombine.high %v2199_v22, %v2199_v22  ;;  %v2462_v1 = vrot.slane %v2199_v22, %v4817_v28 }
 0x286   : > { %v3526_v37 = vrot.slane %v2454_v18, 9  ;;  %v2798_v27 = vmax.f32 %v2453_v2, %v3524_v5  ;;  %v2799_v35 = vmax.f32 %v2452_v56, %v3525_v16  ;;  %v3656_v6 = vpack.c.bf16 %v2797_v63, %v2797_v63 }
 0x287   : > { %v2200_v54 = vmax.f32 %v2182_v48, %v2184_v55  ;;  %v2469_v42 = vrot.slane %v2455_v31, %v4817_v28  ;;  %v2470_v41 = vcombine.high %v2462_v1, %v2462_v1  ;;  %v3527_v40 = vrot.slane %v2462_v1, 9 }
 0x288   : > { %v2800_v19 = vmax.f32 %v2454_v18, %v3526_v37  ;;  %v3657_v9 = vpack.c.bf16 %v2798_v27, %v2798_v27  ;;  %v3658_v39 = vpack.c.bf16 %v2799_v35, %v2799_v35  ;;  %v3117_v57 = vunpack.c.l.b16 %v3656_v6 }
 0x289   : > { %v2472_v62 = vcombine.high %v2200_v54, %v2200_v54  ;;  %v2471_v34 = vcombine.high %v2469_v42, %v2469_v42  ;;  %v3528_v29 = vrot.slane %v2470_v41, 9  ;;  %v3529_v53 = vrot.slane %v2469_v42, 9 }
 0x28a   : > { %v3659_v60 = vpack.c.bf16 %v2800_v19, %v2800_v19  ;;  %v3118_v33 = vunpack.c.l.b16 %v3657_v9  ;;  %v3119_v50 = vunpack.c.l.b16 %v3658_v39  ;;  %v3226_v10 = vrot.slane %v3117_v57, 4 }
 0x28b   : > { %v2801_v0 = vmax.f32 %v2462_v1, %v3527_v40  ;;  %v3530_v49 = vrot.slane %v2471_v34, 9  ;;  %v2802_v13 = vmax.f32 %v2470_v41, %v3528_v29  ;;  %v2803_v14 = vmax.f32 %v2469_v42, %v3529_v53 }
 0x28c   : > { %v3120_v12 = vunpack.c.l.b16 %v3659_v60  ;;  %v3227_v32 = vsel %vm3139_vm0, %v3226_v10, %v3225_v21  ;;  %v3228_v52 = vrot.slane %v3118_v33, 3  ;;  %v3230_v15 = vrot.slane %v3119_v50, 2 }
 0x28d   : > { %v3660_v43 = vpack.c.bf16 %v2801_v0, %v2801_v0  ;;  %v2479_v11 = vrot.slane %v2200_v54, %v4817_v28  ;;  %v2486_v17 = vrot.slane %v2472_v62, %v4817_v28  ;;  %v2804_v38 = vmax.f32 %v2471_v34, %v3530_v49 }
 0x28e   : > { %v3229_v44 = vsel %vm3142_vm1, %v3228_v52, %v3227_v32  ;;  %v3232_v45 = vrot.slane %v3120_v12, 1  ;;  %v3661_v51 = vpack.c.bf16 %v2802_v13, %v2802_v13  ;;  %v3662_v23 = vpack.c.bf16 %v2803_v14, %v2803_v14 }
 0x28f   : > { %v3231_v30 = vsel %vm3145_vm2, %v3230_v15, %v3229_v44  ;;  %v2487_v61 = vcombine.high %v2479_v11, %v2479_v11  ;;  %v2488_v26 = vcombine.high %v2486_v17, %v2486_v17  ;;  %v3663_v4 = vpack.c.bf16 %v2804_v38, %v2804_v38 }
 0x290   : > { %v3233_v3 = vsel %vm3148_vm3, %v3232_v45, %v3231_v30  ;;  %v3122_v25 = vunpack.c.l.b16 %v3661_v51  ;;  %v3123_v8 = vunpack.c.l.b16 %v3662_v23  ;;  %v3531_v59 = vrot.slane %v2479_v11, 9 }
 0x291   : > { %v3254_v58 = vpack.c.b16 %v3233_v3, %v3233_v3  ;;  %v3532_v56 = vrot.slane %v2487_v61, 9  ;;  %v3533_v2 = vrot.slane %v2486_v17, 9  ;;  %v3534_v20 = vrot.slane %v2488_v26, 9 }
 0x292   : > { %v3121_v28 = vunpack.c.l.b16 %v3660_v43  ;;  %v3124_v24 = vunpack.c.l.b16 %v3663_v4  ;;  %v3234_v47 = vrot.slane %v3122_v25, 7  ;;  %v3236_v46 = vrot.slane %v3123_v8, 6 }
 0x293   : > { %3271 = vst.msk [vmem:[%s4919_s19 + $0x18] sm:$0xf] %vm3264_vm4, %v3254_v58  ;;  %v2805_v7 = vmax.f32 %v2479_v11, %v3531_v59  ;;  %v2806_v36 = vmax.f32 %v2487_v61, %v3532_v56  ;;  %v2807_v18 = vmax.f32 %v2486_v17, %v3533_v2  ;;  %v2808_v5 = vmax.f32 %v2488_v26, %v3534_v20 }
 0x294   : > { %v3235_v16 = vsel %vm3130_vm13, %v3234_v47, %v3121_v28  ;;  %v3238_v63 = vrot.slane %v3124_v24, 5 }
 0x295   : > { %v3237_v22 = vsel %vm3133_vm14, %v3236_v46, %v3235_v16  ;;  %v3664_v55 = vpack.c.bf16 %v2805_v7, %v2805_v7  ;;  %v3665_v48 = vpack.c.bf16 %v2806_v36, %v2806_v36  ;;  %v3666_v37 = vpack.c.bf16 %v2807_v18, %v2807_v18 }
 0x296   : > { %v3667_v27 = vpack.c.bf16 %v2808_v5, %v2808_v5  ;;  %v3239_v1 = vsel %vm3136_vm15, %v3238_v63, %v3237_v22 }
 0x297   : > { %v3125_v35 = vunpack.c.l.b16 %v3664_v55  ;;  %v3126_v6 = vunpack.c.l.b16 %v3665_v48  ;;  %v3127_v21 = vunpack.c.l.b16 %v3666_v37 }
 0x298   : > { %v3128_v31 = vunpack.c.l.b16 %v3667_v27 }
 0x299   : > { %v3240_v54 = vrot.slane %v3125_v35, 4  ;;  %v3242_v19 = vrot.slane %v3126_v6, 3  ;;  %v3244_v9 = vrot.slane %v3127_v21, 2 }
 0x29a   : > { %v3246_v39 = vrot.slane %v3128_v31, 1 }
 0x29b   : > { %v3241_v57 = vsel %vm3139_vm0, %v3240_v54, %v3239_v1 }
 0x29c   : > { %v3243_v42 = vsel %vm3142_vm1, %v3242_v19, %v3241_v57 }
 0x29d   : > { %v3245_v41 = vsel %vm3145_vm2, %v3244_v9, %v3243_v42 }
 0x29e   : > { %v3247_v40 = vsel %vm3148_vm3, %v3246_v39, %v3245_v41 }
 0x29f   : > { %v3255_v62 = vpack.c.b16 %v3247_v40, %v3247_v40 }
 0x2a1   : > { %3272 = vst.msk [vmem:[%s4919_s19 + $0x1c] sm:$0xf] %vm3264_vm4, %v3255_v62 }
 0x2a2 PF: > { %s16_s15 = sadd.s32 1, %s4076_s15  }
 0x2a3   : > { %p13_p2 = scmp.ge.s32.totalorder %s16_s15, 4  }
 0x2a5   :  { %15 = sbr.rel (!%p13_p2) target bundleno = 2 (0x2), region = 81 }
 0x2aa   :  { %3294 = vsyncpa [#allocation4], 1 }
 0x2ab   :  { %3296 = vsyncpa [#allocation4 + $0x1], 1 }
 0x2ac   :  { %3297 = vsyncpa [#allocation6], 1 }

// kernel: model_forward.11
= control target key start
LH: loop header
LB: loop body
LE: loop exit
PB: predicated region body
PF: predicated region fallthrough
CT: control target
= control target key end

     0   :  { %11 = vsyncpa [#allocation3], 0  ;;  %v276_v1 = vmov 0.0   ;;  %vm277_vm0 = vmmov 0   ;;  %s380_s0 = inlined_call_operand.vmem [shape: f32[2,2,128], index: 0, kind: input, shape index: {}]   ;;  %s381_s1 = inlined_call_operand.vmem [shape: f32[1,128], index: 1, kind: input, shape index: {}]   ;;  %s382_s2 = inlined_call_operand.vmem [shape: f32[128,10], index: 2, kind: input, shape index: {}]   ;;  %s383_s3 = inlined_call_operand.vmem [shape: f32[1,10], index: 3, kind: input, shape index: {}]   ;;  %s384_s4 = inlined_call_operand.hbm [shape: f32[2,10], index: 4, kind: output, shape index: {0}]   ;;  %s385_s5 = inlined_call_operand.hbm [shape: f32[2,10], index: 5, kind: output, shape index: {1}]  }
   0x1   :  { %v49_v0 = vld [vmem:[%s382_s2 + $0x78] sm:$0xff]  ;;  %189 = vmatprep.subr.mxu0 %v276_v1  ;;  %v48_v2 = vld [vmem:[%s382_s2 + $0x70] sm:$0xff]  ;;  %221 = vmatprep.mubr.msk.f32.mxu0 %vm277_vm0, %v276_v1  ;;  %v47_v3 = vld [vmem:[%s382_s2 + $0x68] sm:$0xff] }
   0x2   :  { %190 = vmatpush3.msra.mxu0 %v49_v0  ;;  %v46_v4 = vld [vmem:[%s382_s2 + $0x60] sm:$0xff] }
   0x3   :  { %191 = vmatprep.subr.mxu0 %v276_v1 }
   0x4   :  { %192 = vmatpush3.msra.mxu0 %v48_v2 }
   0x5   :  { %193 = vmatprep.subr.mxu0 %v276_v1 }
   0x6   :  { %194 = vmatpush3.msra.mxu0 %v47_v3 }
   0x7   :  { %12 = vsyncpa [#allocation5], 0  ;;  %195 = vmatprep.subr.mxu0 %v276_v1  ;;  %v45_v5 = vld [vmem:[%s382_s2 + $0x58] sm:$0xff]  ;;  %v44_v6 = vld [vmem:[%s382_s2 + $0x50] sm:$0xff]  ;;  %vm127_vm1 = vcmask 74752  }
   0x8   :  { %196 = vmatpush3.msra.mxu0 %v46_v4  ;;  %v43_v7 = vld [vmem:[%s382_s2 + $0x48] sm:$0xff]  ;;  %v42_v8 = vld [vmem:[%s382_s2 + $0x40] sm:$0xff]  ;;  %v41_v9 = vld [vmem:[%s382_s2 + $0x38] sm:$0xff] }
   0x9   :  { %197 = vmatprep.subr.mxu0 %v276_v1  ;;  %v40_v10 = vld [vmem:[%s382_s2 + $0x30] sm:$0xff]  ;;  %v21_v11 = vld [vmem:[%s380_s0] sm:$0x3]  ;;  %v169_v12 = vld [vmem:[%s380_s0 + $0x2] sm:$0x3] }
   0xa   :  { %198 = vmatpush3.msra.mxu0 %v45_v5  ;;  %v39_v13 = vld [vmem:[%s382_s2 + $0x28] sm:$0xff]  ;;  %v38_v14 = vld [vmem:[%s382_s2 + $0x20] sm:$0xff]  ;;  %v24_v15 = vadd.f32 %v169_v12, %v21_v11  ;;  %v37_v17 = vld [vmem:[%s382_s2 + $0x18] sm:$0xff] }
   0xb   :  { %199 = vmatprep.subr.mxu0 %v276_v1  ;;  %v170_v16 = vld [vmem:[%s381_s1] ss:$0 sm:$0xff]  ;;  %v36_v18 = vld [vmem:[%s382_s2 + $0x10] sm:$0xff]  ;;  %v35_v20 = vld [vmem:[%s382_s2 + $0x8] sm:$0xff] }
   0xc   :  { %200 = vmatpush3.msra.mxu0 %v44_v6  ;;  %v32_v19 = vadd.f32 %v170_v16, %v24_v15  ;;  %v34_v21 = vld [vmem:[%s382_s2] sm:$0xff]  ;;  %s278_s2 = smov [#allocation2]  }
   0xd   :  { %201 = vmatprep.subr.mxu0 %v276_v1  ;;  %v171_v23 = vld [vmem:[%s383_s3] ss:$0 sm:$0xff]  ;;  %s147_s6 = sshll.u32 %s278_s2, 4  ;;  %s148_s6 = int_to_ptr.vmem [resolvable:$true] %s147_s6 }
   0xe   :  { %202 = vmatpush3.msra.mxu0 %v43_v7  ;;  %v33_v22 = vmax.f32 %v32_v19, 0.0  ;;  %s232_s3 = scalar_lea.vmem %s148_s6, 32  ;;  %p237_p1 = scmp.lt.s32.totalorder %s148_s6, %s148_s6 }
   0xf   :  { %203 = vmatprep.subr.mxu0 %v276_v1  ;;  %p233_p0 = scmp.ne.s32.totalorder %s148_s6, %s232_s3  ;;  %p238_p2 = scmp.lt.s32.totalorder %s232_s3, %s232_s3 }
  0x10   :  { %204 = vmatpush3.msra.mxu0 %v42_v8 }
  0x11   :  { %205 = vmatprep.subr.mxu0 %v276_v1  ;;  %p239_p3 = por %p238_p2, %p237_p1 }
  0x12   :  { %206 = vmatpush3.msra.mxu0 %v41_v9 }
  0x13   :  { %207 = vmatprep.subr.mxu0 %v276_v1  ;;  %p240_p4 = pnand %p239_p3, %p233_p0 }
  0x14   :  { %208 = vmatpush3.msra.mxu0 %v40_v10 }
  0x15   :  { %209 = vmatprep.subr.mxu0 %v276_v1 }
  0x16   :  { %210 = vmatpush3.msra.mxu0 %v39_v13 }
  0x17   :  { %211 = vmatprep.subr.mxu0 %v276_v1 }
  0x18   :  { %212 = vmatpush3.msra.mxu0 %v38_v14 }
  0x19   :  { %213 = vmatprep.subr.mxu0 %v276_v1 }
  0x1a   :  { %214 = vmatpush3.msra.mxu0 %v37_v17 }
  0x1b   :  { %215 = vmatprep.subr.mxu0 %v276_v1 }
  0x1c   :  { %216 = vmatpush3.msra.mxu0 %v36_v18 }
  0x1d   :  { %217 = vmatprep.subr.mxu0 %v276_v1 }
  0x1e   :  { %218 = vmatpush3.msra.mxu0 %v35_v20 }
  0x1f   :  { %219 = vmatprep.subr.mxu0 %v276_v1 }
  0x20   :  { %220 = vmatpush3.msra.mxu0 %v34_v21 }
  0x21   :  { %222 = vmatmul.mubr.f32.vlgmr.msra.gmra.mxu0 %v33_v22 }
  0xe1   :  { %v123_v24 = vpop.f32.mrf.mxu0 }
  0xe2   :  { %v124_v25 = vadd.f32 %v171_v23, %v123_v24 }
  0xe3   :  { %v223_v26 = vpop.f32.mrf.mxu0 }
  0xe4   :  { %v129_v27 = vsel %vm127_vm1, %v124_v25, -inf  ;;  %128 = vst.msk [vmem:[#allocation2] sm:$0x3] %vm127_vm1, %v124_v25 }
  0xe5   :  { %130 = vmax.xlane.f32.xlu0 %v129_v27 }
 0x16e   :  { %v131_v28 = vpop.xlane.xlu0 %130 }
 0x16f   :  { %v132_v29 = vsub.f32 %v124_v25, %v131_v28 }
 0x171   :  { %v133_v30 = vmul.f32 1.442695, %v132_v29 }
 0x173   :  { %228 = vpow2.f32 %v133_v30 }
 0x180   :  { %v229_v31 = vpop.eup %228 }
 0x181   :  { %v135_v32 = vsel %vm127_vm1, %v229_v31, 0.0 }
 0x182   :  { %136 = vadd.xlane.f32.xlu0 %v135_v32 }
 0x183   :  { %243 = shalt.err (!%p240_p4)
}
 0x184   :  { %150 = dma.vmem_to_hbm [thread:$0]  %s148_s6, 32, %s384_s4, [#allocation3]  }
 0x185   :  { %s279_s9 = smov [#allocation4]  }
 0x186   :  { %s157_s10 = sshll.u32 %s279_s9, 4  ;;  %s158_s10 = int_to_ptr.vmem [resolvable:$true] %s157_s10 }
 0x187   :  { %s252_s11 = scalar_lea.vmem %s158_s10, 32  ;;  %p257_p6 = scmp.lt.s32.totalorder %s158_s10, %s158_s10 }
 0x188   :  { %p253_p5 = scmp.ne.s32.totalorder %s158_s10, %s252_s11  ;;  %p258_p7 = scmp.lt.s32.totalorder %s252_s11, %s252_s11 }
 0x18a   :  { %p259_p8 = por %p258_p7, %p257_p6 }
 0x18c   :  { %p260_p9 = pnand %p259_p8, %p253_p5 }
 0x20b   :  { %v137_v33 = vpop.xlane.xlu0 %136 }
 0x20c   :  { %230 = vrcp.f32 %v137_v33 }
 0x219   :  { %v231_v34 = vpop.eup %230 }
 0x21a   :  { %v139_v35 = vmul.f32 %v231_v34, %v229_v31 }
 0x21c   :  { %140 = vst.msk [vmem:[#allocation4] sm:$0x3] %vm127_vm1, %v139_v35 }
 0x21d   :  { %263 = shalt.err (!%p260_p9)
}
 0x21e   :  { %160 = dma.vmem_to_hbm [thread:$0]  %s158_s10, 32, %s385_s5, [#allocation5]  }
 0x21f   :  { %272 = dma.done.wait [#allocation3], 32  }
 0x220   :  { %273 = vsyncadd [#allocation3], 4294967264 }
 0x221   :  { %274 = dma.done.wait [#allocation5], 32  }
 0x222   :  { %275 = vsyncadd [#allocation5], 4294967264 }
 0x223   :  { %167 = vsyncpa [#allocation3], 1 }
 0x224   :  { %168 = vsyncpa [#allocation5], 1 }

// kernel: model_forward.10
= control target key start
LH: loop header
LB: loop body
LE: loop exit
PB: predicated region body
PF: predicated region fallthrough
CT: control target
= control target key end

     0   :  { %s2247_s9 = smov 0   ;;  %s2249_s10 = smov 0   ;;  %s2457_s0 = inlined_call_operand.vmem [shape: bf16[2,4096], index: 0, kind: input, shape index: {}]   ;;  %s2458_s1 = inlined_call_operand.vmem [shape: bf16[4096,128], index: 1, kind: input, shape index: {}]   ;;  %s2459_s2 = inlined_call_operand.vmem [shape: f32[2,2,128], index: 2, kind: output, shape index: {}]  }
   0x1   :  { %s2251_s11 = smov 0  }
   0x2 LB: > { %s24_s12 = sadd.s32 1, %s2224_s10  ;;  %p1739_p0 = scmp.ge.s32.totalorder %s2228_s11, 1  ;;  %s2228_s11 = sphi %s2251_s11, %s12_s11   ;;  %s2224_s10 = sphi %s2249_s10, %s2461_s10   ;;  %s2220_s9 = sphi %s2247_s9, %s2460_s9  }
   0x3   : > { %p26_p1 = scmp.ge.s32.totalorder %s24_s12, 2  ;;  %p143_p2 = scmp.lt.s32.totalorder %s2228_s11, 3 }
   0x5   : > { %s2463_s12 = smov (%p26_p1, %s24_s12), 0  ;;  %p144_p3 = pnand %p1739_p0, %p143_p2 }
   0x6   : > { %s1741_s13 = sshll.u32 (!%p144_p3), %s2220_s9, 8  ;;  %s1740_s18 = sshll.u32 (!%p144_p3), %s2220_s9, 4 }
   0x7   : > { %147 = sbr.rel (%p144_p3) target bundleno = 357 (0x165), region = 28  ;;  %p179_p4 = scmp.lt.s32.totalorder (!%p144_p3), %s1741_s13, 511 }
   0x8   : > { %p172_p5 = scmp.lt.s32.totalorder (!%p144_p3), %s1740_s18, 31  ;;  %p185_p6 = scmp.lt.s32.totalorder (!%p144_p3), %s2220_s9, 1 }
   0xc   : > { %s2465_s13 = smov (!%p179_p4, %s1741_s13), 511  ;;  %v460_v21 = vlaneseq  ;;  %v2230_v23 = vmov 1966171168   ;;  %s2467_s18 = smov (!%p172_p5, %s1740_s18), 31 }
   0xd   : > { %s1742_s14 = sshll.u32 %s2465_s13, 2  ;;  %v458_v24 = vunpack.c.l.s4 %v2230_v23  ;;  %s2307_s21 = scalar_lea.vmem %s2457_s0, %s2467_s18 }
   0xe   : > { %s2271_s17 = scalar_lea.vmem %s2458_s1, %s1742_s14  ;;  %v461_v28 = vshrl.u32 %v460_v21, 7  ;;  %v196_v38 = vld [vmem:[%s2307_s21] sm:$0xff]  ;;  %s2469_s9 = smov (!%p185_p6, %s2220_s9), 1 }
   0xf   : > { %v2076_v0 = vld [vmem:[%s2271_s17 + $0x78] sm:$0xff]   ;;  %v2080_v4 = vld [vmem:[%s2271_s17 + $0x70] sm:$0xff]   ;;  %v2084_v8 = vld [vmem:[%s2271_s17 + $0x68] sm:$0xff]   ;;  %v459_v30 = vunpack.c.0.s8 %v458_v24  ;;  %v456_v39 = vcombine.high %v196_v38, %v196_v38  ;;  %s1743_s22 = sshll.u32 %s2469_s9, 1 }
  0x10   : > { %v2077_v1 = vld [vmem:[%s2271_s17 + $0xf8] sm:$0xff]   ;;  %1874 = vmatprep.subr.bf16.mxu0 %v2076_v0  ;;  %v2081_v5 = vld [vmem:[%s2271_s17 + $0xf0] sm:$0xff]   ;;  %v2085_v9 = vld [vmem:[%s2271_s17 + $0xe8] sm:$0xff]   ;;  %s188_s25 = scalar_lea.vmem %s2459_s2, %s1743_s22 }
  0x11   : > { %v2078_v2 = vld [vmem:[%s2271_s17 + $0x38] sm:$0xff]   ;;  %1896 = vmatprep.subr.bf16.mxu1 %v2077_v1  ;;  %v2082_v6 = vld [vmem:[%s2271_s17 + $0x30] sm:$0xff]   ;;  %v2086_v10 = vld [vmem:[%s2271_s17 + $0x28] sm:$0xff]   ;;  %v2309_v35 = vsub.s32 %v459_v30, %v461_v28 }
  0x12   : > { %v2079_v3 = vld [vmem:[%s2271_s17 + $0xb8] sm:$0xff]   ;;  %1875 = vmatpush3.bf16.msra.mxu0 %v2078_v2  ;;  %v2083_v7 = vld [vmem:[%s2271_s17 + $0xb0] sm:$0xff]   ;;  %v2087_v11 = vld [vmem:[%s2271_s17 + $0xa8] sm:$0xff]  }
  0x13   : > { %1897 = vmatpush3.bf16.msra.mxu1 %v2079_v3  ;;  %1876 = vmatprep.subr.bf16.mxu0 %v2080_v4  ;;  %v2088_v12 = vld [vmem:[%s2271_s17 + $0x60] sm:$0xff]   ;;  %v2092_v16 = vld [vmem:[%s2271_s17 + $0x58] sm:$0xff]   ;;  %v2096_v20 = vld [vmem:[%s2271_s17 + $0x50] sm:$0xff]   ;;  %v463_v40 = vrot.slane %v196_v38, %v2309_v35  ;;  %v2319_v45 = vrot.slane %v456_v39, %v2309_v35 }
  0x14   : > { %1898 = vmatprep.subr.bf16.mxu1 %v2081_v5  ;;  %v2089_v13 = vld [vmem:[%s2271_s17 + $0xe0] sm:$0xff]   ;;  %v2093_v17 = vld [vmem:[%s2271_s17 + $0xd8] sm:$0xff]   ;;  %v2097_v22 = vld [vmem:[%s2271_s17 + $0xd0] sm:$0xff]  }
  0x15   : > { %v2090_v14 = vld [vmem:[%s2271_s17 + $0x20] sm:$0xff]   ;;  %v2094_v18 = vld [vmem:[%s2271_s17 + $0x18] sm:$0xff]   ;;  %v2098_v25 = vld [vmem:[%s2271_s17 + $0x10] sm:$0xff]   ;;  %v471_v43 = vcombine.high %v463_v40, %v463_v40  ;;  %v479_v44 = vrot.slane %v463_v40, %v2309_v35  ;;  %v472_v48 = vcombine.high %v2319_v45, %v2319_v45 }
  0x16   : > { %1877 = vmatpush3.bf16.msra.mxu0 %v2082_v6  ;;  %v2091_v15 = vld [vmem:[%s2271_s17 + $0xa0] sm:$0xff]   ;;  %v2095_v19 = vld [vmem:[%s2271_s17 + $0x98] sm:$0xff]   ;;  %v2099_v26 = vld [vmem:[%s2271_s17 + $0x90] sm:$0xff]  }
  0x17   : > { %1899 = vmatpush3.bf16.msra.mxu1 %v2083_v7  ;;  %1878 = vmatprep.subr.bf16.mxu0 %v2084_v8  ;;  %v2100_v27 = vld [vmem:[%s2271_s17 + $0x48] sm:$0xff]   ;;  %v2104_v33 = vld [vmem:[%s2271_s17 + $0x40] sm:$0xff]   ;;  %v2110_v41 = vld [vmem:[%s2271_s17 + $0x178] sm:$0xff]   ;;  %v493_v46 = vrot.slane %v471_v43, %v2309_v35  ;;  %v501_v49 = vcombine.high %v479_v44, %v479_v44  ;;  %v500_v53 = vrot.slane %v472_v48, %v2309_v35 }
  0x18   : > { %1900 = vmatprep.subr.bf16.mxu1 %v2085_v9  ;;  %v2101_v29 = vld [vmem:[%s2271_s17 + $0xc8] sm:$0xff]   ;;  %v2105_v34 = vld [vmem:[%s2271_s17 + $0xc0] sm:$0xff]   ;;  %v2111_v42 = vld [vmem:[%s2271_s17 + $0x1f8] sm:$0xff]  }
  0x19   : > { %v2102_v31 = vld [vmem:[%s2271_s17 + $0x8] sm:$0xff]   ;;  %v2106_v36 = vld [vmem:[%s2271_s17] sm:$0xff]   ;;  %v2112_v47 = vld [vmem:[%s2271_s17 + $0x138] sm:$0xff]   ;;  %1370 = vmatprep.mubr.bf16.mxu0 %v493_v46  ;;  %v503_v51 = vcombine.high %v493_v46, %v493_v46  ;;  %v504_v56 = vcombine.high %v500_v53, %v500_v53 }
  0x1a   : > { %1879 = vmatpush3.bf16.msra.mxu0 %v2086_v10  ;;  %v2103_v32 = vld [vmem:[%s2271_s17 + $0x88] sm:$0xff]   ;;  %v2107_v37 = vld [vmem:[%s2271_s17 + $0x80] sm:$0xff]   ;;  %v2114_v50 = vld [vmem:[%s2271_s17 + $0x170] sm:$0xff]  }
  0x1b   : > { %1901 = vmatpush3.bf16.msra.mxu1 %v2087_v11  ;;  %1880 = vmatprep.subr.bf16.mxu0 %v2088_v12  ;;  %v2113_v52 = vld [vmem:[%s2271_s17 + $0x1b8] sm:$0xff]   ;;  %v2115_v54 = vld [vmem:[%s2271_s17 + $0x1f0] sm:$0xff]   ;;  %v2118_v57 = vld [vmem:[%s2271_s17 + $0x168] sm:$0xff]  }
  0x1c   : > { %1902 = vmatprep.subr.bf16.mxu1 %v2089_v13  ;;  %1410 = vmatprep.mubr.bf16.mxu1 %v503_v51  ;;  %v2116_v55 = vld [vmem:[%s2271_s17 + $0x130] sm:$0xff]   ;;  %v2119_v59 = vld [vmem:[%s2271_s17 + $0x1e8] sm:$0xff]   ;;  %v2122_v61 = vld [vmem:[%s2271_s17 + $0x160] sm:$0xff]  }
  0x1d   : > { %v2117_v58 = vld [vmem:[%s2271_s17 + $0x1b0] sm:$0xff]   ;;  %v2120_v60 = vld [vmem:[%s2271_s17 + $0x128] sm:$0xff]   ;;  %v2123_v63 = vld [vmem:[%s2271_s17 + $0x1e0] sm:$0xff]  }
  0x1e   : > { %1881 = vmatpush3.bf16.msra.mxu0 %v2090_v14  ;;  %v2121_v62 = vld [vmem:[%s2271_s17 + $0x1a8] sm:$0xff]   ;;  %v2124_v0 = vld [vmem:[%s2271_s17 + $0x120] sm:$0xff]   ;;  %v2126_v1 = vld [vmem:[%s2271_s17 + $0x158] sm:$0xff]  }
  0x1f   : > { %1903 = vmatpush3.bf16.msra.mxu1 %v2091_v15  ;;  %1882 = vmatprep.subr.bf16.mxu0 %v2092_v16  ;;  %v2125_v2 = vld [vmem:[%s2271_s17 + $0x1a0] sm:$0xff]   ;;  %v2127_v3 = vld [vmem:[%s2271_s17 + $0x1d8] sm:$0xff]   ;;  %v2343_v5 = vld [vmem:[%s2307_s21 + $0x8] sm:$0xff] }
  0x20   : > { %1904 = vmatprep.subr.bf16.mxu1 %v2093_v17  ;;  %v2128_v4 = vld [vmem:[%s2271_s17 + $0x118] sm:$0xff]   ;;  %v2130_v6 = vld [vmem:[%s2271_s17 + $0x150] sm:$0xff]   ;;  %v2134_v10 = vld [vmem:[%s2271_s17 + $0x148] sm:$0xff]   ;;  %v2353_v12 = vrot.slane %v2343_v5, %v2309_v35  ;;  %v505_v46 = vcombine.high %v2343_v5, %v2343_v5 }
  0x21   : > { %v2129_v7 = vld [vmem:[%s2271_s17 + $0x198] sm:$0xff]   ;;  %v2131_v8 = vld [vmem:[%s2271_s17 + $0x1d0] sm:$0xff]   ;;  %v2135_v13 = vld [vmem:[%s2271_s17 + $0x1c8] sm:$0xff]  }
  0x22   : > { %1883 = vmatpush3.bf16.msra.mxu0 %v2094_v18  ;;  %v2132_v9 = vld [vmem:[%s2271_s17 + $0x110] sm:$0xff]   ;;  %v2136_v14 = vld [vmem:[%s2271_s17 + $0x108] sm:$0xff]   ;;  %v2138_v15 = vld [vmem:[%s2271_s17 + $0x140] sm:$0xff]   ;;  %v520_v17 = vcombine.high %v2353_v12, %v2353_v12 }
  0x23   : > { %1905 = vmatpush3.bf16.msra.mxu1 %v2095_v19  ;;  %1884 = vmatprep.subr.bf16.mxu0 %v2096_v20  ;;  %v2133_v11 = vld [vmem:[%s2271_s17 + $0x190] sm:$0xff]   ;;  %v2137_v16 = vld [vmem:[%s2271_s17 + $0x188] sm:$0xff]   ;;  %v2139_v18 = vld [vmem:[%s2271_s17 + $0x1c0] sm:$0xff]   ;;  %v486_v20 = vrot.slane %v2319_v45, %v2309_v35 }
  0x24   : > { %1906 = vmatprep.subr.bf16.mxu1 %v2097_v22  ;;  %v2140_v19 = vld [vmem:[%s2271_s17 + $0x100] sm:$0xff]   ;;  %v2142_v21 = vld [vmem:[%s2271_s17 + $0x278] sm:$0xff]   ;;  %v542_v23 = vrot.slane %v520_v17, %v2309_v35  ;;  %v2147_v30 = vld [vmem:[%s2271_s17 + $0x2f0] sm:$0xff]  }
  0x25   : > { %v2141_v22 = vld [vmem:[%s2271_s17 + $0x180] sm:$0xff]   ;;  %v2143_v24 = vld [vmem:[%s2271_s17 + $0x2f8] sm:$0xff]   ;;  %v2153_v38 = vld [vmem:[%s2271_s17 + $0x2a8] sm:$0xff]  }
  0x26   : > { %1885 = vmatpush3.bf16.msra.mxu0 %v2098_v25  ;;  %v2144_v25 = vld [vmem:[%s2271_s17 + $0x238] sm:$0xff]   ;;  %v2155_v39 = vld [vmem:[%s2271_s17 + $0x2e0] sm:$0xff]   ;;  %v2162_v45 = vld [vmem:[%s2271_s17 + $0x250] sm:$0xff]  }
  0x27   : > { %1907 = vmatpush3.bf16.msra.mxu1 %v2099_v26  ;;  %1886 = vmatprep.subr.bf16.mxu0 %v2100_v27  ;;  %v502_v26 = vcombine.high %v486_v20, %v486_v20  ;;  %v2146_v27 = vld [vmem:[%s2271_s17 + $0x270] sm:$0xff]   ;;  %v2145_v28 = vld [vmem:[%s2271_s17 + $0x2b8] sm:$0xff]   ;;  %v2156_v40 = vld [vmem:[%s2271_s17 + $0x220] sm:$0xff]  }
  0x28   : > { %1908 = vmatprep.subr.bf16.mxu1 %v2101_v29  ;;  %v552_v29 = vcombine.high %v542_v23, %v542_v23  ;;  %v2159_v43 = vld [vmem:[%s2271_s17 + $0x2d8] sm:$0xff]   ;;  %v2163_v48 = vld [vmem:[%s2271_s17 + $0x2d0] sm:$0xff]   ;;  %v2189_v17 = vld [vmem:[%s2271_s17 + $0x3a0] sm:$0xff]  }
  0x29   : > { %v2165_v51 = vld [vmem:[%s2271_s17 + $0x290] sm:$0xff]  }
  0x2a   : > { %1887 = vmatpush3.bf16.msra.mxu0 %v2102_v31  ;;  %v2148_v31 = vld [vmem:[%s2271_s17 + $0x230] sm:$0xff]  }
  0x2b   : > { %1909 = vmatpush3.bf16.msra.mxu1 %v2103_v32  ;;  %1888 = vmatprep.subr.bf16.mxu0 %v2104_v33  ;;  %v2150_v32 = vld [vmem:[%s2271_s17 + $0x268] sm:$0xff]   ;;  %v2149_v33 = vld [vmem:[%s2271_s17 + $0x2b0] sm:$0xff]  }
  0x2c   : > { %1910 = vmatprep.subr.bf16.mxu1 %v2105_v34  ;;  %v2151_v34 = vld [vmem:[%s2271_s17 + $0x2e8] sm:$0xff]  }
  0x2e   : > { %1889 = vmatpush3.bf16.msra.mxu0 %v2106_v36  ;;  %v2152_v36 = vld [vmem:[%s2271_s17 + $0x228] sm:$0xff]  }
  0x2f   : > { %1911 = vmatpush3.bf16.msra.mxu1 %v2107_v37  ;;  %1918 = vmatprep.subr.bf16.mxu0 %v2110_v41  ;;  %v2154_v37 = vld [vmem:[%s2271_s17 + $0x260] sm:$0xff]   ;;  %v2158_v41 = vld [vmem:[%s2271_s17 + $0x258] sm:$0xff]  }
  0x30   : > { %1940 = vmatprep.subr.bf16.mxu1 %v2111_v42  ;;  %v2157_v42 = vld [vmem:[%s2271_s17 + $0x2a0] sm:$0xff]  }
  0x31   : > { %1371 = vmatmul.mubr.bf16.vlgmr.msra.gmra.mxu0 %v479_v44  ;;  %v2160_v44 = vld [vmem:[%s2271_s17 + $0x218] sm:$0xff]  }
  0x32   : > { %1919 = vmatpush3.bf16.msra.mxu0 %v2112_v47  ;;  %1411 = vmatmul.mubr.bf16.vlgmr.msra.gmra.mxu1 %v501_v49  ;;  %v2161_v47 = vld [vmem:[%s2271_s17 + $0x298] sm:$0xff]   ;;  %v2164_v49 = vld [vmem:[%s2271_s17 + $0x210] sm:$0xff]  }
  0x33   : > { %1920 = vmatprep.subr.bf16.mxu0 %v2114_v50  ;;  %1941 = vmatpush3.bf16.msra.mxu1 %v2113_v52  ;;  %v2166_v50 = vld [vmem:[%s2271_s17 + $0x248] sm:$0xff]   ;;  %v2395_v52 = vrot.slane %v505_v46, %v2309_v35 }
  0x34   : > { %1450 = vmatprep.mubr.bf16.mxu0 %v500_v53  ;;  %1942 = vmatprep.subr.bf16.mxu1 %v2115_v54  ;;  %v2167_v53 = vld [vmem:[%s2271_s17 + $0x2c8] sm:$0xff]  }
  0x35   : > { %1490 = vmatprep.mubr.bf16.mxu1 %v504_v56  ;;  %v2168_v54 = vld [vmem:[%s2271_s17 + $0x208] sm:$0xff]  }
  0x36   : > { %1921 = vmatpush3.bf16.msra.mxu0 %v2116_v55  ;;  %v2170_v55 = vld [vmem:[%s2271_s17 + $0x240] sm:$0xff]   ;;  %v2169_v56 = vld [vmem:[%s2271_s17 + $0x288] sm:$0xff]  }
  0x37   : > { %1922 = vmatprep.subr.bf16.mxu0 %v2118_v57  ;;  %1943 = vmatpush3.bf16.msra.mxu1 %v2117_v58  ;;  %v521_v57 = vcombine.high %v2395_v52, %v2395_v52  ;;  %v2171_v58 = vld [vmem:[%s2271_s17 + $0x2c0] sm:$0xff]  }
  0x38   : > { %1944 = vmatprep.subr.bf16.mxu1 %v2119_v59  ;;  %v2172_v59 = vld [vmem:[%s2271_s17 + $0x200] sm:$0xff]  }
  0x3a   : > { %1923 = vmatpush3.bf16.msra.mxu0 %v2120_v60  ;;  %v528_v60 = vrot.slane %v2353_v12, %v2309_v35  ;;  %v2186_v12 = vld [vmem:[%s2271_s17 + $0x360] sm:$0xff]  }
  0x3b   : > { %1924 = vmatprep.subr.bf16.mxu0 %v2122_v61  ;;  %1945 = vmatpush3.bf16.msra.mxu1 %v2121_v62  ;;  %v2174_v61 = vld [vmem:[%s2271_s17 + $0x378] sm:$0xff]   ;;  %v2173_v62 = vld [vmem:[%s2271_s17 + $0x280] sm:$0xff]  }
  0x3c   : > { %1946 = vmatprep.subr.bf16.mxu1 %v2123_v63  ;;  %v549_v63 = vrot.slane %v521_v57, %v2309_v35 }
  0x3e   : > { %1925 = vmatpush3.bf16.msra.mxu0 %v2124_v0  ;;  %v2175_v0 = vld [vmem:[%s2271_s17 + $0x3f8] sm:$0xff]   ;;  %v553_v5 = vcombine.high %v549_v63, %v549_v63 }
  0x3f   : > { %1926 = vmatprep.subr.bf16.mxu0 %v2126_v1  ;;  %1947 = vmatpush3.bf16.msra.mxu1 %v2125_v2  ;;  %v2176_v1 = vld [vmem:[%s2271_s17 + $0x338] sm:$0xff]   ;;  %v550_v2 = vcombine.high %v528_v60, %v528_v60 }
  0x40   : > { %1948 = vmatprep.subr.bf16.mxu1 %v2127_v3  ;;  %v2178_v3 = vld [vmem:[%s2271_s17 + $0x370] sm:$0xff]  }
  0x42   : > { %1927 = vmatpush3.bf16.msra.mxu0 %v2128_v4  ;;  %v2177_v4 = vld [vmem:[%s2271_s17 + $0x3b8] sm:$0xff]  }
  0x43   : > { %1928 = vmatprep.subr.bf16.mxu0 %v2130_v6  ;;  %1949 = vmatpush3.bf16.msra.mxu1 %v2129_v7  ;;  %v2179_v6 = vld [vmem:[%s2271_s17 + $0x3f0] sm:$0xff]  }
  0x44   : > { %1950 = vmatprep.subr.bf16.mxu1 %v2131_v8  ;;  %v2180_v7 = vld [vmem:[%s2271_s17 + $0x330] sm:$0xff]   ;;  %v2182_v8 = vld [vmem:[%s2271_s17 + $0x368] sm:$0xff]  }
  0x46   : > { %1929 = vmatpush3.bf16.msra.mxu0 %v2132_v9  ;;  %v2181_v9 = vld [vmem:[%s2271_s17 + $0x3b0] sm:$0xff]  }
  0x47   : > { %1930 = vmatprep.subr.bf16.mxu0 %v2134_v10  ;;  %1951 = vmatpush3.bf16.msra.mxu1 %v2133_v11  ;;  %v2183_v10 = vld [vmem:[%s2271_s17 + $0x3e8] sm:$0xff]  }
  0x48   : > { %1952 = vmatprep.subr.bf16.mxu1 %v2135_v13  ;;  %v2184_v11 = vld [vmem:[%s2271_s17 + $0x328] sm:$0xff]  }
  0x49   : > { %v2185_v13 = vld [vmem:[%s2271_s17 + $0x3a8] sm:$0xff]  }
  0x4a   : > { %1931 = vmatpush3.bf16.msra.mxu0 %v2136_v14  ;;  %v2187_v14 = vld [vmem:[%s2271_s17 + $0x3e0] sm:$0xff]  }
  0x4b   : > { %1932 = vmatprep.subr.bf16.mxu0 %v2138_v15  ;;  %1953 = vmatpush3.bf16.msra.mxu1 %v2137_v16  ;;  %v2188_v15 = vld [vmem:[%s2271_s17 + $0x320] sm:$0xff]   ;;  %v2190_v16 = vld [vmem:[%s2271_s17 + $0x358] sm:$0xff]  }
  0x4c   : > { %1954 = vmatprep.subr.bf16.mxu1 %v2139_v18  ;;  %v2191_v18 = vld [vmem:[%s2271_s17 + $0x3d8] sm:$0xff]  }
  0x4e   : > { %1933 = vmatpush3.bf16.msra.mxu0 %v2140_v19  ;;  %v2192_v19 = vld [vmem:[%s2271_s17 + $0x318] sm:$0xff]  }
  0x4f   : > { %1962 = vmatprep.subr.bf16.mxu0 %v2142_v21  ;;  %1955 = vmatpush3.bf16.msra.mxu1 %v2141_v22  ;;  %v2193_v21 = vld [vmem:[%s2271_s17 + $0x398] sm:$0xff]   ;;  %v2195_v22 = vld [vmem:[%s2271_s17 + $0x3d0] sm:$0xff]  }
  0x50   : > { %1984 = vmatprep.subr.bf16.mxu1 %v2143_v24  ;;  %v2198_v24 = vld [vmem:[%s2271_s17 + $0x348] sm:$0xff]  }
  0x51   : > { %1451 = vmatmul.mubr.bf16.vlgmr.msra.gmra.mxu0 %v486_v20  ;;  %v2194_v20 = vld [vmem:[%s2271_s17 + $0x350] sm:$0xff]  }
  0x52   : > { %1963 = vmatpush3.bf16.msra.mxu0 %v2144_v25  ;;  %1530 = vmatprep.mubr.bf16.mxu0 %v542_v23  ;;  %v2196_v23 = vld [vmem:[%s2271_s17 + $0x310] sm:$0xff]  }
  0x53   : > { %1491 = vmatmul.mubr.bf16.vlgmr.msra.gmra.mxu1 %v502_v26  ;;  %1964 = vmatprep.subr.bf16.mxu0 %v2146_v27  ;;  %v2197_v25 = vld [vmem:[%s2271_s17 + $0x390] sm:$0xff]   ;;  %v2199_v26 = vld [vmem:[%s2271_s17 + $0x3c8] sm:$0xff]  }
  0x54   : > { %1985 = vmatpush3.bf16.msra.mxu1 %v2145_v28  ;;  %1570 = vmatprep.mubr.bf16.mxu1 %v552_v29  ;;  %v2200_v27 = vld [vmem:[%s2271_s17 + $0x308] sm:$0xff]   ;;  %v2202_v28 = vld [vmem:[%s2271_s17 + $0x340] sm:$0xff]  }
  0x55   : > { %1986 = vmatprep.subr.bf16.mxu1 %v2147_v30  ;;  %v2201_v29 = vld [vmem:[%s2271_s17 + $0x388] sm:$0xff]   ;;  %v2203_v30 = vld [vmem:[%s2271_s17 + $0x3c0] sm:$0xff]  }
  0x56   : > { %1965 = vmatpush3.bf16.msra.mxu0 %v2148_v31  ;;  %v2204_v31 = vld [vmem:[%s2271_s17 + $0x300] sm:$0xff]  }
  0x57   : > { %1966 = vmatprep.subr.bf16.mxu0 %v2150_v32  ;;  %v535_v32 = vrot.slane %v2395_v52, %v2309_v35 }
  0x58   : > { %1987 = vmatpush3.bf16.msra.mxu1 %v2149_v33  ;;  %v2205_v33 = vld [vmem:[%s2271_s17 + $0x380] sm:$0xff]  }
  0x59   : > { %1988 = vmatprep.subr.bf16.mxu1 %v2151_v34  ;;  %v551_v34 = vcombine.high %v535_v32, %v535_v32 }
  0x5a   : > { %1967 = vmatpush3.bf16.msra.mxu0 %v2152_v36  ;;  %v2231_v36 = vmov 0.0  }
  0x5b   : > { %1968 = vmatprep.subr.bf16.mxu0 %v2154_v37  ;;  %194 = vst [vmem:[#allocation2] sm:$0x3] %v2231_v36 }
  0x5c   : > { %1989 = vmatpush3.bf16.msra.mxu1 %v2153_v38 }
  0x5d   : > { %1990 = vmatprep.subr.bf16.mxu1 %v2155_v39 }
  0x5e   : > { %1969 = vmatpush3.bf16.msra.mxu0 %v2156_v40 }
  0x5f   : > { %1970 = vmatprep.subr.bf16.mxu0 %v2158_v41 }
  0x60   : > { %1991 = vmatpush3.bf16.msra.mxu1 %v2157_v42 }
  0x61   : > { %1992 = vmatprep.subr.bf16.mxu1 %v2159_v43 }
  0x62   : > { %1971 = vmatpush3.bf16.msra.mxu0 %v2160_v44 }
  0x63   : > { %1972 = vmatprep.subr.bf16.mxu0 %v2162_v45 }
  0x64   : > { %1993 = vmatpush3.bf16.msra.mxu1 %v2161_v47 }
  0x65   : > { %1994 = vmatprep.subr.bf16.mxu1 %v2163_v48 }
  0x66   : > { %1973 = vmatpush3.bf16.msra.mxu0 %v2164_v49 }
  0x67   : > { %1974 = vmatprep.subr.bf16.mxu0 %v2166_v50 }
  0x68   : > { %1995 = vmatpush3.bf16.msra.mxu1 %v2165_v51 }
  0x69   : > { %1996 = vmatprep.subr.bf16.mxu1 %v2167_v53 }
  0x6a   : > { %1975 = vmatpush3.bf16.msra.mxu0 %v2168_v54 }
  0x6b   : > { %1976 = vmatprep.subr.bf16.mxu0 %v2170_v55 }
  0x6c   : > { %1997 = vmatpush3.bf16.msra.mxu1 %v2169_v56 }
  0x6d   : > { %1998 = vmatprep.subr.bf16.mxu1 %v2171_v58 }
  0x6e   : > { %1977 = vmatpush3.bf16.msra.mxu0 %v2172_v59 }
  0x6f   : > { %2006 = vmatprep.subr.bf16.mxu0 %v2174_v61 }
  0x70   : > { %1999 = vmatpush3.bf16.msra.mxu1 %v2173_v62 }
  0x71   : > { %1531 = vmatmul.mubr.bf16.vlgmr.msra.gmra.mxu0 %v528_v60  ;;  %2028 = vmatprep.subr.bf16.mxu1 %v2175_v0 }
  0x72   : > { %2007 = vmatpush3.bf16.msra.mxu0 %v2176_v1  ;;  %1610 = vmatprep.mubr.bf16.mxu0 %v549_v63 }
  0x73   : > { %1571 = vmatmul.mubr.bf16.vlgmr.msra.gmra.mxu1 %v550_v2  ;;  %2008 = vmatprep.subr.bf16.mxu0 %v2178_v3 }
  0x74   : > { %2029 = vmatpush3.bf16.msra.mxu1 %v2177_v4  ;;  %1650 = vmatprep.mubr.bf16.mxu1 %v553_v5 }
  0x75   : > { %2030 = vmatprep.subr.bf16.mxu1 %v2179_v6 }
  0x76   : > { %2009 = vmatpush3.bf16.msra.mxu0 %v2180_v7 }
  0x77   : > { %2010 = vmatprep.subr.bf16.mxu0 %v2182_v8 }
  0x78   : > { %2031 = vmatpush3.bf16.msra.mxu1 %v2181_v9 }
  0x79   : > { %2032 = vmatprep.subr.bf16.mxu1 %v2183_v10 }
  0x7a   : > { %2011 = vmatpush3.bf16.msra.mxu0 %v2184_v11 }
  0x7b   : > { %2012 = vmatprep.subr.bf16.mxu0 %v2186_v12 }
  0x7c   : > { %2033 = vmatpush3.bf16.msra.mxu1 %v2185_v13 }
  0x7d   : > { %2034 = vmatprep.subr.bf16.mxu1 %v2187_v14 }
  0x7e   : > { %2013 = vmatpush3.bf16.msra.mxu0 %v2188_v15  ;;  %v195_v15 = vld [vmem:[#allocation2] sm:$0x3] }
  0x7f   : > { %2014 = vmatprep.subr.bf16.mxu0 %v2190_v16 }
  0x80   : > { %2035 = vmatpush3.bf16.msra.mxu1 %v2189_v17 }
  0x81   : > { %2036 = vmatprep.subr.bf16.mxu1 %v2191_v18 }
  0x82   : > { %2015 = vmatpush3.bf16.msra.mxu0 %v2192_v19 }
  0x83   : > { %2016 = vmatprep.subr.bf16.mxu0 %v2194_v20 }
  0x84   : > { %2037 = vmatpush3.bf16.msra.mxu1 %v2193_v21 }
  0x85   : > { %2038 = vmatprep.subr.bf16.mxu1 %v2195_v22 }
  0x86   : > { %2017 = vmatpush3.bf16.msra.mxu0 %v2196_v23 }
  0x87   : > { %2018 = vmatprep.subr.bf16.mxu0 %v2198_v24 }
  0x88   : > { %2039 = vmatpush3.bf16.msra.mxu1 %v2197_v25 }
  0x89   : > { %2040 = vmatprep.subr.bf16.mxu1 %v2199_v26 }
  0x8a   : > { %2019 = vmatpush3.bf16.msra.mxu0 %v2200_v27 }
  0x8b   : > { %2020 = vmatprep.subr.bf16.mxu0 %v2202_v28 }
  0x8c   : > { %2041 = vmatpush3.bf16.msra.mxu1 %v2201_v29 }
  0x8d   : > { %2042 = vmatprep.subr.bf16.mxu1 %v2203_v30 }
  0x8e   : > { %2021 = vmatpush3.bf16.msra.mxu0 %v2204_v31 }
  0x90   : > { %2043 = vmatpush3.bf16.msra.mxu1 %v2205_v33 }
  0x91   : > { %1611 = vmatmul.mubr.bf16.vlgmr.msra.gmra.mxu0 %v535_v32 }
  0x93   : > { %1651 = vmatmul.mubr.bf16.vlgmr.msra.gmra.mxu1 %v551_v34 }
  0xf1   : > { %v1890_v37 = vpop.f32.mrf.mxu0 }
  0xf2   : > { %v1912_v38 = vpop.f32.mrf.mxu1 }
  0xf3   : > { %v1891_v39 = vpop.f32.mrf.mxu0 }
  0xf4   : > { %v1892_v40 = vadd.f32 %v1891_v39, %v1890_v37  ;;  %v1913_v41 = vpop.f32.mrf.mxu1 }
  0xf5   : > { %v1893_v42 = vpop.f32.mrf.mxu0  ;;  %v1914_v43 = vadd.f32 %v1913_v41, %v1912_v38 }
  0xf6   : > { %v1915_v44 = vpop.f32.mrf.mxu1 }
  0xf7   : > { %v1894_v45 = vpop.f32.mrf.mxu0  ;;  %v1413_v35 = vadd.f32 %v1914_v43, %v1892_v40 }
  0xf8   : > { %v1916_v46 = vpop.f32.mrf.mxu1 }
 0x111   : > { %v1934_v47 = vpop.f32.mrf.mxu0 }
 0x113   : > { %v1956_v48 = vpop.f32.mrf.mxu1  ;;  %v1935_v49 = vpop.f32.mrf.mxu0 }
 0x114   : > { %v1936_v63 = vadd.f32 %v1935_v49, %v1934_v47 }
 0x115   : > { %v1957_v50 = vpop.f32.mrf.mxu1  ;;  %v1937_v51 = vpop.f32.mrf.mxu0 }
 0x116   : > { %v1453_v0 = vadd.f32 %v1936_v63, %v1413_v35  ;;  %v1958_v1 = vadd.f32 %v1957_v50, %v1956_v48 }
 0x117   : > { %v1959_v52 = vpop.f32.mrf.mxu1  ;;  %v1938_v53 = vpop.f32.mrf.mxu0 }
 0x118   : > { %v1493_v3 = vadd.f32 %v1958_v1, %v1453_v0 }
 0x119   : > { %v1960_v54 = vpop.f32.mrf.mxu1 }
 0x131   : > { %v1978_v55 = vpop.f32.mrf.mxu0 }
 0x133   : > { %v2000_v56 = vpop.f32.mrf.mxu1  ;;  %v1979_v57 = vpop.f32.mrf.mxu0 }
 0x134   : > { %v1980_v2 = vadd.f32 %v1979_v57, %v1978_v55 }
 0x135   : > { %v2001_v58 = vpop.f32.mrf.mxu1  ;;  %v1981_v59 = vpop.f32.mrf.mxu0 }
 0x136   : > { %v1533_v4 = vadd.f32 %v1980_v2, %v1493_v3  ;;  %v2002_v5 = vadd.f32 %v2001_v58, %v2000_v56 }
 0x137   : > { %v2003_v60 = vpop.f32.mrf.mxu1  ;;  %v1982_v61 = vpop.f32.mrf.mxu0 }
 0x138   : > { %v1573_v9 = vadd.f32 %v2002_v5, %v1533_v4 }
 0x139   : > { %v2004_v62 = vpop.f32.mrf.mxu1 }
 0x151   : > { %v2022_v6 = vpop.f32.mrf.mxu0 }
 0x153   : > { %v2044_v7 = vpop.f32.mrf.mxu1  ;;  %v2023_v8 = vpop.f32.mrf.mxu0 }
 0x154   : > { %v2024_v10 = vadd.f32 %v2023_v8, %v2022_v6 }
 0x155   : > { %v2045_v11 = vpop.f32.mrf.mxu1  ;;  %v2025_v12 = vpop.f32.mrf.mxu0 }
 0x156   : > { %v1613_v13 = vadd.f32 %v2024_v10, %v1573_v9  ;;  %v2046_v14 = vadd.f32 %v2045_v11, %v2044_v7 }
 0x157   : > { %v2047_v16 = vpop.f32.mrf.mxu1  ;;  %v2026_v17 = vpop.f32.mrf.mxu0 }
 0x158   : > { %v1653_v18 = vadd.f32 %v2046_v14, %v1613_v13 }
 0x159   : > { %v2048_v19 = vpop.f32.mrf.mxu1 }
 0x15a   : > { %v1658_v20 = vadd.f32 %v1653_v18, %v195_v15 }
 0x15c   : > { %1659 = vst [vmem:[#allocation2] sm:$0x3] %v1658_v20 }
 0x163   : > { %v1663_v21 = vld [vmem:[#allocation2] sm:$0x3] }
 0x164   : > { %1664 = vst [vmem:[%s188_s25] sm:$0x3] %v1663_v21 }
 0x165 PF: > { %s12_s11 = sadd.s32 1, %s2228_s11   ;;  %s2460_s9 = smov %s2224_s10 }
 0x166   : > { %p9_p7 = scmp.ge.s32.totalorder %s12_s11, 4   ;;  %s2461_s10 = smov %s2463_s12 }
 0x168   :  { %11 = sbr.rel (!%p9_p7) target bundleno = 2 (0x2), region = 69 }

</bundles_post_ra>
